<compile_context>
chip_gen: v5e
topology: v5e:2x2
jax: 0.10.0
libtpu: 0.0.40
codegen_flags: <defaults>
</compile_context>

<pallas_src>
import math
import numpy as np
import jax
import jax.numpy as jnp
from jax import lax
from jax.experimental import pallas as pl
from jax.experimental.pallas import tpu as pltpu

# ---- model constants (from the PyTorch module) ----
d_k = d_v = 64
d_model = 512
n_heads = 4
d_ff = 2048
src_len = 4
src_vocab_size = 5   # {'P','我','喜欢','机器','学习'}

LN_EPS = 1e-5        # PyTorch LayerNorm default
NEG_INF = -1e9


# ----------------------------- fused kernel -------------------------------- #
def _encoder_layer_kernel(
    x_ref,        # (S, d_model)          f32   input activations (batch squeezed)
    bias_ref,     # (H*S, H*S)            f32   additive attn bias (pad + cross-head)
    rrep_ref,     # (H*S, S)              f32   0/1 row-replication matrix R[r,s]=(s==r//H)
    wqkv_ref,     # (d_model, 3*H*d_k)    bf16  group-interleaved [g:(q|k|v)]; q pre-scaled
    bqkv_ref,     # (1, 3*H*d_k)          f32   same column layout
    wfc_ref,      # (H*d_v, d_model)      bf16
    bfc_ref,      # (1, d_model)          f32
    g1_ref, be1_ref,                      # LayerNorm 1 (after MHA)
    w1_hbm,       # (d_model, d_ff)       bf16  HBM ref (manual DMA)
    cb1_ref,      # (1, d_ff)             f32
    w2_hbm,       # (d_ff, d_model)       bf16  HBM ref (manual DMA)
    cb2_ref, g2_ref, be2_ref,             # conv2 bias, LayerNorm 2 (after FFN)
    out_ref,      # (S, d_model)          f32
    attn_ref,     # (H, S, S)             f32
    p_scr,        # (H*S, H*S)            f32   VMEM scratch: block-diag softmax
    ctx_scr,      # (H*S, d_v)            f32   VMEM scratch: head-major context
    ctx2_scr,     # (S, H*d_v)            f32   VMEM scratch: lane-dense regrouped ctx
    w1_buf, w2_buf, dma_sem,              # VMEM bf16 weight buffers + DMA sems
):
    S = x_ref.shape[0]
    HS = n_heads * S
    G = 3 * d_k                                   # 192 columns per head-group (q|k|v)

    # Kick off the FFN weight streams immediately so ~4 MiB of bf16 weight DMA
    # overlaps the QKV / attention / LayerNorm compute below.  w1 is issued
    # first because it is consumed first (at the first FFN matmul).
    cp_w1 = pltpu.make_async_copy(w1_hbm, w1_buf, dma_sem.at[0])
    cp_w2 = pltpu.make_async_copy(w2_hbm, w2_buf, dma_sem.at[1])
    cp_w1.start()
    cp_w2.start()

    x = x_ref[...]                                                # (S, 512) f32

    # Merged QKV projection: one bf16 MXU pass, f32 accumulate.  1/sqrt(d_k) is
    # already folded into the Q columns / bias host-side.
    qkv = jnp.dot(x.astype(jnp.bfloat16), wqkv_ref[...],
                  preferred_element_type=jnp.float32) + bqkv_ref[...]   # (S, 768)

    # torch's `.view(B,-1,len_q,d_k)` head split (B == 1): row r of the
    # (H*S, d_k) head-major tensor equals qkv[r // H, column-group (r % H)].
    # Row replication is one tiny 0/1 matmul; the column-group pick is 3
    # lane-wide selects (VPU) thanks to the group-interleaved weight layout.
    rep = jnp.dot(rrep_ref[...], qkv, preferred_element_type=jnp.float32)  # (HS, 768)
    ridx = lax.broadcasted_iota(jnp.int32, (HS, 1), 0) % n_heads
    picked = rep[:, 0:G]
    for g in range(1, n_heads):
        picked = jnp.where(ridx == g, rep[:, g * G:(g + 1) * G], picked)   # (HS, 192)
    q_all = picked[:, 0:d_k].astype(jnp.bfloat16)          # (HS, d_k), pre-scaled
    k_all = picked[:, d_k:2 * d_k].astype(jnp.bfloat16)
    v_all = picked[:, 2 * d_k:3 * d_k].astype(jnp.bfloat16)

    # Attention over all heads at once as one block-diagonal (HS, HS) softmax;
    # bias_ref already carries -1e9 on padded keys and on cross-head entries.
    scores = lax.dot_general(q_all, k_all, (((1,), (1,)), ((), ())),
                             preferred_element_type=jnp.float32) + bias_ref[...]
    m = jnp.max(scores, axis=-1, keepdims=True)
    e = jnp.exp(scores - m)
    p = e * pl.reciprocal(jnp.sum(e, axis=-1, keepdims=True), approx=True)
    ctx = jnp.dot(p.astype(jnp.bfloat16), v_all,
                  preferred_element_type=jnp.float32)                     # (HS, d_v)

    # Stage p / ctx in VMEM so per-head blocks come out as cheap static ref
    # slices (no selector matmuls, no runtime masks).
    p_scr[...] = p
    ctx_scr[...] = ctx
    for h in range(n_heads):
        rows_p = p_scr[pl.ds(h * S, S), :]                 # (S, HS)
        attn_ref[h] = rows_p[:, h * S:(h + 1) * S]         # diagonal (S, S) block
        # context.transpose(1,2).reshape(S, H*d_v): head h goes to lane block h
        ctx2_scr[:, h * d_v:(h + 1) * d_v] = ctx_scr[pl.ds(h * S, S), :]

    # Fused output projection: ONE (S, H*d_v) @ (H*d_v, d_model) bf16 MXU pass.
    fc_out = jnp.dot(ctx2_scr[...].astype(jnp.bfloat16), wfc_ref[...],
                     preferred_element_type=jnp.float32) + bfc_ref[...]

    # Add & Norm 1
    x1 = fc_out + x
    mu1 = jnp.mean(x1, axis=-1, keepdims=True)
    c1 = x1 - mu1
    var1 = jnp.mean(c1 * c1, axis=-1, keepdims=True)
    h1 = c1 * lax.rsqrt(var1 + LN_EPS) * g1_ref[...] + be1_ref[...]

    # PoswiseFFN: conv1(1x1) -> ReLU -> conv2(1x1) -> residual -> LayerNorm
    cp_w1.wait()
    ff = jnp.dot(h1.astype(jnp.bfloat16), w1_buf[...],
                 preferred_element_type=jnp.float32) + cb1_ref[...]
    ff = jnp.maximum(ff, 0.0)
    cp_w2.wait()
    ff2 = jnp.dot(ff.astype(jnp.bfloat16), w2_buf[...],
                  preferred_element_type=jnp.float32) + cb2_ref[...]

    # Add & Norm 2
    y = ff2 + h1
    mu2 = jnp.mean(y, axis=-1, keepdims=True)
    c2 = y - mu2
    var2 = jnp.mean(c2 * c2, axis=-1, keepdims=True)
    out_ref[...] = c2 * lax.rsqrt(var2 + LN_EPS) * g2_ref[...] + be2_ref[...]


# ----------------------------- wrapper ------------------------------------- #
def encoder_layer(enc_inputs, enc_self_attn_mask, kparams):
    """enc_inputs: (1, S, d_model) f32; enc_self_attn_mask: (1, S, S) bool."""
    B, S, D = enc_inputs.shape
    assert B == 1, "original PyTorch mask broadcast only supports batch == 1"
    HS = n_heads * S
    x2d = enc_inputs[0].astype(jnp.float32)

    # Additive attention bias for the block-diagonal all-head score matrix:
    # -1e9 on padded keys (tiled over heads) and on cross-head entries.
    mask5 = enc_self_attn_mask[0].astype(jnp.float32)             # 1.0 == pad key
    pad_bias = jnp.tile(mask5, (n_heads, n_heads)) * NEG_INF      # (HS, HS)
    cross = (np.arange(HS)[:, None] // S) != (np.arange(HS)[None, :] // S)
    bias = jnp.where(jnp.asarray(cross), jnp.float32(NEG_INF), pad_bias)

    # 0/1 row-replication matrix for the buggy head regroup: R[r, s] = (s == r // H)
    rrep = jnp.asarray(((np.arange(HS)[:, None] // n_heads)
                        == np.arange(S)[None, :]).astype(np.float32))

    vmem = pl.BlockSpec(memory_space=pltpu.MemorySpace.VMEM)
    hbm = pl.BlockSpec(memory_space=pl.ANY)

    out2d, attn = pl.pallas_call(
        _encoder_layer_kernel,
        out_shape=(jax.ShapeDtypeStruct((S, d_model), jnp.float32),
                   jax.ShapeDtypeStruct((n_heads, S, S), jnp.float32)),
        in_specs=[vmem, vmem, vmem,      # x, bias, rrep
                  vmem, vmem,            # wqkv, bqkv
                  vmem, vmem,            # wfc, bfc
                  vmem, vmem,            # g1, be1
                  hbm, vmem,             # w1 (HBM, manual DMA), cb1
                  hbm, vmem,             # w2 (HBM, manual DMA), cb2
                  vmem, vmem],           # g2, be2
        out_specs=(vmem, vmem),
        scratch_shapes=[pltpu.VMEM((HS, HS), jnp.float32),             # p_scr
                        pltpu.VMEM((HS, d_v), jnp.float32),            # ctx_scr
                        pltpu.VMEM((S, n_heads * d_v), jnp.float32),   # ctx2_scr
                        pltpu.VMEM((d_model, d_ff), jnp.bfloat16),     # w1_buf
                        pltpu.VMEM((d_ff, d_model), jnp.bfloat16),     # w2_buf
                        pltpu.SemaphoreType.DMA((2,))],
        compiler_params=pltpu.CompilerParams(
            vmem_limit_bytes=24 * 1024 * 1024),  # ~5.5 MiB used; fits v7x 64 MiB too
    )(x2d, bias, rrep,
      kparams['wqkv'], kparams['bqkv'], kparams['wfc'], kparams['bfc'],
      kparams['g1'], kparams['be1'], kparams['w1'], kparams['cb1'],
      kparams['w2'], kparams['cb2'], kparams['g2'], kparams['be2'])

    return out2d[None], attn[None]


# --------------------------- glue / setup ----------------------------------- #
def positional_encoding(n_position, dm):
    pos = np.arange(n_position, dtype=np.float64)[:, None]
    hid = np.arange(dm, dtype=np.float64)[None, :]
    table = pos / np.power(10000.0, hid / dm)
    table[:, 0::2] = np.sin(table[:, 0::2])
    table[:, 1::2] = np.cos(table[:, 1::2])
    return jnp.asarray(table, dtype=jnp.float32)


def get_attn_pad_mask(seq_q, seq_k):
    B, len_q = seq_q.shape
    _, len_k = seq_k.shape
    pad = (seq_k == 0)[:, None, :]
    return jnp.broadcast_to(pad, (B, len_q, len_k))


def init_params(key):
    """f32 'PyTorch-equivalent' parameters."""
    ks = jax.random.split(key, 12)
    std = 0.02
    n = lambda k, shape, s: jax.random.normal(k, shape, jnp.float32) * s
    return {
        'wq': n(ks[0], (d_model, n_heads * d_k), std),
        'bq': n(ks[1], (1, n_heads * d_k), 0.01),
        'wk': n(ks[2], (d_model, n_heads * d_k), std),
        'bk': n(ks[3], (1, n_heads * d_k), 0.01),
        'wv': n(ks[4], (d_model, n_heads * d_v), std),
        'bv': n(ks[5], (1, n_heads * d_v), 0.01),
        'wfc': n(ks[6], (n_heads * d_v, d_model), std),
        'bfc': n(ks[7], (1, d_model), 0.01),
        'g1': jnp.ones((1, d_model), jnp.float32),
        'be1': jnp.zeros((1, d_model), jnp.float32),
        'w1': n(ks[8], (d_model, d_ff), std),     # conv1 (1x1): [in, out]
        'cb1': n(ks[9], (1, d_ff), 0.01),
        'w2': n(ks[10], (d_ff, d_model), std),    # conv2 (1x1): [in, out]
        'cb2': n(ks[11], (1, d_model), 0.01),
        'g2': jnp.ones((1, d_model), jnp.float32),
        'be2': jnp.zeros((1, d_model), jnp.float32),
    }


def pack_params(p):
    """Kernel-side layout:
       * QKV weight columns reordered into per-head groups [g:(q|k|v)] so the
         in-kernel head regroup is a lane-wide select, not permutation matmuls;
       * 1/sqrt(d_k) folded into W_Q / b_q (one-time host preprocessing);
       * matmul weights stored bf16, biases/LN params f32."""
    scale = 1.0 / math.sqrt(d_k)
    wq = p['wq'] * scale
    bq = p['bq'] * scale
    wblocks, bblocks = [], []
    for g in range(n_heads):
        wblocks += [wq[:, g * d_k:(g + 1) * d_k],
                    p['wk'][:, g * d_k:(g + 1) * d_k],
                    p['wv'][:, g * d_v:(g + 1) * d_v]]
        bblocks += [bq[:, g * d_k:(g + 1) * d_k],
                    p['bk'][:, g * d_k:(g + 1) * d_k],
                    p['bv'][:, g * d_v:(g + 1) * d_v]]
    return {
        'wqkv': jnp.concatenate(wblocks, axis=1).astype(jnp.bfloat16),  # (512, 768)
        'bqkv': jnp.concatenate(bblocks, axis=1),                       # (1, 768) f32
        'wfc': p['wfc'].astype(jnp.bfloat16),
        'bfc': p['bfc'],
        'g1': p['g1'], 'be1': p['be1'],
        'w1': p['w1'].astype(jnp.bfloat16), 'cb1': p['cb1'],
        'w2': p['w2'].astype(jnp.bfloat16), 'cb2': p['cb2'],
        'g2': p['g2'], 'be2': p['be2'],
    }


def reference(enc_inputs, mask, p):
    """Pure-JAX f32 reference reproducing the PyTorch forward exactly."""
    x = enc_inputs[0]
    S = x.shape[0]
    q = (x @ p['wq'] + p['bq'][0]).reshape(n_heads, S, d_k)   # .view(B,-1,S,d_k), B==1
    k = (x @ p['wk'] + p['bk'][0]).reshape(n_heads, S, d_k)
    v = (x @ p['wv'] + p['bv'][0]).reshape(n_heads, S, d_v)
    scores = jnp.einsum('hqd,hkd->hqk', q, k) / math.sqrt(d_k)
    scores = jnp.where(mask[0][None], -1e9, scores)
    attn = jax.nn.softmax(scores, axis=-1)
    ctx = jnp.einsum('hqk,hkd->hqd', attn, v)
    ctx2 = jnp.transpose(ctx, (1, 0, 2)).reshape(S, n_heads * d_v)

    def ln(z, g, b):
        mu = jnp.mean(z, -1, keepdims=True)
        var = jnp.mean((z - mu) ** 2, -1, keepdims=True)
        return (z - mu) / jnp.sqrt(var + LN_EPS) * g + b

    out = ctx2 @ p['wfc'] + p['bfc'][0]
    h1 = ln(out + x, p['g1'][0], p['be1'][0])
    ff = jnp.maximum(h1 @ p['w1'] + p['cb1'][0], 0.0)
    y = ln(ff @ p['w2'] + p['cb2'][0] + h1, p['g2'][0], p['be2'][0])
    return y[None], attn[None]


if __name__ == "__main__":
    key = jax.random.PRNGKey(0)
    pkey, ekey = jax.random.split(key)
    params = init_params(pkey)
    kparams = pack_params(params)

    # tokens: '我 喜欢 机器 学习' + pad -> ids [1, 2, 3, 4, 0], batch == 1
    tokens = jnp.array([[1, 2, 3, 4, 0]], dtype=jnp.int32)
    S = tokens.shape[1]

    src_emb_table = jax.random.normal(ekey, (src_vocab_size, d_model), jnp.float32)
    pos_table = positional_encoding(src_len + 1, d_model)

    # enc_outputs = src_emb(enc_inputs) + pos_emb(enc_inputs)  (embedding lookups: plain-JAX glue)
    enc_inputs = src_emb_table[tokens] + pos_table[tokens]          # (1, S, d_model)
    enc_self_attn_mask = get_attn_pad_mask(tokens, tokens)          # (1, S, S) bool

    out, attn = encoder_layer(enc_inputs, enc_self_attn_mask, kparams)
    out = jax.block_until_ready(out)
    attn = jax.block_until_ready(attn)

    out_ref, attn_ref = reference(enc_inputs, enc_self_attn_mask, params)
    assert out.shape == (1, S, d_model) and attn.shape == (1, n_heads, S, S)
    # bf16 weight/operand streaming (f32 accumulate) => slightly looser tolerances.
    assert jnp.allclose(attn, attn_ref, atol=2e-2, rtol=2e-2), \
        f"attn max err {float(jnp.max(jnp.abs(attn - attn_ref)))}"
    assert jnp.allclose(out, out_ref, atol=5e-2, rtol=5e-2), \
        f"out max err {float(jnp.max(jnp.abs(out - out_ref)))}"

    print("KERNEL_OK")
</pallas_src>

<mosaic_0001>
module attributes {stable_mosaic.version = 11 : i64} {
  func.func @_encoder_layer_kernel(%arg0: memref<5x512xf32, #tpu.memory_space<vmem>>, %arg1: memref<20x20xf32, #tpu.memory_space<vmem>>, %arg2: memref<20x5xf32, #tpu.memory_space<vmem>>, %arg3: memref<512x768xbf16, #tpu.memory_space<vmem>>, %arg4: memref<1x768xf32, #tpu.memory_space<vmem>>, %arg5: memref<256x512xbf16, #tpu.memory_space<vmem>>, %arg6: memref<1x512xf32, #tpu.memory_space<vmem>>, %arg7: memref<1x512xf32, #tpu.memory_space<vmem>>, %arg8: memref<1x512xf32, #tpu.memory_space<vmem>>, %arg9: memref<512x2048xbf16, #tpu.memory_space<any>>, %arg10: memref<1x2048xf32, #tpu.memory_space<vmem>>, %arg11: memref<2048x512xbf16, #tpu.memory_space<any>>, %arg12: memref<1x512xf32, #tpu.memory_space<vmem>>, %arg13: memref<1x512xf32, #tpu.memory_space<vmem>>, %arg14: memref<1x512xf32, #tpu.memory_space<vmem>>, %arg15: memref<5x512xf32, #tpu.memory_space<vmem>>, %arg16: memref<4x5x5xf32, #tpu.memory_space<vmem>>, %arg17: memref<20x20xf32, #tpu.memory_space<vmem>>, %arg18: memref<20x64xf32, #tpu.memory_space<vmem>>, %arg19: memref<5x256xf32, #tpu.memory_space<vmem>>, %arg20: memref<512x2048xbf16, #tpu.memory_space<vmem>>, %arg21: memref<2048x512xbf16, #tpu.memory_space<vmem>>, %arg22: memref<2x!tpu.dma_semaphore, #tpu.memory_space<semaphore_mem>>) attributes {dimension_semantics = [], scalar_prefetch = 0 : i64, scratch_operands = 6 : i64, tpu.core_type = #tpu.core_type<tc>} {
    %c0_i32 = arith.constant 0 : i32
    %0 = tpu.memref_slice %arg22[%c0_i32] : memref<2x!tpu.dma_semaphore, #tpu.memory_space<semaphore_mem>> -> memref<1x!tpu.dma_semaphore, #tpu.memory_space<semaphore_mem>>
    %1 = tpu.memref_squeeze %0 : memref<1x!tpu.dma_semaphore, #tpu.memory_space<semaphore_mem>> -> memref<!tpu.dma_semaphore, #tpu.memory_space<semaphore_mem>>
    tpu.enqueue_dma source(%arg9 : memref<512x2048xbf16, #tpu.memory_space<any>>) target(%arg20 : memref<512x2048xbf16, #tpu.memory_space<vmem>>) target_semaphore(%1 : memref<!tpu.dma_semaphore, #tpu.memory_space<semaphore_mem>>)
    %c1_i32 = arith.constant 1 : i32
    %2 = tpu.memref_slice %arg22[%c1_i32] : memref<2x!tpu.dma_semaphore, #tpu.memory_space<semaphore_mem>> -> memref<1x!tpu.dma_semaphore, #tpu.memory_space<semaphore_mem>>
    %3 = tpu.memref_squeeze %2 : memref<1x!tpu.dma_semaphore, #tpu.memory_space<semaphore_mem>> -> memref<!tpu.dma_semaphore, #tpu.memory_space<semaphore_mem>>
    tpu.enqueue_dma source(%arg11 : memref<2048x512xbf16, #tpu.memory_space<any>>) target(%arg21 : memref<2048x512xbf16, #tpu.memory_space<vmem>>) target_semaphore(%3 : memref<!tpu.dma_semaphore, #tpu.memory_space<semaphore_mem>>)
    %c0 = arith.constant 0 : index
    %c0_0 = arith.constant 0 : index
    %4 = vector.load %arg0[%c0, %c0_0] : memref<5x512xf32, #tpu.memory_space<vmem>>, vector<5x512xf32>
    %5 = arith.truncf %4 : vector<5x512xf32> to vector<5x512xbf16>
    %c0_1 = arith.constant 0 : index
    %c0_2 = arith.constant 0 : index
    %6 = vector.load %arg3[%c0_1, %c0_2] : memref<512x768xbf16, #tpu.memory_space<vmem>>, vector<512x768xbf16>
    %cst = arith.constant dense<0.000000e+00> : vector<5x768xf32>
    %7 = tpu.matmul %5, %6, %cst {dimension_numbers = #tpu.dot_dimension_numbers<[1], [0], [0], [1], [0, 0, 1, 1], [], []>} : vector<5x512xbf16>, vector<512x768xbf16>, vector<5x768xf32> -> vector<5x768xf32>
    %c0_3 = arith.constant 0 : index
    %c0_4 = arith.constant 0 : index
    %8 = vector.load %arg4[%c0_3, %c0_4] : memref<1x768xf32, #tpu.memory_space<vmem>>, vector<1x768xf32>
    %9 = vector.broadcast %8 : vector<1x768xf32> to vector<5x768xf32>
    %10 = arith.addf %7, %9 : vector<5x768xf32>
    %c0_5 = arith.constant 0 : index
    %c0_6 = arith.constant 0 : index
    %11 = vector.load %arg2[%c0_5, %c0_6] : memref<20x5xf32, #tpu.memory_space<vmem>>, vector<20x5xf32>
    %cst_7 = arith.constant dense<0.000000e+00> : vector<20x768xf32>
    %12 = tpu.matmul %11, %10, %cst_7 {dimension_numbers = #tpu.dot_dimension_numbers<[1], [0], [0], [1], [0, 0, 1, 1], [], []>} : vector<20x5xf32>, vector<5x768xf32>, vector<20x768xf32> -> vector<20x768xf32>
    %13 = tpu.iota {dimensions = array<i32: 0>} : vector<20x1xi32>
    %c4_i32 = arith.constant 4 : i32
    %c0_i32_8 = arith.constant 0 : i32
    %14 = arith.cmpi eq, %c4_i32, %c0_i32_8 : i32
    %c1_i32_9 = arith.constant 1 : i32
    %15 = arith.select %14, %c1_i32_9, %c4_i32 : i32
    %16 = vector.broadcast %15 : i32 to vector<20x1xi32>
    %17 = arith.remsi %13, %16 : vector<20x1xi32>
    %c0_i32_10 = arith.constant 0 : i32
    %18 = vector.broadcast %c0_i32_10 : i32 to vector<20x1xi32>
    %19 = arith.cmpi ne, %17, %18 : vector<20x1xi32>
    %c0_i32_11 = arith.constant 0 : i32
    %20 = vector.broadcast %c0_i32_11 : i32 to vector<20x1xi32>
    %21 = arith.cmpi slt, %17, %20 : vector<20x1xi32>
    %c0_i32_12 = arith.constant 0 : i32
    %22 = arith.cmpi slt, %15, %c0_i32_12 : i32
    %23 = vector.broadcast %22 : i1 to vector<20x1xi1>
    %24 = vector.broadcast %23 : vector<20x1xi1> to vector<20x1xi1>
    %25 = arith.xori %21, %24 : vector<20x1xi1>
    %26 = arith.andi %25, %19 : vector<20x1xi1>
    %27 = vector.broadcast %15 : i32 to vector<20x1xi32>
    %28 = arith.addi %17, %27 : vector<20x1xi32>
    %29 = arith.select %26, %28, %17 : vector<20x1xi1>, vector<20x1xi32>
    %30 = vector.extract_strided_slice %12 {offsets = [0, 0], sizes = [20, 192], strides = [1, 1]} : vector<20x768xf32> to vector<20x192xf32>
    %c1_i32_13 = arith.constant 1 : i32
    %31 = vector.broadcast %c1_i32_13 : i32 to vector<20x1xi32>
    %32 = arith.cmpi eq, %29, %31 : vector<20x1xi32>
    %33 = vector.extract_strided_slice %12 {offsets = [0, 192], sizes = [20, 192], strides = [1, 1]} : vector<20x768xf32> to vector<20x192xf32>
    %34 = vector.shape_cast %32 : vector<20x1xi1> to vector<20x1xi1>
    %35 = vector.broadcast %34 : vector<20x1xi1> to vector<20x192xi1>
    %36 = arith.select %35, %33, %30 : vector<20x192xi1>, vector<20x192xf32>
    %c2_i32 = arith.constant 2 : i32
    %37 = vector.broadcast %c2_i32 : i32 to vector<20x1xi32>
    %38 = arith.cmpi eq, %29, %37 : vector<20x1xi32>
    %39 = vector.extract_strided_slice %12 {offsets = [0, 384], sizes = [20, 192], strides = [1, 1]} : vector<20x768xf32> to vector<20x192xf32>
    %40 = vector.shape_cast %38 : vector<20x1xi1> to vector<20x1xi1>
    %41 = vector.broadcast %40 : vector<20x1xi1> to vector<20x192xi1>
    %42 = arith.select %41, %39, %36 : vector<20x192xi1>, vector<20x192xf32>
    %c3_i32 = arith.constant 3 : i32
    %43 = vector.broadcast %c3_i32 : i32 to vector<20x1xi32>
    %44 = arith.cmpi eq, %29, %43 : vector<20x1xi32>
    %45 = vector.extract_strided_slice %12 {offsets = [0, 576], sizes = [20, 192], strides = [1, 1]} : vector<20x768xf32> to vector<20x192xf32>
    %46 = vector.shape_cast %44 : vector<20x1xi1> to vector<20x1xi1>
    %47 = vector.broadcast %46 : vector<20x1xi1> to vector<20x192xi1>
    %48 = arith.select %47, %45, %42 : vector<20x192xi1>, vector<20x192xf32>
    %49 = vector.extract_strided_slice %48 {offsets = [0, 0], sizes = [20, 64], strides = [1, 1]} : vector<20x192xf32> to vector<20x64xf32>
    %50 = arith.truncf %49 : vector<20x64xf32> to vector<20x64xbf16>
    %51 = vector.extract_strided_slice %48 {offsets = [0, 64], sizes = [20, 64], strides = [1, 1]} : vector<20x192xf32> to vector<20x64xf32>
    %52 = arith.truncf %51 : vector<20x64xf32> to vector<20x64xbf16>
    %53 = vector.extract_strided_slice %48 {offsets = [0, 128], sizes = [20, 64], strides = [1, 1]} : vector<20x192xf32> to vector<20x64xf32>
    %54 = arith.truncf %53 : vector<20x64xf32> to vector<20x64xbf16>
    %cst_14 = arith.constant dense<0.000000e+00> : vector<20x20xf32>
    %55 = tpu.matmul %50, %52, %cst_14 {dimension_numbers = #tpu.dot_dimension_numbers<[1], [1], [0], [0], [0, 0, 1, 0], [], []>} : vector<20x64xbf16>, vector<20x64xbf16>, vector<20x20xf32> -> vector<20x20xf32>
    %c0_15 = arith.constant 0 : index
    %c0_16 = arith.constant 0 : index
    %56 = vector.load %arg1[%c0_15, %c0_16] : memref<20x20xf32, #tpu.memory_space<vmem>>, vector<20x20xf32>
    %57 = arith.addf %55, %56 : vector<20x20xf32>
    %cst_17 = arith.constant dense<0xFF800000> : vector<20xf32>
    %58 = vector.multi_reduction <maximumf>, %57, %cst_17 [1] : vector<20x20xf32> to vector<20xf32>
    %59 = vector.shape_cast %58 : vector<20xf32> to vector<20x1xf32>
    %60 = vector.broadcast %59 : vector<20x1xf32> to vector<20x20xf32>
    %61 = arith.subf %57, %60 : vector<20x20xf32>
    %62 = math.exp %61 : vector<20x20xf32>
    %cst_18 = arith.constant dense<0.000000e+00> : vector<20xf32>
    %63 = vector.multi_reduction <add>, %62, %cst_18 [1] : vector<20x20xf32> to vector<20xf32>
    %64 = vector.shape_cast %63 : vector<20xf32> to vector<20x1xf32>
    %65 = tpu.reciprocal %64 {approx = true} : vector<20x1xf32> -> vector<20x1xf32>
    %66 = vector.broadcast %65 : vector<20x1xf32> to vector<20x20xf32>
    %67 = arith.mulf %62, %66 : vector<20x20xf32>
    %68 = arith.truncf %67 : vector<20x20xf32> to vector<20x20xbf16>
    %cst_19 = arith.constant dense<0.000000e+00> : vector<20x64xf32>
    %69 = tpu.matmul %68, %54, %cst_19 {dimension_numbers = #tpu.dot_dimension_numbers<[1], [0], [0], [1], [0, 0, 1, 1], [], []>} : vector<20x20xbf16>, vector<20x64xbf16>, vector<20x64xf32> -> vector<20x64xf32>
    %c0_20 = arith.constant 0 : index
    %c0_21 = arith.constant 0 : index
    %70 = vector.load %arg17[%c0_20, %c0_21] : memref<20x20xf32, #tpu.memory_space<vmem>>, vector<20x20xf32>
    tpu.vector_store %arg17[%c0_20, %c0_21], %67 {strides = array<i32>} : memref<20x20xf32, #tpu.memory_space<vmem>>, vector<20x20xf32>,
    %c0_22 = arith.constant 0 : index
    %c0_23 = arith.constant 0 : index
    %71 = vector.load %arg18[%c0_22, %c0_23] : memref<20x64xf32, #tpu.memory_space<vmem>>, vector<20x64xf32>
    tpu.vector_store %arg18[%c0_22, %c0_23], %69 {strides = array<i32>} : memref<20x64xf32, #tpu.memory_space<vmem>>, vector<20x64xf32>,
    %c0_24 = arith.constant 0 : index
    %c0_25 = arith.constant 0 : index
    %72 = vector.load %arg17[%c0_24, %c0_25] : memref<20x20xf32, #tpu.memory_space<vmem>>, vector<5x20xf32>
    %73 = vector.extract_strided_slice %72 {offsets = [0, 0], sizes = [5, 5], strides = [1, 1]} : vector<5x20xf32> to vector<5x5xf32>
    %c0_26 = arith.constant 0 : index
    %c0_27 = arith.constant 0 : index
    %c0_28 = arith.constant 0 : index
    %74 = vector.load %arg16[%c0_26, %c0_27, %c0_28] : memref<4x5x5xf32, #tpu.memory_space<vmem>>, vector<1x5x5xf32>
    %75 = vector.shape_cast %74 : vector<1x5x5xf32> to vector<5x5xf32>
    %76 = vector.shape_cast %73 : vector<5x5xf32> to vector<1x5x5xf32>
    tpu.vector_store %arg16[%c0_26, %c0_27, %c0_28], %76 {strides = array<i32>} : memref<4x5x5xf32, #tpu.memory_space<vmem>>, vector<1x5x5xf32>,
    %c0_29 = arith.constant 0 : index
    %c0_30 = arith.constant 0 : index
    %77 = vector.load %arg18[%c0_29, %c0_30] : memref<20x64xf32, #tpu.memory_space<vmem>>, vector<5x64xf32>
    %c0_31 = arith.constant 0 : index
    %c0_32 = arith.constant 0 : index
    %78 = vector.load %arg19[%c0_31, %c0_32] : memref<5x256xf32, #tpu.memory_space<vmem>>, vector<5x64xf32>
    tpu.vector_store %arg19[%c0_31, %c0_32], %77 {strides = array<i32>} : memref<5x256xf32, #tpu.memory_space<vmem>>, vector<5x64xf32>,
    %c5 = arith.constant 5 : index
    %c0_33 = arith.constant 0 : index
    %79 = vector.load %arg17[%c5, %c0_33] : memref<20x20xf32, #tpu.memory_space<vmem>>, vector<5x20xf32>
    %80 = vector.extract_strided_slice %79 {offsets = [0, 5], sizes = [5, 5], strides = [1, 1]} : vector<5x20xf32> to vector<5x5xf32>
    %c1 = arith.constant 1 : index
    %c0_34 = arith.constant 0 : index
    %c0_35 = arith.constant 0 : index
    %81 = vector.load %arg16[%c1, %c0_34, %c0_35] : memref<4x5x5xf32, #tpu.memory_space<vmem>>, vector<1x5x5xf32>
    %82 = vector.shape_cast %81 : vector<1x5x5xf32> to vector<5x5xf32>
    %83 = vector.shape_cast %80 : vector<5x5xf32> to vector<1x5x5xf32>
    tpu.vector_store %arg16[%c1, %c0_34, %c0_35], %83 {strides = array<i32>} : memref<4x5x5xf32, #tpu.memory_space<vmem>>, vector<1x5x5xf32>,
    %c5_36 = arith.constant 5 : index
    %c0_37 = arith.constant 0 : index
    %84 = vector.load %arg18[%c5_36, %c0_37] : memref<20x64xf32, #tpu.memory_space<vmem>>, vector<5x64xf32>
    %c0_38 = arith.constant 0 : index
    %c64 = arith.constant 64 : index
    %85 = vector.load %arg19[%c0_38, %c64] : memref<5x256xf32, #tpu.memory_space<vmem>>, vector<5x64xf32>
    tpu.vector_store %arg19[%c0_38, %c64], %84 {strides = array<i32>} : memref<5x256xf32, #tpu.memory_space<vmem>>, vector<5x64xf32>,
    %c10 = arith.constant 10 : index
    %c0_39 = arith.constant 0 : index
    %86 = vector.load %arg17[%c10, %c0_39] : memref<20x20xf32, #tpu.memory_space<vmem>>, vector<5x20xf32>
    %87 = vector.extract_strided_slice %86 {offsets = [0, 10], sizes = [5, 5], strides = [1, 1]} : vector<5x20xf32> to vector<5x5xf32>
    %c2 = arith.constant 2 : index
    %c0_40 = arith.constant 0 : index
    %c0_41 = arith.constant 0 : index
    %88 = vector.load %arg16[%c2, %c0_40, %c0_41] : memref<4x5x5xf32, #tpu.memory_space<vmem>>, vector<1x5x5xf32>
    %89 = vector.shape_cast %88 : vector<1x5x5xf32> to vector<5x5xf32>
    %90 = vector.shape_cast %87 : vector<5x5xf32> to vector<1x5x5xf32>
    tpu.vector_store %arg16[%c2, %c0_40, %c0_41], %90 {strides = array<i32>} : memref<4x5x5xf32, #tpu.memory_space<vmem>>, vector<1x5x5xf32>,
    %c10_42 = arith.constant 10 : index
    %c0_43 = arith.constant 0 : index
    %91 = vector.load %arg18[%c10_42, %c0_43] : memref<20x64xf32, #tpu.memory_space<vmem>>, vector<5x64xf32>
    %c0_44 = arith.constant 0 : index
    %c128 = arith.constant 128 : index
    %92 = vector.load %arg19[%c0_44, %c128] : memref<5x256xf32, #tpu.memory_space<vmem>>, vector<5x64xf32>
    tpu.vector_store %arg19[%c0_44, %c128], %91 {strides = array<i32>} : memref<5x256xf32, #tpu.memory_space<vmem>>, vector<5x64xf32>,
    %c15 = arith.constant 15 : index
    %c0_45 = arith.constant 0 : index
    %93 = vector.load %arg17[%c15, %c0_45] : memref<20x20xf32, #tpu.memory_space<vmem>>, vector<5x20xf32>
    %94 = vector.extract_strided_slice %93 {offsets = [0, 15], sizes = [5, 5], strides = [1, 1]} : vector<5x20xf32> to vector<5x5xf32>
    %c3 = arith.constant 3 : index
    %c0_46 = arith.constant 0 : index
    %c0_47 = arith.constant 0 : index
    %95 = vector.load %arg16[%c3, %c0_46, %c0_47] : memref<4x5x5xf32, #tpu.memory_space<vmem>>, vector<1x5x5xf32>
    %96 = vector.shape_cast %95 : vector<1x5x5xf32> to vector<5x5xf32>
    %97 = vector.shape_cast %94 : vector<5x5xf32> to vector<1x5x5xf32>
    tpu.vector_store %arg16[%c3, %c0_46, %c0_47], %97 {strides = array<i32>} : memref<4x5x5xf32, #tpu.memory_space<vmem>>, vector<1x5x5xf32>,
    %c15_48 = arith.constant 15 : index
    %c0_49 = arith.constant 0 : index
    %98 = vector.load %arg18[%c15_48, %c0_49] : memref<20x64xf32, #tpu.memory_space<vmem>>, vector<5x64xf32>
    %c0_50 = arith.constant 0 : index
    %c192 = arith.constant 192 : index
    %99 = vector.load %arg19[%c0_50, %c192] : memref<5x256xf32, #tpu.memory_space<vmem>>, vector<5x64xf32>
    tpu.vector_store %arg19[%c0_50, %c192], %98 {strides = array<i32>} : memref<5x256xf32, #tpu.memory_space<vmem>>, vector<5x64xf32>,
    %c0_51 = arith.constant 0 : index
    %c0_52 = arith.constant 0 : index
    %100 = vector.load %arg19[%c0_51, %c0_52] : memref<5x256xf32, #tpu.memory_space<vmem>>, vector<5x256xf32>
    %101 = arith.truncf %100 : vector<5x256xf32> to vector<5x256xbf16>
    %c0_53 = arith.constant 0 : index
    %c0_54 = arith.constant 0 : index
    %102 = vector.load %arg5[%c0_53, %c0_54] : memref<256x512xbf16, #tpu.memory_space<vmem>>, vector<256x512xbf16>
    %cst_55 = arith.constant dense<0.000000e+00> : vector<5x512xf32>
    %103 = tpu.matmul %101, %102, %cst_55 {dimension_numbers = #tpu.dot_dimension_numbers<[1], [0], [0], [1], [0, 0, 1, 1], [], []>} : vector<5x256xbf16>, vector<256x512xbf16>, vector<5x512xf32> -> vector<5x512xf32>
    %c0_56 = arith.constant 0 : index
    %c0_57 = arith.constant 0 : index
    %104 = vector.load %arg6[%c0_56, %c0_57] : memref<1x512xf32, #tpu.memory_space<vmem>>, vector<1x512xf32>
    %105 = vector.broadcast %104 : vector<1x512xf32> to vector<5x512xf32>
    %106 = arith.addf %103, %105 : vector<5x512xf32>
    %107 = arith.addf %106, %4 : vector<5x512xf32>
    %cst_58 = arith.constant dense<0.000000e+00> : vector<5xf32>
    %108 = vector.multi_reduction <add>, %107, %cst_58 [1] : vector<5x512xf32> to vector<5xf32>
    %109 = vector.shape_cast %108 : vector<5xf32> to vector<5x1xf32>
    %cst_59 = arith.constant 5.120000e+02 : f32
    %110 = vector.broadcast %cst_59 : f32 to vector<5x1xf32>
    %111 = arith.divf %109, %110 : vector<5x1xf32>
    %112 = vector.broadcast %111 : vector<5x1xf32> to vector<5x512xf32>
    %113 = arith.subf %107, %112 : vector<5x512xf32>
    %114 = arith.mulf %113, %113 : vector<5x512xf32>
    %cst_60 = arith.constant dense<0.000000e+00> : vector<5xf32>
    %115 = vector.multi_reduction <add>, %114, %cst_60 [1] : vector<5x512xf32> to vector<5xf32>
    %116 = vector.shape_cast %115 : vector<5xf32> to vector<5x1xf32>
    %cst_61 = arith.constant 5.120000e+02 : f32
    %117 = vector.broadcast %cst_61 : f32 to vector<5x1xf32>
    %118 = arith.divf %116, %117 : vector<5x1xf32>
    %cst_62 = arith.constant 9.99999974E-6 : f32
    %119 = vector.broadcast %cst_62 : f32 to vector<5x1xf32>
    %120 = arith.addf %118, %119 : vector<5x1xf32>
    %121 = math.rsqrt %120 : vector<5x1xf32>
    %122 = vector.broadcast %121 : vector<5x1xf32> to vector<5x512xf32>
    %123 = arith.mulf %113, %122 : vector<5x512xf32>
    %c0_63 = arith.constant 0 : index
    %c0_64 = arith.constant 0 : index
    %124 = vector.load %arg7[%c0_63, %c0_64] : memref<1x512xf32, #tpu.memory_space<vmem>>, vector<1x512xf32>
    %125 = vector.broadcast %124 : vector<1x512xf32> to vector<5x512xf32>
    %126 = arith.mulf %123, %125 : vector<5x512xf32>
    %c0_65 = arith.constant 0 : index
    %c0_66 = arith.constant 0 : index
    %127 = vector.load %arg8[%c0_65, %c0_66] : memref<1x512xf32, #tpu.memory_space<vmem>>, vector<1x512xf32>
    %128 = vector.broadcast %127 : vector<1x512xf32> to vector<5x512xf32>
    %129 = arith.addf %126, %128 : vector<5x512xf32>
    %c0_i32_67 = arith.constant 0 : i32
    %130 = tpu.memref_slice %arg22[%c0_i32_67] : memref<2x!tpu.dma_semaphore, #tpu.memory_space<semaphore_mem>> -> memref<1x!tpu.dma_semaphore, #tpu.memory_space<semaphore_mem>>
    %131 = tpu.memref_squeeze %130 : memref<1x!tpu.dma_semaphore, #tpu.memory_space<semaphore_mem>> -> memref<!tpu.dma_semaphore, #tpu.memory_space<semaphore_mem>>
    tpu.wait_dma2 semaphore(%131 : memref<!tpu.dma_semaphore, #tpu.memory_space<semaphore_mem>>) src(%arg9 : memref<512x2048xbf16, #tpu.memory_space<any>>) dst(%arg20 : memref<512x2048xbf16, #tpu.memory_space<vmem>>)
    %132 = arith.truncf %129 : vector<5x512xf32> to vector<5x512xbf16>
    %c0_68 = arith.constant 0 : index
    %c0_69 = arith.constant 0 : index
    %133 = vector.load %arg20[%c0_68, %c0_69] : memref<512x2048xbf16, #tpu.memory_space<vmem>>, vector<512x2048xbf16>
    %cst_70 = arith.constant dense<0.000000e+00> : vector<5x2048xf32>
    %134 = tpu.matmul %132, %133, %cst_70 {dimension_numbers = #tpu.dot_dimension_numbers<[1], [0], [0], [1], [0, 0, 1, 1], [], []>} : vector<5x512xbf16>, vector<512x2048xbf16>, vector<5x2048xf32> -> vector<5x2048xf32>
    %c0_71 = arith.constant 0 : index
    %c0_72 = arith.constant 0 : index
    %135 = vector.load %arg10[%c0_71, %c0_72] : memref<1x2048xf32, #tpu.memory_space<vmem>>, vector<1x2048xf32>
    %136 = vector.broadcast %135 : vector<1x2048xf32> to vector<5x2048xf32>
    %137 = arith.addf %134, %136 : vector<5x2048xf32>
    %cst_73 = arith.constant 0.000000e+00 : f32
    %138 = vector.broadcast %cst_73 : f32 to vector<5x2048xf32>
    %139 = arith.maximumf %137, %138 : vector<5x2048xf32>
    %c1_i32_74 = arith.constant 1 : i32
    %140 = tpu.memref_slice %arg22[%c1_i32_74] : memref<2x!tpu.dma_semaphore, #tpu.memory_space<semaphore_mem>> -> memref<1x!tpu.dma_semaphore, #tpu.memory_space<semaphore_mem>>
    %141 = tpu.memref_squeeze %140 : memref<1x!tpu.dma_semaphore, #tpu.memory_space<semaphore_mem>> -> memref<!tpu.dma_semaphore, #tpu.memory_space<semaphore_mem>>
    tpu.wait_dma2 semaphore(%141 : memref<!tpu.dma_semaphore, #tpu.memory_space<semaphore_mem>>) src(%arg11 : memref<2048x512xbf16, #tpu.memory_space<any>>) dst(%arg21 : memref<2048x512xbf16, #tpu.memory_space<vmem>>)
    %142 = arith.truncf %139 : vector<5x2048xf32> to vector<5x2048xbf16>
    %c0_75 = arith.constant 0 : index
    %c0_76 = arith.constant 0 : index
    %143 = vector.load %arg21[%c0_75, %c0_76] : memref<2048x512xbf16, #tpu.memory_space<vmem>>, vector<2048x512xbf16>
    %cst_77 = arith.constant dense<0.000000e+00> : vector<5x512xf32>
    %144 = tpu.matmul %142, %143, %cst_77 {dimension_numbers = #tpu.dot_dimension_numbers<[1], [0], [0], [1], [0, 0, 1, 1], [], []>} : vector<5x2048xbf16>, vector<2048x512xbf16>, vector<5x512xf32> -> vector<5x512xf32>
    %c0_78 = arith.constant 0 : index
    %c0_79 = arith.constant 0 : index
    %145 = vector.load %arg12[%c0_78, %c0_79] : memref<1x512xf32, #tpu.memory_space<vmem>>, vector<1x512xf32>
    %146 = vector.broadcast %145 : vector<1x512xf32> to vector<5x512xf32>
    %147 = arith.addf %144, %146 : vector<5x512xf32>
    %148 = arith.addf %147, %129 : vector<5x512xf32>
    %cst_80 = arith.constant dense<0.000000e+00> : vector<5xf32>
    %149 = vector.multi_reduction <add>, %148, %cst_80 [1] : vector<5x512xf32> to vector<5xf32>
    %150 = vector.shape_cast %149 : vector<5xf32> to vector<5x1xf32>
    %cst_81 = arith.constant 5.120000e+02 : f32
    %151 = vector.broadcast %cst_81 : f32 to vector<5x1xf32>
    %152 = arith.divf %150, %151 : vector<5x1xf32>
    %153 = vector.broadcast %152 : vector<5x1xf32> to vector<5x512xf32>
    %154 = arith.subf %148, %153 : vector<5x512xf32>
    %155 = arith.mulf %154, %154 : vector<5x512xf32>
    %cst_82 = arith.constant dense<0.000000e+00> : vector<5xf32>
    %156 = vector.multi_reduction <add>, %155, %cst_82 [1] : vector<5x512xf32> to vector<5xf32>
    %157 = vector.shape_cast %156 : vector<5xf32> to vector<5x1xf32>
    %cst_83 = arith.constant 5.120000e+02 : f32
    %158 = vector.broadcast %cst_83 : f32 to vector<5x1xf32>
    %159 = arith.divf %157, %158 : vector<5x1xf32>
    %cst_84 = arith.constant 9.99999974E-6 : f32
    %160 = vector.broadcast %cst_84 : f32 to vector<5x1xf32>
    %161 = arith.addf %159, %160 : vector<5x1xf32>
    %162 = math.rsqrt %161 : vector<5x1xf32>
    %163 = vector.broadcast %162 : vector<5x1xf32> to vector<5x512xf32>
    %164 = arith.mulf %154, %163 : vector<5x512xf32>
    %c0_85 = arith.constant 0 : index
    %c0_86 = arith.constant 0 : index
    %165 = vector.load %arg13[%c0_85, %c0_86] : memref<1x512xf32, #tpu.memory_space<vmem>>, vector<1x512xf32>
    %166 = vector.broadcast %165 : vector<1x512xf32> to vector<5x512xf32>
    %167 = arith.mulf %164, %166 : vector<5x512xf32>
    %c0_87 = arith.constant 0 : index
    %c0_88 = arith.constant 0 : index
    %168 = vector.load %arg14[%c0_87, %c0_88] : memref<1x512xf32, #tpu.memory_space<vmem>>, vector<1x512xf32>
    %169 = vector.broadcast %168 : vector<1x512xf32> to vector<5x512xf32>
    %170 = arith.addf %167, %169 : vector<5x512xf32>
    %c0_89 = arith.constant 0 : index
    %c0_90 = arith.constant 0 : index
    %171 = vector.load %arg15[%c0_89, %c0_90] : memref<5x512xf32, #tpu.memory_space<vmem>>, vector<5x512xf32>
    tpu.vector_store %arg15[%c0_89, %c0_90], %170 {strides = array<i32>} : memref<5x512xf32, #tpu.memory_space<vmem>>, vector<5x512xf32>,
    return
  }
}

</mosaic_0001>

<bundles_post_ra>
// kernel: tpu_custom_call.1
= control target key start
LH: loop header
LB: loop body
LE: loop exit
PB: predicated region body
PF: predicated region fallthrough
CT: control target
= control target key end

     0   :  { %s18447_s0 = inlined_call_operand.hbm [shape: f32[5,512], index: 0, kind: input, shape index: {}]   ;;  %s18448_s1 = inlined_call_operand.hbm [shape: f32[20,20], index: 1, kind: input, shape index: {}]   ;;  %s18449_s2 = inlined_call_operand.vmem [shape: f32[20,5], index: 2, kind: input, shape index: {}]   ;;  %s18450_s3 = inlined_call_operand.hbm [shape: bf16[512,768], index: 3, kind: input, shape index: {}]   ;;  %s18451_s4 = inlined_call_operand.hbm [shape: f32[1,768], index: 4, kind: input, shape index: {}]   ;;  %s18452_s5 = inlined_call_operand.hbm [shape: bf16[256,512], index: 5, kind: input, shape index: {}]   ;;  %s18453_s6 = inlined_call_operand.hbm [shape: f32[1,512], index: 6, kind: input, shape index: {}]   ;;  %s18454_s7 = inlined_call_operand.hbm [shape: f32[1,512], index: 7, kind: input, shape index: {}]   ;;  %s18455_s8 = inlined_call_operand.hbm [shape: f32[1,512], index: 8, kind: input, shape index: {}]   ;;  %s18456_s9 = inlined_call_operand.hbm [shape: bf16[512,2048], index: 9, kind: input, shape index: {}]   ;;  %s18457_s10 = inlined_call_operand.hbm [shape: f32[1,2048], index: 10, kind: input, shape index: {}]   ;;  %s18458_s11 = inlined_call_operand.hbm [shape: bf16[2048,512], index: 11, kind: input, shape index: {}]   ;;  %s18459_s12 = inlined_call_operand.hbm [shape: f32[1,512], index: 12, kind: input, shape index: {}]   ;;  %s18460_s13 = inlined_call_operand.hbm [shape: f32[1,512], index: 13, kind: input, shape index: {}]   ;;  %s18461_s14 = inlined_call_operand.hbm [shape: f32[1,512], index: 14, kind: input, shape index: {}]   ;;  %s18462_s15 = inlined_call_operand.hbm [shape: f32[5,512], index: 15, kind: output, shape index: {0}]   ;;  %s18463_s16 = inlined_call_operand.vmem [shape: f32[4,5,5], index: 16, kind: output, shape index: {1}]  }
   0x1   :  { %18464 = sst [smem:[#allocation45_spill]] %s18447_s0 }
   0x2   :  { %22 = vsyncpa [#allocation9], 0 }
   0x3   :  { %23 = vsyncpa [#allocation12], 0 }
   0x4   :  { %24 = vsyncpa [#allocation15], 0 }
   0x5   :  { %25 = vsyncpa [#allocation18], 0 }
   0x6   :  { %26 = vsyncpa [#allocation21], 0 }
   0x7   :  { %27 = vsyncpa [#allocation24], 0 }
   0x8   :  { %28 = vsyncpa [#allocation27], 0  ;;  %s45_s23 = sshll.u32 %s18448_s1, 4  ;;  %s46_s23 = int_to_ptr.hbm [resolvable:$true] %s45_s23 }
   0x9   :  { %29 = vsyncpa [#allocation10], 0  ;;  %s17761_s24 = smov [#allocation11]   ;;  %s74_s28 = sshll.u32 %s18451_s4, 4  ;;  %s75_s28 = int_to_ptr.hbm [resolvable:$true] %s74_s28 }
   0xa   :  { %s47_s25 = sshll.u32 %s17761_s24, 4  ;;  %s17762_s29 = smov 128   ;;  %s48_s25 = int_to_ptr.vmem [resolvable:$true] %s47_s25 }
   0xb   :  { %s17763_s30 = smov 8   ;;  %s17764_s0 = smov [#allocation14]  }
   0xc   :  { %53 = dma.hbm_to_vmem [thread:$0]  %s46_s23, 384, %s48_s25, [#allocation12], %s17762_s29, %s17762_s29, %s17763_s30  }
   0xd   :  { %s76_s17 = sshll.u32 %s17764_s0, 4  ;;  %s98_s20 = sshll.u32 %s18453_s6, 4  ;;  %s77_s17 = int_to_ptr.vmem [resolvable:$true] %s76_s17  ;;  %s99_s20 = int_to_ptr.hbm [resolvable:$true] %s98_s20 }
   0xe   :  { %79 = dma.hbm_to_vmem [thread:$0]  %s75_s28, 96, %s77_s17, [#allocation15]  }
   0xf   :  { %s120_s22 = sshll.u32 %s18455_s8, 4  ;;  %s17765_s24 = smov [#allocation17]   ;;  %s121_s22 = int_to_ptr.hbm [resolvable:$true] %s120_s22 }
  0x10   :  { %s100_s26 = sshll.u32 %s17765_s24, 4  ;;  %s17766_s4 = smov [#allocation20]   ;;  %s101_s26 = int_to_ptr.vmem [resolvable:$true] %s100_s26 }
  0x11   :  { %103 = dma.hbm_to_vmem [thread:$0]  %s99_s20, 64, %s101_s26, [#allocation18]  }
  0x12   :  { %s122_s23 = sshll.u32 %s17766_s4, 4  ;;  %s142_s29 = sshll.u32 %s18459_s12, 4  ;;  %s123_s23 = int_to_ptr.vmem [resolvable:$true] %s122_s23  ;;  %s143_s29 = int_to_ptr.hbm [resolvable:$true] %s142_s29 }
  0x13   :  { %125 = dma.hbm_to_vmem [thread:$0]  %s121_s22, 64, %s123_s23, [#allocation21]  }
  0x14   :  { %s18465_s30 = sld [smem:[#allocation45_spill]]  ;;  %s17767_s17 = smov [#allocation23]  }
  0x15   :  { %s144_s8 = sshll.u32 %s17767_s17, 4  ;;  %s17768_s18 = smov [#allocation8]   ;;  %s145_s8 = int_to_ptr.vmem [resolvable:$true] %s144_s8 }
  0x16   :  { %147 = dma.hbm_to_vmem [thread:$0]  %s143_s29, 64, %s145_s8, [#allocation24]  }
  0x17   :  { %s37_s19 = sshll.u32 %s17768_s18, 4  ;;  %s60_s21 = sshll.u32 %s18450_s3, 4  ;;  %s38_s19 = int_to_ptr.vmem [resolvable:$true] %s37_s19  ;;  %s61_s21 = int_to_ptr.hbm [resolvable:$true] %s60_s21 }
  0x18   :  { %s17769_s12 = smov [#allocation13]   ;;  %s84_s4 = sshll.u32 %s18452_s5, 4  ;;  %s85_s4 = int_to_ptr.hbm [resolvable:$true] %s84_s4 }
  0x19   :  { %s62_s22 = sshll.u32 %s17769_s12, 4  ;;  %s17770_s23 = smov 384   ;;  %s63_s22 = int_to_ptr.vmem [resolvable:$true] %s62_s22 }
  0x1a   :  { %s35_s0 = sshll.u32 %s18465_s30, 4  ;;  %s17771_s25 = smov 24   ;;  %s36_s0 = int_to_ptr.hbm [resolvable:$true] %s35_s0 }
  0x1b   :  { %40 = dma.hbm_to_vmem [thread:$0]  %s36_s0, 512, %s38_s19, [#allocation9]  }
  0x1c   :  { %68 = dma.hbm_to_vmem [thread:$0]  %s61_s21, 24576, %s63_s22, [#allocation12], %s17770_s23, %s17770_s23, %s17771_s25  }
  0x1d   :  { %s17772_s27 = smov [#allocation16]   ;;  %s17773_s6 = smov 256  }
  0x1e   :  { %s86_s29 = sshll.u32 %s17772_s27, 4  ;;  %s17774_s28 = smov 16   ;;  %s87_s29 = int_to_ptr.vmem [resolvable:$true] %s86_s29 }
  0x1f   :  { %92 = dma.hbm_to_vmem [thread:$0]  %s85_s4, 8192, %s87_s29, [#allocation15], %s17773_s6, %s17773_s6, %s17774_s28  }
  0x20   :  { %s109_s0 = sshll.u32 %s18454_s7, 4  ;;  %s17775_s17 = smov [#allocation19]   ;;  %s110_s0 = int_to_ptr.hbm [resolvable:$true] %s109_s0 }
  0x21   :  { %s111_s8 = sshll.u32 %s17775_s17, 4  ;;  %s131_s19 = sshll.u32 %s18457_s10, 4  ;;  %s112_s8 = int_to_ptr.vmem [resolvable:$true] %s111_s8  ;;  %s132_s19 = int_to_ptr.hbm [resolvable:$true] %s131_s19 }
  0x22   :  { %114 = dma.hbm_to_vmem [thread:$0]  %s110_s0, 64, %s112_s8, [#allocation18]  }
  0x23   :  { %s17776_s20 = smov [#allocation22]   ;;  %s153_s22 = sshll.u32 %s18460_s13, 4  ;;  %s154_s22 = int_to_ptr.hbm [resolvable:$true] %s153_s22 }
  0x24   :  { %s133_s1 = sshll.u32 %s17776_s20, 4  ;;  %s164_s26 = sshll.u32 %s18461_s14, 4  ;;  %s134_s1 = int_to_ptr.vmem [resolvable:$true] %s133_s1  ;;  %s165_s26 = int_to_ptr.hbm [resolvable:$true] %s164_s26 }
  0x25   :  { %136 = dma.hbm_to_vmem [thread:$0]  %s132_s19, 256, %s134_s1, [#allocation21]  }
  0x26   :  { %s17777_s4 = smov [#allocation25]   ;;  %s17778_s10 = smov [#allocation26]  }
  0x27   :  { %s155_s23 = sshll.u32 %s17777_s4, 4  ;;  %s166_s25 = sshll.u32 %s17778_s10, 4  ;;  %s156_s23 = int_to_ptr.vmem [resolvable:$true] %s155_s23  ;;  %s167_s25 = int_to_ptr.vmem [resolvable:$true] %s166_s25 }
  0x28   :  { %158 = dma.hbm_to_vmem [thread:$0]  %s154_s22, 64, %s156_s23, [#allocation24]  }
  0x29   :  { %169 = dma.hbm_to_vmem [thread:$0]  %s165_s26, 64, %s167_s25, [#allocation27]  }
  0x2a   :  { %17741 = dma.done.wait [#allocation9], 512  }
  0x2b   :  { %17742 = vsyncadd [#allocation9], 4294966784 }
  0x2c   :  { %17743 = dma.done.wait [#allocation12], 24960  }
  0x2d   :  { %17744 = vsyncadd [#allocation12], 4294942336 }
  0x2e   :  { %17745 = dma.done.wait [#allocation15], 8288  }
  0x2f   :  { %17746 = vsyncadd [#allocation15], 4294959008 }
  0x30   :  { %17747 = dma.done.wait [#allocation18], 128  }
  0x31   :  { %17748 = vsyncadd [#allocation18], 4294967168 }
  0x32   :  { %17749 = dma.done.wait [#allocation21], 320  }
  0x33   :  { %17750 = vsyncadd [#allocation21], 4294966976 }
  0x34   :  { %17751 = dma.done.wait [#allocation24], 128  }
  0x35   :  { %17752 = vsyncadd [#allocation24], 4294967168 }
  0x36   :  { %17753 = dma.done.wait [#allocation27], 64  }
  0x37   :  { %17754 = vsyncadd [#allocation27], 4294967232  ;;  %v11022_v0 = vld [vmem:[#allocation13 + $0x150] sm:$0xf]  ;;  %v16050_v1 = vld [vmem:[#allocation13 + $0x164] sm:$0xf0] }
  0x38   :  { %v11214_v2 = vld [vmem:[#allocation13 + $0x2d0] sm:$0xf]  ;;  %v11023_v3 = vor.u32 %v16050_v1, %v11022_v0  ;;  %v16098_v4 = vld [vmem:[#allocation13 + $0x2e4] sm:$0xf0]  ;;  %v10998_v11 = vld [vmem:[#allocation13 + $0x120] sm:$0xf] }
  0x39   :  { %v11406_v5 = vld [vmem:[#allocation13 + $0x450] sm:$0xf]  ;;  %v16146_v6 = vld [vmem:[#allocation13 + $0x464] sm:$0xf0]  ;;  %v11215_v7 = vor.u32 %v16098_v4, %v11214_v2  ;;  %v16044_v13 = vld [vmem:[#allocation13 + $0x134] sm:$0xf0] }
  0x3a   :  { %v11407_v8 = vor.u32 %v16146_v6, %v11406_v5  ;;  %v11598_v9 = vld [vmem:[#allocation13 + $0x5d0] sm:$0xf]  ;;  %v16194_v10 = vld [vmem:[#allocation13 + $0x5e4] sm:$0xf0]  ;;  %1420 = vmatpush.bf16.msra.mxu0 %v11023_v3  ;;  %v11190_v14 = vld [vmem:[#allocation13 + $0x2a0] sm:$0xf]  ;;  %v10999_v16 = vor.u32 %v16044_v13, %v10998_v11 }
  0x3b   :  { %v11599_v12 = vor.u32 %v16194_v10, %v11598_v9  ;;  %v16092_v15 = vld [vmem:[#allocation13 + $0x2b4] sm:$0xf0]  ;;  %1433 = vmatpush.bf16.msra.mxu1 %v11215_v7  ;;  %v11382_v18 = vld [vmem:[#allocation13 + $0x420] sm:$0xf]  ;;  %v10974_v23 = vld [vmem:[#allocation13 + $0xf0] sm:$0xf] }
  0x3c   :  { %1446 = vmatpush.bf16.msra.mxu2 %v11407_v8  ;;  %v11191_v17 = vor.u32 %v16092_v15, %v11190_v14  ;;  %v16140_v19 = vld [vmem:[#allocation13 + $0x434] sm:$0xf0]  ;;  %v11574_v20 = vld [vmem:[#allocation13 + $0x5a0] sm:$0xf]  ;;  %v16038_v24 = vld [vmem:[#allocation13 + $0x104] sm:$0xf0] }
  0x3d   :  { %1459 = vmatpush.bf16.msra.mxu3 %v11599_v12  ;;  %v11383_v21 = vor.u32 %v16140_v19, %v11382_v18  ;;  %v16188_v22 = vld [vmem:[#allocation13 + $0x5b4] sm:$0xf0]  ;;  %v11166_v26 = vld [vmem:[#allocation13 + $0x270] sm:$0xf]  ;;  %v16086_v27 = vld [vmem:[#allocation13 + $0x284] sm:$0xf0]  ;;  %v10975_v29 = vor.u32 %v16038_v24, %v10974_v23 }
  0x3e   :  { %v11575_v25 = vor.u32 %v16188_v22, %v11574_v20  ;;  %v11358_v28 = vld [vmem:[#allocation13 + $0x3f0] sm:$0xf]  ;;  %1421 = vmatpush.bf16.msra.mxu0 %v10999_v16  ;;  %v16134_v30 = vld [vmem:[#allocation13 + $0x404] sm:$0xf0]  ;;  %v11167_v33 = vor.u32 %v16086_v27, %v11166_v26  ;;  %v10950_v35 = vld [vmem:[#allocation13 + $0xc0] sm:$0xf] }
  0x3f   :  { %v11550_v31 = vld [vmem:[#allocation13 + $0x570] sm:$0xf]  ;;  %v16182_v32 = vld [vmem:[#allocation13 + $0x584] sm:$0xf0]  ;;  %1434 = vmatpush.bf16.msra.mxu1 %v11191_v17  ;;  %v11359_v34 = vor.u32 %v16134_v30, %v11358_v28  ;;  %v16032_v36 = vld [vmem:[#allocation13 + $0xd4] sm:$0xf0] }
  0x40   :  { %1447 = vmatpush.bf16.msra.mxu2 %v11383_v21  ;;  %v11142_v37 = vld [vmem:[#allocation13 + $0x240] sm:$0xf]  ;;  %v11551_v38 = vor.u32 %v16182_v32, %v11550_v31  ;;  %v16080_v39 = vld [vmem:[#allocation13 + $0x254] sm:$0xf0]  ;;  %v10951_v44 = vor.u32 %v16032_v36, %v10950_v35  ;;  %v10926_v47 = vld [vmem:[#allocation13 + $0x90] sm:$0xf] }
  0x41   :  { %1460 = vmatpush.bf16.msra.mxu3 %v11575_v25  ;;  %v11334_v40 = vld [vmem:[#allocation13 + $0x3c0] sm:$0xf]  ;;  %v16128_v41 = vld [vmem:[#allocation13 + $0x3d4] sm:$0xf0]  ;;  %v11143_v45 = vor.u32 %v16080_v39, %v11142_v37  ;;  %v16026_v48 = vld [vmem:[#allocation13 + $0xa4] sm:$0xf0] }
  0x42   :  { %v11526_v42 = vld [vmem:[#allocation13 + $0x540] sm:$0xf]  ;;  %v16176_v43 = vld [vmem:[#allocation13 + $0x554] sm:$0xf0]  ;;  %1422 = vmatpush.bf16.msra.mxu0 %v10975_v29  ;;  %v11335_v46 = vor.u32 %v16128_v41, %v11334_v40  ;;  %v11118_v49 = vld [vmem:[#allocation13 + $0x210] sm:$0xf]  ;;  %v10927_v56 = vor.u32 %v16026_v48, %v10926_v47 }
  0x43   :  { %1435 = vmatpush.bf16.msra.mxu1 %v11167_v33  ;;  %v11527_v50 = vor.u32 %v16176_v43, %v11526_v42  ;;  %v16074_v51 = vld [vmem:[#allocation13 + $0x224] sm:$0xf0]  ;;  %v11310_v52 = vld [vmem:[#allocation13 + $0x390] sm:$0xf]  ;;  %v10902_v59 = vld [vmem:[#allocation13 + $0x60] sm:$0xf] }
  0x44   :  { %1448 = vmatpush.bf16.msra.mxu2 %v11359_v34  ;;  %v16122_v53 = vld [vmem:[#allocation13 + $0x3a4] sm:$0xf0]  ;;  %v11502_v54 = vld [vmem:[#allocation13 + $0x510] sm:$0xf]  ;;  %v11119_v57 = vor.u32 %v16074_v51, %v11118_v49  ;;  %v16020_v60 = vld [vmem:[#allocation13 + $0x74] sm:$0xf0] }
  0x45   :  { %1461 = vmatpush.bf16.msra.mxu3 %v11551_v38  ;;  %v16170_v55 = vld [vmem:[#allocation13 + $0x524] sm:$0xf0]  ;;  %v11311_v58 = vor.u32 %v16122_v53, %v11310_v52  ;;  %v11094_v61 = vld [vmem:[#allocation13 + $0x1e0] sm:$0xf]  ;;  %v16068_v63 = vld [vmem:[#allocation13 + $0x1f4] sm:$0xf0]  ;;  %v10903_v4 = vor.u32 %v16020_v60, %v10902_v59 }
  0x46   :  { %1423 = vmatpush.bf16.msra.mxu0 %v10951_v44  ;;  %v11503_v62 = vor.u32 %v16170_v55, %v11502_v54  ;;  %v11286_v0 = vld [vmem:[#allocation13 + $0x360] sm:$0xf]  ;;  %v16116_v1 = vld [vmem:[#allocation13 + $0x374] sm:$0xf0]  ;;  %v11095_v5 = vor.u32 %v16068_v63, %v11094_v61  ;;  %v10878_v7 = vld [vmem:[#allocation13 + $0x30] sm:$0xf] }
  0x47   :  { %1436 = vmatpush.bf16.msra.mxu1 %v11143_v45  ;;  %v11478_v2 = vld [vmem:[#allocation13 + $0x4e0] sm:$0xf]  ;;  %v16164_v3 = vld [vmem:[#allocation13 + $0x4f4] sm:$0xf0]  ;;  %v11287_v6 = vor.u32 %v16116_v1, %v11286_v0  ;;  %v16014_v8 = vld [vmem:[#allocation13 + $0x44] sm:$0xf0] }
  0x48   :  { %1449 = vmatpush.bf16.msra.mxu2 %v11335_v46  ;;  %v11070_v9 = vld [vmem:[#allocation13 + $0x1b0] sm:$0xf]  ;;  %v11479_v10 = vor.u32 %v16164_v3, %v11478_v2  ;;  %v16062_v11 = vld [vmem:[#allocation13 + $0x1c4] sm:$0xf0]  ;;  %v10879_v16 = vor.u32 %v16014_v8, %v10878_v7  ;;  %v10854_v17 = vld [vmem:[#allocation13] sm:$0xf] }
  0x49   :  { %1462 = vmatpush.bf16.msra.mxu3 %v11527_v50  ;;  %v11262_v12 = vld [vmem:[#allocation13 + $0x330] sm:$0xf]  ;;  %v16110_v13 = vld [vmem:[#allocation13 + $0x344] sm:$0xf0]  ;;  %v16008_v18 = vld [vmem:[#allocation13 + $0x14] sm:$0xf0]  ;;  %v11071_v19 = vor.u32 %v16062_v11, %v11070_v9 }
  0x4a   :  { %1424 = vmatpush.bf16.msra.mxu0 %v10927_v56  ;;  %v11454_v14 = vld [vmem:[#allocation13 + $0x4b0] sm:$0xf]  ;;  %v16158_v15 = vld [vmem:[#allocation13 + $0x4c4] sm:$0xf0]  ;;  %v11263_v20 = vor.u32 %v16110_v13, %v11262_v12  ;;  %v11046_v21 = vld [vmem:[#allocation13 + $0x180] sm:$0xf]  ;;  %v10855_v31 = vor.u32 %v16008_v18, %v10854_v17 }
  0x4b   :  { %1437 = vmatpush.bf16.msra.mxu1 %v11119_v57  ;;  %v16056_v22 = vld [vmem:[#allocation13 + $0x194] sm:$0xf0]  ;;  %v11238_v23 = vld [vmem:[#allocation13 + $0x300] sm:$0xf]  ;;  %v11455_v24 = vor.u32 %v16158_v15, %v11454_v14  ;;  %v16047_v28 = vld [vmem:[#allocation13 + $0x154] sm:$0xf] }
  0x4c   :  { %1450 = vmatpush.bf16.msra.mxu2 %v11311_v58  ;;  %v16104_v25 = vld [vmem:[#allocation13 + $0x314] sm:$0xf0]  ;;  %v11430_v26 = vld [vmem:[#allocation13 + $0x480] sm:$0xf]  ;;  %v11024_v29 = vld [vmem:[#allocation13 + $0x168] sm:$0xf0]  ;;  %v11047_v35 = vor.u32 %v16056_v22, %v11046_v21 }
  0x4d   :  { %1463 = vmatpush.bf16.msra.mxu3 %v11503_v62  ;;  %v16152_v27 = vld [vmem:[#allocation13 + $0x494] sm:$0xf0]  ;;  %v16095_v30 = vld [vmem:[#allocation13 + $0x2d4] sm:$0xf]  ;;  %v11216_v32 = vld [vmem:[#allocation13 + $0x2e8] sm:$0xf0]  ;;  %v11239_v36 = vor.u32 %v16104_v25, %v11238_v23  ;;  %v11027_v41 = vor.u32 %v16047_v28, %v11024_v29 }
  0x4e   :  { %1425 = vmatpush.bf16.msra.mxu0 %v10903_v4  ;;  %v16143_v33 = vld [vmem:[#allocation13 + $0x454] sm:$0xf]  ;;  %v11408_v34 = vld [vmem:[#allocation13 + $0x468] sm:$0xf0]  ;;  %v248_v39 = vld [vmem:[#allocation8 + $0x10] sm:$0x1f]  ;;  %v11431_v40 = vor.u32 %v16152_v27, %v11430_v26  ;;  %v11219_v45 = vor.u32 %v16095_v30, %v11216_v32 }
  0x4f   :  { %1438 = vmatpush.bf16.msra.mxu1 %v11095_v5  ;;  %v16191_v37 = vld [vmem:[#allocation13 + $0x5d4] sm:$0xf]  ;;  %v11600_v38 = vld [vmem:[#allocation13 + $0x5e8] sm:$0xf0]  ;;  %v16041_v42 = vld [vmem:[#allocation13 + $0x124] sm:$0xf]  ;;  %v11411_v46 = vor.u32 %v16143_v33, %v11408_v34  ;;  %v17908_v54 = vpack.c.bf16 %v248_v39, %v248_v39 }
  0x50   :  { %1451 = vmatpush.bf16.msra.mxu2 %v11287_v6  ;;  %v11000_v43 = vld [vmem:[#allocation13 + $0x138] sm:$0xf0]  ;;  %v246_v44 = vld [vmem:[#allocation8] sm:$0x1f]  ;;  %v16089_v47 = vld [vmem:[#allocation13 + $0x2a4] sm:$0xf]  ;;  %v11603_v50 = vor.u32 %v16191_v37, %v11600_v38 }
  0x51   :  { %1464 = vmatpush.bf16.msra.mxu3 %v11479_v10  ;;  %v249_v48 = vld [vmem:[#allocation8 + $0x18] sm:$0x1f]  ;;  %v247_v49 = vld [vmem:[#allocation8 + $0x8] sm:$0x1f]  ;;  %v11192_v51 = vld [vmem:[#allocation13 + $0x2b8] sm:$0xf0]  ;;  %v17910_v57 = vpack.c.bf16 %v246_v44, %v246_v44  ;;  %v11003_v59 = vor.u32 %v16041_v42, %v11000_v43 }
  0x52   :  { %1426 = vmatpush.bf16.msra.mxu0 %v10879_v16  ;;  %v16137_v52 = vld [vmem:[#allocation13 + $0x424] sm:$0xf]  ;;  %v11384_v53 = vld [vmem:[#allocation13 + $0x438] sm:$0xf0]  ;;  %v17912_v58 = vpack.c.bf16 %v249_v48, %v249_v48  ;;  %v17914_v60 = vpack.c.bf16 %v247_v49, %v247_v49  ;;  %v11195_v61 = vor.u32 %v16089_v47, %v11192_v51  ;;  %v16035_v63 = vld [vmem:[#allocation13 + $0xf4] sm:$0xf] }
  0x53   :  { %1439 = vmatpush.bf16.msra.mxu1 %v11071_v19  ;;  %v16185_v55 = vld [vmem:[#allocation13 + $0x5a4] sm:$0xf]  ;;  %v11576_v56 = vld [vmem:[#allocation13 + $0x5b8] sm:$0xf0]  ;;  %v11387_v62 = vor.u32 %v16137_v52, %v11384_v53  ;;  %v10976_v0 = vld [vmem:[#allocation13 + $0x108] sm:$0xf0] }
  0x54   :  { %1452 = vmatpush.bf16.msra.mxu2 %v11263_v20  ;;  %v16083_v1 = vld [vmem:[#allocation13 + $0x274] sm:$0xf]  ;;  %v11579_v2 = vor.u32 %v16185_v55, %v11576_v56  ;;  %v11168_v3 = vld [vmem:[#allocation13 + $0x288] sm:$0xf0]  ;;  %v10979_v8 = vor.u32 %v16035_v63, %v10976_v0  ;;  %v16029_v11 = vld [vmem:[#allocation13 + $0xc4] sm:$0xf] }
  0x55   :  { %1465 = vmatpush.bf16.msra.mxu3 %v11455_v24  ;;  %v16131_v4 = vld [vmem:[#allocation13 + $0x3f4] sm:$0xf]  ;;  %v11360_v5 = vld [vmem:[#allocation13 + $0x408] sm:$0xf0]  ;;  %v11171_v9 = vor.u32 %v16083_v1, %v11168_v3  ;;  %v10952_v12 = vld [vmem:[#allocation13 + $0xd8] sm:$0xf0] }
  0x56   :  { %1427 = vmatpush.bf16.msra.mxu0 %v10855_v31  ;;  %v16179_v6 = vld [vmem:[#allocation13 + $0x574] sm:$0xf]  ;;  %v11552_v7 = vld [vmem:[#allocation13 + $0x588] sm:$0xf0]  ;;  %v11363_v10 = vor.u32 %v16131_v4, %v11360_v5  ;;  %v16077_v13 = vld [vmem:[#allocation13 + $0x244] sm:$0xf]  ;;  %v10955_v20 = vor.u32 %v16029_v11, %v10952_v12 }
  0x57   :  { %1440 = vmatpush.bf16.msra.mxu1 %v11047_v35  ;;  %v11555_v14 = vor.u32 %v16179_v6, %v11552_v7  ;;  %v11144_v15 = vld [vmem:[#allocation13 + $0x258] sm:$0xf0]  ;;  %v16125_v16 = vld [vmem:[#allocation13 + $0x3c4] sm:$0xf]  ;;  %v16023_v23 = vld [vmem:[#allocation13 + $0x94] sm:$0xf] }
  0x58   :  { %1453 = vmatpush.bf16.msra.mxu2 %v11239_v36  ;;  %v11336_v17 = vld [vmem:[#allocation13 + $0x3d8] sm:$0xf0]  ;;  %v16173_v18 = vld [vmem:[#allocation13 + $0x544] sm:$0xf]  ;;  %v11147_v21 = vor.u32 %v16077_v13, %v11144_v15  ;;  %v10928_v24 = vld [vmem:[#allocation13 + $0xa8] sm:$0xf0] }
  0x59   :  { %1466 = vmatpush.bf16.msra.mxu3 %v11431_v40  ;;  %1428 = vmatmul.bf16.vlgmr.msra.gmra.mxu0 %v17910_v57  ;;  %v11528_v19 = vld [vmem:[#allocation13 + $0x558] sm:$0xf0]  ;;  %v11339_v22 = vor.u32 %v16125_v16, %v11336_v17  ;;  %v16071_v25 = vld [vmem:[#allocation13 + $0x214] sm:$0xf]  ;;  %v11120_v27 = vld [vmem:[#allocation13 + $0x228] sm:$0xf0]  ;;  %v10931_v32 = vor.u32 %v16023_v23, %v10928_v24 }
  0x5a   :  { %1472 = vmatpush.bf16.msrb.mxu0 %v11027_v41  ;;  %1441 = vmatmul.bf16.vlgmr.msra.gmra.mxu1 %v17914_v60  ;;  %v11531_v26 = vor.u32 %v16173_v18, %v11528_v19  ;;  %v16119_v28 = vld [vmem:[#allocation13 + $0x394] sm:$0xf]  ;;  %v11312_v29 = vld [vmem:[#allocation13 + $0x3a8] sm:$0xf0]  ;;  %v11123_v33 = vor.u32 %v16071_v25, %v11120_v27  ;;  %v16017_v35 = vld [vmem:[#allocation13 + $0x64] sm:$0xf] }
  0x5b   :  { %1485 = vmatpush.bf16.msrb.mxu1 %v11219_v45  ;;  %1454 = vmatmul.bf16.vlgmr.msra.gmra.mxu2 %v17908_v54  ;;  %v16167_v30 = vld [vmem:[#allocation13 + $0x514] sm:$0xf]  ;;  %v11504_v31 = vld [vmem:[#allocation13 + $0x528] sm:$0xf0]  ;;  %v11315_v34 = vor.u32 %v16119_v28, %v11312_v29  ;;  %v10904_v36 = vld [vmem:[#allocation13 + $0x78] sm:$0xf0] }
  0x5c   :  { %1498 = vmatpush.bf16.msrb.mxu2 %v11411_v46  ;;  %1467 = vmatmul.bf16.vlgmr.msra.gmra.mxu3 %v17912_v58  ;;  %v16065_v37 = vld [vmem:[#allocation13 + $0x1e4] sm:$0xf]  ;;  %v11507_v38 = vor.u32 %v16167_v30, %v11504_v31  ;;  %v11096_v39 = vld [vmem:[#allocation13 + $0x1f8] sm:$0xf0]  ;;  %v10907_v44 = vor.u32 %v16017_v35, %v10904_v36  ;;  %v16011_v47 = vld [vmem:[#allocation13 + $0x34] sm:$0xf] }
  0x5d   :  { %1511 = vmatpush.bf16.msrb.mxu3 %v11603_v50  ;;  %v16113_v40 = vld [vmem:[#allocation13 + $0x364] sm:$0xf]  ;;  %v11288_v41 = vld [vmem:[#allocation13 + $0x378] sm:$0xf0]  ;;  %v11099_v45 = vor.u32 %v16065_v37, %v11096_v39  ;;  %v10880_v48 = vld [vmem:[#allocation13 + $0x48] sm:$0xf0] }
  0x5e   :  { %1473 = vmatpush.bf16.msrb.mxu0 %v11003_v59  ;;  %v16161_v42 = vld [vmem:[#allocation13 + $0x4e4] sm:$0xf]  ;;  %v11480_v43 = vld [vmem:[#allocation13 + $0x4f8] sm:$0xf0]  ;;  %v11291_v46 = vor.u32 %v16113_v40, %v11288_v41  ;;  %v16059_v49 = vld [vmem:[#allocation13 + $0x1b4] sm:$0xf]  ;;  %v10883_v59 = vor.u32 %v16011_v47, %v10880_v48 }
  0x5f   :  { %1486 = vmatpush.bf16.msrb.mxu1 %v11195_v61  ;;  %v11483_v50 = vor.u32 %v16161_v42, %v11480_v43  ;;  %v11072_v51 = vld [vmem:[#allocation13 + $0x1c8] sm:$0xf0]  ;;  %v16107_v52 = vld [vmem:[#allocation13 + $0x334] sm:$0xf]  ;;  %v16005_v61 = vld [vmem:[#allocation13 + $0x4] sm:$0xf] }
  0x60   :  { %1499 = vmatpush.bf16.msrb.mxu2 %v11387_v62  ;;  %v11264_v53 = vld [vmem:[#allocation13 + $0x348] sm:$0xf0]  ;;  %v16155_v55 = vld [vmem:[#allocation13 + $0x4b4] sm:$0xf]  ;;  %v11075_v62 = vor.u32 %v16059_v49, %v11072_v51  ;;  %v10856_v0 = vld [vmem:[#allocation13 + $0x18] sm:$0xf0] }
  0x61   :  { %1512 = vmatpush.bf16.msrb.mxu3 %v11579_v2  ;;  %v11456_v56 = vld [vmem:[#allocation13 + $0x4c8] sm:$0xf0]  ;;  %v11267_v63 = vor.u32 %v16107_v52, %v11264_v53  ;;  %v16053_v1 = vld [vmem:[#allocation13 + $0x184] sm:$0xf]  ;;  %v11048_v2 = vld [vmem:[#allocation13 + $0x198] sm:$0xf0] }
  0x62   :  { %1474 = vmatpush.bf16.msrb.mxu0 %v10979_v8  ;;  %v11459_v3 = vor.u32 %v16155_v55, %v11456_v56  ;;  %v16101_v4 = vld [vmem:[#allocation13 + $0x304] sm:$0xf]  ;;  %v11240_v5 = vld [vmem:[#allocation13 + $0x318] sm:$0xf0]  ;;  %v11030_v8 = vld [vmem:[#allocation13 + $0x158] sm:$0xf]  ;;  %v11051_v13 = vor.u32 %v16053_v1, %v11048_v2 }
  0x63   :  { %1487 = vmatpush.bf16.msrb.mxu1 %v11171_v9  ;;  %v16149_v6 = vld [vmem:[#allocation13 + $0x484] sm:$0xf]  ;;  %v11432_v7 = vld [vmem:[#allocation13 + $0x498] sm:$0xf0]  ;;  %v16051_v9 = vld [vmem:[#allocation13 + $0x16c] sm:$0xf0] }
  0x64   :  { %1500 = vmatpush.bf16.msrb.mxu2 %v11363_v10  ;;  %v10859_v10 = vor.u32 %v16005_v61, %v10856_v0  ;;  %v11222_v11 = vld [vmem:[#allocation13 + $0x2d8] sm:$0xf]  ;;  %v16099_v12 = vld [vmem:[#allocation13 + $0x2ec] sm:$0xf0]  ;;  %v11435_v15 = vor.u32 %v16149_v6, %v11432_v7  ;;  %v11031_v16 = vor.u32 %v16051_v9, %v11030_v8  ;;  %v11006_v17 = vld [vmem:[#allocation13 + $0x128] sm:$0xf] }
  0x65   :  { %1513 = vmatpush.bf16.msrb.mxu3 %v11555_v14  ;;  %v11243_v14 = vor.u32 %v16101_v4, %v11240_v5  ;;  %v11414_v18 = vld [vmem:[#allocation13 + $0x458] sm:$0xf]  ;;  %v16147_v19 = vld [vmem:[#allocation13 + $0x46c] sm:$0xf0]  ;;  %v11198_v24 = vld [vmem:[#allocation13 + $0x2a8] sm:$0xf] }
  0x66   :  { %1475 = vmatpush.bf16.msrb.mxu0 %v10955_v20  ;;  %v11223_v20 = vor.u32 %v16099_v12, %v11222_v11  ;;  %v16195_v23 = vld [vmem:[#allocation13 + $0x5ec] sm:$0xf0]  ;;  %v16093_v25 = vld [vmem:[#allocation13 + $0x2bc] sm:$0xf0]  ;;  %v10982_v28 = vld [vmem:[#allocation13 + $0xf8] sm:$0xf] }
  0x67   :  { %1488 = vmatpush.bf16.msrb.mxu1 %v11147_v21  ;;  %v16045_v21 = vld [vmem:[#allocation13 + $0x13c] sm:$0xf0]  ;;  %v11390_v30 = vld [vmem:[#allocation13 + $0x428] sm:$0xf]  ;;  %v11174_v36 = vld [vmem:[#allocation13 + $0x278] sm:$0xf] }
  0x68   :  { %1501 = vmatpush.bf16.msrb.mxu2 %v11339_v22  ;;  %v11606_v22 = vld [vmem:[#allocation13 + $0x5d8] sm:$0xf]  ;;  %v11007_v27 = vor.u32 %v16045_v21, %v11006_v17  ;;  %v16141_v31 = vld [vmem:[#allocation13 + $0x43c] sm:$0xf0]  ;;  %v16087_v37 = vld [vmem:[#allocation13 + $0x28c] sm:$0xf0] }
  0x69   :  { %1514 = vmatpush.bf16.msrb.mxu3 %v11531_v26  ;;  %v11415_v26 = vor.u32 %v16147_v19, %v11414_v18  ;;  %v11607_v29 = vor.u32 %v16195_v23, %v11606_v22  ;;  %v16189_v35 = vld [vmem:[#allocation13 + $0x5bc] sm:$0xf0]  ;;  %v10958_v40 = vld [vmem:[#allocation13 + $0xc8] sm:$0xf]  ;;  %v11366_v42 = vld [vmem:[#allocation13 + $0x3f8] sm:$0xf] }
  0x6a   :  { %1476 = vmatpush.bf16.msrb.mxu0 %v10931_v32  ;;  %v11199_v32 = vor.u32 %v16093_v25, %v11198_v24  ;;  %v16135_v43 = vld [vmem:[#allocation13 + $0x40c] sm:$0xf0]  ;;  %v11150_v48 = vld [vmem:[#allocation13 + $0x248] sm:$0xf]  ;;  %v16081_v49 = vld [vmem:[#allocation13 + $0x25c] sm:$0xf0] }
  0x6b   :  { %1489 = vmatpush.bf16.msrb.mxu1 %v11123_v33  ;;  %v16039_v33 = vld [vmem:[#allocation13 + $0x10c] sm:$0xf0]  ;;  %v10934_v52 = vld [vmem:[#allocation13 + $0x98] sm:$0xf]  ;;  %v11342_v55 = vld [vmem:[#allocation13 + $0x3c8] sm:$0xf] }
  0x6c   :  { %1502 = vmatpush.bf16.msrb.mxu2 %v11315_v34  ;;  %v11582_v34 = vld [vmem:[#allocation13 + $0x5a8] sm:$0xf]  ;;  %v10983_v39 = vor.u32 %v16039_v33, %v10982_v28  ;;  %v16183_v47 = vld [vmem:[#allocation13 + $0x58c] sm:$0xf0]  ;;  %v16129_v56 = vld [vmem:[#allocation13 + $0x3dc] sm:$0xf0] }
  0x6d   :  { %1515 = vmatpush.bf16.msrb.mxu3 %v11507_v38  ;;  %v11391_v38 = vor.u32 %v16141_v31, %v11390_v30  ;;  %v11583_v41 = vor.u32 %v16189_v35, %v11582_v34  ;;  %v16027_v61 = vld [vmem:[#allocation13 + $0xac] sm:$0xf0]  ;;  %v11126_v0 = vld [vmem:[#allocation13 + $0x218] sm:$0xf]  ;;  %v11343_v2 = vor.u32 %v16129_v56, %v11342_v55  ;;  %v10910_v4 = vld [vmem:[#allocation13 + $0x68] sm:$0xf] }
  0x6e   :  { %1477 = vmatpush.bf16.msrb.mxu0 %v10907_v44  ;;  %v11175_v44 = vor.u32 %v16087_v37, %v11174_v36  ;;  %v16075_v1 = vld [vmem:[#allocation13 + $0x22c] sm:$0xf0]  ;;  %v11318_v6 = vld [vmem:[#allocation13 + $0x398] sm:$0xf]  ;;  %v16021_v9 = vld [vmem:[#allocation13 + $0x7c] sm:$0xf0] }
  0x6f   :  { %1490 = vmatpush.bf16.msrb.mxu1 %v11099_v45  ;;  %v16033_v45 = vld [vmem:[#allocation13 + $0xdc] sm:$0xf0]  ;;  %v16123_v7 = vld [vmem:[#allocation13 + $0x3ac] sm:$0xf0]  ;;  %v11127_v8 = vor.u32 %v16075_v1, %v11126_v0  ;;  %v11102_v12 = vld [vmem:[#allocation13 + $0x1e8] sm:$0xf] }
  0x70   :  { %1503 = vmatpush.bf16.msrb.mxu2 %v11291_v46  ;;  %v11558_v46 = vld [vmem:[#allocation13 + $0x578] sm:$0xf]  ;;  %v10959_v51 = vor.u32 %v16033_v45, %v10958_v40  ;;  %v16171_v11 = vld [vmem:[#allocation13 + $0x52c] sm:$0xf0]  ;;  %v11294_v18 = vld [vmem:[#allocation13 + $0x368] sm:$0xf] }
  0x71   :  { %1516 = vmatpush.bf16.msrb.mxu3 %v11483_v50  ;;  %v11367_v50 = vor.u32 %v16135_v43, %v11366_v42  ;;  %v11559_v53 = vor.u32 %v16183_v47, %v11558_v46  ;;  %v16117_v19 = vld [vmem:[#allocation13 + $0x37c] sm:$0xf0]  ;;  %v16015_v21 = vld [vmem:[#allocation13 + $0x4c] sm:$0xf0]  ;;  %v11486_v22 = vld [vmem:[#allocation13 + $0x4e8] sm:$0xf] }
  0x72   :  { %1478 = vmatpush.bf16.msrb.mxu0 %v10883_v59  ;;  %v11151_v59 = vor.u32 %v16081_v49, %v11150_v48  ;;  %v16165_v23 = vld [vmem:[#allocation13 + $0x4fc] sm:$0xf0]  ;;  %v11078_v24 = vld [vmem:[#allocation13 + $0x1b8] sm:$0xf]  ;;  %v16063_v25 = vld [vmem:[#allocation13 + $0x1cc] sm:$0xf0] }
  0x73   :  { %1491 = vmatpush.bf16.msrb.mxu1 %v11075_v62  ;;  %v11534_v62 = vld [vmem:[#allocation13 + $0x548] sm:$0xf]  ;;  %v11487_v30 = vor.u32 %v16165_v23, %v11486_v22  ;;  %v11270_v31 = vld [vmem:[#allocation13 + $0x338] sm:$0xf]  ;;  %v11079_v33 = vor.u32 %v16063_v25, %v11078_v24  ;;  %v16159_v36 = vld [vmem:[#allocation13 + $0x4cc] sm:$0xf0] }
  0x74   :  { %1504 = vmatpush.bf16.msrb.mxu2 %v11267_v63  ;;  %v16177_v63 = vld [vmem:[#allocation13 + $0x55c] sm:$0xf0]  ;;  %v11054_v34 = vld [vmem:[#allocation13 + $0x188] sm:$0xf]  ;;  %v11462_v35 = vld [vmem:[#allocation13 + $0x4b8] sm:$0xf] }
  0x75   :  { %1517 = vmatpush.bf16.msrb.mxu3 %v11459_v3  ;;  %v10935_v3 = vor.u32 %v16027_v61, %v10934_v52  ;;  %v11535_v5 = vor.u32 %v16177_v63, %v11534_v62  ;;  %v16057_v37 = vld [vmem:[#allocation13 + $0x19c] sm:$0xf0]  ;;  %v16096_v40 = vld [vmem:[#allocation13 + $0x2dc] sm:$0xf]  ;;  %v11463_v45 = vor.u32 %v16159_v36, %v11462_v35  ;;  %v11246_v46 = vld [vmem:[#allocation13 + $0x308] sm:$0xf] }
  0x76   :  { %1479 = vmatpush.bf16.msrb.mxu0 %v10859_v10  ;;  %v11510_v10 = vld [vmem:[#allocation13 + $0x518] sm:$0xf]  ;;  %v16105_v47 = vld [vmem:[#allocation13 + $0x31c] sm:$0xf0]  ;;  %v16144_v48 = vld [vmem:[#allocation13 + $0x45c] sm:$0xf]  ;;  %v11055_v49 = vor.u32 %v16057_v37, %v11054_v34 }
  0x77   :  { %1492 = vmatpush.bf16.msrb.mxu1 %v11051_v13  ;;  %v16069_v13 = vld [vmem:[#allocation13 + $0x1fc] sm:$0xf0]  ;;  %v11511_v17 = vor.u32 %v16171_v11, %v11510_v10  ;;  %v11438_v52 = vld [vmem:[#allocation13 + $0x488] sm:$0xf]  ;;  %v11008_v56 = vld [vmem:[#allocation13 + $0x140] sm:$0xf0]  ;;  %v11247_v0 = vor.u32 %v16105_v47, %v11246_v46 }
  0x78   :  { %1505 = vmatpush.bf16.msrb.mxu2 %v11243_v14  ;;  %v11319_v14 = vor.u32 %v16123_v7, %v11318_v6  ;;  %v11608_v61 = vld [vmem:[#allocation13 + $0x5f0] sm:$0xf0]  ;;  %v16090_v62 = vld [vmem:[#allocation13 + $0x2ac] sm:$0xf]  ;;  %v11200_v63 = vld [vmem:[#allocation13 + $0x2c0] sm:$0xf0] }
  0x79   :  { %1518 = vmatpush.bf16.msrb.mxu3 %v11435_v15  ;;  %1480 = vmatmul.bf16.vlgmr.msrb.gmra.mxu0 %v17910_v57  ;;  %v10911_v15 = vor.u32 %v16021_v9, %v10910_v4  ;;  %v16036_v4 = vld [vmem:[#allocation13 + $0xfc] sm:$0xf]  ;;  %v16138_v6 = vld [vmem:[#allocation13 + $0x42c] sm:$0xf]  ;;  %v11392_v7 = vld [vmem:[#allocation13 + $0x440] sm:$0xf0] }
  0x7a   :  { %1524 = vmatpush.bf16.msra.mxu0 %v11031_v16  ;;  %1493 = vmatmul.bf16.vlgmr.msrb.gmra.mxu1 %v17914_v60  ;;  %v10886_v16 = vld [vmem:[#allocation13 + $0x38] sm:$0xf]  ;;  %v10984_v9 = vld [vmem:[#allocation13 + $0x110] sm:$0xf0]  ;;  %v16186_v10 = vld [vmem:[#allocation13 + $0x5ac] sm:$0xf] }
  0x7b   :  { %1537 = vmatpush.bf16.msra.mxu1 %v11223_v20  ;;  %1506 = vmatmul.bf16.vlgmr.msrb.gmra.mxu2 %v17908_v54  ;;  %v11103_v20 = vor.u32 %v16069_v13, %v11102_v12  ;;  %v10887_v28 = vor.u32 %v16015_v21, %v10886_v16  ;;  %v11584_v11 = vld [vmem:[#allocation13 + $0x5c0] sm:$0xf0]  ;;  %v16084_v12 = vld [vmem:[#allocation13 + $0x27c] sm:$0xf]  ;;  %v11176_v13 = vld [vmem:[#allocation13 + $0x290] sm:$0xf0] }
  0x7c   :  { %1519 = vmatmul.bf16.vlgmr.msrb.gmra.mxu3 %v17912_v58  ;;  %1550 = vmatpush.bf16.msra.mxu2 %v11415_v26  ;;  %v10862_v26 = vld [vmem:[#allocation13 + $0x8] sm:$0xf]  ;;  %v16030_v16 = vld [vmem:[#allocation13 + $0xcc] sm:$0xf]  ;;  %v10960_v21 = vld [vmem:[#allocation13 + $0xe0] sm:$0xf0] }
  0x7d   :  { %1563 = vmatpush.bf16.msra.mxu3 %v11607_v29  ;;  %v16009_v29 = vld [vmem:[#allocation13 + $0x1c] sm:$0xf0]  ;;  %v16180_v22 = vld [vmem:[#allocation13 + $0x57c] sm:$0xf]  ;;  %v11560_v23 = vld [vmem:[#allocation13 + $0x590] sm:$0xf0] }
  0x7e   :  { %1525 = vmatpush.bf16.msra.mxu0 %v11007_v27  ;;  %v11295_v27 = vor.u32 %v16117_v19, %v11294_v18  ;;  %v10863_v43 = vor.u32 %v16009_v29, %v10862_v26  ;;  %v16132_v18 = vld [vmem:[#allocation13 + $0x3fc] sm:$0xf]  ;;  %v11368_v19 = vld [vmem:[#allocation13 + $0x410] sm:$0xf0]  ;;  %v16078_v24 = vld [vmem:[#allocation13 + $0x24c] sm:$0xf]  ;;  %v11563_v29 = vor.u32 %v16180_v22, %v11560_v23 }
  0x7f   :  { %1538 = vmatpush.bf16.msra.mxu1 %v11199_v32  ;;  %v16111_v32 = vld [vmem:[#allocation13 + $0x34c] sm:$0xf0]  ;;  %v11152_v25 = vld [vmem:[#allocation13 + $0x260] sm:$0xf0]  ;;  %v11371_v26 = vor.u32 %v16132_v18, %v11368_v19  ;;  %v16174_v34 = vld [vmem:[#allocation13 + $0x54c] sm:$0xf] }
  0x80   :  { %1551 = vmatpush.bf16.msra.mxu2 %v11391_v38  ;;  %v16048_v38 = vld [vmem:[#allocation13 + $0x15c] sm:$0xf]  ;;  %v11271_v42 = vor.u32 %v16111_v32, %v11270_v31  ;;  %v11344_v31 = vld [vmem:[#allocation13 + $0x3e0] sm:$0xf0]  ;;  %v11155_v32 = vor.u32 %v16078_v24, %v11152_v25  ;;  %v11128_v37 = vld [vmem:[#allocation13 + $0x230] sm:$0xf0] }
  0x81   :  { %1564 = vmatpush.bf16.msra.mxu3 %v11583_v41  ;;  %v11224_v41 = vld [vmem:[#allocation13 + $0x2f0] sm:$0xf0]  ;;  %v11536_v35 = vld [vmem:[#allocation13 + $0x560] sm:$0xf0]  ;;  %v16072_v36 = vld [vmem:[#allocation13 + $0x21c] sm:$0xf] }
  0x82   :  { %1526 = vmatpush.bf16.msra.mxu0 %v10983_v39  ;;  %v11032_v39 = vld [vmem:[#allocation13 + $0x170] sm:$0xf0]  ;;  %v11227_v55 = vor.u32 %v16096_v40, %v11224_v41  ;;  %v16018_v40 = vld [vmem:[#allocation13 + $0x6c] sm:$0xf]  ;;  %v11539_v41 = vor.u32 %v16174_v34, %v11536_v35  ;;  %v16168_v46 = vld [vmem:[#allocation13 + $0x51c] sm:$0xf] }
  0x83   :  { %1539 = vmatpush.bf16.msra.mxu1 %v11175_v44  ;;  %v16042_v44 = vld [vmem:[#allocation13 + $0x12c] sm:$0xf]  ;;  %v11512_v47 = vld [vmem:[#allocation13 + $0x530] sm:$0xf0]  ;;  %v11248_v23 = vld [vmem:[#allocation13 + $0x320] sm:$0xf0] }
  0x84   :  { %1552 = vmatpush.bf16.msra.mxu2 %v11367_v50  ;;  %v11035_v50 = vor.u32 %v16048_v38, %v11032_v39  ;;  %v16102_v19 = vld [vmem:[#allocation13 + $0x30c] sm:$0xf]  ;;  %v11422_v24 = vld [vmem:[#allocation13 + $0x460] sm:$0xf]  ;;  %v11206_v34 = vld [vmem:[#allocation13 + $0x2b0] sm:$0xf] }
  0x85   :  { %1565 = vmatpush.bf16.msra.mxu3 %v11559_v53  ;;  %v16153_v53 = vld [vmem:[#allocation13 + $0x49c] sm:$0xf0]  ;;  %v16094_v35 = vld [vmem:[#allocation13 + $0x2c4] sm:$0xf0]  ;;  %vm1745_vm0 = vcmask 1044480   ;;  %vm1735_vm1 = vcmask 39936  }
  0x86   :  { %1527 = vmatpush.bf16.msra.mxu0 %v10959_v51  ;;  %v11416_v51 = vld [vmem:[#allocation13 + $0x470] sm:$0xf0]  ;;  %vm1987_vm3 = vcmask 523264   ;;  %vm2130_vm12 = vcmask 162816   ;;  %vm2137_vm13 = vcmask 158720   ;;  %vm2180_vm14 = vcmask 1041408  }
  0x87   :  { %1540 = vmatpush.bf16.msra.mxu1 %v11151_v59  ;;  %v16192_v59 = vld [vmem:[#allocation13 + $0x5dc] sm:$0xf]  ;;  %v11419_v1 = vor.u32 %v16144_v48, %v11416_v51  ;;  %v16066_v48 = vld [vmem:[#allocation13 + $0x1ec] sm:$0xf]  ;;  %vm2210_vm15 = vcmask 36864   ;;  %s17780_s0 = smov 123  }
  0x88   :  { %1553 = vmatpush.bf16.msra.mxu2 %v11343_v2  ;;  %v11439_v2 = vor.u32 %v16153_v53, %v11438_v52  ;;  %v16012_v52 = vld [vmem:[#allocation13 + $0x3c] sm:$0xf]  ;;  %v11515_v53 = vor.u32 %v16168_v46, %v11512_v47  ;;  %v11590_v46 = vld [vmem:[#allocation13 + $0x5b0] sm:$0xf]  ;;  %v16190_v47 = vld [vmem:[#allocation13 + $0x5c4] sm:$0xf0] }
  0x89   :  { %1566 = vmatpush.bf16.msra.mxu3 %v11535_v5  ;;  %v11611_v5 = vor.u32 %v16192_v59, %v11608_v61  ;;  %v10888_v61 = vld [vmem:[#allocation13 + $0x50] sm:$0xf0]  ;;  %s17781_s17 = smov 118   ;;  %s17782_s8 = smov 113  }
  0x8a   :  { %1528 = vmatpush.bf16.msra.mxu0 %v10935_v3  ;;  %v11011_v3 = vor.u32 %v16042_v44, %v11008_v56  ;;  %v11131_v44 = vor.u32 %v16072_v36, %v11128_v37  ;;  %v11296_v56 = vld [vmem:[#allocation13 + $0x380] sm:$0xf0]  ;;  %v11251_v36 = vor.u32 %v16102_v19, %v11248_v23  ;;  %v16124_v19 = vld [vmem:[#allocation13 + $0x3b4] sm:$0xf0]  ;;  %s226_s22 = sshll.u32 %s18456_s9, 4  ;;  %s17784_s7 = smov [#allocation5]   ;;  %s227_s22 = int_to_ptr.hbm [resolvable:$true] %s226_s22 }
  0x8b   :  { %1541 = vmatpush.bf16.msra.mxu1 %v11127_v8  ;;  %v11203_v8 = vor.u32 %v16090_v62, %v11200_v63  ;;  %v16162_v62 = vld [vmem:[#allocation13 + $0x4ec] sm:$0xf]  ;;  %v11488_v63 = vld [vmem:[#allocation13 + $0x500] sm:$0xf0]  ;;  %v16172_v23 = vld [vmem:[#allocation13 + $0x534] sm:$0xf0] }
  0x8c   :  { %1554 = vmatpush.bf16.msra.mxu2 %v11319_v14  ;;  %v11395_v14 = vor.u32 %v16138_v6, %v11392_v7  ;;  %v10864_v6 = vld [vmem:[#allocation13 + $0x20] sm:$0xf0]  ;;  %v11491_v7 = vor.u32 %v16162_v62, %v11488_v63  ;;  %v11566_v62 = vld [vmem:[#allocation13 + $0x580] sm:$0xf]  ;;  %v16184_v63 = vld [vmem:[#allocation13 + $0x594] sm:$0xf0] }
  0x8d   :  { %1567 = vmatpush.bf16.msra.mxu3 %v11511_v17  ;;  %v11587_v17 = vor.u32 %v16186_v10, %v11584_v11  ;;  %v16054_v10 = vld [vmem:[#allocation13 + $0x18c] sm:$0xf]  ;;  %v16156_v11 = vld [vmem:[#allocation13 + $0x4bc] sm:$0xf]  ;;  %s228_s24 = sshll.u32 %s17784_s7, 4  ;;  %s240_s23 = sshll.u32 %s18458_s11, 4  ;;  %s229_s24 = int_to_ptr.vmem [resolvable:$true] %s228_s24  ;;  %s241_s23 = int_to_ptr.hbm [resolvable:$true] %s240_s23 }
  0x8e   :  { %1529 = vmatpush.bf16.msra.mxu0 %v10911_v15  ;;  %v10987_v15 = vor.u32 %v16036_v4, %v10984_v9  ;;  %v10891_v4 = vor.u32 %v16012_v52, %v10888_v61  ;;  %v10966_v52 = vld [vmem:[#allocation13 + $0xd0] sm:$0xf]  ;;  %v16034_v61 = vld [vmem:[#allocation13 + $0xe4] sm:$0xf0]  ;;  %231 = dma.hbm_to_vmem [thread:$0]  %s227_s22, 65536, %s229_s24, [#allocation7] }
  0x8f   :  { %1542 = vmatpush.bf16.msra.mxu1 %v11103_v20  ;;  %v11179_v20 = vor.u32 %v16084_v12, %v11176_v13  ;;  %v11464_v12 = vld [vmem:[#allocation13 + $0x4d0] sm:$0xf0]  ;;  %v11056_v13 = vld [vmem:[#allocation13 + $0x1a0] sm:$0xf0]  ;;  %s17785_s10 = smov [#allocation6]  }
  0x90   :  { %1555 = vmatpush.bf16.msra.mxu2 %v11295_v27  ;;  %v10963_v27 = vor.u32 %v16030_v16, %v10960_v21  ;;  %v11230_v16 = vld [vmem:[#allocation13 + $0x2e0] sm:$0xf]  ;;  %v11014_v21 = vld [vmem:[#allocation13 + $0x130] sm:$0xf]  ;;  %v11467_v22 = vor.u32 %v16156_v11, %v11464_v12  ;;  %v11059_v25 = vor.u32 %v16054_v10, %v11056_v13  ;;  %v16178_v11 = vld [vmem:[#allocation13 + $0x564] sm:$0xf0] }
  0x91   :  { %1568 = vmatpush.bf16.msra.mxu3 %v11487_v30  ;;  %v16126_v30 = vld [vmem:[#allocation13 + $0x3cc] sm:$0xf]  ;;  %v11542_v10 = vld [vmem:[#allocation13 + $0x550] sm:$0xf]  ;;  %v11134_v12 = vld [vmem:[#allocation13 + $0x220] sm:$0xf] }
  0x92   :  { %1530 = vmatpush.bf16.msra.mxu0 %v10887_v28  ;;  %v16024_v28 = vld [vmem:[#allocation13 + $0x9c] sm:$0xf]  ;;  %v11347_v38 = vor.u32 %v16126_v30, %v11344_v31  ;;  %v16046_v31 = vld [vmem:[#allocation13 + $0x144] sm:$0xf0]  ;;  %v16076_v13 = vld [vmem:[#allocation13 + $0x234] sm:$0xf0] }
  0x93   :  { %1543 = vmatpush.bf16.msra.mxu1 %v11079_v33  ;;  %v10936_v33 = vld [vmem:[#allocation13 + $0xb0] sm:$0xf0]  ;;  %s242_s25 = sshll.u32 %s17785_s10, 4  ;;  %s243_s25 = int_to_ptr.vmem [resolvable:$true] %s242_s25 }
  0x94   :  { %1556 = vmatpush.bf16.msra.mxu2 %v11271_v42  ;;  %v10939_v39 = vor.u32 %v16024_v28, %v10936_v33  ;;  %v16120_v42 = vld [vmem:[#allocation13 + $0x39c] sm:$0xf]  ;;  %v16150_v28 = vld [vmem:[#allocation13 + $0x48c] sm:$0xf]  ;;  %v16196_v33 = vld [vmem:[#allocation13 + $0x5f4] sm:$0xf0] }
  0x95   :  { %1569 = vmatpush.bf16.msra.mxu3 %v11463_v45  ;;  %v10912_v45 = vld [vmem:[#allocation13 + $0x80] sm:$0xf0]  ;;  %245 = dma.hbm_to_vmem [thread:$0]  %s241_s23, 65536, %s243_s25, [#allocation7 + $0x1] }
  0x96   :  { %1531 = vmatpush.bf16.msra.mxu0 %v10863_v43  ;;  %v11320_v43 = vld [vmem:[#allocation13 + $0x3b0] sm:$0xf0]  ;;  %v10915_v51 = vor.u32 %v16018_v40, %v10912_v45  ;;  %v10990_v40 = vld [vmem:[#allocation13 + $0x100] sm:$0xf]  ;;  %v16040_v45 = vld [vmem:[#allocation13 + $0x114] sm:$0xf0] }
  0x97   :  { %1544 = vmatpush.bf16.msra.mxu1 %v11055_v49  ;;  %v11104_v49 = vld [vmem:[#allocation13 + $0x200] sm:$0xf0] }
  0x98   :  { %1557 = vmatpush.bf16.msra.mxu2 %v11247_v0  ;;  %v11107_v59 = vor.u32 %v16066_v48, %v11104_v49  ;;  %v16060_v0 = vld [vmem:[#allocation13 + $0x1bc] sm:$0xf]  ;;  %v11182_v48 = vld [vmem:[#allocation13 + $0x280] sm:$0xf]  ;;  %v16088_v49 = vld [vmem:[#allocation13 + $0x294] sm:$0xf0] }
  0x99   :  { %1532 = vmatmul.bf16.vlgmr.msra.gmra.mxu0 %v17910_v57  ;;  %1570 = vmatpush.bf16.msra.mxu3 %v11439_v2 }
  0x9a   :  { %1576 = vmatpush.bf16.msrb.mxu0 %v11035_v50  ;;  %1545 = vmatmul.bf16.vlgmr.msra.gmra.mxu1 %v17914_v60  ;;  %v11323_v50 = vor.u32 %v16120_v42, %v11320_v43  ;;  %v11398_v42 = vld [vmem:[#allocation13 + $0x430] sm:$0xf]  ;;  %v16142_v43 = vld [vmem:[#allocation13 + $0x444] sm:$0xf0] }
  0x9b   :  { %1589 = vmatpush.bf16.msrb.mxu1 %v11227_v55  ;;  %1558 = vmatmul.bf16.vlgmr.msra.gmra.mxu2 %v17908_v54  ;;  %v16114_v55 = vld [vmem:[#allocation13 + $0x36c] sm:$0xf] }
  0x9c   :  { %1602 = vmatpush.bf16.msrb.mxu2 %v11419_v1  ;;  %1571 = vmatmul.bf16.vlgmr.msra.gmra.mxu3 %v17912_v58  ;;  %v11080_v1 = vld [vmem:[#allocation13 + $0x1d0] sm:$0xf0]  ;;  %v11299_v2 = vor.u32 %v16114_v55, %v11296_v56  ;;  %v11374_v55 = vld [vmem:[#allocation13 + $0x400] sm:$0xf]  ;;  %v16136_v56 = vld [vmem:[#allocation13 + $0x414] sm:$0xf0] }
  0x9d   :  { %1615 = vmatpush.bf16.msrb.mxu3 %v11611_v5  ;;  %v16006_v5 = vld [vmem:[#allocation13 + $0xc] sm:$0xf]  ;;  %v11083_v9 = vor.u32 %v16060_v0, %v11080_v1  ;;  %v11158_v0 = vld [vmem:[#allocation13 + $0x250] sm:$0xf]  ;;  %v16082_v1 = vld [vmem:[#allocation13 + $0x264] sm:$0xf0] }
  0x9e   :  { %1577 = vmatpush.bf16.msrb.mxu0 %v11011_v3  ;;  %v16108_v3 = vld [vmem:[#allocation13 + $0x33c] sm:$0xf] }
  0x9f   :  { %1590 = vmatpush.bf16.msrb.mxu1 %v11203_v8  ;;  %v11272_v8 = vld [vmem:[#allocation13 + $0x350] sm:$0xf0] }
  0xa0   :  { %1603 = vmatpush.bf16.msrb.mxu2 %v11395_v14  ;;  %v11038_v14 = vld [vmem:[#allocation13 + $0x160] sm:$0xf]  ;;  %v11275_v18 = vor.u32 %v16108_v3, %v11272_v8  ;;  %v10967_v3 = vor.u32 %v16034_v61, %v10966_v52  ;;  %v11159_v8 = vor.u32 %v16082_v1, %v11158_v0  ;;  %v16097_v52 = vld [vmem:[#allocation13 + $0x2e4] sm:$0xf]  ;;  %v16043_v61 = vld [vmem:[#allocation13 + $0x134] sm:$0xf] }
  0xa1   :  { %1616 = vmatpush.bf16.msrb.mxu3 %v11587_v17  ;;  %v16100_v17 = vld [vmem:[#allocation13 + $0x2f4] sm:$0xf0]  ;;  %v16145_v0 = vld [vmem:[#allocation13 + $0x464] sm:$0xf] }
  0xa2   :  { %1578 = vmatpush.bf16.msrb.mxu0 %v10987_v15  ;;  %v16052_v15 = vld [vmem:[#allocation13 + $0x174] sm:$0xf0]  ;;  %v11231_v30 = vor.u32 %v16100_v17, %v11230_v16  ;;  %v10918_v16 = vld [vmem:[#allocation13 + $0x70] sm:$0xf]  ;;  %v11543_v17 = vor.u32 %v16178_v11, %v11542_v10  ;;  %v16091_v10 = vld [vmem:[#allocation13 + $0x2b4] sm:$0xf] }
  0xa3   :  { %1591 = vmatpush.bf16.msrb.mxu1 %v11179_v20  ;;  %v10867_v20 = vor.u32 %v16006_v5, %v10864_v6  ;;  %v11567_v5 = vor.u32 %v16184_v63, %v11566_v62  ;;  %v11350_v6 = vld [vmem:[#allocation13 + $0x3d0] sm:$0xf]  ;;  %v16106_v63 = vld [vmem:[#allocation13 + $0x324] sm:$0xf0]  ;;  %v11208_v11 = vld [vmem:[#allocation13 + $0x2c8] sm:$0xf0] }
  0xa4   :  { %1604 = vmatpush.bf16.msrb.mxu2 %v11371_v26  ;;  %v11039_v26 = vor.u32 %v16052_v15, %v11038_v14 }
  0xa5   :  { %1617 = vmatpush.bf16.msrb.mxu3 %v11563_v29  ;;  %v11440_v29 = vld [vmem:[#allocation13 + $0x4a0] sm:$0xf0] }
  0xa6   :  { %1579 = vmatpush.bf16.msrb.mxu0 %v10963_v27  ;;  %v16148_v27 = vld [vmem:[#allocation13 + $0x474] sm:$0xf0] }
  0xa7   :  { %1592 = vmatpush.bf16.msrb.mxu1 %v11155_v32  ;;  %v11614_v32 = vld [vmem:[#allocation13 + $0x5e0] sm:$0xf]  ;;  %v11423_v37 = vor.u32 %v16148_v27, %v11422_v24  ;;  %v11110_v24 = vld [vmem:[#allocation13 + $0x1f0] sm:$0xf] }
  0xa8   :  { %1605 = vmatpush.bf16.msrb.mxu2 %v11347_v38  ;;  %v11443_v38 = vor.u32 %v16150_v28, %v11440_v29  ;;  %v10894_v28 = vld [vmem:[#allocation13 + $0x40] sm:$0xf] }
  0xa9   :  { %1618 = vmatpush.bf16.msrb.mxu3 %v11539_v41  ;;  %v11615_v41 = vor.u32 %v16196_v33, %v11614_v32  ;;  %v16016_v33 = vld [vmem:[#allocation13 + $0x54] sm:$0xf0] }
  0xaa   :  { %1580 = vmatpush.bf16.msrb.mxu0 %v10939_v39  ;;  %v11015_v39 = vor.u32 %v16046_v31, %v11014_v21  ;;  %v16022_v21 = vld [vmem:[#allocation13 + $0x84] sm:$0xf0] }
  0xab   :  { %1593 = vmatpush.bf16.msrb.mxu1 %v11131_v44  ;;  %v11207_v44 = vor.u32 %v16094_v35, %v11206_v34  ;;  %v10919_v27 = vor.u32 %v16022_v21, %v10918_v16  ;;  %v16118_v31 = vld [vmem:[#allocation13 + $0x384] sm:$0xf0]  ;;  %v11494_v34 = vld [vmem:[#allocation13 + $0x4f0] sm:$0xf]  ;;  %v16037_v16 = vld [vmem:[#allocation13 + $0x104] sm:$0xf] }
  0xac   :  { %1606 = vmatpush.bf16.msrb.mxu2 %v11323_v50  ;;  %v11399_v50 = vor.u32 %v16142_v43, %v11398_v42  ;;  %v16166_v35 = vld [vmem:[#allocation13 + $0x504] sm:$0xf0]  ;;  %v10992_v21 = vld [vmem:[#allocation13 + $0x118] sm:$0xf0] }
  0xad   :  { %1619 = vmatpush.bf16.msrb.mxu3 %v11515_v53  ;;  %v11591_v53 = vor.u32 %v16190_v47, %v11590_v46  ;;  %v16010_v42 = vld [vmem:[#allocation13 + $0x24] sm:$0xf0]  ;;  %v11495_v43 = vor.u32 %v16166_v35, %v11494_v34  ;;  %v11062_v46 = vld [vmem:[#allocation13 + $0x190] sm:$0xf]  ;;  %v11470_v47 = vld [vmem:[#allocation13 + $0x4c0] sm:$0xf] }
  0xae   :  { %1581 = vmatpush.bf16.msrb.mxu0 %v10915_v51  ;;  %v10991_v51 = vor.u32 %v16040_v45, %v10990_v40  ;;  %v10895_v40 = vor.u32 %v16016_v33, %v10894_v28  ;;  %v10995_v28 = vor.u32 %v16037_v16, %v10992_v21  ;;  %v17933_v34 = vld [vmem:[#allocation14] sm:$0x3f]  ;;  %v11088_v21 = vld [vmem:[#allocation13 + $0x1d8] sm:$0xf0] }
  0xaf   :  { %1594 = vmatpush.bf16.msrb.mxu1 %v11107_v59  ;;  %v11183_v59 = vor.u32 %v16088_v49, %v11182_v48  ;;  %v16160_v48 = vld [vmem:[#allocation13 + $0x4d4] sm:$0xf0]  ;;  %v16058_v49 = vld [vmem:[#allocation13 + $0x1a4] sm:$0xf0]  ;;  %v16181_v35 = vld [vmem:[#allocation13 + $0x584] sm:$0xf] }
  0xb0   :  { %1607 = vmatpush.bf16.msrb.mxu2 %v11299_v2  ;;  %v11375_v2 = vor.u32 %v16136_v56, %v11374_v55  ;;  %v11254_v56 = vld [vmem:[#allocation13 + $0x310] sm:$0xf]  ;;  %v11471_v62 = vor.u32 %v16160_v48, %v11470_v47  ;;  %v11063_v1 = vor.u32 %v16058_v49, %v11062_v46  ;;  %v10944_v47 = vld [vmem:[#allocation13 + $0xb8] sm:$0xf0]  ;;  %v16175_v48 = vld [vmem:[#allocation13 + $0x554] sm:$0xf] }
  0xb1   :  { %1620 = vmatpush.bf16.msrb.mxu3 %v11491_v7  ;;  %v16130_v7 = vld [vmem:[#allocation13 + $0x3e4] sm:$0xf0]  ;;  %v11544_v49 = vld [vmem:[#allocation13 + $0x568] sm:$0xf0] }
  0xb2   :  { %1582 = vmatpush.bf16.msrb.mxu0 %v10891_v4  ;;  %v10942_v4 = vld [vmem:[#allocation13 + $0xa0] sm:$0xf]  ;;  %v11351_v14 = vor.u32 %v16130_v7, %v11350_v6  ;;  %v11016_v7 = vld [vmem:[#allocation13 + $0x148] sm:$0xf0] }
  0xb3   :  { %1595 = vmatpush.bf16.msrb.mxu1 %v11083_v9  ;;  %v16028_v9 = vld [vmem:[#allocation13 + $0xb4] sm:$0xf0] }
  0xb4   :  { %1608 = vmatpush.bf16.msrb.mxu2 %v11275_v18  ;;  %v10943_v15 = vor.u32 %v16028_v9, %v10942_v4  ;;  %v11326_v18 = vld [vmem:[#allocation13 + $0x3a0] sm:$0xf]  ;;  %v11446_v4 = vld [vmem:[#allocation13 + $0x490] sm:$0xf]  ;;  %v11616_v9 = vld [vmem:[#allocation13 + $0x5f8] sm:$0xf0] }
  0xb5   :  { %1621 = vmatpush.bf16.msrb.mxu3 %v11467_v22  ;;  %v11518_v22 = vld [vmem:[#allocation13 + $0x520] sm:$0xf] }
  0xb6   :  { %1583 = vmatpush.bf16.msrb.mxu0 %v10867_v20  ;;  %v11135_v20 = vor.u32 %v16076_v13, %v11134_v12  ;;  %v11519_v29 = vor.u32 %v16172_v23, %v11518_v22  ;;  %v11255_v12 = vor.u32 %v16106_v63, %v11254_v56  ;;  %v16187_v22 = vld [vmem:[#allocation13 + $0x5b4] sm:$0xf]  ;;  %v11592_v23 = vld [vmem:[#allocation13 + $0x5c8] sm:$0xf0]  ;;  %v16169_v63 = vld [vmem:[#allocation13 + $0x524] sm:$0xf] }
  0xb7   :  { %1596 = vmatpush.bf16.msrb.mxu1 %v11059_v25  ;;  %v16070_v25 = vld [vmem:[#allocation13 + $0x204] sm:$0xf0] }
  0xb8   :  { %1609 = vmatpush.bf16.msrb.mxu2 %v11251_v36  ;;  %v11111_v32 = vor.u32 %v16070_v25, %v11110_v24  ;;  %v11086_v36 = vld [vmem:[#allocation13 + $0x1c0] sm:$0xf]  ;;  %v16085_v24 = vld [vmem:[#allocation13 + $0x284] sm:$0xf]  ;;  %v11184_v25 = vld [vmem:[#allocation13 + $0x298] sm:$0xf0] }
  0xb9   :  { %1584 = vmatmul.bf16.vlgmr.msrb.gmra.mxu0 %v17910_v57  ;;  %1622 = vmatpush.bf16.msrb.mxu3 %v11443_v38  ;;  %v11187_v33 = vor.u32 %v16085_v24, %v11184_v25 }
  0xba   :  { %1628 = vmatpush.bf16.msra.mxu0 %v11039_v26  ;;  %1597 = vmatmul.bf16.vlgmr.msrb.gmra.mxu1 %v17914_v60  ;;  %v11327_v26 = vor.u32 %v16124_v19, %v11326_v18  ;;  %v16139_v18 = vld [vmem:[#allocation13 + $0x434] sm:$0xf]  ;;  %v11400_v19 = vld [vmem:[#allocation13 + $0x448] sm:$0xf0] }
  0xbb   :  { %1641 = vmatpush.bf16.msra.mxu1 %v11231_v30  ;;  %1610 = vmatmul.bf16.vlgmr.msrb.gmra.mxu2 %v17908_v54  ;;  %v11302_v30 = vld [vmem:[#allocation13 + $0x370] sm:$0xf] }
  0xbc   :  { %1654 = vmatpush.bf16.msra.mxu2 %v11423_v37  ;;  %1623 = vmatmul.bf16.vlgmr.msrb.gmra.mxu3 %v17912_v58  ;;  %v16064_v37 = vld [vmem:[#allocation13 + $0x1d4] sm:$0xf0]  ;;  %v11303_v38 = vor.u32 %v16118_v31, %v11302_v30  ;;  %v10968_v30 = vld [vmem:[#allocation13 + $0xe8] sm:$0xf0]  ;;  %v11595_v31 = vor.u32 %v16187_v22, %v11592_v23 }
  0xbd   :  { %1667 = vmatpush.bf16.msra.mxu3 %v11615_v41  ;;  %v10870_v41 = vld [vmem:[#allocation13 + $0x10] sm:$0xf]  ;;  %v11087_v45 = vor.u32 %v16064_v37, %v11086_v36  ;;  %v11568_v36 = vld [vmem:[#allocation13 + $0x598] sm:$0xf0]  ;;  %v16079_v37 = vld [vmem:[#allocation13 + $0x254] sm:$0xf] }
  0xbe   :  { %1629 = vmatpush.bf16.msra.mxu0 %v11015_v39  ;;  %v11278_v39 = vld [vmem:[#allocation13 + $0x340] sm:$0xf] }
  0xbf   :  { %1642 = vmatpush.bf16.msra.mxu1 %v11207_v44  ;;  %v16112_v44 = vld [vmem:[#allocation13 + $0x354] sm:$0xf0] }
  0xc0   :  { %1655 = vmatpush.bf16.msra.mxu2 %v11399_v50  ;;  %v16049_v50 = vld [vmem:[#allocation13 + $0x164] sm:$0xf]  ;;  %v11279_v55 = vor.u32 %v16112_v44, %v11278_v39  ;;  %v11571_v44 = vor.u32 %v16181_v35, %v11568_v36  ;;  %v11472_v35 = vld [vmem:[#allocation13 + $0x4d8] sm:$0xf0]  ;;  %v16055_v36 = vld [vmem:[#allocation13 + $0x194] sm:$0xf] }
  0xc1   :  { %1668 = vmatpush.bf16.msra.mxu3 %v11591_v53  ;;  %v11232_v53 = vld [vmem:[#allocation13 + $0x2f8] sm:$0xf0] }
  0xc2   :  { %1630 = vmatpush.bf16.msra.mxu0 %v10991_v51  ;;  %v11040_v51 = vld [vmem:[#allocation13 + $0x178] sm:$0xf0]  ;;  %v11235_v6 = vor.u32 %v16097_v52, %v11232_v53 }
  0xc3   :  { %1643 = vmatpush.bf16.msra.mxu1 %v11183_v59  ;;  %v10871_v59 = vor.u32 %v16010_v42, %v10870_v41  ;;  %v448_v42 = vperm.slane %v17933_v34, 0 }
  0xc4   :  { %1656 = vmatpush.bf16.msra.mxu2 %v11375_v2  ;;  %v11043_v2 = vor.u32 %v16049_v50, %v11040_v51  ;;  %v16073_v50 = vld [vmem:[#allocation13 + $0x224] sm:$0xf]  ;;  %v11136_v51 = vld [vmem:[#allocation13 + $0x238] sm:$0xf0] }
  0xc5   :  { %1669 = vmatpush.bf16.msra.mxu3 %v11567_v5  ;;  %v16154_v5 = vld [vmem:[#allocation13 + $0x4a4] sm:$0xf0] }
  0xc6   :  { %1631 = vmatpush.bf16.msra.mxu0 %v10967_v3  ;;  %v11424_v3 = vld [vmem:[#allocation13 + $0x478] sm:$0xf0] }
  0xc7   :  { %1644 = vmatpush.bf16.msra.mxu1 %v11159_v8  ;;  %v16193_v8 = vld [vmem:[#allocation13 + $0x5e4] sm:$0xf]  ;;  %v11427_v13 = vor.u32 %v16145_v0, %v11424_v3  ;;  %v10920_v3 = vld [vmem:[#allocation13 + $0x88] sm:$0xf0] }
  0xc8   :  { %1657 = vmatpush.bf16.msra.mxu2 %v11351_v14  ;;  %v11447_v14 = vor.u32 %v16154_v5, %v11446_v4  ;;  %v11520_v4 = vld [vmem:[#allocation13 + $0x538] sm:$0xf0]  ;;  %v16067_v5 = vld [vmem:[#allocation13 + $0x1f4] sm:$0xf] }
  0xc9   :  { %1670 = vmatpush.bf16.msra.mxu3 %v11543_v17  ;;  %v11619_v17 = vor.u32 %v16193_v8, %v11616_v9 }
  0xca   :  { %1632 = vmatpush.bf16.msra.mxu0 %v10943_v15  ;;  %v11019_v15 = vor.u32 %v16043_v61, %v11016_v7  ;;  %v16121_v61 = vld [vmem:[#allocation13 + $0x3a4] sm:$0xf] }
  0xcb   :  { %1645 = vmatpush.bf16.msra.mxu1 %v11135_v20  ;;  %v11211_v20 = vor.u32 %v16091_v10, %v11208_v11  ;;  %v16013_v10 = vld [vmem:[#allocation13 + $0x44] sm:$0xf]  ;;  %v11523_v11 = vor.u32 %v16169_v63, %v11520_v4  ;;  %v17958_v63 = vld [vmem:[%s18449_s2 + $0x8] sm:$0xff] }
  0xcc   :  { %1658 = vmatpush.bf16.msra.mxu2 %v11327_v26  ;;  %v11403_v26 = vor.u32 %v16139_v18, %v11400_v19  ;;  %v16163_v18 = vld [vmem:[#allocation13 + $0x4f4] sm:$0xf]  ;;  %v11496_v19 = vld [vmem:[#allocation13 + $0x508] sm:$0xf0] }
  0xcd   :  { %1671 = vmatpush.bf16.msra.mxu3 %v11519_v29  ;;  %v16031_v29 = vld [vmem:[#allocation13 + $0xd4] sm:$0xf] }
  0xce   :  { %1633 = vmatpush.bf16.msra.mxu0 %v10919_v27  ;;  %v16133_v27 = vld [vmem:[#allocation13 + $0x404] sm:$0xf]  ;;  %v10971_v41 = vor.u32 %v16031_v29, %v10968_v30  ;;  %v11280_v29 = vld [vmem:[#allocation13 + $0x358] sm:$0xf0] }
  0xcf   :  { %1646 = vmatpush.bf16.msra.mxu1 %v11111_v32  ;;  %v11376_v32 = vld [vmem:[#allocation13 + $0x418] sm:$0xf0] }
  0xd0   :  { %1659 = vmatpush.bf16.msra.mxu2 %v11303_v38  ;;  %v11160_v38 = vld [vmem:[#allocation13 + $0x268] sm:$0xf0]  ;;  %v11379_v39 = vor.u32 %v16133_v27, %v11376_v32  ;;  %v11499_v27 = vor.u32 %v16163_v18, %v11496_v19 }
  0xd1   :  { %1672 = vmatpush.bf16.msra.mxu3 %v11495_v43  ;;  %v16025_v43 = vld [vmem:[#allocation13 + $0xa4] sm:$0xf]  ;;  %v11163_v46 = vor.u32 %v16079_v37, %v11160_v38  ;;  %v10872_v32 = vld [vmem:[#allocation13 + $0x28] sm:$0xf0] }
  0xd2   :  { %1634 = vmatpush.bf16.msra.mxu0 %v10895_v40  ;;  %v16127_v40 = vld [vmem:[#allocation13 + $0x3d4] sm:$0xf]  ;;  %v10947_v56 = vor.u32 %v16025_v43, %v10944_v47  ;;  %v11064_v37 = vld [vmem:[#allocation13 + $0x1a8] sm:$0xf0] }
  0xd3   :  { %1647 = vmatpush.bf16.msra.mxu1 %v11087_v45  ;;  %v11352_v45 = vld [vmem:[#allocation13 + $0x3e8] sm:$0xf0]  ;;  %v16151_v47 = vld [vmem:[#allocation13 + $0x494] sm:$0xf] }
  0xd4   :  { %1660 = vmatpush.bf16.msra.mxu2 %v11279_v55  ;;  %v11355_v53 = vor.u32 %v16127_v40, %v11352_v45  ;;  %v11256_v43 = vld [vmem:[#allocation13 + $0x328] sm:$0xf0] }
  0xd5   :  { %1673 = vmatpush.bf16.msra.mxu3 %v11471_v62  ;;  %v11328_v62 = vld [vmem:[#allocation13 + $0x3b8] sm:$0xf0] }
  0xd6   :  { %1635 = vmatpush.bf16.msra.mxu0 %v10871_v59  ;;  %v1429_v52 = vpop.f32.mrf.mxu0  ;;  %v11547_v59 = vor.u32 %v16175_v48, %v11544_v49  ;;  %v11331_v7 = vor.u32 %v16121_v61, %v11328_v62  ;;  %v11448_v48 = vld [vmem:[#allocation13 + $0x4a8] sm:$0xf0] }
  0xd7   :  { %1648 = vmatpush.bf16.msra.mxu1 %v11063_v1  ;;  %v1442_v55 = vpop.f32.mrf.mxu1  ;;  %v1430_v0 = vadd.f32 %v1429_v52, %v448_v42  ;;  %v11139_v1 = vor.u32 %v16073_v50, %v11136_v51  ;;  %v16103_v42 = vld [vmem:[#allocation13 + $0x314] sm:$0xf]  ;;  %v11451_v50 = vor.u32 %v16151_v47, %v11448_v48  ;;  %v449_v51 = vperm.slane %v17933_v34, 1 }
  0xd8   :  { %1661 = vmatpush.bf16.msra.mxu2 %v11255_v12  ;;  %v16115_v12 = vld [vmem:[#allocation13 + $0x374] sm:$0xf]  ;;  %v11259_v49 = vor.u32 %v16103_v42, %v11256_v43  ;;  %v453_v43 = vperm.slane %v17933_v34, 5 }
  0xd9   :  { %1636 = vmatmul.bf16.vlgmr.msra.gmra.mxu0 %v17910_v57  ;;  %1674 = vmatpush.bf16.msra.mxu3 %v11447_v14  ;;  %v1443_v14 = vadd.f32 %v1442_v55, %v1430_v0 }
  0xda   :  { %1680 = vmatpush.bf16.msrb.mxu0 %v11043_v2  ;;  %1649 = vmatmul.bf16.vlgmr.msra.gmra.mxu1 %v17914_v60  ;;  %v16019_v2 = vld [vmem:[#allocation13 + $0x74] sm:$0xf] }
  0xdb   :  { %1693 = vmatpush.bf16.msrb.mxu1 %v11235_v6  ;;  %1662 = vmatmul.bf16.vlgmr.msra.gmra.mxu2 %v17908_v54  ;;  %v11112_v6 = vld [vmem:[#allocation13 + $0x208] sm:$0xf0]  ;;  %v10923_v9 = vor.u32 %v16019_v2, %v10920_v3  ;;  %v17967_v2 = vld [vmem:[%s18449_s2 + $0x10] sm:$0xf]  ;;  %v450_v3 = vperm.slane %v17933_v34, 2 }
  0xdc   :  { %1706 = vmatpush.bf16.msrb.mxu2 %v11427_v13  ;;  %1675 = vmatmul.bf16.vlgmr.msra.gmra.mxu3 %v17912_v58  ;;  %v11304_v13 = vld [vmem:[#allocation13 + $0x388] sm:$0xf0]  ;;  %v11115_v16 = vor.u32 %v16067_v5, %v11112_v6 }
  0xdd   :  { %1719 = vmatpush.bf16.msrb.mxu3 %v11619_v17  ;;  %v10896_v17 = vld [vmem:[#allocation13 + $0x58] sm:$0xf0]  ;;  %v11307_v23 = vor.u32 %v16115_v12, %v11304_v13 }
  0xde   :  { %1681 = vmatpush.bf16.msrb.mxu0 %v11019_v15  ;;  %v1455_v8 = vpop.f32.mrf.mxu2  ;;  %v1431_v22 = vpop.f32.mrf.mxu0  ;;  %v10899_v25 = vor.u32 %v16013_v10, %v10896_v17 }
  0xdf   :  { %1694 = vmatpush.bf16.msrb.mxu1 %v11211_v20  ;;  %v1468_v15 = vpop.f32.mrf.mxu3  ;;  %v16061_v20 = vld [vmem:[#allocation13 + $0x1c4] sm:$0xf]  ;;  %v1444_v24 = vpop.f32.mrf.mxu1  ;;  %v1456_v30 = vadd.f32 %v1455_v8, %v1443_v14 }
  0xe0   :  { %1707 = vmatpush.bf16.msrb.mxu2 %v11403_v26  ;;  %v16007_v26 = vld [vmem:[#allocation13 + $0x14] sm:$0xf] }
  0xe1   :  { %1720 = vmatpush.bf16.msrb.mxu3 %v11595_v31  ;;  %v11091_v31 = vor.u32 %v16061_v20, %v11088_v21  ;;  %v10875_v40 = vor.u32 %v16007_v26, %v10872_v32 }
  0xe2   :  { %1682 = vmatpush.bf16.msrb.mxu0 %v10995_v28  ;;  %v16109_v28 = vld [vmem:[#allocation13 + $0x344] sm:$0xf] }
  0xe3   :  { %1695 = vmatpush.bf16.msrb.mxu1 %v11187_v33  ;;  %v16157_v33 = vld [vmem:[#allocation13 + $0x4c4] sm:$0xf]  ;;  %v11283_v38 = vor.u32 %v16109_v28, %v11280_v29  ;;  %v452_v29 = vperm.slane %v17933_v34, 4 }
  0xe4   :  { %1708 = vmatpush.bf16.msrb.mxu2 %v11379_v39 }
  0xe5   :  { %1721 = vmatpush.bf16.msrb.mxu3 %v11571_v44  ;;  %v1469_v44 = vadd.f32 %v1468_v15, %v1456_v30 }
  0xe6   :  { %1683 = vmatpush.bf16.msrb.mxu0 %v10971_v41  ;;  %v1457_v39 = vpop.f32.mrf.mxu2  ;;  %v11475_v41 = vor.u32 %v16157_v33, %v11472_v35 }
  0xe7   :  { %1696 = vmatpush.bf16.msrb.mxu1 %v11163_v46  ;;  %v1470_v45 = vpop.f32.mrf.mxu3  ;;  %v11067_v46 = vor.u32 %v16055_v36, %v11064_v37 }
  0xe8   :  { %1709 = vmatpush.bf16.msrb.mxu2 %v11355_v53 }
  0xe9   :  { %1722 = vmatpush.bf16.msrb.mxu3 %v11547_v59  ;;  %v17948_v59 = vld [vmem:[%s18449_s2] sm:$0xff]  ;;  %s17779_s2 = smov 64  }
  0xea   :  { %1684 = vmatpush.bf16.msrb.mxu0 %v10947_v56 }
  0xeb   :  { %1697 = vmatpush.bf16.msrb.mxu1 %v11139_v1 }
  0xec   :  { %1710 = vmatpush.bf16.msrb.mxu2 %v11331_v7 }
  0xed   :  { %1723 = vmatpush.bf16.msrb.mxu3 %v11523_v11 }
  0xee   :  { %1685 = vmatpush.bf16.msrb.mxu0 %v10923_v9 }
  0xef   :  { %1698 = vmatpush.bf16.msrb.mxu1 %v11115_v16  ;;  %v451_v16 = vperm.slane %v17933_v34, 3 }
  0xf0   :  { %1711 = vmatpush.bf16.msrb.mxu2 %v11307_v23 }
  0xf1   :  { %1724 = vmatpush.bf16.msrb.mxu3 %v11499_v27 }
  0xf2   :  { %1686 = vmatpush.bf16.msrb.mxu0 %v10899_v25 }
  0xf3   :  { %1699 = vmatpush.bf16.msrb.mxu1 %v11091_v31 }
  0xf4   :  { %1712 = vmatpush.bf16.msrb.mxu2 %v11283_v38 }
  0xf5   :  { %1725 = vmatpush.bf16.msrb.mxu3 %v11475_v41 }
  0xf6   :  { %1687 = vmatpush.bf16.msrb.mxu0 %v10875_v40  ;;  %v1481_v52 = vpop.f32.mrf.mxu0 }
  0xf7   :  { %1700 = vmatpush.bf16.msrb.mxu1 %v11067_v46  ;;  %v1482_v53 = vadd.f32 %v1481_v52, %v449_v51  ;;  %v1494_v55 = vpop.f32.mrf.mxu1 }
  0xf8   :  { %1713 = vmatpush.bf16.msrb.mxu2 %v11259_v49 }
  0xf9   :  { %1688 = vmatmul.bf16.vlgmr.msrb.gmra.mxu0 %v17910_v57  ;;  %1726 = vmatpush.bf16.msrb.mxu3 %v11451_v50  ;;  %v1495_v56 = vadd.f32 %v1494_v55, %v1482_v53 }
  0xfa   :  { %11620 = vmatpush.msk.msra.mxu0 %vm1745_vm0, %v1469_v44  ;;  %1701 = vmatmul.bf16.vlgmr.msrb.gmra.mxu1 %v17914_v60 }
  0xfb   :  { %1714 = vmatmul.bf16.vlgmr.msrb.gmra.mxu2 %v17908_v54 }
  0xfc   :  { %1727 = vmatmul.bf16.vlgmr.msrb.gmra.mxu3 %v17912_v58 }
  0xfe   :  { %v1507_v57 = vpop.f32.mrf.mxu2  ;;  %v1483_v62 = vpop.f32.mrf.mxu0 }
  0xff   :  { %v1508_v61 = vadd.f32 %v1507_v57, %v1495_v56  ;;  %v1520_v60 = vpop.f32.mrf.mxu3  ;;  %v1496_v54 = vpop.f32.mrf.mxu1 }
 0x101   :  { %v1521_v58 = vadd.f32 %v1520_v60, %v1508_v61 }
 0x103   :  { %11624 = vmatpush.msk.msra.mxu1 %vm1745_vm0, %v1521_v58 }
 0x106   :  { %v1509_v0 = vpop.f32.mrf.mxu2 }
 0x107   :  { %v1522_v1 = vpop.f32.mrf.mxu3 }
 0x108   :  { %v1920_v1 = vlaneseq }
 0x109   :  { %11621 = vmatmul.msk.f32.vlgmr.msra.gmra.mxu0 %vm1735_vm1, %v17948_v59 }
 0x10a   :  { %11625 = vmatmul.msk.f32.vlgmr.msra.gmra.mxu1 %vm1735_vm1, %v17948_v59 }
 0x111   :  { %11622 = vmatmul.msk.f32.gmra.mxu0 %vm1735_vm1, %v17958_v63 }
 0x112   :  { %11626 = vmatmul.msk.f32.gmra.mxu1 %vm1735_vm1, %v17958_v63 }
 0x116   :  { %v1533_v4 = vpop.f32.mrf.mxu0 }
 0x117   :  { %v1534_v5 = vadd.f32 %v1533_v4, %v450_v3  ;;  %v1546_v6 = vpop.f32.mrf.mxu1  ;;  %v1921_v3 = vshrl.u32 %v1920_v1, 7 }
 0x119   :  { %11623 = vmatmul.msk.f32.gmra.mxu0 %vm1735_vm1, %v17967_v2  ;;  %v1547_v7 = vadd.f32 %v1546_v6, %v1534_v5  ;;  %v18008_v4 = vand.u32 3, %v1921_v3  ;;  %v1922_v6 = vadd.s32 8, %v1921_v3 }
 0x11a   :  { %11627 = vmatmul.msk.f32.gmra.mxu1 %vm1735_vm1, %v17967_v2 }
 0x11b   :  { %vm1960_vm2 = vcmp.eq.s32.totalorder %v18008_v4, 1  ;;  %vm2003_vm8 = vcmp.eq.s32.totalorder %v18008_v4, 2  ;;  %vm2045_vm10 = vcmp.eq.s32.totalorder %v18008_v4, 3 }
 0x11e   :  { %v1535_v8 = vpop.f32.mrf.mxu0  ;;  %v1559_v9 = vpop.f32.mrf.mxu2 }
 0x11f   :  { %v1560_v10 = vadd.f32 %v1559_v9, %v1547_v7  ;;  %v1572_v11 = vpop.f32.mrf.mxu3  ;;  %v1548_v12 = vpop.f32.mrf.mxu1 }
 0x121   :  { %v1573_v13 = vadd.f32 %v1572_v11, %v1560_v10  ;;  %v18012_v11 = vand.u32 3, %v1922_v6 }
 0x123   :  { %11628 = vmatpush.msk.msra.mxu2 %vm1745_vm0, %v1573_v13  ;;  %vm1961_vm4 = vcmp.eq.s32.totalorder %v18012_v11, 1  ;;  %vm2004_vm7 = vcmp.eq.s32.totalorder %v18012_v11, 2  ;;  %vm2046_vm11 = vcmp.eq.s32.totalorder %v18012_v11, 3 }
 0x124   :  { %11629 = vmatmul.msk.f32.vlgmr.msra.gmra.mxu2 %vm1735_vm1, %v17948_v59 }
 0x126   :  { %v1561_v14 = vpop.f32.mrf.mxu2 }
 0x127   :  { %v1574_v15 = vpop.f32.mrf.mxu3 }
 0x128   :  { %v1923_v15 = vadd.s32 16, %v1921_v3 }
 0x12c   :  { %11630 = vmatmul.msk.f32.gmra.mxu2 %vm1735_vm1, %v17958_v63 }
 0x134   :  { %11631 = vmatmul.msk.f32.gmra.mxu2 %vm1735_vm1, %v17967_v2 }
 0x136   :  { %v1585_v17 = vpop.f32.mrf.mxu0 }
 0x137   :  { %v1586_v18 = vadd.f32 %v1585_v17, %v451_v16  ;;  %v1598_v19 = vpop.f32.mrf.mxu1 }
 0x139   :  { %v1599_v20 = vadd.f32 %v1598_v19, %v1586_v18 }
 0x13e   :  { %v1587_v21 = vpop.f32.mrf.mxu0  ;;  %v1611_v22 = vpop.f32.mrf.mxu2 }
 0x13f   :  { %v1612_v23 = vadd.f32 %v1611_v22, %v1599_v20  ;;  %v1624_v24 = vpop.f32.mrf.mxu3  ;;  %v1600_v25 = vpop.f32.mrf.mxu1  ;;  %v1942_v21 = vand.u32 3, %v1923_v15 }
 0x141   :  { %v1625_v26 = vadd.f32 %v1624_v24, %v1612_v23  ;;  %vm1962_vm5 = vcmp.eq.s32.totalorder %v1942_v21, 1  ;;  %vm2005_vm6 = vcmp.eq.s32.totalorder %v1942_v21, 2  ;;  %vm2047_vm9 = vcmp.eq.s32.totalorder %v1942_v21, 3 }
 0x143   :  { %11632 = vmatpush.msk.msra.mxu3 %vm1745_vm0, %v1625_v26 }
 0x144   :  { %11633 = vmatmul.msk.f32.vlgmr.msra.gmra.mxu3 %vm1735_vm1, %v17948_v59 }
 0x146   :  { %v1613_v27 = vpop.f32.mrf.mxu2 }
 0x147   :  { %v1626_v28 = vpop.f32.mrf.mxu3 }
 0x14c   :  { %11634 = vmatmul.msk.f32.gmra.mxu3 %vm1735_vm1, %v17958_v63 }
 0x154   :  { %11635 = vmatmul.msk.f32.gmra.mxu3 %vm1735_vm1, %v17967_v2 }
 0x156   :  { %v1637_v30 = vpop.f32.mrf.mxu0 }
 0x157   :  { %v1638_v31 = vadd.f32 %v1637_v30, %v452_v29  ;;  %v1650_v32 = vpop.f32.mrf.mxu1 }
 0x159   :  { %v1651_v33 = vadd.f32 %v1650_v32, %v1638_v31 }
 0x15e   :  { %v1639_v35 = vpop.f32.mrf.mxu0  ;;  %v1663_v36 = vpop.f32.mrf.mxu2 }
 0x15f   :  { %v1664_v37 = vadd.f32 %v1663_v36, %v1651_v33  ;;  %v1676_v38 = vpop.f32.mrf.mxu3  ;;  %v1652_v39 = vpop.f32.mrf.mxu1 }
 0x161   :  { %v1677_v40 = vadd.f32 %v1676_v38, %v1664_v37 }
 0x163   :  { %11636 = vmatpush.msk.msrb.mxu0 %vm1745_vm0, %v1677_v40 }
 0x164   :  { %11637 = vmatmul.msk.f32.vlgmr.msrb.gmra.mxu0 %vm1735_vm1, %v17948_v59 }
 0x166   :  { %v1665_v41 = vpop.f32.mrf.mxu2 }
 0x167   :  { %v1678_v42 = vpop.f32.mrf.mxu3 }
 0x16c   :  { %11638 = vmatmul.msk.f32.gmra.mxu0 %vm1735_vm1, %v17958_v63 }
 0x174   :  { %11639 = vmatmul.msk.f32.gmra.mxu0 %vm1735_vm1, %v17967_v2 }
 0x176   :  { %v1689_v44 = vpop.f32.mrf.mxu0 }
 0x177   :  { %v1702_v45 = vpop.f32.mrf.mxu1  ;;  %v1690_v46 = vadd.f32 %v1689_v44, %v453_v43 }
 0x179   :  { %v1703_v47 = vadd.f32 %v1702_v45, %v1690_v46 }
 0x17e   :  { %v1691_v48 = vpop.f32.mrf.mxu0  ;;  %v1715_v50 = vpop.f32.mrf.mxu2 }
 0x17f   :  { %v1704_v49 = vpop.f32.mrf.mxu1  ;;  %v1716_v51 = vadd.f32 %v1715_v50, %v1703_v47  ;;  %v1728_v52 = vpop.f32.mrf.mxu3 }
 0x181   :  { %v1729_v53 = vadd.f32 %v1728_v52, %v1716_v51 }
 0x183   :  { %11640 = vmatpush.msk.msrb.mxu1 %vm1745_vm0, %v1729_v53 }
 0x184   :  { %11641 = vmatmul.msk.f32.vlgmr.msrb.gmra.mxu1 %vm1735_vm1, %v17948_v59 }
 0x186   :  { %v1781_v55 = vpop.f32.mrf.mxu0  ;;  %v1717_v34 = vpop.f32.mrf.mxu2 }
 0x187   :  { %v1730_v56 = vpop.f32.mrf.mxu3  ;;  %v1807_v57 = vpop.f32.mrf.mxu1 }
 0x188   :  { %v17311_v61 = vpack.i.bf16 %v1807_v57, %v1781_v55 }
 0x18a   :  { %17312 = vrot.lane.b32.xlu0 %v17311_v61, %s17779_s2 }
 0x18c   :  { %11642 = vmatmul.msk.f32.gmra.mxu1 %vm1735_vm1, %v17958_v63 }
 0x18e   :  { %v1784_v60 = vpop.f32.mrf.mxu0 }
 0x18f   :  { %v1810_v62 = vpop.f32.mrf.mxu1 }
 0x190   :  { %v17316_v54 = vpack.i.bf16 %v1810_v62, %v1784_v60 }
 0x192   :  { %17317 = vrot.lane.b32.xlu0 %v17316_v54, %s17779_s2 }
 0x194   :  { %11643 = vmatmul.msk.f32.gmra.mxu1 %vm1735_vm1, %v17967_v2  ;;  %vm2207_vm1 = vcmask 519168  }
 0x196   :  { %v1787_v59 = vpop.f32.mrf.mxu0 }
 0x197   :  { %v1813_v58 = vpop.f32.mrf.mxu1 }
 0x198   :  { %v17321_v0 = vpack.i.bf16 %v1813_v58, %v1787_v59 }
 0x19a   :  { %17322 = vrot.lane.b32.xlu1 %v17321_v0, %s17779_s2 }
 0x1a7   :  { %v1833_v63 = vpop.f32.mrf.mxu2 }
 0x1af   :  { %v1836_v13 = vpop.f32.mrf.mxu2 }
 0x1b7   :  { %v1839_v26 = vpop.f32.mrf.mxu2 }
 0x1c7   :  { %v1859_v32 = vpop.f32.mrf.mxu3 }
 0x1cf   :  { %v1862_v35 = vpop.f32.mrf.mxu3 }
 0x1d7   :  { %v1865_v41 = vpop.f32.mrf.mxu3 }
 0x1e1   :  { %v1885_v31 = vpop.f32.mrf.mxu0 }
 0x1e9   :  { %v1888_v33 = vpop.f32.mrf.mxu0 }
 0x1f1   :  { %v1891_v38 = vpop.f32.mrf.mxu0 }
 0x1fc   :  { %v17313_v5 = vpop.permute.xlu0 %17312 }
 0x1fd   :  { %v17315_v7 = vunpack.i.h.bf16 %v17313_v5  ;;  %v17314_v8 = vunpack.i.l.bf16 %v17313_v5 }
 0x1ff   :  { %v1988_v2 = vsel %vm1987_vm3, %v17314_v8, %v17315_v7  ;;  %v1997_v9 = vsel %vm1960_vm2, %v1807_v57, %v17314_v8 }
 0x200   :  { %v1998_v10 = vsel %vm1960_vm2, %v1833_v63, %v1988_v2  ;;  %vm2213_vm2 = vcmask 520192  }
 0x201   :  { %v17326_v12 = vpack.i.bf16 %v1998_v10, %v1997_v9  ;;  %v1911_v60 = vpop.f32.mrf.mxu1 }
 0x203   :  { %17327 = vrot.lane.b32.xlu1 %v17326_v12, %s17779_s2 }
 0x204   :  { %v17318_v14 = vpop.permute.xlu0 %17317 }
 0x205   :  { %v17320_v16 = vunpack.i.h.bf16 %v17318_v14  ;;  %v17319_v17 = vunpack.i.l.bf16 %v17318_v14 }
 0x207   :  { %v1989_v18 = vsel %vm1987_vm3, %v17319_v17, %v17320_v16  ;;  %v1999_v19 = vsel %vm1961_vm4, %v1810_v62, %v17319_v17 }
 0x208   :  { %v2000_v20 = vsel %vm1961_vm4, %v1836_v13, %v1989_v18 }
 0x209   :  { %v17331_v22 = vpack.i.bf16 %v2000_v20, %v1999_v19  ;;  %v1914_v62 = vpop.f32.mrf.mxu1 }
 0x20b   :  { %17332 = vrot.lane.b32.xlu2 %v17331_v22, %s17779_s2 }
 0x20c   :  { %v17323_v23 = vpop.permute.xlu1 %17322 }
 0x20d   :  { %v17325_v24 = vunpack.i.h.bf16 %v17323_v23  ;;  %v17324_v25 = vunpack.i.l.bf16 %v17323_v23  ;;  %v2091_v23 = vld [vmem:[#allocation11] sm:$0xff] }
 0x20f   :  { %v1990_v27 = vsel %vm1987_vm3, %v17324_v25, %v17325_v24  ;;  %v2001_v28 = vsel %vm1962_vm5, %v1813_v58, %v17324_v25 }
 0x210   :  { %v2002_v29 = vsel %vm1962_vm5, %v1839_v26, %v1990_v27  ;;  %v2092_v27 = vld [vmem:[#allocation11 + $0x8] sm:$0xff] }
 0x211   :  { %v17336_v30 = vpack.i.bf16 %v2002_v29, %v2001_v28  ;;  %v1917_v0 = vpop.f32.mrf.mxu1 }
 0x213   :  { %17337 = vrot.lane.b32.xlu2 %v17336_v30, %s17779_s2 }
 0x265   :  { %v17333_v36 = vpop.permute.xlu2 %17332 }
 0x266   :  { %v17335_v45 = vunpack.i.h.bf16 %v17333_v36  ;;  %v17334_v46 = vunpack.i.l.bf16 %v17333_v36 }
 0x268   :  { %v2031_v49 = vsel %vm1987_vm3, %v17334_v46, %v17335_v45  ;;  %v2042_v52 = vsel %vm2004_vm7, %v1888_v33, %v17335_v45 }
 0x269   :  { %v2041_v34 = vsel %vm2004_vm7, %v1862_v35, %v2031_v49 }
 0x26d   :  { %v17338_v37 = vpop.permute.xlu2 %17337 }
 0x26e   :  { %v17340_v39 = vunpack.i.h.bf16 %v17338_v37  ;;  %v17339_v40 = vunpack.i.l.bf16 %v17338_v37 }
 0x270   :  { %v2044_v42 = vsel %vm2005_vm6, %v1891_v38, %v17340_v39  ;;  %v2032_v43 = vsel %vm1987_vm3, %v17339_v40, %v17340_v39 }
 0x271   :  { %v2043_v44 = vsel %vm2005_vm6, %v1865_v41, %v2032_v43 }
 0x272   :  { %v17346_v47 = vpack.i.bf16 %v2044_v42, %v2043_v44 }
 0x274   :  { %17347 = vrot.lane.b32.xlu1 %v17346_v47, %s17779_s2 }
 0x275   :  { %v17328_v48 = vpop.permute.xlu1 %17327 }
 0x276   :  { %v17330_v50 = vunpack.i.h.bf16 %v17328_v48  ;;  %v17329_v51 = vunpack.i.l.bf16 %v17328_v48 }
 0x278   :  { %v2030_v53 = vsel %vm1987_vm3, %v17329_v51, %v17330_v50  ;;  %v2040_v55 = vsel %vm2003_vm8, %v1885_v31, %v17330_v50 }
 0x279   :  { %v17351_v56 = vpack.i.bf16 %v2042_v52, %v2040_v55  ;;  %v2039_v57 = vsel %vm2003_vm8, %v1859_v32, %v2030_v53 }
 0x27a   :  { %v17341_v61 = vpack.i.bf16 %v2041_v34, %v2039_v57 }
 0x27b   :  { %17352 = vrot.lane.b32.xlu2 %v17351_v56, %s17779_s2 }
 0x27c   :  { %17342 = vrot.lane.b32.xlu0 %v17341_v61, %s17779_s2 }
 0x2d5   :  { %v17353_v7 = vpop.permute.xlu2 %17352 }
 0x2d6   :  { %v17355_v9 = vunpack.i.h.bf16 %v17353_v7  ;;  %v17354_v10 = vunpack.i.l.bf16 %v17353_v7  ;;  %v16227_v7 = vld [vmem:[#allocation16 + $0xec] sm:$0xf0] }
 0x2e6   :  { %v17348_v54 = vpop.permute.xlu1 %17347 }
 0x2e7   :  { %v17350_v59 = vunpack.i.h.bf16 %v17348_v54  ;;  %v17349_v58 = vunpack.i.l.bf16 %v17348_v54 }
 0x2e9   :  { %v2074_v1 = vsel %vm1987_vm3, %v17349_v58, %v17350_v59  ;;  %v2085_v3 = vsel %vm2047_vm9, %v1891_v38, %v17349_v58 }
 0x2ea   :  { %v2086_v63 = vsel %vm2047_vm9, %v1917_v0, %v2074_v1  ;;  %v2088_v5 = vpack.c.bf16 %v2085_v3, %v2085_v3 }
 0x2eb   :  { %v2090_v6 = vpack.c.bf16 %v2086_v63, %v2086_v63 }
 0x2ec   :  { %2098 = vrot.lane.b32.xlu1 %v2088_v5, %s17779_s2 }
 0x2ed   :  { %v2110_v8 = vsel %vm1987_vm3, %v2090_v6, 0 }
 0x2ee   :  { %v17343_v2 = vpop.permute.xlu0 %17342  ;;  %2118 = vmatpush.bf16.xpose.msrb.mxu2 %v2110_v8 }
 0x2ef   :  { %v17345_v12 = vunpack.i.h.bf16 %v17343_v2  ;;  %v17344_v13 = vunpack.i.l.bf16 %v17343_v2  ;;  %v16225_v2 = vld [vmem:[#allocation16 + $0xe4] sm:$0xf] }
 0x2f1   :  { %v2072_v14 = vsel %vm1987_vm3, %v17344_v13, %v17354_v10  ;;  %v2073_v15 = vsel %vm1987_vm3, %v17345_v12, %v17355_v9  ;;  %v2081_v16 = vsel %vm2045_vm10, %v1885_v31, %v17344_v13  ;;  %v2083_v17 = vsel %vm2046_vm11, %v1888_v33, %v17345_v12  ;;  %v2093_v31 = vld [vmem:[#allocation11 + $0x10] sm:$0xf]  ;;  %v11749_v10 = vld [vmem:[#allocation16 + $0xc0] sm:$0xf] }
 0x2f2   :  { %v2087_v18 = vpack.c.bf16 %v2083_v17, %v2081_v16  ;;  %v2082_v19 = vsel %vm2045_vm10, %v1911_v60, %v2072_v14  ;;  %v2084_v20 = vsel %vm2046_vm11, %v1914_v62, %v2073_v15  ;;  %v11767_v9 = vld [vmem:[#allocation16 + $0xf0] sm:$0xf0]  ;;  %v16223_v13 = vld [vmem:[#allocation16 + $0xcc] sm:$0xf0]  ;;  %v16221_v14 = vld [vmem:[#allocation16 + $0xc4] sm:$0xf] }
 0x2f3   :  { %v2089_v21 = vpack.c.bf16 %v2084_v20, %v2082_v19  ;;  %v11770_v12 = vor.u32 %v16225_v2, %v11767_v9  ;;  %v11751_v15 = vld [vmem:[#allocation16 + $0xd0] sm:$0xf0]  ;;  %v11750_v16 = vor.u32 %v16223_v13, %v11749_v10  ;;  %v16219_v19 = vld [vmem:[#allocation16 + $0xac] sm:$0xf0]  ;;  %v16217_v20 = vld [vmem:[#allocation16 + $0xa4] sm:$0xf] }
 0x2f4   :  { %2096 = vrot.lane.b32.xlu0 %v2087_v18, %s17779_s2  ;;  %v11754_v17 = vor.u32 %v16221_v14, %v11751_v15  ;;  %v11733_v18 = vld [vmem:[#allocation16 + $0xa0] sm:$0xf]  ;;  %v11757_v2 = vld [vmem:[#allocation16 + $0xc8] sm:$0xf]  ;;  %v16224_v9 = vld [vmem:[#allocation16 + $0xd4] sm:$0xf0] }
 0x2f5   :  { %v2107_v4 = vsel %vm1987_vm3, %v2089_v21, 0  ;;  %v16222_v13 = vld [vmem:[#allocation16 + $0xcc] sm:$0xf]  ;;  %v11759_v14 = vld [vmem:[#allocation16 + $0xd8] sm:$0xf0]  ;;  %v11758_v15 = vor.u32 %v16224_v9, %v11757_v2 }
 0x2f6   :  { %2119 = vmatpush.bf16.xpose.msrb.mxu2 %v2107_v4  ;;  %v16202_v9 = vld [vmem:[#allocation16 + $0x2c] sm:$0xf] }
 0x2fe   :  { %2675 = vmatpush.bf16.msra.mxu2 %v11770_v12 }
 0x302   :  { %2676 = vmatpush.bf16.msra.mxu2 %v11754_v17  ;;  %v11877_v17 = vld [vmem:[#allocation16 + $0x1c0] sm:$0xf] }
 0x35e   :  { %v2099_v22 = vpop.permute.xlu1 %2098 }
 0x366   :  { %v2097_v11 = vpop.permute.xlu0 %2096 }
 0x367   :  { %11644 = vmatmul.msk.bf16.vlgmr.msrb.gmra.mxu2 %vm1987_vm3, %v2097_v11 }
 0x377   :  { %11645 = vmatmul.msk.bf16.gmra.mxu2 %vm1987_vm3, %v2099_v22  ;;  %v11734_v22 = vor.u32 %v16219_v19, %v11733_v18  ;;  %v16255_v18 = vld [vmem:[#allocation16 + $0x1cc] sm:$0xf0]  ;;  %v16253_v19 = vld [vmem:[#allocation16 + $0x1c4] sm:$0xf] }
 0x3ea   :  { %v2121_v24 = vpop.f32.mrf.mxu2 }
 0x3eb   :  { %v2122_v25 = vadd.f32 %v2121_v24, %v2091_v23  ;;  %v11717_v24 = vld [vmem:[#allocation16 + $0x80] sm:$0xf] }
 0x3ed   :  { %v2131_v26 = vsel %vm2130_vm12, %v2122_v25, -inf }
 0x3ee   :  { %2132 = vmax.xlane.f32.xlu2 %v2131_v26  ;;  %v16213_v26 = vld [vmem:[#allocation16 + $0x84] sm:$0xf] }
 0x3f2   :  { %v2123_v28 = vpop.f32.mrf.mxu2 }
 0x3f3   :  { %v2124_v29 = vadd.f32 %v2123_v28, %v2092_v27  ;;  %v11719_v27 = vld [vmem:[#allocation16 + $0x90] sm:$0xf0] }
 0x3f5   :  { %v2134_v30 = vsel %vm2130_vm12, %v2124_v29, -inf }
 0x3f6   :  { %2135 = vmax.xlane.f32.xlu0 %v2134_v30  ;;  %v16211_v30 = vld [vmem:[#allocation16 + $0x6c] sm:$0xf0] }
 0x3fa   :  { %v2126_v32 = vpop.f32.mrf.mxu2 }
 0x3fb   :  { %v2127_v33 = vadd.f32 %v2126_v32, %v2093_v31  ;;  %v11722_v32 = vor.u32 %v16213_v26, %v11719_v27  ;;  %v11861_v26 = vld [vmem:[#allocation16 + $0x1a0] sm:$0xf] }
 0x3fd   :  { %v2138_v35 = vsel %vm2137_vm13, %v2127_v33, -inf }
 0x3fe   :  { %2139 = vmax.xlane.f32.xlu1 %v2138_v35  ;;  %v16259_v35 = vld [vmem:[#allocation16 + $0x1ec] sm:$0xf0] }
 0x402   :  { %v2128_v36 = vpop.f32.mrf.mxu2 }
 0x403   :  { %v16257_v36 = vld [vmem:[#allocation16 + $0x1e4] sm:$0xf] }
 0x40a   :  { %2171 = vrot.lane.b32.xlu0 %v2090_v6, %s17779_s2  ;;  %v11765_v6 = vld [vmem:[#allocation16 + $0xe0] sm:$0xf] }
 0x40b   :  { %v11766_v8 = vor.u32 %v16227_v7, %v11765_v6  ;;  %v11775_v6 = vld [vmem:[#allocation16 + $0xf8] sm:$0xf0] }
 0x40d   :  { %2649 = vmatpush.bf16.msra.mxu0 %v11766_v8 }
 0x411   :  { %2650 = vmatpush.bf16.msra.mxu0 %v11750_v16  ;;  %v11762_v16 = vor.u32 %v16222_v13, %v11759_v14  ;;  %v16235_v14 = vld [vmem:[#allocation16 + $0x12c] sm:$0xf0] }
 0x415   :  { %2651 = vmatpush.bf16.msra.mxu0 %v11734_v22 }
 0x417   :  { %2169 = vrot.lane.b32.xlu1 %v2089_v21, %s17779_s2  ;;  %v11735_v21 = vld [vmem:[#allocation16 + $0xb0] sm:$0xf0] }
 0x418   :  { %v11738_v23 = vor.u32 %v16217_v20, %v11735_v21  ;;  %v11878_v20 = vor.u32 %v16255_v18, %v11877_v17  ;;  %v11879_v21 = vld [vmem:[#allocation16 + $0x1d0] sm:$0xf0]  ;;  %v11661_v17 = vld [vmem:[#allocation16 + $0x8] sm:$0xf]  ;;  %v16200_v18 = vld [vmem:[#allocation16 + $0x14] sm:$0xf0] }
 0x419   :  { %v11882_v22 = vor.u32 %v16253_v19, %v11879_v21  ;;  %v16198_v19 = vld [vmem:[#allocation16 + $0xc] sm:$0xf]  ;;  %v11663_v21 = vld [vmem:[#allocation16 + $0x18] sm:$0xf0] }
 0x41a   :  { %2677 = vmatpush.bf16.msra.mxu2 %v11738_v23 }
 0x41e   :  { %2678 = vmatpush.bf16.msra.mxu2 %v11722_v32 }
 0x461   :  { %v2133_v37 = vpop.xlane.xlu2 %2132 }
 0x462   :  { %v2141_v38 = vsub.f32 %v2122_v25, %v2133_v37  ;;  %v16215_v25 = vld [vmem:[#allocation16 + $0x8c] sm:$0xf0]  ;;  %v16209_v37 = vld [vmem:[#allocation16 + $0x64] sm:$0xf] }
 0x463   :  { %v11718_v28 = vor.u32 %v16215_v25, %v11717_v24  ;;  %v16218_v24 = vld [vmem:[#allocation16 + $0xac] sm:$0xf]  ;;  %v11743_v25 = vld [vmem:[#allocation16 + $0xb8] sm:$0xf0] }
 0x464   :  { %v2144_v39 = vmul.f32 1.442695, %v2141_v38  ;;  %v11703_v38 = vld [vmem:[#allocation16 + $0x70] sm:$0xf0]  ;;  %v11746_v27 = vor.u32 %v16218_v24, %v11743_v25  ;;  %v16231_v24 = vld [vmem:[#allocation16 + $0x10c] sm:$0xf0] }
 0x465   :  { %2652 = vmatpush.bf16.msra.mxu0 %v11718_v28  ;;  %v16251_v28 = vld [vmem:[#allocation16 + $0x1ac] sm:$0xf0]  ;;  %v16229_v25 = vld [vmem:[#allocation16 + $0x104] sm:$0xf] }
 0x466   :  { %17356 = vpow2.f32 %v2144_v39 }
 0x469   :  { %v2136_v40 = vpop.xlane.xlu0 %2135 }
 0x46a   :  { %v2142_v41 = vsub.f32 %v2124_v29, %v2136_v40  ;;  %v11701_v29 = vld [vmem:[#allocation16 + $0x60] sm:$0xf]  ;;  %v11895_v40 = vld [vmem:[#allocation16 + $0x1f0] sm:$0xf0] }
 0x46c   :  { %v17357_v42 = vpop.eup %17356  ;;  %v2146_v43 = vmul.f32 1.442695, %v2142_v41 }
 0x46d   :  { %v2150_v44 = vsel %vm2130_vm12, %v17357_v42, 0.0 }
 0x46e   :  { %17358 = vpow2.f32 %v2146_v43  ;;  %2151 = vadd.xlane.f32.xlu2 %v2150_v44  ;;  %v11702_v44 = vor.u32 %v16211_v30, %v11701_v29  ;;  %v16249_v29 = vld [vmem:[#allocation16 + $0x1a4] sm:$0xf]  ;;  %v11863_v30 = vld [vmem:[#allocation16 + $0x1b0] sm:$0xf0] }
 0x46f   :  { %v11866_v32 = vor.u32 %v16249_v29, %v11863_v30  ;;  %v11901_v29 = vld [vmem:[#allocation16 + $0x1e8] sm:$0xf]  ;;  %v16260_v30 = vld [vmem:[#allocation16 + $0x1f4] sm:$0xf0] }
 0x470   :  { %2653 = vmatpush.bf16.msra.mxu0 %v11702_v44  ;;  %v11847_v44 = vld [vmem:[#allocation16 + $0x190] sm:$0xf0] }
 0x471   :  { %v2140_v45 = vpop.xlane.xlu1 %2139 }
 0x472   :  { %v2143_v46 = vsub.f32 %v2127_v33, %v2140_v45  ;;  %v11893_v33 = vld [vmem:[#allocation16 + $0x1e0] sm:$0xf] }
 0x473   :  { %v11894_v39 = vor.u32 %v16259_v35, %v11893_v33  ;;  %v11685_v45 = vld [vmem:[#allocation16 + $0x40] sm:$0xf]  ;;  %v11725_v33 = vld [vmem:[#allocation16 + $0x88] sm:$0xf]  ;;  %v16216_v35 = vld [vmem:[#allocation16 + $0x94] sm:$0xf0] }
 0x474   :  { %v17359_v47 = vpop.eup %17358  ;;  %v2148_v48 = vmul.f32 1.442695, %v2143_v46  ;;  %v11898_v46 = vor.u32 %v16257_v36, %v11895_v40  ;;  %v16214_v36 = vld [vmem:[#allocation16 + $0x8c] sm:$0xf]  ;;  %v11845_v40 = vld [vmem:[#allocation16 + $0x180] sm:$0xf] }
 0x475   :  { %v2153_v49 = vsel %vm2130_vm12, %v17359_v47, 0.0  ;;  %2662 = vmatpush.bf16.msra.mxu1 %v11894_v39 }
 0x476   :  { %17360 = vpow2.f32 %v2148_v48  ;;  %2154 = vadd.xlane.f32.xlu2 %v2153_v49  ;;  %v11706_v49 = vor.u32 %v16209_v37, %v11703_v38  ;;  %v11726_v37 = vor.u32 %v16216_v35, %v11725_v33  ;;  %v11727_v38 = vld [vmem:[#allocation16 + $0x98] sm:$0xf0]  ;;  %v11885_v35 = vld [vmem:[#allocation16 + $0x1c8] sm:$0xf] }
 0x477   :  { %v11730_v39 = vor.u32 %v16214_v36, %v11727_v38  ;;  %v11903_v33 = vld [vmem:[#allocation16 + $0x1f8] sm:$0xf0]  ;;  %v16256_v36 = vld [vmem:[#allocation16 + $0x1d4] sm:$0xf0]  ;;  %v16254_v38 = vld [vmem:[#allocation16 + $0x1cc] sm:$0xf] }
 0x478   :  { %2679 = vmatpush.bf16.msra.mxu2 %v11706_v49  ;;  %v16210_v49 = vld [vmem:[#allocation16 + $0x6c] sm:$0xf] }
 0x479   :  { %2663 = vmatpush.bf16.msra.mxu1 %v11878_v20 }
 0x47c   :  { %v17361_v50 = vpop.eup %17360  ;;  %v2172_v51 = vpop.permute.xlu0 %2171 }
 0x47d   :  { %v2182_v52 = vsel %vm2180_vm14, %v2172_v51, 0  ;;  %v2156_v53 = vsel %vm2137_vm13, %v17361_v50, 0.0  ;;  %v11687_v51 = vld [vmem:[#allocation16 + $0x50] sm:$0xf0] }
 0x47e   :  { %2190 = vmatpush.bf16.msrb.mxu3 %v2182_v52  ;;  %2157 = vadd.xlane.f32.xlu2 %v2156_v53  ;;  %v11669_v53 = vld [vmem:[#allocation16 + $0x20] sm:$0xf] }
 0x489   :  { %v2170_v55 = vpop.permute.xlu1 %2169 }
 0x48a   :  { %2191 = vmatpush.bf16.msrb.mxu3 %v2170_v55  ;;  %v16203_v55 = vld [vmem:[#allocation16 + $0x2c] sm:$0xf0] }
 0x48e   :  { %2688 = vmatpush.bf16.msra.mxu3 %v11898_v46  ;;  %v16212_v46 = vld [vmem:[#allocation16 + $0x74] sm:$0xf0] }
 0x492   :  { %2689 = vmatpush.bf16.msra.mxu3 %v11882_v22  ;;  %v11666_v22 = vor.u32 %v16198_v19, %v11663_v21 }
 0x496   :  { %2690 = vmatpush.bf16.msra.mxu3 %v11866_v32  ;;  %v11902_v32 = vor.u32 %v16260_v30, %v11901_v29 }
 0x4e1   :  { %v2152_v34 = vpop.xlane.xlu2 %2151 }
 0x4e2   :  { %17362 = vrcp.f32 %v2152_v34 }
 0x4e8   :  { %v17363_v56 = vpop.eup %17362 }
 0x4e9   :  { %v2162_v57 = vmul.f32 %v17363_v56, %v17357_v42  ;;  %v2155_v61 = vpop.xlane.xlu2 %2154  ;;  %v16201_v56 = vld [vmem:[#allocation16 + $0x24] sm:$0xf] }
 0x4ea   :  { %17364 = vrcp.f32 %v2155_v61 }
 0x4eb   :  { %2202 = vst.msk [vmem:[#allocation2] sm:$0xff] %vm2130_vm12, %v2162_v57 }
 0x4f0   :  { %v17365_v60 = vpop.eup %17364 }
 0x4f1   :  { %v2163_v62 = vmul.f32 %v17365_v60, %v17359_v47  ;;  %v2158_v54 = vpop.xlane.xlu2 %2157  ;;  %v16207_v47 = vld [vmem:[#allocation16 + $0x4c] sm:$0xf0]  ;;  %v11670_v60 = vor.u32 %v16203_v55, %v11669_v53  ;;  %v16241_v55 = vld [vmem:[#allocation16 + $0x164] sm:$0xf] }
 0x4f2   :  { %17366 = vrcp.f32 %v2158_v54  ;;  %v2209_v59 = vld [vmem:[#allocation2] sm:$0x1f]  ;;  %v11686_v52 = vor.u32 %v16207_v47, %v11685_v45  ;;  %v16199_v54 = vld [vmem:[#allocation16 + $0xc] sm:$0xf0]  ;;  %v11709_v45 = vld [vmem:[#allocation16 + $0x68] sm:$0xf] }
 0x4f3   :  { %v2165_v58 = vpack.c.bf16 %v2163_v62, %v2162_v57  ;;  %2203 = vst.msk [vmem:[#allocation2 + $0x8] sm:$0xff] %vm2130_vm12, %v2163_v62  ;;  %v11671_v57 = vld [vmem:[#allocation16 + $0x30] sm:$0xf0]  ;;  %v11653_v62 = vld [vmem:[#allocation16] sm:$0xf] }
 0x4f4   :  { %2211 = vst.msk [vmem:[%s18463_s16] sm:$0x1f] %vm2210_vm15, %v2209_v59  ;;  %2654 = vmatpush.bf16.msra.mxu0 %v11686_v52  ;;  %v11674_v59 = vor.u32 %v16201_v56, %v11671_v57  ;;  %v16243_v53 = vld [vmem:[#allocation16 + $0x16c] sm:$0xf0] }
 0x4f5   :  { %11646 = vmatmul.msk.bf16.vlgmr.msrb.gmra.mxu3 %vm2130_vm12, %v2165_v58  ;;  %v11773_v58 = vld [vmem:[#allocation16 + $0xe8] sm:$0xf] }
 0x4f8   :  { %v17367_v0 = vpop.eup %17366  ;;  %2655 = vmatpush.bf16.msra.mxu0 %v11670_v60  ;;  %v16208_v60 = vld [vmem:[#allocation16 + $0x54] sm:$0xf0] }
 0x4f9   :  { %v2164_v1 = vmul.f32 %v17367_v0, %v17361_v50  ;;  %v16205_v50 = vld [vmem:[#allocation16 + $0x44] sm:$0xf]  ;;  %v16228_v0 = vld [vmem:[#allocation16 + $0xf4] sm:$0xf0] }
 0x4fa   :  { %v2215_v42 = vld [vmem:[#allocation2 + $0x5] sm:$0x1f]  ;;  %v11690_v34 = vor.u32 %v16205_v50, %v11687_v51  ;;  %v2229_v61 = vld [vmem:[#allocation2 + $0xa] sm:$0x1f]  ;;  %v11774_v7 = vor.u32 %v16228_v0, %v11773_v58  ;;  %v11711_v50 = vld [vmem:[#allocation16 + $0x78] sm:$0xf0] }
 0x4fb   :  { %2204 = vst.msk [vmem:[#allocation2 + $0x10] sm:$0xf] %vm2137_vm13, %v2164_v1  ;;  %v2166_v3 = vpack.c.bf16 %v2164_v1, %v2164_v1  ;;  %v16197_v1 = vld [vmem:[#allocation16 + $0x4] sm:$0xf]  ;;  %v11829_v51 = vld [vmem:[#allocation16 + $0x160] sm:$0xf]  ;;  %v11714_v52 = vor.u32 %v16210_v49, %v11711_v50 }
 0x4fc   :  { %2680 = vmatpush.bf16.msra.mxu2 %v11690_v34  ;;  %v11831_v34 = vld [vmem:[#allocation16 + $0x170] sm:$0xf0]  ;;  %v11830_v56 = vor.u32 %v16243_v53, %v11829_v51  ;;  %v11813_v0 = vld [vmem:[#allocation16 + $0x140] sm:$0xf]  ;;  %v11853_v49 = vld [vmem:[#allocation16 + $0x188] sm:$0xf] }
 0x4fd   :  { %v11834_v57 = vor.u32 %v16241_v55, %v11831_v34  ;;  %v16248_v50 = vld [vmem:[#allocation16 + $0x194] sm:$0xf0]  ;;  %v16246_v51 = vld [vmem:[#allocation16 + $0x18c] sm:$0xf] }
 0x4fe   :  { %v11854_v34 = vor.u32 %v16248_v50, %v11853_v49  ;;  %v17373_v49 = vld [vmem:[#allocation8] sm:$0x1f] }
 0x500   :  { %2681 = vmatpush.bf16.msra.mxu2 %v11674_v59  ;;  %v11695_v59 = vld [vmem:[#allocation16 + $0x58] sm:$0xf0] }
 0x502   :  { %v2238_v12 = vld [vmem:[#allocation2 + $0xf] sm:$0x1f] }
 0x505   :  { %11647 = vmatmul.msk.bf16.gmra.mxu3 %vm2130_vm12, %v2166_v3  ;;  %v11655_v3 = vld [vmem:[#allocation16 + $0x10] sm:$0xf0] }
 0x506   :  { %v11658_v8 = vor.u32 %v16197_v1, %v11655_v3  ;;  %v16239_v1 = vld [vmem:[#allocation16 + $0x14c] sm:$0xf0]  ;;  %v16237_v3 = vld [vmem:[#allocation16 + $0x144] sm:$0xf] }
 0x508   :  { %2682 = vmatpush.bf16.msra.mxu2 %v11658_v8 }
 0x578   :  { %v2193_v63 = vpop.f32.mrf.mxu3 }
 0x579   :  { %2205 = vst.msk [vmem:[#allocation3] sm:$0xff] %vm1987_vm3, %v2193_v63  ;;  %v11654_v63 = vor.u32 %v16199_v54, %v11653_v62  ;;  %v16206_v62 = vld [vmem:[#allocation16 + $0x4c] sm:$0xf] }
 0x57a   :  { %v11698_v58 = vor.u32 %v16206_v62, %v11695_v59  ;;  %v16242_v62 = vld [vmem:[#allocation16 + $0x16c] sm:$0xf]  ;;  %v11839_v59 = vld [vmem:[#allocation16 + $0x178] sm:$0xf0] }
 0x57b   :  { %2656 = vmatpush.bf16.msra.mxu0 %v11654_v63  ;;  %v11814_v63 = vor.u32 %v16239_v1, %v11813_v0  ;;  %v11842_v0 = vor.u32 %v16242_v62, %v11839_v59  ;;  %v16240_v1 = vld [vmem:[#allocation16 + $0x154] sm:$0xf0] }
 0x57f   :  { %2701 = vmatpush.bf16.msrb.mxu0 %v11774_v7  ;;  %v16204_v7 = vld [vmem:[#allocation16 + $0x34] sm:$0xf0] }
 0x580   :  { %v2195_v5 = vpop.f32.mrf.mxu3  ;;  %v2212_v31 = vld [vmem:[#allocation3] sm:$0x1f] }
 0x581   :  { %2206 = vst.msk [vmem:[#allocation3 + $0x8] sm:$0xff] %vm1987_vm3, %v2195_v5  ;;  %v16226_v5 = vld [vmem:[#allocation16 + $0xec] sm:$0xf]  ;;  %vm2227_vm3 = vcmask 1044992  }
 0x582   :  { %2214 = vst.msk [vmem:[#allocation4] sm:$0x1f] %vm2213_vm2, %v2212_v31  ;;  %v11778_v10 = vor.u32 %v16226_v5, %v11775_v6  ;;  %v11862_v31 = vor.u32 %v16251_v28, %v11861_v26  ;;  %v11815_v5 = vld [vmem:[#allocation16 + $0x150] sm:$0xf0]  ;;  %v11677_v6 = vld [vmem:[#allocation16 + $0x28] sm:$0xf] }
 0x583   :  { %2702 = vmatpush.bf16.msrb.mxu0 %v11758_v15  ;;  %v11818_v8 = vor.u32 %v16237_v3, %v11815_v5  ;;  %v11678_v2 = vor.u32 %v16204_v7, %v11677_v6  ;;  %v16233_v15 = vld [vmem:[#allocation16 + $0x124] sm:$0xf]  ;;  %v16238_v3 = vld [vmem:[#allocation16 + $0x14c] sm:$0xf] }
 0x584   :  { %2727 = vmatpush.bf16.msrb.mxu2 %v11778_v10  ;;  %2664 = vmatpush.bf16.msra.mxu1 %v11862_v31  ;;  %v11679_v10 = vld [vmem:[#allocation16 + $0x38] sm:$0xf0]  ;;  %v16258_v31 = vld [vmem:[#allocation16 + $0x1ec] sm:$0xf] }
 0x585   :  { %v11682_v13 = vor.u32 %v16202_v9, %v11679_v10  ;;  %v16234_v9 = vld [vmem:[#allocation16 + $0x12c] sm:$0xf]  ;;  %v11807_v10 = vld [vmem:[#allocation16 + $0x138] sm:$0xf0] }
 0x588   :  { %v2198_v4 = vpop.f32.mrf.mxu3  ;;  %v2222_v11 = vld [vmem:[#allocation3 + $0x5] sm:$0x1f]  ;;  %v2236_v48 = vld [vmem:[#allocation3 + $0xa] sm:$0x1f]  ;;  %2728 = vmatpush.bf16.msrb.mxu2 %v11762_v16  ;;  %v11799_v16 = vld [vmem:[#allocation16 + $0x130] sm:$0xf0] }
 0x589   :  { %2208 = vst.msk [vmem:[#allocation3 + $0x10] sm:$0xf] %vm2207_vm1, %v2198_v4  ;;  %2224 = vrot.lane.b32.xlu2 %v2222_v11, %s17779_s2  ;;  %v11741_v4 = vld [vmem:[#allocation16 + $0xa8] sm:$0xf]  ;;  %v16220_v11 = vld [vmem:[#allocation16 + $0xb4] sm:$0xf0] }
 0x58a   :  { %2237 = vst.msk [vmem:[#allocation4 + $0x8] sm:$0x1f] %vm2213_vm2, %v2236_v48  ;;  %v11742_v23 = vor.u32 %v16220_v11, %v11741_v4  ;;  %v11710_v48 = vor.u32 %v16212_v46, %v11709_v45  ;;  %v11802_v4 = vor.u32 %v16233_v15, %v11799_v16  ;;  %v11662_v11 = vor.u32 %v16200_v18, %v11661_v17  ;;  %v16250_v45 = vld [vmem:[#allocation16 + $0x1ac] sm:$0xf]  ;;  %v11871_v46 = vld [vmem:[#allocation16 + $0x1b8] sm:$0xf0] }
 0x58b   :  { %v16232_v15 = vld [vmem:[#allocation16 + $0x114] sm:$0xf0]  ;;  %v16230_v16 = vld [vmem:[#allocation16 + $0x10c] sm:$0xf]  ;;  %v11791_v17 = vld [vmem:[#allocation16 + $0x118] sm:$0xf0] }
 0x58c   :  { %2703 = vmatpush.bf16.msrb.mxu0 %v11742_v23  ;;  %2729 = vmatpush.bf16.msrb.mxu2 %v11746_v27  ;;  %v11781_v23 = vld [vmem:[#allocation16 + $0x100] sm:$0xf]  ;;  %v11783_v27 = vld [vmem:[#allocation16 + $0x110] sm:$0xf0] }
 0x58d   :  { %v11782_v26 = vor.u32 %v16231_v24, %v11781_v23  ;;  %v11786_v28 = vor.u32 %v16229_v25, %v11783_v27 }
 0x590   :  { %v2200_v41 = vpop.f32.mrf.mxu3  ;;  %v2245_v43 = vld [vmem:[#allocation3 + $0xf] sm:$0x1f]  ;;  %2704 = vmatpush.bf16.msrb.mxu0 %v11726_v37  ;;  %2730 = vmatpush.bf16.msrb.mxu2 %v11730_v39  ;;  %v11906_v37 = vor.u32 %v16258_v31, %v11903_v33  ;;  %v11887_v39 = vld [vmem:[#allocation16 + $0x1d8] sm:$0xf0]  ;;  %v2319_v31 = vld [vmem:[#allocation17] sm:$0xf] }
 0x591   :  { %2217 = vrot.lane.b32.xlu2 %v2215_v42, %s17780_s0  ;;  %2247 = vrot.lane.b32.xlu0 %v2245_v43, %s17779_s2  ;;  %v16247_v41 = vld [vmem:[#allocation16 + $0x18c] sm:$0xf0]  ;;  %v16245_v42 = vld [vmem:[#allocation16 + $0x184] sm:$0xf]  ;;  %v2322_v33 = vperm.slane %v2319_v31, 1 }
 0x592   :  { %v11846_v43 = vor.u32 %v16247_v41, %v11845_v40  ;;  %v11850_v47 = vor.u32 %v16245_v42, %v11847_v44  ;;  %v11886_v40 = vor.u32 %v16256_v36, %v11885_v35  ;;  %v11890_v42 = vor.u32 %v16254_v38, %v11887_v39  ;;  %v16252_v44 = vld [vmem:[#allocation16 + $0x1b4] sm:$0xf0] }
 0x593   :  { %v2321_v36 = vperm.slane %v2319_v31, 0  ;;  %v2323_v38 = vperm.slane %v2319_v31, 2 }
 0x594   :  { %2665 = vmatpush.bf16.msra.mxu1 %v11846_v43  ;;  %2691 = vmatpush.bf16.msra.mxu3 %v11850_v47  ;;  %v11869_v43 = vld [vmem:[#allocation16 + $0x1a8] sm:$0xf] }
 0x595   :  { %2705 = vmatpush.bf16.msrb.mxu0 %v11710_v48  ;;  %2731 = vmatpush.bf16.msrb.mxu2 %v11714_v52  ;;  %v11870_v47 = vor.u32 %v16252_v44, %v11869_v43  ;;  %v11874_v48 = vor.u32 %v16250_v45, %v11871_v46  ;;  %v11855_v52 = vld [vmem:[#allocation16 + $0x198] sm:$0xf0]  ;;  %v2324_v45 = vperm.slane %v2319_v31, 3  ;;  %v17372_v46 = vld [vmem:[#allocation8 + $0x8] sm:$0x1f] }
 0x598   :  { %2666 = vmatpush.bf16.msra.mxu1 %v11830_v56  ;;  %2692 = vmatpush.bf16.msra.mxu3 %v11834_v57  ;;  %v11858_v56 = vor.u32 %v16246_v51, %v11855_v52  ;;  %v17374_v51 = vld [vmem:[#allocation8 + $0x10] sm:$0x1f] }
 0x599   :  { %2231 = vrot.lane.b32.xlu2 %v2229_v61, %s17781_s17  ;;  %v11693_v61 = vld [vmem:[#allocation16 + $0x48] sm:$0xf]  ;;  %2732 = vmatpush.bf16.msrb.mxu2 %v11698_v58 }
 0x59a   :  { %v11694_v54 = vor.u32 %v16208_v60, %v11693_v61  ;;  %v11837_v61 = vld [vmem:[#allocation16 + $0x168] sm:$0xf]  ;;  %v16244_v60 = vld [vmem:[#allocation16 + $0x174] sm:$0xf0] }
 0x59b   :  { %v11821_v58 = vld [vmem:[#allocation16 + $0x148] sm:$0xf] }
 0x59c   :  { %2706 = vmatpush.bf16.msrb.mxu0 %v11694_v54  ;;  %2667 = vmatpush.bf16.msra.mxu1 %v11814_v63  ;;  %v11838_v54 = vor.u32 %v16244_v60, %v11837_v61  ;;  %v11823_v63 = vld [vmem:[#allocation16 + $0x158] sm:$0xf0]  ;;  %v11822_v6 = vor.u32 %v16240_v1, %v11821_v58 }
 0x59d   :  { %2693 = vmatpush.bf16.msra.mxu3 %v11818_v8  ;;  %2733 = vmatpush.bf16.msrb.mxu2 %v11682_v13  ;;  %v11826_v7 = vor.u32 %v16238_v3, %v11823_v63  ;;  %v11805_v8 = vld [vmem:[#allocation16 + $0x128] sm:$0xf]  ;;  %v11810_v13 = vor.u32 %v16234_v9, %v11807_v10  ;;  %v17783_v63 = vmov 512.0  }
 0x59e   :  { %17368 = vrcp.f32 %v17783_v63 }
 0x5a0   :  { %2707 = vmatpush.bf16.msrb.mxu0 %v11678_v2  ;;  %v16236_v2 = vld [vmem:[#allocation16 + $0x134] sm:$0xf0] }
 0x5a1   :  { %2240 = vrot.lane.b32.xlu2 %v2238_v12, %s17782_s8  ;;  %v11797_v12 = vld [vmem:[#allocation16 + $0x120] sm:$0xf]  ;;  %2694 = vmatpush.bf16.msra.mxu3 %v11802_v4 }
 0x5a2   :  { %v11798_v20 = vor.u32 %v16235_v14, %v11797_v12  ;;  %2734 = vmatpush.bf16.msrb.mxu2 %v11666_v22  ;;  %v11806_v12 = vor.u32 %v16236_v2, %v11805_v8  ;;  %v11789_v14 = vld [vmem:[#allocation16 + $0x108] sm:$0xf] }
 0x5a3   :  { %v11790_v19 = vor.u32 %v16232_v15, %v11789_v14 }
 0x5a4   :  { %2668 = vmatpush.bf16.msra.mxu1 %v11798_v20  ;;  %2708 = vmatpush.bf16.msrb.mxu0 %v11662_v11  ;;  %v11794_v20 = vor.u32 %v16230_v16, %v11791_v17 }
 0x5a5   :  { %2695 = vmatpush.bf16.msra.mxu3 %v11786_v28 }
 0x5a8   :  { %2669 = vmatpush.bf16.msra.mxu1 %v11782_v26 }
 0x5a9   :  { %2740 = vmatpush.bf16.msrb.mxu3 %v11906_v37 }
 0x5ac   :  { %2714 = vmatpush.bf16.msrb.mxu1 %v11902_v32 }
 0x5ad   :  { %2741 = vmatpush.bf16.msrb.mxu3 %v11890_v42 }
 0x5b0   :  { %2715 = vmatpush.bf16.msrb.mxu1 %v11886_v40 }
 0x5b1   :  { %2742 = vmatpush.bf16.msrb.mxu3 %v11874_v48 }
 0x5b4   :  { %2716 = vmatpush.bf16.msrb.mxu1 %v11870_v47 }
 0x5b5   :  { %2743 = vmatpush.bf16.msrb.mxu3 %v11858_v56 }
 0x5b8   :  { %2717 = vmatpush.bf16.msrb.mxu1 %v11854_v34 }
 0x5b9   :  { %2744 = vmatpush.bf16.msrb.mxu3 %v11842_v0 }
 0x5bc   :  { %2718 = vmatpush.bf16.msrb.mxu1 %v11838_v54  ;;  %v17375_v54 = vld [vmem:[#allocation8 + $0x18] sm:$0x1f] }
 0x5bd   :  { %2745 = vmatpush.bf16.msrb.mxu3 %v11826_v7 }
 0x5c0   :  { %2719 = vmatpush.bf16.msrb.mxu1 %v11822_v6 }
 0x5c1   :  { %2746 = vmatpush.bf16.msrb.mxu3 %v11810_v13 }
 0x5c4   :  { %2720 = vmatpush.bf16.msrb.mxu1 %v11806_v12 }
 0x5c5   :  { %2747 = vmatpush.bf16.msrb.mxu3 %v11794_v20 }
 0x5c8   :  { %2721 = vmatpush.bf16.msrb.mxu1 %v11790_v19 }
 0x5e3   :  { %v2225_v41 = vpop.permute.xlu2 %2224 }
 0x5e4   :  { %2228 = vst.msk [vmem:[#allocation4] sm:$0x1f] %vm2227_vm3, %v2225_v41 }
 0x5eb   :  { %v2218_v53 = vpop.permute.xlu2 %2217  ;;  %v2251_v55 = vld [vmem:[#allocation4] sm:$0x1f] }
 0x5ec   :  { %11648 = vst.msk [vmem:[%s18463_s16 + $0x8] sm:$0x1f] %vm2210_vm15, %v2218_v53  ;;  %v2253_v57 = vpack.c.bf16 %v2251_v55, %v2251_v55 }
 0x5ee   :  { %2657 = vmatmul.bf16.vlgmr.msra.gmra.mxu0 %v2253_v57  ;;  %2683 = vmatmul.bf16.vlgmr.msra.gmra.mxu2 %v2253_v57 }
 0x5f3   :  { %v2232_v5 = vpop.permute.xlu2 %2231 }
 0x5f4   :  { %11649 = vst.msk [vmem:[%s18463_s16 + $0x10] sm:$0x1f] %vm2210_vm15, %v2232_v5  ;;  %v17369_v5 = vpop.eup %17368 }
 0x5f5   :  { %v2767_v6 = vmul.f32 512.0, %v17369_v5  ;;  %vm2771_vm4 = vweird.f32 %v17369_v5 }
 0x5f7   :  { %v2768_v7 = vsub.f32 1.0, %v2767_v6 }
 0x5f9   :  { %v2769_v8 = vmul.f32 %v17369_v5, %v2768_v7 }
 0x5fb   :  { %v2241_v18 = vpop.permute.xlu2 %2240  ;;  %v2770_v2 = vadd.f32 %v17369_v5, %v2769_v8 }
 0x5fc   :  { %11650 = vst.msk [vmem:[%s18463_s16 + $0x18] sm:$0x1f] %vm2210_vm15, %v2241_v18 }
 0x5fd   :  { %v18080_v9 = vsel %vm2771_vm4, %v17369_v5, %v2770_v2 }
 0x5fe   :  { %2709 = vmatmul.bf16.vlgmr.msrb.gmra.mxu0 %v2253_v57  ;;  %2735 = vmatmul.bf16.vlgmr.msrb.gmra.mxu2 %v2253_v57 }
 0x603   :  { %v2248_v21 = vpop.permute.xlu0 %2247 }
 0x604   :  { %2250 = vst.msk [vmem:[#allocation4 + $0x8] sm:$0x1f] %vm2227_vm3, %v2248_v21 }
 0x60b   :  { %v2252_v4 = vld [vmem:[#allocation4 + $0x8] sm:$0x1f] }
 0x60c   :  { %v2254_v11 = vpack.c.bf16 %v2252_v4, %v2252_v4 }
 0x60e   :  { %2670 = vmatmul.bf16.vlgmr.msra.gmra.mxu1 %v2254_v11  ;;  %2696 = vmatmul.bf16.vlgmr.msra.gmra.mxu3 %v2254_v11 }
 0x61e   :  { %2722 = vmatmul.bf16.vlgmr.msrb.gmra.mxu1 %v2254_v11  ;;  %2748 = vmatmul.bf16.vlgmr.msrb.gmra.mxu3 %v2254_v11 }
 0x66b   :  { %v2658_v22 = vpop.f32.mrf.mxu0 }
 0x66c   :  { %v2659_v39 = vadd.f32 %v2658_v22, %v2321_v36 }
 0x671   :  { %v2684_v23 = vpop.f32.mrf.mxu2 }
 0x672   :  { %v2685_v37 = vadd.f32 %v2684_v23, %v2322_v33  ;;  %v2807_v33 = vld [vmem:[#allocation19] sm:$0xf] }
 0x673   :  { %v2660_v24 = vpop.f32.mrf.mxu0 }
 0x679   :  { %v2686_v25 = vpop.f32.mrf.mxu2 }
 0x67b   :  { %v2710_v26 = vpop.f32.mrf.mxu0 }
 0x67c   :  { %v2711_v42 = vadd.f32 %v2710_v26, %v2323_v38 }
 0x681   :  { %v2736_v27 = vpop.f32.mrf.mxu2 }
 0x682   :  { %v2737_v53 = vadd.f32 %v2736_v27, %v2324_v45 }
 0x683   :  { %v2712_v28 = vpop.f32.mrf.mxu0 }
 0x689   :  { %v2738_v29 = vpop.f32.mrf.mxu2 }
 0x68b   :  { %v2671_v30 = vpop.f32.mrf.mxu1 }
 0x68c   :  { %v2672_v43 = vadd.f32 %v2671_v30, %v2659_v39  ;;  %v2810_v39 = vperm.slane %v2807_v33, 1 }
 0x68e   :  { %v2753_v50 = vadd.f32 %v17373_v49, %v2672_v43 }
 0x690   :  { %v2757_v56 = vsel %vm1745_vm0, %v2753_v50, 0.0 }
 0x691   :  { %v2697_v32 = vpop.f32.mrf.mxu3 }
 0x692   :  { %v2698_v40 = vadd.f32 %v2697_v32, %v2685_v37  ;;  %v2809_v37 = vperm.slane %v2807_v33, 0 }
 0x693   :  { %v2673_v35 = vpop.f32.mrf.mxu1 }
 0x694   :  { %v2754_v47 = vadd.f32 %v17372_v46, %v2698_v40  ;;  %v2821_v35 = vld [vmem:[#allocation20] sm:$0xf]  ;;  %v2811_v40 = vperm.slane %v2807_v33, 2 }
 0x695   :  { %v2824_v43 = vperm.slane %v2821_v35, 1  ;;  %v2826_v45 = vperm.slane %v2821_v35, 3 }
 0x696   :  { %v2758_v55 = vsel %vm1745_vm0, %v2754_v47, 0.0 }
 0x697   :  { %v2759_v62 = vadd.f32 %v2758_v55, %v2757_v56 }
 0x699   :  { %v2699_v41 = vpop.f32.mrf.mxu3 }
 0x69a   :  { %v2812_v41 = vperm.slane %v2807_v33, 3 }
 0x69b   :  { %v2723_v44 = vpop.f32.mrf.mxu1 }
 0x69c   :  { %v2724_v48 = vadd.f32 %v2723_v44, %v2711_v42  ;;  %v2823_v42 = vperm.slane %v2821_v35, 0  ;;  %v2825_v44 = vperm.slane %v2821_v35, 2 }
 0x69e   :  { %v2755_v52 = vadd.f32 %v17374_v51, %v2724_v48 }
 0x6a0   :  { %v2760_v61 = vsel %vm1745_vm0, %v2755_v52, 0.0 }
 0x6a1   :  { %v2749_v34 = vpop.f32.mrf.mxu3  ;;  %v2761_v58 = vadd.f32 %v2760_v61, %v2759_v62 }
 0x6a2   :  { %v2750_v57 = vadd.f32 %v2749_v34, %v2737_v53 }
 0x6a3   :  { %v2725_v60 = vpop.f32.mrf.mxu1 }
 0x6a4   :  { %v2756_v59 = vadd.f32 %v17375_v54, %v2750_v57 }
 0x6a6   :  { %v2762_v0 = vsel %vm1745_vm0, %v2756_v59, 0.0 }
 0x6a7   :  { %v2763_v1 = vadd.f32 %v2762_v0, %v2761_v58 }
 0x6a9   :  { %v2751_v3 = vpop.f32.mrf.mxu3  ;;  %2764 = vadd.xlane.f32.xlu1 %v2763_v1 }
 0x71c   :  { %v2765_v10 = vpop.xlane.xlu1 %2764 }
 0x71d   :  { %v2773_v12 = vmul.f32 %v18080_v9, %v2765_v10 }
 0x71f   :  { %v2774_v13 = vsub.f32 %v2753_v50, %v2773_v12  ;;  %v2775_v14 = vsub.f32 %v2754_v47, %v2773_v12  ;;  %v2776_v15 = vsub.f32 %v2755_v52, %v2773_v12  ;;  %v2777_v16 = vsub.f32 %v2756_v59, %v2773_v12 }
 0x721   :  { %v2778_v17 = vmul.f32 %v2774_v13, %v2774_v13  ;;  %v2779_v18 = vmul.f32 %v2775_v14, %v2775_v14  ;;  %v2780_v19 = vmul.f32 %v2776_v15, %v2776_v15  ;;  %v2781_v20 = vmul.f32 %v2777_v16, %v2777_v16 }
 0x723   :  { %v2782_v21 = vsel %vm1745_vm0, %v2778_v17, 0.0  ;;  %v2783_v4 = vsel %vm1745_vm0, %v2779_v18, 0.0  ;;  %v2785_v22 = vsel %vm1745_vm0, %v2780_v19, 0.0  ;;  %v2787_v24 = vsel %vm1745_vm0, %v2781_v20, 0.0 }
 0x724   :  { %v2784_v11 = vadd.f32 %v2783_v4, %v2782_v21 }
 0x726   :  { %v2786_v23 = vadd.f32 %v2785_v22, %v2784_v11 }
 0x728   :  { %v2788_v25 = vadd.f32 %v2787_v24, %v2786_v23 }
 0x72a   :  { %2789 = vadd.xlane.f32.xlu0 %v2788_v25 }
 0x79d   :  { %v2790_v26 = vpop.xlane.xlu0 %2789 }
 0x79e   :  { %v2791_v27 = vmul.f32 %v2790_v26, %v18080_v9 }
 0x7a0   :  { %v2792_v28 = vadd.f32 1e-05, %v2791_v27 }
 0x7a2   :  { %17370 = vrsqrt.f32 %v2792_v28  ;;  %vm2799_vm6 = vweird.f32 %v2792_v28 }
 0x7a8   :  { %v17371_v29 = vpop.eup %17370 }
 0x7a9   :  { %v2794_v30 = vmul.f32 %v17371_v29, %v2792_v28  ;;  %vm2800_vm5 = vweird.f32 %v17371_v29 }
 0x7aa   :  { %vm2801_vm7 = vmor %vm2799_vm6, %vm2800_vm5 }
 0x7ab   :  { %v2795_v31 = vmul.f32 %v17371_v29, %v2794_v30 }
 0x7ad   :  { %v2796_v32 = vmul.f32 0.5, %v2795_v31 }
 0x7af   :  { %v2797_v36 = vsub.f32 1.5, %v2796_v32 }
 0x7b1   :  { %v2798_v38 = vmul.f32 %v17371_v29, %v2797_v36 }
 0x7b3   :  { %v2802_v46 = vsel %vm2801_vm7, %v17371_v29, %v2798_v38 }
 0x7b4   :  { %v2803_v47 = vmul.f32 %v2802_v46, %v2774_v13  ;;  %v2804_v48 = vmul.f32 %v2802_v46, %v2775_v14  ;;  %v2805_v49 = vmul.f32 %v2802_v46, %v2776_v15  ;;  %v2806_v50 = vmul.f32 %v2802_v46, %v2777_v16 }
 0x7b6   :  { %v2817_v51 = vmul.f32 %v2809_v37, %v2803_v47  ;;  %v2818_v52 = vmul.f32 %v2810_v39, %v2804_v48  ;;  %v2819_v53 = vmul.f32 %v2811_v40, %v2805_v49  ;;  %v2820_v55 = vmul.f32 %v2812_v41, %v2806_v50 }
 0x7b8   :  { %v18094_v34 = vadd.f32 %v2823_v42, %v2817_v51  ;;  %v18096_v56 = vadd.f32 %v2824_v43, %v2818_v52  ;;  %v18098_v57 = vadd.f32 %v2825_v44, %v2819_v53  ;;  %v18100_v61 = vadd.f32 %v2826_v45, %v2820_v55 }
 0x7b9   :  { %17755 = dma.done.wait [#allocation7], 65536 }
 0x7ba   :  { %17756 = vsyncadd [#allocation7], 4294901760  ;;  %v12357_v60 = vld [vmem:[#allocation5 + $0x380] sm:$0xf] }
 0x7bb   :  { %v16381_v62 = vld [vmem:[#allocation5 + $0x3bc] sm:$0xf0] }
 0x7bc   :  { %v12869_v54 = vld [vmem:[#allocation5 + $0x780] sm:$0xf]  ;;  %v12358_v59 = vor.u32 %v16381_v62, %v12357_v60 }
 0x7bd   :  { %v16509_v58 = vld [vmem:[#allocation5 + $0x7bc] sm:$0xf0] }
 0x7be   :  { %v13381_v0 = vld [vmem:[#allocation5 + $0xb80] sm:$0xf]  ;;  %v12870_v3 = vor.u32 %v16509_v58, %v12869_v54  ;;  %5951 = vmatpush.bf16.msra.mxu0 %v12358_v59 }
 0x7bf   :  { %v16637_v1 = vld [vmem:[#allocation5 + $0xbbc] sm:$0xf0] }
 0x7c0   :  { %v13382_v63 = vor.u32 %v16637_v1, %v13381_v0  ;;  %v13893_v5 = vld [vmem:[#allocation5 + $0xf80] sm:$0xf]  ;;  %5964 = vmatpush.bf16.msra.mxu1 %v12870_v3 }
 0x7c1   :  { %v16765_v6 = vld [vmem:[#allocation5 + $0xfbc] sm:$0xf0] }
 0x7c2   :  { %v12293_v7 = vld [vmem:[#allocation5 + $0x300] sm:$0xf]  ;;  %v13894_v8 = vor.u32 %v16765_v6, %v13893_v5  ;;  %5977 = vmatpush.bf16.msra.mxu2 %v13382_v63 }
 0x7c3   :  { %v16365_v2 = vld [vmem:[#allocation5 + $0x33c] sm:$0xf0] }
 0x7c4   :  { %v12805_v10 = vld [vmem:[#allocation5 + $0x700] sm:$0xf]  ;;  %v12294_v13 = vor.u32 %v16365_v2, %v12293_v7  ;;  %5990 = vmatpush.bf16.msra.mxu3 %v13894_v8 }
 0x7c5   :  { %v16493_v12 = vld [vmem:[#allocation5 + $0x73c] sm:$0xf0] }
 0x7c6   :  { %v12806_v14 = vor.u32 %v16493_v12, %v12805_v10  ;;  %v13317_v15 = vld [vmem:[#allocation5 + $0xb00] sm:$0xf]  ;;  %5952 = vmatpush.bf16.msra.mxu0 %v12294_v13 }
 0x7c7   :  { %v16621_v16 = vld [vmem:[#allocation5 + $0xb3c] sm:$0xf0] }
 0x7c8   :  { %v13829_v17 = vld [vmem:[#allocation5 + $0xf00] sm:$0xf]  ;;  %v13318_v18 = vor.u32 %v16621_v16, %v13317_v15  ;;  %5965 = vmatpush.bf16.msra.mxu1 %v12806_v14 }
 0x7c9   :  { %v16749_v19 = vld [vmem:[#allocation5 + $0xf3c] sm:$0xf0] }
 0x7ca   :  { %v12229_v20 = vld [vmem:[#allocation5 + $0x280] sm:$0xf]  ;;  %v13830_v4 = vor.u32 %v16749_v19, %v13829_v17  ;;  %5978 = vmatpush.bf16.msra.mxu2 %v13318_v18 }
 0x7cb   :  { %v16349_v21 = vld [vmem:[#allocation5 + $0x2bc] sm:$0xf0] }
 0x7cc   :  { %v12741_v11 = vld [vmem:[#allocation5 + $0x680] sm:$0xf]  ;;  %v12230_v24 = vor.u32 %v16349_v21, %v12229_v20  ;;  %5991 = vmatpush.bf16.msra.mxu3 %v13830_v4 }
 0x7cd   :  { %v16477_v22 = vld [vmem:[#allocation5 + $0x6bc] sm:$0xf0] }
 0x7ce   :  { %v13253_v23 = vld [vmem:[#allocation5 + $0xa80] sm:$0xf]  ;;  %v12742_v28 = vor.u32 %v16477_v22, %v12741_v11  ;;  %5953 = vmatpush.bf16.msra.mxu0 %v12230_v24 }
 0x7cf   :  { %v16605_v25 = vld [vmem:[#allocation5 + $0xabc] sm:$0xf0] }
 0x7d0   :  { %v13765_v26 = vld [vmem:[#allocation5 + $0xe80] sm:$0xf]  ;;  %v13254_v29 = vor.u32 %v16605_v25, %v13253_v23  ;;  %5966 = vmatpush.bf16.msra.mxu1 %v12742_v28  ;;  %v16373_v28 = vld [vmem:[#allocation5 + $0x384] sm:$0xf] }
 0x7d1   :  { %v16733_v27 = vld [vmem:[#allocation5 + $0xebc] sm:$0xf0] }
 0x7d2   :  { %v12165_v30 = vld [vmem:[#allocation5 + $0x200] sm:$0xf]  ;;  %v13766_v33 = vor.u32 %v16733_v27, %v13765_v26  ;;  %5979 = vmatpush.bf16.msra.mxu2 %v13254_v29  ;;  %v12359_v29 = vld [vmem:[#allocation5 + $0x3c0] sm:$0xf0] }
 0x7d3   :  { %v16333_v31 = vld [vmem:[#allocation5 + $0x23c] sm:$0xf0] }
 0x7d4   :  { %v12677_v32 = vld [vmem:[#allocation5 + $0x600] sm:$0xf]  ;;  %v12166_v40 = vor.u32 %v16333_v31, %v12165_v30  ;;  %5992 = vmatpush.bf16.msra.mxu3 %v13766_v33  ;;  %v16501_v30 = vld [vmem:[#allocation5 + $0x784] sm:$0xf] }
 0x7d5   :  { %v16461_v35 = vld [vmem:[#allocation5 + $0x63c] sm:$0xf0]  ;;  %v16629_v33 = vld [vmem:[#allocation5 + $0xb84] sm:$0xf] }
 0x7d6   :  { %v13189_v36 = vld [vmem:[#allocation5 + $0xa00] sm:$0xf]  ;;  %v12678_v41 = vor.u32 %v16461_v35, %v12677_v32  ;;  %5954 = vmatpush.bf16.msra.mxu0 %v12166_v40  ;;  %v12871_v32 = vld [vmem:[#allocation5 + $0x7c0] sm:$0xf0] }
 0x7d7   :  { %v16589_v37 = vld [vmem:[#allocation5 + $0xa3c] sm:$0xf0]  ;;  %v13383_v35 = vld [vmem:[#allocation5 + $0xbc0] sm:$0xf0] }
 0x7d8   :  { %v13701_v38 = vld [vmem:[#allocation5 + $0xe00] sm:$0xf]  ;;  %v13190_v42 = vor.u32 %v16589_v37, %v13189_v36  ;;  %5967 = vmatpush.bf16.msra.mxu1 %v12678_v41  ;;  %v12362_v41 = vor.u32 %v16373_v28, %v12359_v29  ;;  %v12615_v28 = vld [vmem:[#allocation5 + $0x5c0] sm:$0xf0] }
 0x7d9   :  { %v16717_v39 = vld [vmem:[#allocation5 + $0xe3c] sm:$0xf0]  ;;  %v16565_v29 = vld [vmem:[#allocation5 + $0x984] sm:$0xf] }
 0x7da   :  { %v12101_v43 = vld [vmem:[#allocation5 + $0x180] sm:$0xf]  ;;  %v13702_v46 = vor.u32 %v16717_v39, %v13701_v38  ;;  %5980 = vmatpush.bf16.msra.mxu2 %v13190_v42  ;;  %v16757_v38 = vld [vmem:[#allocation5 + $0xf84] sm:$0xf]  ;;  %v12874_v42 = vor.u32 %v16501_v30, %v12871_v32 }
 0x7db   :  { %v16317_v44 = vld [vmem:[#allocation5 + $0x1bc] sm:$0xf0]  ;;  %v13895_v39 = vld [vmem:[#allocation5 + $0xfc0] sm:$0xf0] }
 0x7dc   :  { %v12613_v45 = vld [vmem:[#allocation5 + $0x580] sm:$0xf]  ;;  %v12102_v52 = vor.u32 %v16317_v44, %v12101_v43  ;;  %5993 = vmatpush.bf16.msra.mxu3 %v13702_v46  ;;  %v13386_v43 = vor.u32 %v16629_v33, %v13383_v35  ;;  %v16357_v44 = vld [vmem:[#allocation5 + $0x304] sm:$0xf] }
 0x7dd   :  { %v16445_v47 = vld [vmem:[#allocation5 + $0x5bc] sm:$0xf0]  ;;  %v16485_v46 = vld [vmem:[#allocation5 + $0x704] sm:$0xf] }
 0x7de   :  { %v13125_v48 = vld [vmem:[#allocation5 + $0x980] sm:$0xf]  ;;  %v12614_v53 = vor.u32 %v16445_v47, %v12613_v45  ;;  %5955 = vmatpush.bf16.msra.mxu0 %v12102_v52  ;;  %v12295_v45 = vld [vmem:[#allocation5 + $0x340] sm:$0xf0]  ;;  %v13898_v47 = vor.u32 %v16757_v38, %v13895_v39 }
 0x7df   :  { %v16573_v49 = vld [vmem:[#allocation5 + $0x9bc] sm:$0xf0]  ;;  %v16741_v52 = vld [vmem:[#allocation5 + $0xf04] sm:$0xf] }
 0x7e0   :  { %v13637_v50 = vld [vmem:[#allocation5 + $0xd80] sm:$0xf]  ;;  %v13126_v55 = vor.u32 %v16573_v49, %v13125_v48  ;;  %5968 = vmatpush.bf16.msra.mxu1 %v12614_v53  ;;  %v12807_v48 = vld [vmem:[#allocation5 + $0x740] sm:$0xf0] }
 0x7e1   :  { %v16701_v51 = vld [vmem:[#allocation5 + $0xdbc] sm:$0xf0]  ;;  %v16613_v49 = vld [vmem:[#allocation5 + $0xb04] sm:$0xf] }
 0x7e2   :  { %v12037_v60 = vld [vmem:[#allocation5 + $0x100] sm:$0xf]  ;;  %v13638_v59 = vor.u32 %v16701_v51, %v13637_v50  ;;  %5981 = vmatpush.bf16.msra.mxu2 %v13126_v55  ;;  %v13319_v50 = vld [vmem:[#allocation5 + $0xb40] sm:$0xf0]  ;;  %v18104_v51 = vpack.c.bf16 %v18098_v57, %v18098_v57  ;;  %v18108_v55 = vpack.c.bf16 %v18100_v61, %v18100_v61 }
 0x7e3   :  { %v16301_v62 = vld [vmem:[#allocation5 + $0x13c] sm:$0xf0]  ;;  %v13831_v53 = vld [vmem:[#allocation5 + $0xf40] sm:$0xf0] }
 0x7e4   :  { %v12549_v54 = vld [vmem:[#allocation5 + $0x500] sm:$0xf]  ;;  %v12038_v5 = vor.u32 %v16301_v62, %v12037_v60  ;;  %5994 = vmatpush.bf16.msra.mxu3 %v13638_v59  ;;  %v18112_v60 = vpack.c.bf16 %v18094_v34, %v18094_v34  ;;  %v12298_v62 = vor.u32 %v16357_v44, %v12295_v45  ;;  %v12810_v59 = vor.u32 %v16485_v46, %v12807_v48  ;;  %v13127_v30 = vld [vmem:[#allocation5 + $0x9c0] sm:$0xf0] }
 0x7e5   :  { %v16429_v58 = vld [vmem:[#allocation5 + $0x53c] sm:$0xf0]  ;;  %v13639_v32 = vld [vmem:[#allocation5 + $0xdc0] sm:$0xf0] }
 0x7e6   :  { %v13061_v0 = vld [vmem:[#allocation5 + $0x900] sm:$0xf]  ;;  %v12550_v6 = vor.u32 %v16429_v58, %v12549_v54  ;;  %5956 = vmatpush.bf16.msra.mxu0 %v12038_v5  ;;  %v18116_v54 = vpack.c.bf16 %v18096_v56, %v18096_v56  ;;  %v13322_v58 = vor.u32 %v16613_v49, %v13319_v50  ;;  %v12743_v5 = vld [vmem:[#allocation5 + $0x6c0] sm:$0xf0] }
 0x7e7   :  { %v16557_v1 = vld [vmem:[#allocation5 + $0x93c] sm:$0xf0]  ;;  %v12039_v38 = vld [vmem:[#allocation5 + $0x140] sm:$0xf0] }
 0x7e8   :  { %v13573_v3 = vld [vmem:[#allocation5 + $0xd00] sm:$0xf]  ;;  %v13062_v7 = vor.u32 %v16557_v1, %v13061_v0  ;;  %5969 = vmatpush.bf16.msra.mxu1 %v12550_v6  ;;  %v16341_v0 = vld [vmem:[#allocation5 + $0x284] sm:$0xf] }
 0x7e9   :  { %v16685_v63 = vld [vmem:[#allocation5 + $0xd3c] sm:$0xf0]  ;;  %v12231_v1 = vld [vmem:[#allocation5 + $0x2c0] sm:$0xf0] }
 0x7ea   :  { %v11973_v8 = vld [vmem:[#allocation5 + $0x80] sm:$0xf]  ;;  %v13574_v12 = vor.u32 %v16685_v63, %v13573_v3  ;;  %5982 = vmatpush.bf16.msra.mxu2 %v13062_v7  ;;  %v16469_v3 = vld [vmem:[#allocation5 + $0x684] sm:$0xf]  ;;  %v13834_v63 = vor.u32 %v16741_v52, %v13831_v53 }
 0x7eb   :  { %v16285_v2 = vld [vmem:[#allocation5 + $0xbc] sm:$0xf0]  ;;  %v16597_v6 = vld [vmem:[#allocation5 + $0xa84] sm:$0xf] }
 0x7ec   :  { %v12485_v10 = vld [vmem:[#allocation5 + $0x480] sm:$0xf]  ;;  %v11974_v18 = vor.u32 %v16285_v2, %v11973_v8  ;;  %5995 = vmatpush.bf16.msra.mxu3 %v13574_v12  ;;  %v13255_v7 = vld [vmem:[#allocation5 + $0xac0] sm:$0xf0]  ;;  %v12746_v12 = vor.u32 %v16469_v3, %v12743_v5 }
 0x7ed   :  { %v16413_v13 = vld [vmem:[#allocation5 + $0x4bc] sm:$0xf0]  ;;  %v16725_v8 = vld [vmem:[#allocation5 + $0xe84] sm:$0xf] }
 0x7ee   :  { %v12997_v14 = vld [vmem:[#allocation5 + $0x880] sm:$0xf]  ;;  %v12486_v21 = vor.u32 %v16413_v13, %v12485_v10  ;;  %5957 = vmatpush.bf16.msra.mxu0 %v11974_v18  ;;  %v13767_v2 = vld [vmem:[#allocation5 + $0xec0] sm:$0xf0]  ;;  %v12234_v10 = vor.u32 %v16341_v0, %v12231_v1  ;;  %v13258_v13 = vor.u32 %v16597_v6, %v13255_v7 }
 0x7ef   :  { %v16541_v15 = vld [vmem:[#allocation5 + $0x8bc] sm:$0xf0]  ;;  %v12679_v18 = vld [vmem:[#allocation5 + $0x640] sm:$0xf0] }
 0x7f0   :  { %v13509_v16 = vld [vmem:[#allocation5 + $0xc80] sm:$0xf]  ;;  %v12998_v4 = vor.u32 %v16541_v15, %v12997_v14  ;;  %5970 = vmatpush.bf16.msra.mxu1 %v12486_v21  ;;  %v16325_v14 = vld [vmem:[#allocation5 + $0x204] sm:$0xf] }
 0x7f1   :  { %v16669_v17 = vld [vmem:[#allocation5 + $0xcbc] sm:$0xf0]  ;;  %v12167_v15 = vld [vmem:[#allocation5 + $0x240] sm:$0xf0] }
 0x7f2   :  { %v11909_v19 = vld [vmem:[#allocation5] sm:$0xf]  ;;  %v13510_v24 = vor.u32 %v16669_v17, %v13509_v16  ;;  %5983 = vmatpush.bf16.msra.mxu2 %v12998_v4  ;;  %v16453_v16 = vld [vmem:[#allocation5 + $0x604] sm:$0xf]  ;;  %v13770_v17 = vor.u32 %v16725_v8, %v13767_v2 }
 0x7f3   :  { %v16269_v20 = vld [vmem:[#allocation5 + $0x3c] sm:$0xf0]  ;;  %v16709_v21 = vld [vmem:[#allocation5 + $0xe04] sm:$0xf] }
 0x7f4   :  { %v12421_v11 = vld [vmem:[#allocation5 + $0x400] sm:$0xf]  ;;  %v11910_v31 = vor.u32 %v16269_v20, %v11909_v19  ;;  %5996 = vmatpush.bf16.msra.mxu3 %v13510_v24  ;;  %v16581_v19 = vld [vmem:[#allocation5 + $0xa04] sm:$0xf] }
 0x7f5   :  { %v16397_v22 = vld [vmem:[#allocation5 + $0x43c] sm:$0xf0]  ;;  %v13191_v20 = vld [vmem:[#allocation5 + $0xa40] sm:$0xf0] }
 0x7f6   :  { %v12933_v23 = vld [vmem:[#allocation5 + $0x800] sm:$0xf]  ;;  %v12422_v36 = vor.u32 %v16397_v22, %v12421_v11  ;;  %5958 = vmatpush.bf16.msra.mxu0 %v11910_v31  ;;  %v13703_v4 = vld [vmem:[#allocation5 + $0xe40] sm:$0xf0]  ;;  %v12170_v11 = vor.u32 %v16325_v14, %v12167_v15  ;;  %v12682_v22 = vor.u32 %v16453_v16, %v12679_v18  ;;  %v12365_v16 = vld [vmem:[#allocation5 + $0x388] sm:$0xf] }
 0x7f7   :  { %v16525_v25 = vld [vmem:[#allocation5 + $0x83c] sm:$0xf0]  ;;  %v16309_v24 = vld [vmem:[#allocation5 + $0x184] sm:$0xf]  ;;  %v12877_v18 = vld [vmem:[#allocation5 + $0x788] sm:$0xf] }
 0x7f8   :  { %v13445_v26 = vld [vmem:[#allocation5 + $0xc00] sm:$0xf]  ;;  %v12934_v37 = vor.u32 %v16525_v25, %v12933_v23  ;;  %5971 = vmatpush.bf16.msra.mxu1 %v12422_v36  ;;  %v13194_v23 = vor.u32 %v16581_v19, %v13191_v20  ;;  %v12103_v25 = vld [vmem:[#allocation5 + $0x1c0] sm:$0xf0]  ;;  %v13130_v36 = vor.u32 %v16565_v29, %v13127_v30  ;;  %v16510_v20 = vld [vmem:[#allocation5 + $0x7c4] sm:$0xf0] }
 0x7f9   :  { %v16653_v27 = vld [vmem:[#allocation5 + $0xc3c] sm:$0xf0]  ;;  %5959 = vmatmul.bf16.vlgmr.msra.gmra.mxu0 %v18112_v60  ;;  %v16693_v31 = vld [vmem:[#allocation5 + $0xd84] sm:$0xf]  ;;  %v12106_v33 = vor.u32 %v16309_v24, %v12103_v25  ;;  %v16766_v24 = vld [vmem:[#allocation5 + $0xfc4] sm:$0xf0] }
 0x7fa   :  { %v13446_v40 = vor.u32 %v16653_v27, %v13445_v26  ;;  %5984 = vmatpush.bf16.msra.mxu2 %v12934_v37  ;;  %6003 = vmatpush.bf16.msrb.mxu0 %v12362_v41  ;;  %v16437_v26 = vld [vmem:[#allocation5 + $0x584] sm:$0xf]  ;;  %v13706_v27 = vor.u32 %v16709_v21, %v13703_v4  ;;  %v13389_v21 = vld [vmem:[#allocation5 + $0xb88] sm:$0xf] }
 0x7fb   :  { %5972 = vmatmul.bf16.vlgmr.msra.gmra.mxu1 %v18116_v54  ;;  %v12618_v35 = vor.u32 %v16437_v26, %v12615_v28  ;;  %v16293_v37 = vld [vmem:[#allocation5 + $0x104] sm:$0xf]  ;;  %v16638_v4 = vld [vmem:[#allocation5 + $0xbc4] sm:$0xf0] }
 0x7fc   :  { %5997 = vmatpush.bf16.msra.mxu3 %v13446_v40  ;;  %6016 = vmatpush.bf16.msrb.mxu1 %v12874_v42  ;;  %v16421_v39 = vld [vmem:[#allocation5 + $0x504] sm:$0xf]  ;;  %v13642_v40 = vor.u32 %v16693_v31, %v13639_v32  ;;  %v12042_v46 = vor.u32 %v16293_v37, %v12039_v38  ;;  %v13390_v28 = vor.u32 %v16638_v4, %v13389_v21  ;;  %v12301_v29 = vld [vmem:[#allocation5 + $0x308] sm:$0xf] }
 0x7fd   :  { %5985 = vmatmul.bf16.vlgmr.msra.gmra.mxu2 %v18104_v51  ;;  %v12551_v41 = vld [vmem:[#allocation5 + $0x540] sm:$0xf0]  ;;  %v16366_v30 = vld [vmem:[#allocation5 + $0x344] sm:$0xf0] }
 0x7fe   :  { %6029 = vmatpush.bf16.msrb.mxu2 %v13386_v43  ;;  %6004 = vmatpush.bf16.msrb.mxu0 %v12298_v62  ;;  %v16549_v42 = vld [vmem:[#allocation5 + $0x904] sm:$0xf]  ;;  %v12813_v31 = vld [vmem:[#allocation5 + $0x708] sm:$0xf] }
 0x7ff   :  { %5998 = vmatmul.bf16.vlgmr.msra.gmra.mxu3 %v18108_v55  ;;  %v13063_v43 = vld [vmem:[#allocation5 + $0x940] sm:$0xf0]  ;;  %v13837_v37 = vld [vmem:[#allocation5 + $0xf08] sm:$0xf] }
 0x800   :  { %6042 = vmatpush.bf16.msrb.mxu3 %v13898_v47  ;;  %6017 = vmatpush.bf16.msrb.mxu1 %v12810_v59  ;;  %v16677_v44 = vld [vmem:[#allocation5 + $0xd04] sm:$0xf]  ;;  %v12554_v47 = vor.u32 %v16421_v39, %v12551_v41  ;;  %v13066_v48 = vor.u32 %v16549_v42, %v13063_v43  ;;  %v16750_v38 = vld [vmem:[#allocation5 + $0xf44] sm:$0xf0]  ;;  %v12302_v39 = vor.u32 %v16366_v30, %v12301_v29 }
 0x801   :  { %v13575_v45 = vld [vmem:[#allocation5 + $0xd40] sm:$0xf0]  ;;  %v12237_v42 = vld [vmem:[#allocation5 + $0x288] sm:$0xf] }
 0x802   :  { %6030 = vmatpush.bf16.msrb.mxu2 %v13322_v58  ;;  %6005 = vmatpush.bf16.msrb.mxu0 %v12234_v10  ;;  %v16277_v49 = vld [vmem:[#allocation5 + $0x84] sm:$0xf]  ;;  %v13578_v53 = vor.u32 %v16677_v44, %v13575_v45  ;;  %v16350_v43 = vld [vmem:[#allocation5 + $0x2c4] sm:$0xf0]  ;;  %v13838_v45 = vor.u32 %v16750_v38, %v13837_v37 }
 0x803   :  { %v11975_v50 = vld [vmem:[#allocation5 + $0xc0] sm:$0xf0]  ;;  %v12749_v44 = vld [vmem:[#allocation5 + $0x688] sm:$0xf] }
 0x804   :  { %6043 = vmatpush.bf16.msrb.mxu3 %v13834_v63  ;;  %6018 = vmatpush.bf16.msrb.mxu1 %v12746_v12  ;;  %v16405_v52 = vld [vmem:[#allocation5 + $0x484] sm:$0xf]  ;;  %v11978_v3 = vor.u32 %v16277_v49, %v11975_v50  ;;  %v13773_v49 = vld [vmem:[#allocation5 + $0xe88] sm:$0xf] }
 0x805   :  { %v12487_v62 = vld [vmem:[#allocation5 + $0x4c0] sm:$0xf0]  ;;  %v16734_v50 = vld [vmem:[#allocation5 + $0xec4] sm:$0xf0] }
 0x806   :  { %6031 = vmatpush.bf16.msrb.mxu2 %v13258_v13  ;;  %6006 = vmatpush.bf16.msrb.mxu0 %v12170_v11  ;;  %v16533_v59 = vld [vmem:[#allocation5 + $0x884] sm:$0xf]  ;;  %v12490_v6 = vor.u32 %v16405_v52, %v12487_v62  ;;  %v12238_v52 = vor.u32 %v16350_v43, %v12237_v42  ;;  %v13581_v29 = vld [vmem:[#allocation5 + $0xd08] sm:$0xf] }
 0x807   :  { %v12999_v58 = vld [vmem:[#allocation5 + $0x8c0] sm:$0xf0]  ;;  %v16686_v30 = vld [vmem:[#allocation5 + $0xd44] sm:$0xf0] }
 0x808   :  { %6044 = vmatpush.bf16.msrb.mxu3 %v13770_v17  ;;  %6019 = vmatpush.bf16.msrb.mxu1 %v12682_v22  ;;  %v16661_v0 = vld [vmem:[#allocation5 + $0xc84] sm:$0xf]  ;;  %v13002_v7 = vor.u32 %v16533_v59, %v12999_v58  ;;  %v16382_v17 = vld [vmem:[#allocation5 + $0x3c4] sm:$0xf0]  ;;  %v13582_v38 = vor.u32 %v16686_v30, %v13581_v29  ;;  %v16470_v29 = vld [vmem:[#allocation5 + $0x68c] sm:$0xf] }
 0x809   :  { %v13511_v1 = vld [vmem:[#allocation5 + $0xcc0] sm:$0xf0]  ;;  %v12366_v26 = vor.u32 %v16382_v17, %v12365_v16  ;;  %v12173_v59 = vld [vmem:[#allocation5 + $0x208] sm:$0xf] }
 0x80a   :  { %6032 = vmatpush.bf16.msrb.mxu2 %v13194_v23  ;;  %6007 = vmatpush.bf16.msrb.mxu0 %v12106_v33  ;;  %v16261_v63 = vld [vmem:[#allocation5 + $0x4] sm:$0xf]  ;;  %v13514_v12 = vor.u32 %v16661_v0, %v13511_v1  ;;  %v13901_v23 = vld [vmem:[#allocation5 + $0xf88] sm:$0xf]  ;;  %v13774_v1 = vor.u32 %v16734_v50, %v13773_v49 }
 0x80b   :  { %v11911_v5 = vld [vmem:[#allocation5 + $0x40] sm:$0xf0]  ;;  %v13902_v32 = vor.u32 %v16766_v24, %v13901_v23  ;;  %v16494_v33 = vld [vmem:[#allocation5 + $0x744] sm:$0xf0] }
 0x80c   :  { %6045 = vmatpush.bf16.msrb.mxu3 %v13706_v27  ;;  %6020 = vmatpush.bf16.msrb.mxu1 %v12618_v35  ;;  %v16389_v8 = vld [vmem:[#allocation5 + $0x404] sm:$0xf]  ;;  %v11914_v19 = vor.u32 %v16261_v63, %v11911_v5  ;;  %v12878_v27 = vor.u32 %v16510_v20, %v12877_v18  ;;  %v13325_v35 = vld [vmem:[#allocation5 + $0xb08] sm:$0xf] }
 0x80d   :  { %v12423_v2 = vld [vmem:[#allocation5 + $0x440] sm:$0xf0]  ;;  %v16334_v58 = vld [vmem:[#allocation5 + $0x244] sm:$0xf0] }
 0x80e   :  { %6033 = vmatpush.bf16.msrb.mxu2 %v13130_v36  ;;  %6008 = vmatpush.bf16.msrb.mxu0 %v12042_v46  ;;  %v16517_v10 = vld [vmem:[#allocation5 + $0x804] sm:$0xf]  ;;  %v12426_v11 = vor.u32 %v16389_v8, %v12423_v2  ;;  %v16622_v36 = vld [vmem:[#allocation5 + $0xb44] sm:$0xf0]  ;;  %v12174_v8 = vor.u32 %v16334_v58, %v12173_v59 }
 0x80f   :  { %v12935_v13 = vld [vmem:[#allocation5 + $0x840] sm:$0xf0]  ;;  %v13326_v41 = vor.u32 %v16622_v36, %v13325_v35  ;;  %v16478_v46 = vld [vmem:[#allocation5 + $0x6c4] sm:$0xf0] }
 0x810   :  { %6046 = vmatpush.bf16.msrb.mxu3 %v13642_v40  ;;  %6021 = vmatpush.bf16.msrb.mxu1 %v12554_v47  ;;  %v16645_v14 = vld [vmem:[#allocation5 + $0xc04] sm:$0xf]  ;;  %v12938_v22 = vor.u32 %v16517_v10, %v12935_v13  ;;  %v12814_v40 = vor.u32 %v16494_v33, %v12813_v31  ;;  %v13261_v47 = vld [vmem:[#allocation5 + $0xa88] sm:$0xf] }
 0x811   :  { %v13447_v15 = vld [vmem:[#allocation5 + $0xc40] sm:$0xf0]  ;;  %v12685_v0 = vld [vmem:[#allocation5 + $0x608] sm:$0xf] }
 0x812   :  { %6034 = vmatpush.bf16.msrb.mxu2 %v13066_v48  ;;  %6009 = vmatpush.bf16.msrb.mxu0 %v11978_v3  ;;  %v13450_v25 = vor.u32 %v16645_v14, %v13447_v15  ;;  %v16606_v48 = vld [vmem:[#allocation5 + $0xac4] sm:$0xf0] }
 0x813   :  { %v13262_v62 = vor.u32 %v16606_v48, %v13261_v47  ;;  %v16462_v3 = vld [vmem:[#allocation5 + $0x644] sm:$0xf0] }
 0x814   :  { %6047 = vmatpush.bf16.msrb.mxu3 %v13578_v53  ;;  %6022 = vmatpush.bf16.msrb.mxu1 %v12490_v6  ;;  %v12750_v53 = vor.u32 %v16478_v46, %v12749_v44  ;;  %v13197_v63 = vld [vmem:[#allocation5 + $0xa08] sm:$0xf]  ;;  %v12686_v2 = vor.u32 %v16462_v3, %v12685_v0  ;;  %v16374_v0 = vld [vmem:[#allocation5 + $0x38c] sm:$0xf] }
 0x815   :  { %v16590_v5 = vld [vmem:[#allocation5 + $0xa44] sm:$0xf0]  ;;  %v16502_v3 = vld [vmem:[#allocation5 + $0x78c] sm:$0xf] }
 0x816   :  { %6035 = vmatpush.bf16.msrb.mxu2 %v13002_v7  ;;  %6010 = vmatpush.bf16.msrb.mxu0 %v11914_v19  ;;  %v13709_v6 = vld [vmem:[#allocation5 + $0xe08] sm:$0xf]  ;;  %v13198_v10 = vor.u32 %v16590_v5, %v13197_v63  ;;  %v12879_v5 = vld [vmem:[#allocation5 + $0x7c8] sm:$0xf0] }
 0x817   :  { %v16718_v7 = vld [vmem:[#allocation5 + $0xe44] sm:$0xf0] }
 0x818   :  { %6048 = vmatpush.bf16.msrb.mxu3 %v13514_v12  ;;  %6023 = vmatpush.bf16.msrb.mxu1 %v12426_v11  ;;  %v12109_v12 = vld [vmem:[#allocation5 + $0x188] sm:$0xf]  ;;  %v13710_v15 = vor.u32 %v16718_v7, %v13709_v6  ;;  %v16630_v6 = vld [vmem:[#allocation5 + $0xb8c] sm:$0xf] }
 0x819   :  { %6011 = vmatmul.bf16.vlgmr.msrb.gmra.mxu0 %v18112_v60  ;;  %v16318_v13 = vld [vmem:[#allocation5 + $0x1c4] sm:$0xf0]  ;;  %v13391_v7 = vld [vmem:[#allocation5 + $0xbc8] sm:$0xf0] }
 0x81a   :  { %6036 = vmatpush.bf16.msrb.mxu2 %v12938_v22  ;;  %6055 = vmatpush.bf16.msra.mxu0 %v12366_v26  ;;  %v12621_v14 = vld [vmem:[#allocation5 + $0x588] sm:$0xf]  ;;  %v12110_v21 = vor.u32 %v16318_v13, %v12109_v12  ;;  %v13903_v12 = vld [vmem:[#allocation5 + $0xfc8] sm:$0xf0] }
 0x81b   :  { %6024 = vmatmul.bf16.vlgmr.msrb.gmra.mxu1 %v18116_v54  ;;  %v16446_v16 = vld [vmem:[#allocation5 + $0x5c4] sm:$0xf0] }
 0x81c   :  { %6049 = vmatpush.bf16.msrb.mxu3 %v13450_v25  ;;  %6068 = vmatpush.bf16.msra.mxu1 %v12878_v27  ;;  %v13133_v17 = vld [vmem:[#allocation5 + $0x988] sm:$0xf]  ;;  %v12622_v4 = vor.u32 %v16446_v16, %v12621_v14  ;;  %v13394_v16 = vor.u32 %v16630_v6, %v13391_v7 }
 0x81d   :  { %6037 = vmatmul.bf16.vlgmr.msrb.gmra.mxu2 %v18104_v51  ;;  %v16574_v18 = vld [vmem:[#allocation5 + $0x9c4] sm:$0xf0] }
 0x81e   :  { %6081 = vmatpush.bf16.msra.mxu2 %v13390_v28  ;;  %6056 = vmatpush.bf16.msra.mxu0 %v12302_v39  ;;  %v13645_v19 = vld [vmem:[#allocation5 + $0xd88] sm:$0xf]  ;;  %v13134_v11 = vor.u32 %v16574_v18, %v13133_v17  ;;  %v16358_v17 = vld [vmem:[#allocation5 + $0x30c] sm:$0xf] }
 0x81f   :  { %6050 = vmatmul.bf16.vlgmr.msrb.gmra.mxu3 %v18108_v55  ;;  %v16702_v20 = vld [vmem:[#allocation5 + $0xdc4] sm:$0xf0]  ;;  %v12303_v18 = vld [vmem:[#allocation5 + $0x348] sm:$0xf0] }
 0x820   :  { %6094 = vmatpush.bf16.msra.mxu3 %v13902_v32  ;;  %6069 = vmatpush.bf16.msra.mxu1 %v12814_v40  ;;  %v12045_v22 = vld [vmem:[#allocation5 + $0x108] sm:$0xf]  ;;  %v13646_v25 = vor.u32 %v16702_v20, %v13645_v19  ;;  %v16486_v19 = vld [vmem:[#allocation5 + $0x70c] sm:$0xf] }
 0x821   :  { %v16302_v23 = vld [vmem:[#allocation5 + $0x144] sm:$0xf0] }
 0x822   :  { %6082 = vmatpush.bf16.msra.mxu2 %v13326_v41  ;;  %6057 = vmatpush.bf16.msra.mxu0 %v12238_v52  ;;  %v12557_v24 = vld [vmem:[#allocation5 + $0x508] sm:$0xf]  ;;  %v12046_v31 = vor.u32 %v16302_v23, %v12045_v22  ;;  %v16742_v22 = vld [vmem:[#allocation5 + $0xf0c] sm:$0xf] }
 0x823   :  { %v16430_v26 = vld [vmem:[#allocation5 + $0x544] sm:$0xf0]  ;;  %v13839_v23 = vld [vmem:[#allocation5 + $0xf48] sm:$0xf0] }
 0x824   :  { %6095 = vmatpush.bf16.msra.mxu3 %v13838_v45  ;;  %6070 = vmatpush.bf16.msra.mxu1 %v12750_v53  ;;  %v13069_v27 = vld [vmem:[#allocation5 + $0x908] sm:$0xf]  ;;  %v12558_v32 = vor.u32 %v16430_v26, %v12557_v24  ;;  %v12306_v24 = vor.u32 %v16358_v17, %v12303_v18  ;;  %v13842_v30 = vor.u32 %v16742_v22, %v13839_v23  ;;  %v16678_v17 = vld [vmem:[#allocation5 + $0xd0c] sm:$0xf] }
 0x825   :  { %v16558_v28 = vld [vmem:[#allocation5 + $0x944] sm:$0xf0]  ;;  %v13583_v18 = vld [vmem:[#allocation5 + $0xd48] sm:$0xf0] }
 0x826   :  { %6083 = vmatpush.bf16.msra.mxu2 %v13262_v62  ;;  %6058 = vmatpush.bf16.msra.mxu0 %v12174_v8  ;;  %v13070_v33 = vor.u32 %v16558_v28, %v13069_v27  ;;  %v11981_v35 = vld [vmem:[#allocation5 + $0x88] sm:$0xf]  ;;  %v16342_v27 = vld [vmem:[#allocation5 + $0x28c] sm:$0xf]  ;;  %v13586_v23 = vor.u32 %v16678_v17, %v13583_v18  ;;  %v12757_v17 = vld [vmem:[#allocation5 + $0x690] sm:$0xf] }
 0x827   :  { %v16286_v36 = vld [vmem:[#allocation5 + $0xc4] sm:$0xf0]  ;;  %v12239_v28 = vld [vmem:[#allocation5 + $0x2c8] sm:$0xf0] }
 0x828   :  { %6096 = vmatpush.bf16.msra.mxu3 %v13774_v1  ;;  %6071 = vmatpush.bf16.msra.mxu1 %v12686_v2  ;;  %v12493_v37 = vld [vmem:[#allocation5 + $0x488] sm:$0xf]  ;;  %v11982_v44 = vor.u32 %v16286_v36, %v11981_v35  ;;  %v12367_v1 = vld [vmem:[#allocation5 + $0x3c8] sm:$0xf0] }
 0x829   :  { %v16414_v39 = vld [vmem:[#allocation5 + $0x4c4] sm:$0xf0]  ;;  %v12370_v14 = vor.u32 %v16374_v0, %v12367_v1  ;;  %v16726_v35 = vld [vmem:[#allocation5 + $0xe8c] sm:$0xf] }
 0x82a   :  { %6084 = vmatpush.bf16.msra.mxu2 %v13198_v10  ;;  %6059 = vmatpush.bf16.msra.mxu0 %v12110_v21  ;;  %v13005_v40 = vld [vmem:[#allocation5 + $0x888] sm:$0xf]  ;;  %v12494_v47 = vor.u32 %v16414_v39, %v12493_v37  ;;  %v16758_v10 = vld [vmem:[#allocation5 + $0xf8c] sm:$0xf]  ;;  %v12242_v37 = vor.u32 %v16342_v27, %v12239_v28 }
 0x82b   :  { %v16542_v41 = vld [vmem:[#allocation5 + $0x8c4] sm:$0xf0]  ;;  %v13906_v20 = vor.u32 %v16758_v10, %v13903_v12  ;;  %v12815_v21 = vld [vmem:[#allocation5 + $0x748] sm:$0xf0] }
 0x82c   :  { %6097 = vmatpush.bf16.msra.mxu3 %v13710_v15  ;;  %6072 = vmatpush.bf16.msra.mxu1 %v12622_v4  ;;  %v13517_v42 = vld [vmem:[#allocation5 + $0xc88] sm:$0xf]  ;;  %v13006_v48 = vor.u32 %v16542_v41, %v13005_v40  ;;  %v12882_v15 = vor.u32 %v16502_v3, %v12879_v5  ;;  %v16614_v4 = vld [vmem:[#allocation5 + $0xb0c] sm:$0xf] }
 0x82d   :  { %v16670_v43 = vld [vmem:[#allocation5 + $0xcc4] sm:$0xf0]  ;;  %v13775_v36 = vld [vmem:[#allocation5 + $0xec8] sm:$0xf0] }
 0x82e   :  { %6085 = vmatpush.bf16.msra.mxu2 %v13134_v11  ;;  %6060 = vmatpush.bf16.msra.mxu0 %v12046_v31  ;;  %v11917_v45 = vld [vmem:[#allocation5 + $0x8] sm:$0xf]  ;;  %v13518_v53 = vor.u32 %v16670_v43, %v13517_v42  ;;  %v13327_v11 = vld [vmem:[#allocation5 + $0xb48] sm:$0xf0]  ;;  %v13778_v43 = vor.u32 %v16726_v35, %v13775_v36 }
 0x82f   :  { %v16270_v46 = vld [vmem:[#allocation5 + $0x44] sm:$0xf0]  ;;  %v13330_v26 = vor.u32 %v16614_v4, %v13327_v11  ;;  %v12751_v31 = vld [vmem:[#allocation5 + $0x6c8] sm:$0xf0] }
 0x830   :  { %6098 = vmatpush.bf16.msra.mxu3 %v13646_v25  ;;  %6073 = vmatpush.bf16.msra.mxu1 %v12558_v32  ;;  %v12429_v49 = vld [vmem:[#allocation5 + $0x408] sm:$0xf]  ;;  %v11918_v63 = vor.u32 %v16270_v46, %v11917_v45  ;;  %v12818_v25 = vor.u32 %v16486_v19, %v12815_v21  ;;  %v16598_v32 = vld [vmem:[#allocation5 + $0xa8c] sm:$0xf] }
 0x831   :  { %v16398_v50 = vld [vmem:[#allocation5 + $0x444] sm:$0xf0]  ;;  %v16326_v40 = vld [vmem:[#allocation5 + $0x20c] sm:$0xf] }
 0x832   :  { %6086 = vmatpush.bf16.msra.mxu2 %v13070_v33  ;;  %v12941_v52 = vld [vmem:[#allocation5 + $0x808] sm:$0xf]  ;;  %6061 = vmatpush.bf16.msra.mxu0 %v11982_v44  ;;  %v12430_v8 = vor.u32 %v16398_v50, %v12429_v49  ;;  %v13263_v33 = vld [vmem:[#allocation5 + $0xac8] sm:$0xf0] }
 0x833   :  { %v16526_v62 = vld [vmem:[#allocation5 + $0x844] sm:$0xf0]  ;;  %v13266_v39 = vor.u32 %v16598_v32, %v13263_v33  ;;  %v12175_v41 = vld [vmem:[#allocation5 + $0x248] sm:$0xf0] }
 0x834   :  { %6099 = vmatpush.bf16.msra.mxu3 %v13582_v38  ;;  %v13453_v59 = vld [vmem:[#allocation5 + $0xc08] sm:$0xf]  ;;  %6074 = vmatpush.bf16.msra.mxu1 %v12494_v47  ;;  %v12942_v2 = vor.u32 %v16526_v62, %v12941_v52  ;;  %v12754_v38 = vor.u32 %v16470_v29, %v12751_v31  ;;  %v16454_v42 = vld [vmem:[#allocation5 + $0x60c] sm:$0xf]  ;;  %v12178_v49 = vor.u32 %v16326_v40, %v12175_v41 }
 0x835   :  { %v16654_v58 = vld [vmem:[#allocation5 + $0xc44] sm:$0xf0]  ;;  %v12687_v44 = vld [vmem:[#allocation5 + $0x648] sm:$0xf0] }
 0x836   :  { %6087 = vmatpush.bf16.msra.mxu2 %v13006_v48  ;;  %v13454_v13 = vor.u32 %v16654_v58, %v13453_v59  ;;  %6062 = vmatpush.bf16.msra.mxu0 %v11918_v63  ;;  %v16582_v45 = vld [vmem:[#allocation5 + $0xa0c] sm:$0xf]  ;;  %v12690_v50 = vor.u32 %v16454_v42, %v12687_v44  ;;  %v12373_v42 = vld [vmem:[#allocation5 + $0x390] sm:$0xf] }
 0x837   :  { %v13199_v46 = vld [vmem:[#allocation5 + $0xa48] sm:$0xf0]  ;;  %v12885_v44 = vld [vmem:[#allocation5 + $0x790] sm:$0xf] }
 0x838   :  { %6100 = vmatpush.bf16.msra.mxu3 %v13518_v53  ;;  %6075 = vmatpush.bf16.msra.mxu1 %v12430_v8  ;;  %v16710_v47 = vld [vmem:[#allocation5 + $0xe0c] sm:$0xf]  ;;  %v13202_v52 = vor.u32 %v16582_v45, %v13199_v46  ;;  %v16511_v46 = vld [vmem:[#allocation5 + $0x7cc] sm:$0xf0] }
 0x839   :  { %6063 = vmatmul.bf16.vlgmr.msra.gmra.mxu0 %v18112_v60  ;;  %v13711_v48 = vld [vmem:[#allocation5 + $0xe48] sm:$0xf0] }
 0x83a   :  { %6088 = vmatpush.bf16.msra.mxu2 %v12942_v2  ;;  %6107 = vmatpush.bf16.msrb.mxu0 %v12370_v14  ;;  %v16310_v53 = vld [vmem:[#allocation5 + $0x18c] sm:$0xf]  ;;  %v13714_v58 = vor.u32 %v16710_v47, %v13711_v48  ;;  %v13397_v47 = vld [vmem:[#allocation5 + $0xb90] sm:$0xf] }
 0x83b   :  { %6076 = vmatmul.bf16.vlgmr.msra.gmra.mxu1 %v18116_v54  ;;  %v12111_v62 = vld [vmem:[#allocation5 + $0x1c8] sm:$0xf0]  ;;  %v16639_v48 = vld [vmem:[#allocation5 + $0xbcc] sm:$0xf0] }
 0x83c   :  { %6101 = vmatpush.bf16.msra.mxu3 %v13454_v13  ;;  %6120 = vmatpush.bf16.msrb.mxu1 %v12882_v15  ;;  %v16438_v59 = vld [vmem:[#allocation5 + $0x58c] sm:$0xf]  ;;  %v12114_v6 = vor.u32 %v16310_v53, %v12111_v62  ;;  %v16767_v53 = vld [vmem:[#allocation5 + $0xfcc] sm:$0xf0] }
 0x83d   :  { %6089 = vmatmul.bf16.vlgmr.msra.gmra.mxu2 %v18104_v51  ;;  %v12623_v0 = vld [vmem:[#allocation5 + $0x5c8] sm:$0xf0] }
 0x83e   :  { %6133 = vmatpush.bf16.msrb.mxu2 %v13394_v16  ;;  %6108 = vmatpush.bf16.msrb.mxu0 %v12306_v24  ;;  %v16566_v1 = vld [vmem:[#allocation5 + $0x98c] sm:$0xf]  ;;  %v12626_v7 = vor.u32 %v16438_v59, %v12623_v0  ;;  %v13398_v0 = vor.u32 %v16639_v48, %v13397_v47 }
 0x83f   :  { %6102 = vmatmul.bf16.vlgmr.msra.gmra.mxu3 %v18108_v55  ;;  %v13135_v3 = vld [vmem:[#allocation5 + $0x9c8] sm:$0xf0] }
 0x840   :  { %6146 = vmatpush.bf16.msrb.mxu3 %v13906_v20  ;;  %6121 = vmatpush.bf16.msrb.mxu1 %v12818_v25  ;;  %v16694_v63 = vld [vmem:[#allocation5 + $0xd8c] sm:$0xf]  ;;  %v13138_v8 = vor.u32 %v16566_v1, %v13135_v3  ;;  %v12309_v1 = vld [vmem:[#allocation5 + $0x310] sm:$0xf] }
 0x841   :  { %v13647_v5 = vld [vmem:[#allocation5 + $0xdc8] sm:$0xf0]  ;;  %v16367_v3 = vld [vmem:[#allocation5 + $0x34c] sm:$0xf0] }
 0x842   :  { %6134 = vmatpush.bf16.msrb.mxu2 %v13330_v26  ;;  %6109 = vmatpush.bf16.msrb.mxu0 %v12242_v37  ;;  %v16294_v2 = vld [vmem:[#allocation5 + $0x10c] sm:$0xf]  ;;  %v13650_v13 = vor.u32 %v16694_v63, %v13647_v5  ;;  %v12821_v63 = vld [vmem:[#allocation5 + $0x710] sm:$0xf] }
 0x843   :  { %v12047_v10 = vld [vmem:[#allocation5 + $0x148] sm:$0xf0] }
 0x844   :  { %6147 = vmatpush.bf16.msrb.mxu3 %v13842_v30  ;;  %6122 = vmatpush.bf16.msrb.mxu1 %v12754_v38  ;;  %v16422_v12 = vld [vmem:[#allocation5 + $0x50c] sm:$0xf]  ;;  %v12050_v19 = vor.u32 %v16294_v2, %v12047_v10  ;;  %v13845_v2 = vld [vmem:[#allocation5 + $0xf10] sm:$0xf] }
 0x845   :  { %v12559_v14 = vld [vmem:[#allocation5 + $0x548] sm:$0xf0]  ;;  %v16751_v10 = vld [vmem:[#allocation5 + $0xf4c] sm:$0xf0] }
 0x846   :  { %6135 = vmatpush.bf16.msrb.mxu2 %v13266_v39  ;;  %6110 = vmatpush.bf16.msrb.mxu0 %v12178_v49  ;;  %v16550_v15 = vld [vmem:[#allocation5 + $0x90c] sm:$0xf]  ;;  %v12562_v20 = vor.u32 %v16422_v12, %v12559_v14  ;;  %v12310_v12 = vor.u32 %v16367_v3, %v12309_v1  ;;  %v13846_v18 = vor.u32 %v16751_v10, %v13845_v2  ;;  %v13589_v1 = vld [vmem:[#allocation5 + $0xd10] sm:$0xf] }
 0x847   :  { %v13071_v16 = vld [vmem:[#allocation5 + $0x948] sm:$0xf0]  ;;  %v16687_v3 = vld [vmem:[#allocation5 + $0xd4c] sm:$0xf0] }
 0x848   :  { %6148 = vmatpush.bf16.msrb.mxu3 %v13778_v43  ;;  %6123 = vmatpush.bf16.msrb.mxu1 %v12690_v50  ;;  %v13074_v21 = vor.u32 %v16550_v15, %v13071_v16  ;;  %v16278_v4 = vld [vmem:[#allocation5 + $0x8c] sm:$0xf]  ;;  %v16383_v43 = vld [vmem:[#allocation5 + $0x3cc] sm:$0xf0]  ;;  %v13590_v10 = vor.u32 %v16687_v3, %v13589_v1  ;;  %v16471_v1 = vld [vmem:[#allocation5 + $0x694] sm:$0xf] }
 0x849   :  { %v11983_v11 = vld [vmem:[#allocation5 + $0xc8] sm:$0xf0]  ;;  %v12374_v59 = vor.u32 %v16383_v43, %v12373_v42  ;;  %v12245_v15 = vld [vmem:[#allocation5 + $0x290] sm:$0xf] }
 0x84a   :  { %6136 = vmatpush.bf16.msrb.mxu2 %v13202_v52  ;;  %6111 = vmatpush.bf16.msrb.mxu0 %v12114_v6  ;;  %v16406_v22 = vld [vmem:[#allocation5 + $0x48c] sm:$0xf]  ;;  %v11986_v29 = vor.u32 %v16278_v4, %v11983_v11  ;;  %v13909_v52 = vld [vmem:[#allocation5 + $0xf90] sm:$0xf] }
 0x84b   :  { %v12495_v24 = vld [vmem:[#allocation5 + $0x4c8] sm:$0xf0]  ;;  %v13910_v5 = vor.u32 %v16767_v53, %v13909_v52  ;;  %v16495_v6 = vld [vmem:[#allocation5 + $0x74c] sm:$0xf0] }
 0x84c   :  { %6149 = vmatpush.bf16.msrb.mxu3 %v13714_v58  ;;  %6124 = vmatpush.bf16.msrb.mxu1 %v12626_v7  ;;  %v16534_v25 = vld [vmem:[#allocation5 + $0x88c] sm:$0xf]  ;;  %v12498_v32 = vor.u32 %v16406_v22, %v12495_v24  ;;  %v12886_v58 = vor.u32 %v16511_v46, %v12885_v44  ;;  %v13333_v7 = vld [vmem:[#allocation5 + $0xb10] sm:$0xf] }
 0x84d   :  { %v13007_v26 = vld [vmem:[#allocation5 + $0x8c8] sm:$0xf0]  ;;  %v16351_v16 = vld [vmem:[#allocation5 + $0x2cc] sm:$0xf0] }
 0x84e   :  { %6137 = vmatpush.bf16.msrb.mxu2 %v13138_v8  ;;  %v16662_v27 = vld [vmem:[#allocation5 + $0xc8c] sm:$0xf]  ;;  %6112 = vmatpush.bf16.msrb.mxu0 %v12050_v19  ;;  %v13010_v33 = vor.u32 %v16534_v25, %v13007_v26  ;;  %v16623_v8 = vld [vmem:[#allocation5 + $0xb4c] sm:$0xf0]  ;;  %v12246_v22 = vor.u32 %v16351_v16, %v12245_v15 }
 0x84f   :  { %v13519_v28 = vld [vmem:[#allocation5 + $0xcc8] sm:$0xf0]  ;;  %v13334_v14 = vor.u32 %v16623_v8, %v13333_v7  ;;  %v16479_v19 = vld [vmem:[#allocation5 + $0x6cc] sm:$0xf0] }
 0x850   :  { %6150 = vmatpush.bf16.msrb.mxu3 %v13650_v13  ;;  %v16262_v30 = vld [vmem:[#allocation5 + $0xc] sm:$0xf]  ;;  %6125 = vmatpush.bf16.msrb.mxu1 %v12562_v20  ;;  %v13522_v38 = vor.u32 %v16662_v27, %v13519_v28  ;;  %v12822_v13 = vor.u32 %v16495_v6, %v12821_v63  ;;  %v13269_v20 = vld [vmem:[#allocation5 + $0xa90] sm:$0xf] }
 0x851   :  { %v11919_v31 = vld [vmem:[#allocation5 + $0x48] sm:$0xf0]  ;;  %v13781_v4 = vld [vmem:[#allocation5 + $0xe90] sm:$0xf] }
 0x852   :  { %6138 = vmatpush.bf16.msrb.mxu2 %v13074_v21  ;;  %v16390_v35 = vld [vmem:[#allocation5 + $0x40c] sm:$0xf]  ;;  %6113 = vmatpush.bf16.msrb.mxu0 %v11986_v29  ;;  %v11922_v45 = vor.u32 %v16262_v30, %v11919_v31  ;;  %v16607_v21 = vld [vmem:[#allocation5 + $0xacc] sm:$0xf0] }
 0x853   :  { %v12431_v36 = vld [vmem:[#allocation5 + $0x448] sm:$0xf0]  ;;  %v16735_v11 = vld [vmem:[#allocation5 + $0xecc] sm:$0xf0]  ;;  %v13270_v24 = vor.u32 %v16607_v21, %v13269_v20 }
 0x854   :  { %v16518_v37 = vld [vmem:[#allocation5 + $0x80c] sm:$0xf]  ;;  %6151 = vmatpush.bf16.msrb.mxu3 %v13586_v23  ;;  %6126 = vmatpush.bf16.msrb.mxu1 %v12498_v32  ;;  %v12434_v49 = vor.u32 %v16390_v35, %v12431_v36  ;;  %v12758_v23 = vor.u32 %v16479_v19, %v12757_v17  ;;  %v12181_v25 = vld [vmem:[#allocation5 + $0x210] sm:$0xf]  ;;  %v13782_v28 = vor.u32 %v16735_v11, %v13781_v4 }
 0x855   :  { %v12943_v39 = vld [vmem:[#allocation5 + $0x848] sm:$0xf0]  ;;  %v16335_v26 = vld [vmem:[#allocation5 + $0x24c] sm:$0xf0] }
 0x856   :  { %v16646_v40 = vld [vmem:[#allocation5 + $0xc0c] sm:$0xf]  ;;  %6139 = vmatpush.bf16.msrb.mxu2 %v13010_v33  ;;  %v12946_v50 = vor.u32 %v16518_v37, %v12943_v39  ;;  %6114 = vmatpush.bf16.msrb.mxu0 %v11922_v45  ;;  %v12693_v27 = vld [vmem:[#allocation5 + $0x610] sm:$0xf]  ;;  %v12182_v35 = vor.u32 %v16335_v26, %v12181_v25 }
 0x857   :  { %v13455_v41 = vld [vmem:[#allocation5 + $0xc48] sm:$0xf0]  ;;  %v16463_v29 = vld [vmem:[#allocation5 + $0x64c] sm:$0xf0] }
 0x858   :  { %6152 = vmatpush.bf16.msrb.mxu3 %v13522_v38  ;;  %v13458_v62 = vor.u32 %v16646_v40, %v13455_v41  ;;  %6127 = vmatpush.bf16.msrb.mxu1 %v12434_v49  ;;  %v13205_v30 = vld [vmem:[#allocation5 + $0xa10] sm:$0xf]  ;;  %v12694_v36 = vor.u32 %v16463_v29, %v12693_v27  ;;  %v16375_v27 = vld [vmem:[#allocation5 + $0x394] sm:$0xf] }
 0x859   :  { %6115 = vmatmul.bf16.vlgmr.msrb.gmra.mxu0 %v18112_v60  ;;  %v16591_v31 = vld [vmem:[#allocation5 + $0xa4c] sm:$0xf0]  ;;  %v16503_v29 = vld [vmem:[#allocation5 + $0x794] sm:$0xf] }
 0x85a   :  { %6140 = vmatpush.bf16.msrb.mxu2 %v12946_v50  ;;  %6159 = vmatpush.bf16.msra.mxu0 %v12374_v59  ;;  %v13717_v32 = vld [vmem:[#allocation5 + $0xe10] sm:$0xf]  ;;  %v13206_v37 = vor.u32 %v16591_v31, %v13205_v30  ;;  %v12887_v31 = vld [vmem:[#allocation5 + $0x7d0] sm:$0xf0] }
 0x85b   :  { %6128 = vmatmul.bf16.vlgmr.msrb.gmra.mxu1 %v18116_v54  ;;  %v16719_v33 = vld [vmem:[#allocation5 + $0xe4c] sm:$0xf0] }
 0x85c   :  { %6153 = vmatpush.bf16.msrb.mxu3 %v13458_v62  ;;  %6172 = vmatpush.bf16.msra.mxu1 %v12886_v58  ;;  %v12117_v38 = vld [vmem:[#allocation5 + $0x190] sm:$0xf]  ;;  %v13718_v41 = vor.u32 %v16719_v33, %v13717_v32  ;;  %v16631_v32 = vld [vmem:[#allocation5 + $0xb94] sm:$0xf] }
 0x85d   :  { %6141 = vmatmul.bf16.vlgmr.msrb.gmra.mxu2 %v18104_v51  ;;  %v16319_v39 = vld [vmem:[#allocation5 + $0x1cc] sm:$0xf0]  ;;  %v13399_v33 = vld [vmem:[#allocation5 + $0xbd0] sm:$0xf0] }
 0x85e   :  { %6185 = vmatpush.bf16.msra.mxu2 %v13398_v0  ;;  %6160 = vmatpush.bf16.msra.mxu0 %v12310_v12  ;;  %v12629_v40 = vld [vmem:[#allocation5 + $0x590] sm:$0xf]  ;;  %v12118_v47 = vor.u32 %v16319_v39, %v12117_v38  ;;  %v13911_v38 = vld [vmem:[#allocation5 + $0xfd0] sm:$0xf0] }
 0x85f   :  { %6154 = vmatmul.bf16.vlgmr.msrb.gmra.mxu3 %v18108_v55  ;;  %v16447_v42 = vld [vmem:[#allocation5 + $0x5cc] sm:$0xf0] }
 0x860   :  { %6198 = vmatpush.bf16.msra.mxu3 %v13910_v5  ;;  %6173 = vmatpush.bf16.msra.mxu1 %v12822_v13  ;;  %v13141_v43 = vld [vmem:[#allocation5 + $0x990] sm:$0xf]  ;;  %v12630_v48 = vor.u32 %v16447_v42, %v12629_v40  ;;  %v13402_v42 = vor.u32 %v16631_v32, %v13399_v33  ;;  %v12631_v32 = vld [vmem:[#allocation5 + $0x5d0] sm:$0xf0] }
 0x861   :  { %v16575_v44 = vld [vmem:[#allocation5 + $0x9cc] sm:$0xf0]  ;;  %v16567_v33 = vld [vmem:[#allocation5 + $0x994] sm:$0xf] }
 0x862   :  { %6186 = vmatpush.bf16.msra.mxu2 %v13334_v14  ;;  %6161 = vmatpush.bf16.msra.mxu0 %v12246_v22  ;;  %v13653_v45 = vld [vmem:[#allocation5 + $0xd90] sm:$0xf]  ;;  %v13142_v49 = vor.u32 %v16575_v44, %v13141_v43  ;;  %v16359_v43 = vld [vmem:[#allocation5 + $0x314] sm:$0xf] }
 0x863   :  { %v16703_v46 = vld [vmem:[#allocation5 + $0xdcc] sm:$0xf0]  ;;  %v12311_v44 = vld [vmem:[#allocation5 + $0x350] sm:$0xf0] }
 0x864   :  { %6199 = vmatpush.bf16.msra.mxu3 %v13846_v18  ;;  %6174 = vmatpush.bf16.msra.mxu1 %v12758_v23  ;;  %v12053_v50 = vld [vmem:[#allocation5 + $0x110] sm:$0xf]  ;;  %v13654_v62 = vor.u32 %v16703_v46, %v13653_v45  ;;  %v16487_v45 = vld [vmem:[#allocation5 + $0x714] sm:$0xf] }
 0x865   :  { %v16303_v52 = vld [vmem:[#allocation5 + $0x14c] sm:$0xf0] }
 0x866   :  { %6187 = vmatpush.bf16.msra.mxu2 %v13270_v24  ;;  %6162 = vmatpush.bf16.msra.mxu0 %v12182_v35  ;;  %v12565_v53 = vld [vmem:[#allocation5 + $0x510] sm:$0xf]  ;;  %v12054_v63 = vor.u32 %v16303_v52, %v12053_v50  ;;  %v16743_v50 = vld [vmem:[#allocation5 + $0xf14] sm:$0xf] }
 0x867   :  { %v16431_v59 = vld [vmem:[#allocation5 + $0x54c] sm:$0xf0]  ;;  %v13847_v52 = vld [vmem:[#allocation5 + $0xf50] sm:$0xf0] }
 0x868   :  { %6200 = vmatpush.bf16.msra.mxu3 %v13782_v28  ;;  %6175 = vmatpush.bf16.msra.mxu1 %v12694_v36  ;;  %v13077_v58 = vld [vmem:[#allocation5 + $0x910] sm:$0xf]  ;;  %v12566_v5 = vor.u32 %v16431_v59, %v12565_v53  ;;  %v12375_v28 = vld [vmem:[#allocation5 + $0x3d0] sm:$0xf0]  ;;  %v12314_v53 = vor.u32 %v16359_v43, %v12311_v44  ;;  %v13850_v3 = vor.u32 %v16743_v50, %v13847_v52 }
 0x869   :  { %v16559_v0 = vld [vmem:[#allocation5 + $0x94c] sm:$0xf0]  ;;  %v12378_v40 = vor.u32 %v16375_v27, %v12375_v28  ;;  %v12119_v27 = vld [vmem:[#allocation5 + $0x1d0] sm:$0xf0] }
 0x86a   :  { %6188 = vmatpush.bf16.msra.mxu2 %v13206_v37  ;;  %6163 = vmatpush.bf16.msra.mxu0 %v12118_v47  ;;  %v13078_v6 = vor.u32 %v16559_v0, %v13077_v58  ;;  %v11989_v7 = vld [vmem:[#allocation5 + $0x90] sm:$0xf]  ;;  %v16759_v37 = vld [vmem:[#allocation5 + $0xf94] sm:$0xf] }
 0x86b   :  { %v16287_v8 = vld [vmem:[#allocation5 + $0xcc] sm:$0xf0]  ;;  %v13914_v46 = vor.u32 %v16759_v37, %v13911_v38  ;;  %v12823_v47 = vld [vmem:[#allocation5 + $0x750] sm:$0xf0] }
 0x86c   :  { %6201 = vmatpush.bf16.msra.mxu3 %v13718_v41  ;;  %6176 = vmatpush.bf16.msra.mxu1 %v12630_v48  ;;  %v12501_v2 = vld [vmem:[#allocation5 + $0x490] sm:$0xf]  ;;  %v11990_v17 = vor.u32 %v16287_v8, %v11989_v7  ;;  %v12890_v41 = vor.u32 %v16503_v29, %v12887_v31  ;;  %v16615_v48 = vld [vmem:[#allocation5 + $0xb14] sm:$0xf] }
 0x86d   :  { %v16415_v12 = vld [vmem:[#allocation5 + $0x4cc] sm:$0xf0]  ;;  %v16343_v58 = vld [vmem:[#allocation5 + $0x294] sm:$0xf] }
 0x86e   :  { %6189 = vmatpush.bf16.msra.mxu2 %v13142_v49  ;;  %v13013_v13 = vld [vmem:[#allocation5 + $0x890] sm:$0xf]  ;;  %6164 = vmatpush.bf16.msra.mxu0 %v12054_v63  ;;  %v12502_v20 = vor.u32 %v16415_v12, %v12501_v2  ;;  %v13335_v49 = vld [vmem:[#allocation5 + $0xb50] sm:$0xf0] }
 0x86f   :  { %v16543_v14 = vld [vmem:[#allocation5 + $0x8cc] sm:$0xf0]  ;;  %v13338_v59 = vor.u32 %v16615_v48, %v13335_v49  ;;  %v12247_v0 = vld [vmem:[#allocation5 + $0x2d0] sm:$0xf0] }
 0x870   :  { %6202 = vmatpush.bf16.msra.mxu3 %v13654_v62  ;;  %v13525_v15 = vld [vmem:[#allocation5 + $0xc90] sm:$0xf]  ;;  %6177 = vmatpush.bf16.msra.mxu1 %v12566_v5  ;;  %v13014_v21 = vor.u32 %v16543_v14, %v13013_v13  ;;  %v12826_v62 = vor.u32 %v16487_v45, %v12823_v47  ;;  %v12759_v63 = vld [vmem:[#allocation5 + $0x6d0] sm:$0xf0]  ;;  %v12250_v2 = vor.u32 %v16343_v58, %v12247_v0 }
 0x871   :  { %v16671_v16 = vld [vmem:[#allocation5 + $0xccc] sm:$0xf0]  ;;  %v16599_v5 = vld [vmem:[#allocation5 + $0xa94] sm:$0xf]  ;;  %v12762_v13 = vor.u32 %v16471_v1, %v12759_v63 }
 0x872   :  { %v11925_v18 = vld [vmem:[#allocation5 + $0x10] sm:$0xf]  ;;  %6190 = vmatpush.bf16.msra.mxu2 %v13078_v6  ;;  %v13526_v23 = vor.u32 %v16671_v16, %v13525_v15  ;;  %6165 = vmatpush.bf16.msra.mxu0 %v11990_v17  ;;  %v13271_v6 = vld [vmem:[#allocation5 + $0xad0] sm:$0xf0] }
 0x873   :  { %v16271_v19 = vld [vmem:[#allocation5 + $0x4c] sm:$0xf0]  ;;  %v16727_v7 = vld [vmem:[#allocation5 + $0xe94] sm:$0xf]  ;;  %v13274_v14 = vor.u32 %v16599_v5, %v13271_v6 }
 0x874   :  { %v12437_v4 = vld [vmem:[#allocation5 + $0x410] sm:$0xf]  ;;  %6203 = vmatpush.bf16.msra.mxu3 %v13590_v10  ;;  %v11926_v30 = vor.u32 %v16271_v19, %v11925_v18  ;;  %6178 = vmatpush.bf16.msra.mxu1 %v12502_v20  ;;  %v13783_v8 = vld [vmem:[#allocation5 + $0xed0] sm:$0xf0] }
 0x875   :  { %v16399_v11 = vld [vmem:[#allocation5 + $0x44c] sm:$0xf0]  ;;  %v16327_v10 = vld [vmem:[#allocation5 + $0x214] sm:$0xf]  ;;  %v13786_v18 = vor.u32 %v16727_v7, %v13783_v8 }
 0x876   :  { %v12949_v22 = vld [vmem:[#allocation5 + $0x810] sm:$0xf]  ;;  %6191 = vmatpush.bf16.msra.mxu2 %v13014_v21  ;;  %v12438_v35 = vor.u32 %v16399_v11, %v12437_v4  ;;  %6166 = vmatpush.bf16.msra.mxu0 %v11926_v30  ;;  %v12183_v15 = vld [vmem:[#allocation5 + $0x250] sm:$0xf0] }
 0x877   :  { %v16527_v24 = vld [vmem:[#allocation5 + $0x84c] sm:$0xf0]  ;;  %v16455_v16 = vld [vmem:[#allocation5 + $0x614] sm:$0xf] }
 0x878   :  { %v13461_v25 = vld [vmem:[#allocation5 + $0xc10] sm:$0xf]  ;;  %v12950_v36 = vor.u32 %v16527_v24, %v12949_v22  ;;  %6204 = vmatpush.bf16.msra.mxu3 %v13526_v23  ;;  %6179 = vmatpush.bf16.msra.mxu1 %v12438_v35  ;;  %v12695_v19 = vld [vmem:[#allocation5 + $0x650] sm:$0xf0]  ;;  %v12186_v22 = vor.u32 %v16327_v10, %v12183_v15  ;;  %v5960_v23 = vpop.f32.mrf.mxu0  ;;  %v5973_v30 = vpop.f32.mrf.mxu1 }
 0x879   :  { %v16655_v26 = vld [vmem:[#allocation5 + $0xc4c] sm:$0xf0]  ;;  %6167 = vmatmul.bf16.vlgmr.msra.gmra.mxu0 %v18112_v60  ;;  %v16583_v20 = vld [vmem:[#allocation5 + $0xa14] sm:$0xf]  ;;  %v12698_v24 = vor.u32 %v16455_v16, %v12695_v19 }
 0x87a   :  { %v13462_v39 = vor.u32 %v16655_v26, %v13461_v25  ;;  %6192 = vmatpush.bf16.msra.mxu2 %v12950_v36  ;;  %6211 = vmatpush.bf16.msrb.mxu0 %v12378_v40  ;;  %v18138_v12 = vld [vmem:[#allocation22] sm:$0xff]  ;;  %v13207_v21 = vld [vmem:[#allocation5 + $0xa50] sm:$0xf0] }
 0x87b   :  { %6180 = vmatmul.bf16.vlgmr.msra.gmra.mxu1 %v18116_v54  ;;  %v3359_v17 = vperm.slane %v18138_v12, 0  ;;  %v16711_v4 = vld [vmem:[#allocation5 + $0xe14] sm:$0xf]  ;;  %v13210_v25 = vor.u32 %v16583_v20, %v13207_v21 }
 0x87c   :  { %6205 = vmatpush.bf16.msra.mxu3 %v13462_v39  ;;  %6224 = vmatpush.bf16.msrb.mxu1 %v12890_v41  ;;  %v13719_v11 = vld [vmem:[#allocation5 + $0xe50] sm:$0xf0] }
 0x87d   :  { %6193 = vmatmul.bf16.vlgmr.msra.gmra.mxu2 %v18104_v51  ;;  %v16311_v26 = vld [vmem:[#allocation5 + $0x194] sm:$0xf]  ;;  %v5961_v29 = vadd.f32 %v5960_v23, %v3359_v17  ;;  %v13722_v31 = vor.u32 %v16711_v4, %v13719_v11 }
 0x87e   :  { %6237 = vmatpush.bf16.msrb.mxu2 %v13402_v42  ;;  %6212 = vmatpush.bf16.msrb.mxu0 %v12314_v53  ;;  %v16439_v28 = vld [vmem:[#allocation5 + $0x594] sm:$0xf]  ;;  %v12122_v39 = vor.u32 %v16311_v26, %v12119_v27 }
 0x87f   :  { %6206 = vmatmul.bf16.vlgmr.msra.gmra.mxu3 %v18108_v55  ;;  %v13143_v35 = vld [vmem:[#allocation5 + $0x9d0] sm:$0xf0]  ;;  %v5974_v38 = vadd.f32 %v5973_v30, %v5961_v29  ;;  %v12634_v40 = vor.u32 %v16439_v28, %v12631_v32  ;;  %v12381_v29 = vld [vmem:[#allocation5 + $0x398] sm:$0xf] }
 0x880   :  { %6250 = vmatpush.bf16.msrb.mxu3 %v13914_v46  ;;  %6225 = vmatpush.bf16.msrb.mxu1 %v12826_v62  ;;  %v16695_v36 = vld [vmem:[#allocation5 + $0xd94] sm:$0xf]  ;;  %v13146_v41 = vor.u32 %v16567_v33, %v13143_v35  ;;  %v5986_v45 = vpop.f32.mrf.mxu2  ;;  %v5962_v1 = vpop.f32.mrf.mxu0  ;;  %v16384_v30 = vld [vmem:[#allocation5 + $0x3d4] sm:$0xf0] }
 0x881   :  { %v13655_v37 = vld [vmem:[#allocation5 + $0xdd0] sm:$0xf0]  ;;  %v5987_v50 = vadd.f32 %v5986_v45, %v5974_v38  ;;  %v5975_v8 = vpop.f32.mrf.mxu1  ;;  %v16512_v33 = vld [vmem:[#allocation5 + $0x7d4] sm:$0xf0] }
 0x882   :  { %6238 = vmatpush.bf16.msrb.mxu2 %v13338_v59  ;;  %6213 = vmatpush.bf16.msrb.mxu0 %v12250_v2  ;;  %v16295_v42 = vld [vmem:[#allocation5 + $0x114] sm:$0xf]  ;;  %v13658_v46 = vor.u32 %v16695_v36, %v13655_v37  ;;  %v5999_v52 = vpop.f32.mrf.mxu3  ;;  %v13405_v35 = vld [vmem:[#allocation5 + $0xb98] sm:$0xf] }
 0x883   :  { %v12055_v43 = vld [vmem:[#allocation5 + $0x150] sm:$0xf0]  ;;  %v18141_v0 = vadd.f32 %v5999_v52, %v5987_v50  ;;  %v16640_v36 = vld [vmem:[#allocation5 + $0xbd4] sm:$0xf0] }
 0x884   :  { %6251 = vmatpush.bf16.msrb.mxu3 %v13850_v3  ;;  %6226 = vmatpush.bf16.msrb.mxu1 %v12762_v13  ;;  %v16423_v44 = vld [vmem:[#allocation5 + $0x514] sm:$0xf]  ;;  %v12058_v59 = vor.u32 %v16295_v42, %v12055_v43  ;;  %v12382_v42 = vor.u32 %v16384_v30, %v12381_v29  ;;  %v12317_v45 = vld [vmem:[#allocation5 + $0x318] sm:$0xf] }
 0x885   :  { %v12567_v47 = vld [vmem:[#allocation5 + $0x550] sm:$0xf0]  ;;  %v13341_v50 = vld [vmem:[#allocation5 + $0xb18] sm:$0xf] }
 0x886   :  { %6239 = vmatpush.bf16.msrb.mxu2 %v13274_v14  ;;  %6214 = vmatpush.bf16.msrb.mxu0 %v12186_v22  ;;  %v16551_v48 = vld [vmem:[#allocation5 + $0x914] sm:$0xf]  ;;  %v12570_v3 = vor.u32 %v16423_v44, %v12567_v47  ;;  %v6783_v14 = vmax.f32 %v18141_v0, 0.0  ;;  %v13406_v44 = vor.u32 %v16640_v36, %v13405_v35  ;;  %v12829_v47 = vld [vmem:[#allocation5 + $0x718] sm:$0xf] }
 0x887   :  { %v13079_v49 = vld [vmem:[#allocation5 + $0x950] sm:$0xf0]  ;;  %v16624_v52 = vld [vmem:[#allocation5 + $0xb54] sm:$0xf0] }
 0x888   :  { %6252 = vmatpush.bf16.msrb.mxu3 %v13786_v18  ;;  %6227 = vmatpush.bf16.msrb.mxu1 %v12698_v24  ;;  %v16679_v53 = vld [vmem:[#allocation5 + $0xd14] sm:$0xf]  ;;  %v13082_v63 = vor.u32 %v16551_v48, %v13079_v49  ;;  %v5988_v23 = vpop.f32.mrf.mxu2  ;;  %v16496_v49 = vld [vmem:[#allocation5 + $0x754] sm:$0xf0]  ;;  %v13342_v1 = vor.u32 %v16624_v52, %v13341_v50 }
 0x889   :  { %v13591_v62 = vld [vmem:[#allocation5 + $0xd50] sm:$0xf0]  ;;  %v13277_v8 = vld [vmem:[#allocation5 + $0xa98] sm:$0xf] }
 0x88a   :  { %6240 = vmatpush.bf16.msrb.mxu2 %v13210_v25  ;;  %6215 = vmatpush.bf16.msrb.mxu0 %v12122_v39  ;;  %v16279_v58 = vld [vmem:[#allocation5 + $0x94] sm:$0xf]  ;;  %v13594_v2 = vor.u32 %v16679_v53, %v13591_v62  ;;  %v6001_v28 = vpop.f32.mrf.mxu3  ;;  %v13917_v39 = vld [vmem:[#allocation5 + $0xf98] sm:$0xf] }
 0x88b   :  { %v11991_v5 = vld [vmem:[#allocation5 + $0xd0] sm:$0xf0]  ;;  %v13853_v53 = vld [vmem:[#allocation5 + $0xf18] sm:$0xf] }
 0x88c   :  { %6253 = vmatpush.bf16.msrb.mxu3 %v13722_v31  ;;  %6228 = vmatpush.bf16.msrb.mxu1 %v12634_v40  ;;  %v16407_v6 = vld [vmem:[#allocation5 + $0x494] sm:$0xf]  ;;  %v11994_v17 = vor.u32 %v16279_v58, %v11991_v5  ;;  %v12893_v31 = vld [vmem:[#allocation5 + $0x798] sm:$0xf]  ;;  %v12830_v58 = vor.u32 %v16496_v49, %v12829_v47 }
 0x88d   :  { %v12503_v7 = vld [vmem:[#allocation5 + $0x4d0] sm:$0xf0]  ;;  %v16768_v40 = vld [vmem:[#allocation5 + $0xfd4] sm:$0xf0]  ;;  %v12894_v43 = vor.u32 %v16512_v33, %v12893_v31 }
 0x88e   :  { %6241 = vmatpush.bf16.msrb.mxu2 %v13146_v41  ;;  %v16535_v10 = vld [vmem:[#allocation5 + $0x894] sm:$0xf]  ;;  %6216 = vmatpush.bf16.msrb.mxu0 %v12058_v59  ;;  %v12506_v20 = vor.u32 %v16407_v6, %v12503_v7  ;;  %v13918_v48 = vor.u32 %v16768_v40, %v13917_v39  ;;  %v16752_v62 = vld [vmem:[#allocation5 + $0xf54] sm:$0xf0] }
 0x88f   :  { %v13015_v13 = vld [vmem:[#allocation5 + $0x8d0] sm:$0xf0]  ;;  %v12765_v5 = vld [vmem:[#allocation5 + $0x698] sm:$0xf]  ;;  %v13854_v6 = vor.u32 %v16752_v62, %v13853_v53 }
 0x890   :  { %6254 = vmatpush.bf16.msrb.mxu3 %v13658_v46  ;;  %v16663_v15 = vld [vmem:[#allocation5 + $0xc94] sm:$0xf]  ;;  %6229 = vmatpush.bf16.msrb.mxu1 %v12570_v3  ;;  %v13018_v21 = vor.u32 %v16535_v10, %v13015_v13  ;;  %v16368_v46 = vld [vmem:[#allocation5 + $0x354] sm:$0xf0] }
 0x891   :  { %v13527_v16 = vld [vmem:[#allocation5 + $0xcd0] sm:$0xf0]  ;;  %v12318_v59 = vor.u32 %v16368_v46, %v12317_v45  ;;  %v12253_v3 = vld [vmem:[#allocation5 + $0x298] sm:$0xf] }
 0x892   :  { %v16263_v18 = vld [vmem:[#allocation5 + $0x14] sm:$0xf]  ;;  %6242 = vmatpush.bf16.msrb.mxu2 %v13082_v63  ;;  %v13530_v24 = vor.u32 %v16663_v15, %v13527_v16  ;;  %6217 = vmatpush.bf16.msrb.mxu0 %v11994_v17  ;;  %v16352_v63 = vld [vmem:[#allocation5 + $0x2d4] sm:$0xf0] }
 0x893   :  { %v11927_v19 = vld [vmem:[#allocation5 + $0x50] sm:$0xf0]  ;;  %v16480_v7 = vld [vmem:[#allocation5 + $0x6d4] sm:$0xf0]  ;;  %v12254_v15 = vor.u32 %v16352_v63, %v12253_v3 }
 0x894   :  { %v16391_v4 = vld [vmem:[#allocation5 + $0x414] sm:$0xf]  ;;  %6255 = vmatpush.bf16.msrb.mxu3 %v13594_v2  ;;  %v11930_v32 = vor.u32 %v16263_v18, %v11927_v19  ;;  %6230 = vmatpush.bf16.msrb.mxu1 %v12506_v20  ;;  %v16608_v2 = vld [vmem:[#allocation5 + $0xad4] sm:$0xf0]  ;;  %v12766_v17 = vor.u32 %v16480_v7, %v12765_v5 }
 0x895   :  { %v12439_v11 = vld [vmem:[#allocation5 + $0x450] sm:$0xf0]  ;;  %v13789_v10 = vld [vmem:[#allocation5 + $0xe98] sm:$0xf]  ;;  %v13278_v18 = vor.u32 %v16608_v2, %v13277_v8 }
 0x896   :  { %v16519_v22 = vld [vmem:[#allocation5 + $0x814] sm:$0xf]  ;;  %6243 = vmatpush.bf16.msrb.mxu2 %v13018_v21  ;;  %v12442_v37 = vor.u32 %v16391_v4, %v12439_v11  ;;  %6218 = vmatpush.bf16.msrb.mxu0 %v11930_v32  ;;  %v16736_v13 = vld [vmem:[#allocation5 + $0xed4] sm:$0xf0]  ;;  %v3360_v21 = vperm.slane %v18138_v12, 1 }
 0x897   :  { %v12951_v25 = vld [vmem:[#allocation5 + $0x850] sm:$0xf0]  ;;  %v12189_v16 = vld [vmem:[#allocation5 + $0x218] sm:$0xf]  ;;  %v13790_v4 = vor.u32 %v16736_v13, %v13789_v10 }
 0x898   :  { %v16647_v26 = vld [vmem:[#allocation5 + $0xc14] sm:$0xf]  ;;  %v12954_v38 = vor.u32 %v16519_v22, %v12951_v25  ;;  %6256 = vmatpush.bf16.msrb.mxu3 %v13530_v24  ;;  %6231 = vmatpush.bf16.msrb.mxu1 %v12442_v37  ;;  %v16336_v19 = vld [vmem:[#allocation5 + $0x254] sm:$0xf0]  ;;  %v6025_v35 = vpop.f32.mrf.mxu1 }
 0x899   :  { %v13463_v27 = vld [vmem:[#allocation5 + $0xc50] sm:$0xf0]  ;;  %6219 = vmatmul.bf16.vlgmr.msrb.gmra.mxu0 %v18112_v60  ;;  %v12701_v20 = vld [vmem:[#allocation5 + $0x618] sm:$0xf] }
 0x89a   :  { %v13466_v41 = vor.u32 %v16647_v26, %v13463_v27  ;;  %6244 = vmatpush.bf16.msrb.mxu2 %v12954_v38  ;;  %6263 = vmatpush.bf16.msra.mxu0 %v12382_v42  ;;  %v16464_v11 = vld [vmem:[#allocation5 + $0x654] sm:$0xf0]  ;;  %v12190_v26 = vor.u32 %v16336_v19, %v12189_v16  ;;  %v6012_v27 = vpop.f32.mrf.mxu0 }
 0x89b   :  { %6232 = vmatmul.bf16.vlgmr.msrb.gmra.mxu1 %v18116_v54  ;;  %v13213_v22 = vld [vmem:[#allocation5 + $0xa18] sm:$0xf]  ;;  %v12702_v28 = vor.u32 %v16464_v11, %v12701_v20  ;;  %v6013_v33 = vadd.f32 %v6012_v27, %v3360_v21 }
 0x89c   :  { %6257 = vmatpush.bf16.msrb.mxu3 %v13466_v41  ;;  %6276 = vmatpush.bf16.msra.mxu1 %v12894_v43  ;;  %v16592_v23 = vld [vmem:[#allocation5 + $0xa54] sm:$0xf0] }
 0x89d   :  { %6245 = vmatmul.bf16.vlgmr.msrb.gmra.mxu2 %v18104_v51  ;;  %v13725_v24 = vld [vmem:[#allocation5 + $0xe18] sm:$0xf]  ;;  %v13214_v29 = vor.u32 %v16592_v23, %v13213_v22  ;;  %v6026_v42 = vadd.f32 %v6025_v35, %v6013_v33 }
 0x89e   :  { %6289 = vmatpush.bf16.msra.mxu2 %v13406_v44  ;;  %6264 = vmatpush.bf16.msra.mxu0 %v12318_v59  ;;  %v16720_v25 = vld [vmem:[#allocation5 + $0xe54] sm:$0xf0] }
 0x89f   :  { %6258 = vmatmul.bf16.vlgmr.msrb.gmra.mxu3 %v18108_v55  ;;  %v12125_v30 = vld [vmem:[#allocation5 + $0x198] sm:$0xf]  ;;  %v13726_v36 = vor.u32 %v16720_v25, %v13725_v24 }
 0x8a0   :  { %6302 = vmatpush.bf16.msra.mxu3 %v13918_v48  ;;  %6277 = vmatpush.bf16.msra.mxu1 %v12830_v58  ;;  %v16320_v31 = vld [vmem:[#allocation5 + $0x1d4] sm:$0xf0]  ;;  %v6038_v49 = vpop.f32.mrf.mxu2  ;;  %v6027_v16 = vpop.f32.mrf.mxu1 }
 0x8a1   :  { %v12637_v32 = vld [vmem:[#allocation5 + $0x598] sm:$0xf]  ;;  %v12126_v43 = vor.u32 %v16320_v31, %v12125_v30  ;;  %v6039_v59 = vadd.f32 %v6038_v49, %v6026_v42  ;;  %v13407_v42 = vld [vmem:[#allocation5 + $0xbd8] sm:$0xf0] }
 0x8a2   :  { %6290 = vmatpush.bf16.msra.mxu2 %v13342_v1  ;;  %6265 = vmatpush.bf16.msra.mxu0 %v12254_v15  ;;  %v16448_v37 = vld [vmem:[#allocation5 + $0x5d4] sm:$0xf0]  ;;  %v6051_v58 = vpop.f32.mrf.mxu3  ;;  %v6014_v7 = vpop.f32.mrf.mxu0 }
 0x8a3   :  { %v13149_v38 = vld [vmem:[#allocation5 + $0x998] sm:$0xf]  ;;  %v12638_v44 = vor.u32 %v16448_v37, %v12637_v32  ;;  %v12383_v37 = vld [vmem:[#allocation5 + $0x3d8] sm:$0xf0] }
 0x8a4   :  { %6303 = vmatpush.bf16.msra.mxu3 %v13854_v6  ;;  %6278 = vmatpush.bf16.msra.mxu1 %v12766_v17  ;;  %v16576_v39 = vld [vmem:[#allocation5 + $0x9d4] sm:$0xf0]  ;;  %v18149_v6 = vadd.f32 %v6051_v58, %v6039_v59  ;;  %v12831_v58 = vld [vmem:[#allocation5 + $0x758] sm:$0xf0] }
 0x8a5   :  { %v13661_v40 = vld [vmem:[#allocation5 + $0xd98] sm:$0xf]  ;;  %v13150_v45 = vor.u32 %v16576_v39, %v13149_v38  ;;  %v16504_v38 = vld [vmem:[#allocation5 + $0x79c] sm:$0xf] }
 0x8a6   :  { %6291 = vmatpush.bf16.msra.mxu2 %v13278_v18  ;;  %v16704_v41 = vld [vmem:[#allocation5 + $0xdd4] sm:$0xf0]  ;;  %6266 = vmatpush.bf16.msra.mxu0 %v12190_v26  ;;  %v6784_v20 = vmax.f32 %v18149_v6, 0.0 }
 0x8a7   :  { %v12061_v46 = vld [vmem:[#allocation5 + $0x118] sm:$0xf]  ;;  %v13662_v50 = vor.u32 %v16704_v41, %v13661_v40  ;;  %v12895_v40 = vld [vmem:[#allocation5 + $0x7d8] sm:$0xf0] }
 0x8a8   :  { %6304 = vmatpush.bf16.msra.mxu3 %v13790_v4  ;;  %6279 = vmatpush.bf16.msra.mxu1 %v12702_v28  ;;  %v16304_v47 = vld [vmem:[#allocation5 + $0x154] sm:$0xf0]  ;;  %v16632_v41 = vld [vmem:[#allocation5 + $0xb9c] sm:$0xf]  ;;  %v12898_v49 = vor.u32 %v16504_v38, %v12895_v40 }
 0x8a9   :  { %v12573_v48 = vld [vmem:[#allocation5 + $0x518] sm:$0xf]  ;;  %v12062_v63 = vor.u32 %v16304_v47, %v12061_v46  ;;  %v13919_v46 = vld [vmem:[#allocation5 + $0xfd8] sm:$0xf0] }
 0x8aa   :  { %6292 = vmatpush.bf16.msra.mxu2 %v13214_v29  ;;  %v16432_v52 = vld [vmem:[#allocation5 + $0x554] sm:$0xf0]  ;;  %6267 = vmatpush.bf16.msra.mxu0 %v12126_v43  ;;  %v6040_v29 = vpop.f32.mrf.mxu2  ;;  %v6053_v35 = vpop.f32.mrf.mxu3  ;;  %v12127_v40 = vld [vmem:[#allocation5 + $0x1d8] sm:$0xf0] }
 0x8ab   :  { %v13085_v53 = vld [vmem:[#allocation5 + $0x918] sm:$0xf]  ;;  %v12574_v8 = vor.u32 %v16432_v52, %v12573_v48  ;;  %v16360_v52 = vld [vmem:[#allocation5 + $0x31c] sm:$0xf] }
 0x8ac   :  { %6305 = vmatpush.bf16.msra.mxu3 %v13726_v36  ;;  %v16560_v62 = vld [vmem:[#allocation5 + $0x954] sm:$0xf0]  ;;  %6280 = vmatpush.bf16.msra.mxu1 %v12638_v44  ;;  %v16376_v36 = vld [vmem:[#allocation5 + $0x39c] sm:$0xf] }
 0x8ad   :  { %v13597_v1 = vld [vmem:[#allocation5 + $0xd18] sm:$0xf]  ;;  %v13086_v2 = vor.u32 %v16560_v62, %v13085_v53  ;;  %v12386_v48 = vor.u32 %v16376_v36, %v12383_v37  ;;  %v12319_v53 = vld [vmem:[#allocation5 + $0x358] sm:$0xf0] }
 0x8ae   :  { %v16688_v3 = vld [vmem:[#allocation5 + $0xd54] sm:$0xf0]  ;;  %6293 = vmatpush.bf16.msra.mxu2 %v13150_v45  ;;  %6268 = vmatpush.bf16.msra.mxu0 %v12062_v63  ;;  %v16760_v45 = vld [vmem:[#allocation5 + $0xf9c] sm:$0xf]  ;;  %v12322_v7 = vor.u32 %v16360_v52, %v12319_v53 }
 0x8af   :  { %v11997_v5 = vld [vmem:[#allocation5 + $0x98] sm:$0xf]  ;;  %v13598_v17 = vor.u32 %v16688_v3, %v13597_v1  ;;  %v16488_v62 = vld [vmem:[#allocation5 + $0x71c] sm:$0xf]  ;;  %v13922_v59 = vor.u32 %v16760_v45, %v13919_v46 }
 0x8b0   :  { %v16288_v10 = vld [vmem:[#allocation5 + $0xd4] sm:$0xf0]  ;;  %6306 = vmatpush.bf16.msra.mxu3 %v13662_v50  ;;  %6281 = vmatpush.bf16.msra.mxu1 %v12574_v8  ;;  %v13410_v50 = vor.u32 %v16632_v41, %v13407_v42  ;;  %v16616_v1 = vld [vmem:[#allocation5 + $0xb1c] sm:$0xf]  ;;  %v12834_v8 = vor.u32 %v16488_v62, %v12831_v58 }
 0x8b1   :  { %v12509_v13 = vld [vmem:[#allocation5 + $0x498] sm:$0xf]  ;;  %v11998_v11 = vor.u32 %v16288_v10, %v11997_v5  ;;  %v13343_v3 = vld [vmem:[#allocation5 + $0xb58] sm:$0xf0] }
 0x8b2   :  { %v16416_v15 = vld [vmem:[#allocation5 + $0x4d4] sm:$0xf0]  ;;  %6294 = vmatpush.bf16.msra.mxu2 %v13086_v2  ;;  %v16744_v63 = vld [vmem:[#allocation5 + $0xf1c] sm:$0xf]  ;;  %v13346_v2 = vor.u32 %v16616_v1, %v13343_v3 }
 0x8b3   :  { %v13021_v18 = vld [vmem:[#allocation5 + $0x898] sm:$0xf]  ;;  %v12510_v24 = vor.u32 %v16416_v15, %v12509_v13  ;;  %6269 = vmatpush.bf16.msra.mxu0 %v11998_v11  ;;  %v13855_v5 = vld [vmem:[#allocation5 + $0xf58] sm:$0xf0] }
 0x8b4   :  { %v16544_v19 = vld [vmem:[#allocation5 + $0x8d4] sm:$0xf0]  ;;  %6307 = vmatpush.bf16.msra.mxu3 %v13598_v17  ;;  %v16344_v10 = vld [vmem:[#allocation5 + $0x29c] sm:$0xf]  ;;  %v13858_v16 = vor.u32 %v16744_v63, %v13855_v5 }
 0x8b5   :  { %v13533_v21 = vld [vmem:[#allocation5 + $0xc98] sm:$0xf]  ;;  %v13022_v25 = vor.u32 %v16544_v19, %v13021_v18  ;;  %6282 = vmatpush.bf16.msra.mxu1 %v12510_v24  ;;  %v12255_v13 = vld [vmem:[#allocation5 + $0x2d8] sm:$0xf0] }
 0x8b6   :  { %v16672_v4 = vld [vmem:[#allocation5 + $0xcd4] sm:$0xf0]  ;;  %v16472_v15 = vld [vmem:[#allocation5 + $0x69c] sm:$0xf]  ;;  %v12258_v11 = vor.u32 %v16344_v10, %v12255_v13  ;;  %v6064_v36 = vpop.f32.mrf.mxu0 }
 0x8b7   :  { %v11933_v22 = vld [vmem:[#allocation5 + $0x18] sm:$0xf]  ;;  %v13534_v30 = vor.u32 %v16672_v4, %v13533_v21  ;;  %6295 = vmatpush.bf16.msra.mxu2 %v13022_v25  ;;  %v12767_v17 = vld [vmem:[#allocation5 + $0x6d8] sm:$0xf0] }
 0x8b8   :  { %v16272_v23 = vld [vmem:[#allocation5 + $0x54] sm:$0xf0]  ;;  %v16600_v18 = vld [vmem:[#allocation5 + $0xa9c] sm:$0xf] }
 0x8b9   :  { %v12445_v26 = vld [vmem:[#allocation5 + $0x418] sm:$0xf]  ;;  %v11934_v39 = vor.u32 %v16272_v23, %v11933_v22  ;;  %6308 = vmatpush.bf16.msra.mxu3 %v13534_v30  ;;  %v13279_v19 = vld [vmem:[#allocation5 + $0xad8] sm:$0xf0]  ;;  %v12770_v23 = vor.u32 %v16472_v15, %v12767_v17 }
 0x8ba   :  { %v16400_v27 = vld [vmem:[#allocation5 + $0x454] sm:$0xf0]  ;;  %v16728_v21 = vld [vmem:[#allocation5 + $0xe9c] sm:$0xf]  ;;  %v13282_v24 = vor.u32 %v16600_v18, %v13279_v19 }
 0x8bb   :  { %v12957_v28 = vld [vmem:[#allocation5 + $0x818] sm:$0xf]  ;;  %v12446_v43 = vor.u32 %v16400_v27, %v12445_v26  ;;  %6270 = vmatpush.bf16.msra.mxu0 %v11934_v39  ;;  %v13791_v4 = vld [vmem:[#allocation5 + $0xed8] sm:$0xf0]  ;;  %v3361_v27 = vperm.slane %v18138_v12, 2 }
 0x8bc   :  { %v16528_v31 = vld [vmem:[#allocation5 + $0x854] sm:$0xf0]  ;;  %v16328_v22 = vld [vmem:[#allocation5 + $0x21c] sm:$0xf] }
 0x8bd   :  { %v13469_v32 = vld [vmem:[#allocation5 + $0xc18] sm:$0xf]  ;;  %v12958_v44 = vor.u32 %v16528_v31, %v12957_v28  ;;  %6283 = vmatpush.bf16.msra.mxu1 %v12446_v43  ;;  %v12191_v25 = vld [vmem:[#allocation5 + $0x258] sm:$0xf0]  ;;  %v13794_v28 = vor.u32 %v16728_v21, %v13791_v4  ;;  %v6065_v42 = vadd.f32 %v6064_v36, %v3361_v27  ;;  %v6077_v43 = vpop.f32.mrf.mxu1 }
 0x8be   :  { %v16656_v33 = vld [vmem:[#allocation5 + $0xc54] sm:$0xf0]  ;;  %6271 = vmatmul.bf16.vlgmr.msra.gmra.mxu0 %v18112_v60  ;;  %v16456_v26 = vld [vmem:[#allocation5 + $0x61c] sm:$0xf]  ;;  %v12194_v35 = vor.u32 %v16328_v22, %v12191_v25  ;;  %v6066_v19 = vpop.f32.mrf.mxu0 }
 0x8bf   :  { %v13470_v47 = vor.u32 %v16656_v33, %v13469_v32  ;;  %6296 = vmatpush.bf16.msra.mxu2 %v12958_v44  ;;  %6315 = vmatpush.bf16.msrb.mxu0 %v12386_v48  ;;  %v12703_v29 = vld [vmem:[#allocation5 + $0x658] sm:$0xf0]  ;;  %v13861_v19 = vld [vmem:[#allocation5 + $0xf20] sm:$0xf] }
 0x8c0   :  { %6284 = vmatmul.bf16.vlgmr.msra.gmra.mxu1 %v18116_v54  ;;  %v16584_v30 = vld [vmem:[#allocation5 + $0xa1c] sm:$0xf]  ;;  %v12706_v37 = vor.u32 %v16456_v26, %v12703_v29  ;;  %v6090_v3 = vpop.f32.mrf.mxu2 }
 0x8c1   :  { %6309 = vmatpush.bf16.msra.mxu3 %v13470_v47  ;;  %6328 = vmatpush.bf16.msrb.mxu1 %v12898_v49  ;;  %v13215_v31 = vld [vmem:[#allocation5 + $0xa58] sm:$0xf0] }
 0x8c2   :  { %6297 = vmatmul.bf16.vlgmr.msra.gmra.mxu2 %v18104_v51  ;;  %v16712_v32 = vld [vmem:[#allocation5 + $0xe1c] sm:$0xf]  ;;  %v13218_v38 = vor.u32 %v16584_v30, %v13215_v31  ;;  %v6103_v10 = vpop.f32.mrf.mxu3 }
 0x8c3   :  { %6341 = vmatpush.bf16.msrb.mxu2 %v13410_v50  ;;  %6316 = vmatpush.bf16.msrb.mxu0 %v12322_v7  ;;  %v13727_v33 = vld [vmem:[#allocation5 + $0xe58] sm:$0xf0]  ;;  %v6078_v50 = vadd.f32 %v6077_v43, %v6065_v42 }
 0x8c4   :  { %6310 = vmatmul.bf16.vlgmr.msra.gmra.mxu3 %v18108_v55  ;;  %v16312_v39 = vld [vmem:[#allocation5 + $0x19c] sm:$0xf]  ;;  %v13730_v44 = vor.u32 %v16712_v32, %v13727_v33 }
 0x8c5   :  { %6354 = vmatpush.bf16.msrb.mxu3 %v13922_v59  ;;  %6329 = vmatpush.bf16.msrb.mxu1 %v12834_v8  ;;  %v16440_v41 = vld [vmem:[#allocation5 + $0x59c] sm:$0xf]  ;;  %v12130_v52 = vor.u32 %v16312_v39, %v12127_v40 }
 0x8c6   :  { %v12639_v45 = vld [vmem:[#allocation5 + $0x5d8] sm:$0xf0] }
 0x8c7   :  { %6342 = vmatpush.bf16.msrb.mxu2 %v13346_v2  ;;  %6317 = vmatpush.bf16.msrb.mxu0 %v12258_v11  ;;  %v16568_v46 = vld [vmem:[#allocation5 + $0x99c] sm:$0xf]  ;;  %v12642_v53 = vor.u32 %v16440_v41, %v12639_v45  ;;  %v6091_v2 = vadd.f32 %v6090_v3, %v6078_v50  ;;  %v16513_v50 = vld [vmem:[#allocation5 + $0x7dc] sm:$0xf0] }
 0x8c8   :  { %v13151_v47 = vld [vmem:[#allocation5 + $0x9d8] sm:$0xf0]  ;;  %v6092_v40 = vpop.f32.mrf.mxu2 }
 0x8c9   :  { %6355 = vmatpush.bf16.msrb.mxu3 %v13858_v16  ;;  %6330 = vmatpush.bf16.msrb.mxu1 %v12770_v23  ;;  %v16696_v48 = vld [vmem:[#allocation5 + $0xd9c] sm:$0xf]  ;;  %v13154_v62 = vor.u32 %v16568_v46, %v13151_v47  ;;  %v18157_v18 = vadd.f32 %v6103_v10, %v6091_v2  ;;  %v12389_v46 = vld [vmem:[#allocation5 + $0x3a0] sm:$0xf]  ;;  %v3362_v40 = vperm.slane %v18138_v12, 3 }
 0x8ca   :  { %v13663_v49 = vld [vmem:[#allocation5 + $0xdd8] sm:$0xf0]  ;;  %v6105_v45 = vpop.f32.mrf.mxu3  ;;  %v16385_v47 = vld [vmem:[#allocation5 + $0x3dc] sm:$0xf0] }
 0x8cb   :  { %6343 = vmatpush.bf16.msrb.mxu2 %v13282_v24  ;;  %6318 = vmatpush.bf16.msrb.mxu0 %v12194_v35  ;;  %v16296_v59 = vld [vmem:[#allocation5 + $0x11c] sm:$0xf]  ;;  %v13666_v63 = vor.u32 %v16696_v48, %v13663_v49  ;;  %v6079_v24 = vpop.f32.mrf.mxu1  ;;  %v12901_v48 = vld [vmem:[#allocation5 + $0x7a0] sm:$0xf] }
 0x8cc   :  { %v12063_v58 = vld [vmem:[#allocation5 + $0x158] sm:$0xf0]  ;;  %v16369_v2 = vld [vmem:[#allocation5 + $0x35c] sm:$0xf0] }
 0x8cd   :  { %6356 = vmatpush.bf16.msrb.mxu3 %v13794_v28  ;;  %6331 = vmatpush.bf16.msrb.mxu1 %v12706_v37  ;;  %v16424_v1 = vld [vmem:[#allocation5 + $0x51c] sm:$0xf]  ;;  %v12066_v16 = vor.u32 %v16296_v59, %v12063_v58  ;;  %v6785_v28 = vmax.f32 %v18157_v18, 0.0  ;;  %v13925_v58 = vld [vmem:[#allocation5 + $0xfa0] sm:$0xf] }
 0x8ce   :  { %v12575_v5 = vld [vmem:[#allocation5 + $0x558] sm:$0xf0]  ;;  %v12837_v10 = vld [vmem:[#allocation5 + $0x720] sm:$0xf] }
 0x8cf   :  { %6344 = vmatpush.bf16.msrb.mxu2 %v13218_v38  ;;  %v16552_v7 = vld [vmem:[#allocation5 + $0x91c] sm:$0xf]  ;;  %6319 = vmatpush.bf16.msrb.mxu0 %v12130_v52  ;;  %v12578_v21 = vor.u32 %v16424_v1, %v12575_v5  ;;  %v13413_v52 = vld [vmem:[#allocation5 + $0xba0] sm:$0xf]  ;;  %v12902_v5 = vor.u32 %v16513_v50, %v12901_v48 }
 0x8d0   :  { %v13087_v8 = vld [vmem:[#allocation5 + $0x958] sm:$0xf0]  ;;  %v16769_v1 = vld [vmem:[#allocation5 + $0xfdc] sm:$0xf0] }
 0x8d1   :  { %6357 = vmatpush.bf16.msrb.mxu3 %v13730_v44  ;;  %v16680_v13 = vld [vmem:[#allocation5 + $0xd1c] sm:$0xf]  ;;  %6332 = vmatpush.bf16.msrb.mxu1 %v12642_v53  ;;  %v13090_v4 = vor.u32 %v16552_v7, %v13087_v8  ;;  %v16641_v53 = vld [vmem:[#allocation5 + $0xbdc] sm:$0xf0] }
 0x8d2   :  { %v13599_v15 = vld [vmem:[#allocation5 + $0xd58] sm:$0xf0]  ;;  %v13414_v7 = vor.u32 %v16641_v53, %v13413_v52  ;;  %v12325_v8 = vld [vmem:[#allocation5 + $0x320] sm:$0xf] }
 0x8d3   :  { %v16280_v17 = vld [vmem:[#allocation5 + $0x9c] sm:$0xf]  ;;  %6345 = vmatpush.bf16.msrb.mxu2 %v13154_v62  ;;  %v13602_v25 = vor.u32 %v16680_v13, %v13599_v15  ;;  %6320 = vmatpush.bf16.msrb.mxu0 %v12066_v16  ;;  %v13926_v13 = vor.u32 %v16769_v1, %v13925_v58  ;;  %v16497_v15 = vld [vmem:[#allocation5 + $0x75c] sm:$0xf0] }
 0x8d4   :  { %v11999_v11 = vld [vmem:[#allocation5 + $0xd8] sm:$0xf0]  ;;  %v13349_v16 = vld [vmem:[#allocation5 + $0xb20] sm:$0xf] }
 0x8d5   :  { %v16408_v22 = vld [vmem:[#allocation5 + $0x49c] sm:$0xf]  ;;  %6358 = vmatpush.bf16.msrb.mxu3 %v13666_v63  ;;  %v12002_v31 = vor.u32 %v16280_v17, %v11999_v11  ;;  %6333 = vmatpush.bf16.msrb.mxu1 %v12578_v21  ;;  %v12390_v63 = vor.u32 %v16385_v47, %v12389_v46  ;;  %v16625_v17 = vld [vmem:[#allocation5 + $0xb5c] sm:$0xf0]  ;;  %v12838_v11 = vor.u32 %v16497_v15, %v12837_v10 }
 0x8d6   :  { %v12511_v23 = vld [vmem:[#allocation5 + $0x4d8] sm:$0xf0]  ;;  %v16753_v21 = vld [vmem:[#allocation5 + $0xf5c] sm:$0xf0]  ;;  %v6116_v48 = vpop.f32.mrf.mxu0 }
 0x8d7   :  { %v16536_v26 = vld [vmem:[#allocation5 + $0x89c] sm:$0xf]  ;;  %6346 = vmatpush.bf16.msrb.mxu2 %v13090_v4  ;;  %v12514_v35 = vor.u32 %v16408_v22, %v12511_v23  ;;  %6321 = vmatpush.bf16.msrb.mxu0 %v12002_v31  ;;  %v12326_v4 = vor.u32 %v16369_v2, %v12325_v8  ;;  %v13350_v22 = vor.u32 %v16625_v17, %v13349_v16  ;;  %v12261_v23 = vld [vmem:[#allocation5 + $0x2a0] sm:$0xf] }
 0x8d8   :  { %v13023_v27 = vld [vmem:[#allocation5 + $0x8d8] sm:$0xf0]  ;;  %v16353_v24 = vld [vmem:[#allocation5 + $0x2dc] sm:$0xf0]  ;;  %v6129_v58 = vpop.f32.mrf.mxu1 }
 0x8d9   :  { %v16664_v29 = vld [vmem:[#allocation5 + $0xc9c] sm:$0xf]  ;;  %v13026_v36 = vor.u32 %v16536_v26, %v13023_v27  ;;  %6359 = vmatpush.bf16.msrb.mxu3 %v13602_v25  ;;  %6334 = vmatpush.bf16.msrb.mxu1 %v12514_v35  ;;  %v12773_v25 = vld [vmem:[#allocation5 + $0x6a0] sm:$0xf]  ;;  %v13862_v26 = vor.u32 %v16753_v21, %v13861_v19 }
 0x8da   :  { %v13535_v30 = vld [vmem:[#allocation5 + $0xcd8] sm:$0xf0]  ;;  %v16481_v27 = vld [vmem:[#allocation5 + $0x6dc] sm:$0xf0] }
 0x8db   :  { %v16264_v32 = vld [vmem:[#allocation5 + $0x1c] sm:$0xf]  ;;  %v13538_v41 = vor.u32 %v16664_v29, %v13535_v30  ;;  %6347 = vmatpush.bf16.msrb.mxu2 %v13026_v36  ;;  %v13285_v29 = vld [vmem:[#allocation5 + $0xaa0] sm:$0xf]  ;;  %v12774_v36 = vor.u32 %v16481_v27, %v12773_v25 }
 0x8dc   :  { %v11935_v33 = vld [vmem:[#allocation5 + $0x58] sm:$0xf0]  ;;  %v16609_v30 = vld [vmem:[#allocation5 + $0xadc] sm:$0xf0] }
 0x8dd   :  { %v16392_v37 = vld [vmem:[#allocation5 + $0x41c] sm:$0xf]  ;;  %v11938_v49 = vor.u32 %v16264_v32, %v11935_v33  ;;  %6360 = vmatpush.bf16.msrb.mxu3 %v13538_v41  ;;  %v13797_v31 = vld [vmem:[#allocation5 + $0xea0] sm:$0xf]  ;;  %v12262_v33 = vor.u32 %v16353_v24, %v12261_v23 }
 0x8de   :  { %v12447_v38 = vld [vmem:[#allocation5 + $0x458] sm:$0xf0]  ;;  %v16737_v32 = vld [vmem:[#allocation5 + $0xedc] sm:$0xf0] }
 0x8df   :  { %v16520_v39 = vld [vmem:[#allocation5 + $0x81c] sm:$0xf]  ;;  %v12450_v62 = vor.u32 %v16392_v37, %v12447_v38  ;;  %6322 = vmatpush.bf16.msrb.mxu0 %v11938_v49  ;;  %v12197_v35 = vld [vmem:[#allocation5 + $0x220] sm:$0xf]  ;;  %v13286_v37 = vor.u32 %v16609_v30, %v13285_v29  ;;  %v13798_v41 = vor.u32 %v16737_v32, %v13797_v31  ;;  %v6118_v31 = vpop.f32.mrf.mxu0 }
 0x8e0   :  { %v12959_v42 = vld [vmem:[#allocation5 + $0x858] sm:$0xf0]  ;;  %v16337_v38 = vld [vmem:[#allocation5 + $0x25c] sm:$0xf0]  ;;  %v6142_v19 = vpop.f32.mrf.mxu2  ;;  %v13351_v31 = vld [vmem:[#allocation5 + $0xb60] sm:$0xf0] }
 0x8e1   :  { %v16648_v43 = vld [vmem:[#allocation5 + $0xc1c] sm:$0xf]  ;;  %v12962_v59 = vor.u32 %v16520_v39, %v12959_v42  ;;  %6335 = vmatpush.bf16.msrb.mxu1 %v12450_v62  ;;  %v12709_v39 = vld [vmem:[#allocation5 + $0x620] sm:$0xf]  ;;  %v12198_v47 = vor.u32 %v16337_v38, %v12197_v35  ;;  %v6131_v38 = vpop.f32.mrf.mxu1 }
 0x8e2   :  { %v13471_v44 = vld [vmem:[#allocation5 + $0xc58] sm:$0xf0]  ;;  %6323 = vmatmul.bf16.vlgmr.msrb.gmra.mxu0 %v18112_v60  ;;  %v16465_v42 = vld [vmem:[#allocation5 + $0x65c] sm:$0xf0]  ;;  %v6155_v24 = vpop.f32.mrf.mxu3  ;;  %v16345_v38 = vld [vmem:[#allocation5 + $0x2a4] sm:$0xf] }
 0x8e3   :  { %v13474_v3 = vor.u32 %v16648_v43, %v13471_v44  ;;  %6348 = vmatpush.bf16.msrb.mxu2 %v12962_v59  ;;  %6367 = vmatpush.bf16.msra.mxu0 %v12390_v63  ;;  %v13221_v43 = vld [vmem:[#allocation5 + $0xa20] sm:$0xf]  ;;  %v12710_v49 = vor.u32 %v16465_v42, %v12709_v39  ;;  %v6117_v59 = vadd.f32 %v6116_v48, %v3362_v40 }
 0x8e4   :  { %6336 = vmatmul.bf16.vlgmr.msrb.gmra.mxu1 %v18116_v54  ;;  %v16593_v44 = vld [vmem:[#allocation5 + $0xa5c] sm:$0xf0] }
 0x8e5   :  { %6361 = vmatpush.bf16.msrb.mxu3 %v13474_v3  ;;  %6380 = vmatpush.bf16.msra.mxu1 %v12902_v5  ;;  %v13733_v45 = vld [vmem:[#allocation5 + $0xe20] sm:$0xf]  ;;  %v13222_v50 = vor.u32 %v16593_v44, %v13221_v43  ;;  %v6130_v8 = vadd.f32 %v6129_v58, %v6117_v59 }
 0x8e6   :  { %6349 = vmatmul.bf16.vlgmr.msrb.gmra.mxu2 %v18104_v51  ;;  %v16721_v46 = vld [vmem:[#allocation5 + $0xe5c] sm:$0xf0] }
 0x8e7   :  { %6393 = vmatpush.bf16.msra.mxu2 %v13414_v7  ;;  %6368 = vmatpush.bf16.msra.mxu0 %v12326_v4  ;;  %v12133_v52 = vld [vmem:[#allocation5 + $0x1a0] sm:$0xf]  ;;  %v13734_v12 = vor.u32 %v16721_v46, %v13733_v45  ;;  %v6143_v23 = vadd.f32 %v6142_v19, %v6130_v8  ;;  %v13927_v19 = vld [vmem:[#allocation5 + $0xfe0] sm:$0xf0] }
 0x8e8   :  { %6362 = vmatmul.bf16.vlgmr.msrb.gmra.mxu3 %v18108_v55  ;;  %v16321_v53 = vld [vmem:[#allocation5 + $0x1dc] sm:$0xf0] }
 0x8e9   :  { %6406 = vmatpush.bf16.msra.mxu3 %v13926_v13  ;;  %6381 = vmatpush.bf16.msra.mxu1 %v12838_v11  ;;  %v12645_v62 = vld [vmem:[#allocation5 + $0x5a0] sm:$0xf]  ;;  %v12134_v2 = vor.u32 %v16321_v53, %v12133_v52  ;;  %v18165_v30 = vadd.f32 %v6155_v24, %v6143_v23  ;;  %v16361_v23 = vld [vmem:[#allocation5 + $0x324] sm:$0xf] }
 0x8ea   :  { %v16449_v1 = vld [vmem:[#allocation5 + $0x5dc] sm:$0xf0]  ;;  %v12327_v24 = vld [vmem:[#allocation5 + $0x360] sm:$0xf0] }
 0x8eb   :  { %6394 = vmatpush.bf16.msra.mxu2 %v13350_v22  ;;  %6369 = vmatpush.bf16.msra.mxu0 %v12262_v33  ;;  %v13157_v3 = vld [vmem:[#allocation5 + $0x9a0] sm:$0xf]  ;;  %v12646_v10 = vor.u32 %v16449_v1, %v12645_v62  ;;  %v6786_v42 = vmax.f32 %v18165_v30, 0.0  ;;  %v6144_v62 = vpop.f32.mrf.mxu2 }
 0x8ec   :  { %v16577_v63 = vld [vmem:[#allocation5 + $0x9dc] sm:$0xf0]  ;;  %v16457_v62 = vld [vmem:[#allocation5 + $0x624] sm:$0xf] }
 0x8ed   :  { %6407 = vmatpush.bf16.msra.mxu3 %v13862_v26  ;;  %6382 = vmatpush.bf16.msra.mxu1 %v12774_v36  ;;  %v13669_v5 = vld [vmem:[#allocation5 + $0xda0] sm:$0xf]  ;;  %v13158_v13 = vor.u32 %v16577_v63, %v13157_v3  ;;  %v6157_v3 = vpop.f32.mrf.mxu3  ;;  %v16377_v63 = vld [vmem:[#allocation5 + $0x3a4] sm:$0xf] }
 0x8ee   :  { %v16705_v7 = vld [vmem:[#allocation5 + $0xddc] sm:$0xf0]  ;;  %v16585_v3 = vld [vmem:[#allocation5 + $0xa24] sm:$0xf] }
 0x8ef   :  { %6395 = vmatpush.bf16.msra.mxu2 %v13286_v37  ;;  %6370 = vmatpush.bf16.msra.mxu0 %v12198_v47  ;;  %v12069_v15 = vld [vmem:[#allocation5 + $0x120] sm:$0xf]  ;;  %v13670_v21 = vor.u32 %v16705_v7, %v13669_v5  ;;  %v12391_v5 = vld [vmem:[#allocation5 + $0x3e0] sm:$0xf0] }
 0x8f0   :  { %v16305_v16 = vld [vmem:[#allocation5 + $0x15c] sm:$0xf0]  ;;  %v16505_v7 = vld [vmem:[#allocation5 + $0x7a4] sm:$0xf] }
 0x8f1   :  { %6408 = vmatpush.bf16.msra.mxu3 %v13798_v41  ;;  %6383 = vmatpush.bf16.msra.mxu1 %v12710_v49  ;;  %v12581_v17 = vld [vmem:[#allocation5 + $0x520] sm:$0xf]  ;;  %v12070_v27 = vor.u32 %v16305_v16, %v12069_v15 }
 0x8f2   :  { %v16433_v4 = vld [vmem:[#allocation5 + $0x55c] sm:$0xf0] }
 0x8f3   :  { %6396 = vmatpush.bf16.msra.mxu2 %v13222_v50  ;;  %v13093_v11 = vld [vmem:[#allocation5 + $0x920] sm:$0xf]  ;;  %6371 = vmatpush.bf16.msra.mxu0 %v12134_v2  ;;  %v12582_v32 = vor.u32 %v16433_v4, %v12581_v17  ;;  %v12903_v2 = vld [vmem:[#allocation5 + $0x7e0] sm:$0xf0]  ;;  %v12394_v4 = vor.u32 %v16377_v63, %v12391_v5 }
 0x8f4   :  { %v16561_v22 = vld [vmem:[#allocation5 + $0x95c] sm:$0xf0]  ;;  %v16761_v17 = vld [vmem:[#allocation5 + $0xfa4] sm:$0xf] }
 0x8f5   :  { %6409 = vmatpush.bf16.msra.mxu3 %v13734_v12  ;;  %v13605_v25 = vld [vmem:[#allocation5 + $0xd20] sm:$0xf]  ;;  %6384 = vmatpush.bf16.msra.mxu1 %v12646_v10  ;;  %v13094_v33 = vor.u32 %v16561_v22, %v13093_v11  ;;  %v16633_v10 = vld [vmem:[#allocation5 + $0xba4] sm:$0xf]  ;;  %v12906_v11 = vor.u32 %v16505_v7, %v12903_v2 }
 0x8f6   :  { %v16689_v26 = vld [vmem:[#allocation5 + $0xd5c] sm:$0xf0]  ;;  %v13223_v63 = vld [vmem:[#allocation5 + $0xa60] sm:$0xf0]  ;;  %v6168_v2 = vpop.f32.mrf.mxu0 }
 0x8f7   :  { %v12005_v29 = vld [vmem:[#allocation5 + $0xa0] sm:$0xf]  ;;  %6397 = vmatpush.bf16.msra.mxu2 %v13158_v13  ;;  %v13606_v39 = vor.u32 %v16689_v26, %v13605_v25  ;;  %6372 = vmatpush.bf16.msra.mxu0 %v12070_v27  ;;  %v13415_v13 = vld [vmem:[#allocation5 + $0xbe0] sm:$0xf0]  ;;  %v13930_v26 = vor.u32 %v16761_v17, %v13927_v19 }
 0x8f8   :  { %v16289_v35 = vld [vmem:[#allocation5 + $0xdc] sm:$0xf0]  ;;  %v13418_v22 = vor.u32 %v16633_v10, %v13415_v13  ;;  %v16489_v25 = vld [vmem:[#allocation5 + $0x724] sm:$0xf]  ;;  %v13226_v13 = vor.u32 %v16585_v3, %v13223_v63 }
 0x8f9   :  { %v12517_v36 = vld [vmem:[#allocation5 + $0x4a0] sm:$0xf]  ;;  %6410 = vmatpush.bf16.msra.mxu3 %v13670_v21  ;;  %v12006_v45 = vor.u32 %v16289_v35, %v12005_v29  ;;  %6385 = vmatpush.bf16.msra.mxu1 %v12582_v32  ;;  %v12839_v27 = vld [vmem:[#allocation5 + $0x760] sm:$0xf0]  ;;  %v12330_v35 = vor.u32 %v16361_v23, %v12327_v24 }
 0x8fa   :  { %v16417_v37 = vld [vmem:[#allocation5 + $0x4dc] sm:$0xf0]  ;;  %v16617_v29 = vld [vmem:[#allocation5 + $0xb24] sm:$0xf] }
 0x8fb   :  { %v13029_v40 = vld [vmem:[#allocation5 + $0x8a0] sm:$0xf]  ;;  %6398 = vmatpush.bf16.msra.mxu2 %v13094_v33  ;;  %v12518_v48 = vor.u32 %v16417_v37, %v12517_v36  ;;  %6373 = vmatpush.bf16.msra.mxu0 %v12006_v45  ;;  %v16745_v32 = vld [vmem:[#allocation5 + $0xf24] sm:$0xf]  ;;  %v12842_v36 = vor.u32 %v16489_v25, %v12839_v27  ;;  %v13354_v37 = vor.u32 %v16617_v29, %v13351_v31 }
 0x8fc   :  { %v16545_v41 = vld [vmem:[#allocation5 + $0x8dc] sm:$0xf0]  ;;  %v13863_v33 = vld [vmem:[#allocation5 + $0xf60] sm:$0xf0] }
 0x8fd   :  { %v13541_v43 = vld [vmem:[#allocation5 + $0xca0] sm:$0xf]  ;;  %v13030_v49 = vor.u32 %v16545_v41, %v13029_v40  ;;  %6411 = vmatpush.bf16.msra.mxu3 %v13606_v39  ;;  %6386 = vmatpush.bf16.msra.mxu1 %v12518_v48  ;;  %v12263_v39 = vld [vmem:[#allocation5 + $0x2e0] sm:$0xf0]  ;;  %v13866_v41 = vor.u32 %v16745_v32, %v13863_v33 }
 0x8fe   :  { %v16673_v44 = vld [vmem:[#allocation5 + $0xcdc] sm:$0xf0]  ;;  %v16473_v40 = vld [vmem:[#allocation5 + $0x6a4] sm:$0xf]  ;;  %v12266_v48 = vor.u32 %v16345_v38, %v12263_v39 }
 0x8ff   :  { %v11941_v46 = vld [vmem:[#allocation5 + $0x20] sm:$0xf]  ;;  %v13542_v59 = vor.u32 %v16673_v44, %v13541_v43  ;;  %6399 = vmatpush.bf16.msra.mxu2 %v13030_v49  ;;  %v12775_v43 = vld [vmem:[#allocation5 + $0x6e0] sm:$0xf0] }
 0x900   :  { %v16273_v47 = vld [vmem:[#allocation5 + $0x5c] sm:$0xf0]  ;;  %v16601_v44 = vld [vmem:[#allocation5 + $0xaa4] sm:$0xf] }
 0x901   :  { %v12453_v50 = vld [vmem:[#allocation5 + $0x420] sm:$0xf]  ;;  %v11942_v8 = vor.u32 %v16273_v47, %v11941_v46  ;;  %6412 = vmatpush.bf16.msra.mxu3 %v13542_v59  ;;  %v13287_v45 = vld [vmem:[#allocation5 + $0xae0] sm:$0xf0]  ;;  %v18172_v59 = vld [vmem:[#allocation22] sm:$0xff] }
 0x902   :  { %v16401_v52 = vld [vmem:[#allocation5 + $0x45c] sm:$0xf0]  ;;  %v16729_v46 = vld [vmem:[#allocation5 + $0xea4] sm:$0xf] }
 0x903   :  { %v12965_v53 = vld [vmem:[#allocation5 + $0x820] sm:$0xf]  ;;  %v12454_v15 = vor.u32 %v16401_v52, %v12453_v50  ;;  %6374 = vmatpush.bf16.msra.mxu0 %v11942_v8  ;;  %v13799_v47 = vld [vmem:[#allocation5 + $0xee0] sm:$0xf0]  ;;  %v12778_v50 = vor.u32 %v16473_v40, %v12775_v43  ;;  %v13290_v52 = vor.u32 %v16601_v44, %v13287_v45  ;;  %v6207_v43 = vpop.f32.mrf.mxu3 }
 0x904   :  { %v16529_v58 = vld [vmem:[#allocation5 + $0x85c] sm:$0xf0]  ;;  %v16329_v49 = vld [vmem:[#allocation5 + $0x224] sm:$0xf] }
 0x905   :  { %v13477_v12 = vld [vmem:[#allocation5 + $0xc20] sm:$0xf]  ;;  %v12966_v16 = vor.u32 %v16529_v58, %v12965_v53  ;;  %6387 = vmatpush.bf16.msra.mxu1 %v12454_v15  ;;  %v12199_v53 = vld [vmem:[#allocation5 + $0x260] sm:$0xf0]  ;;  %v3363_v58 = vperm.slane %v18172_v59, 4 }
 0x906   :  { %v16657_v1 = vld [vmem:[#allocation5 + $0xc5c] sm:$0xf0]  ;;  %6375 = vmatmul.bf16.vlgmr.msra.gmra.mxu0 %v18112_v60  ;;  %v16713_v5 = vld [vmem:[#allocation5 + $0xe24] sm:$0xf]  ;;  %v12202_v8 = vor.u32 %v16329_v49, %v12199_v53  ;;  %v6170_v49 = vpop.f32.mrf.mxu0 }
 0x907   :  { %v13478_v21 = vor.u32 %v16657_v1, %v13477_v12  ;;  %6400 = vmatpush.bf16.msra.mxu2 %v12966_v16  ;;  %6419 = vmatpush.bf16.msrb.mxu0 %v12394_v4  ;;  %v13802_v12 = vor.u32 %v16729_v46, %v13799_v47  ;;  %v12711_v1 = vld [vmem:[#allocation5 + $0x660] sm:$0xf0]  ;;  %v6169_v19 = vadd.f32 %v6168_v2, %v3363_v58 }
 0x908   :  { %6388 = vmatmul.bf16.vlgmr.msra.gmra.mxu1 %v18116_v54  ;;  %v13735_v7 = vld [vmem:[#allocation5 + $0xe60] sm:$0xf0]  ;;  %v12714_v10 = vor.u32 %v16457_v62, %v12711_v1 }
 0x909   :  { %6413 = vmatpush.bf16.msra.mxu3 %v13478_v21  ;;  %6432 = vmatpush.bf16.msrb.mxu1 %v12906_v11  ;;  %v16313_v15 = vld [vmem:[#allocation5 + $0x1a4] sm:$0xf]  ;;  %v6181_v21 = vpop.f32.mrf.mxu1  ;;  %v13738_v4 = vor.u32 %v16713_v5, %v13735_v7 }
 0x90a   :  { %6401 = vmatmul.bf16.vlgmr.msra.gmra.mxu2 %v18104_v51  ;;  %v12135_v16 = vld [vmem:[#allocation5 + $0x1e0] sm:$0xf0] }
 0x90b   :  { %6445 = vmatpush.bf16.msrb.mxu2 %v13418_v22  ;;  %6420 = vmatpush.bf16.msrb.mxu0 %v12330_v35  ;;  %v16441_v17 = vld [vmem:[#allocation5 + $0x5a4] sm:$0xf]  ;;  %v12138_v27 = vor.u32 %v16313_v15, %v12135_v16 }
 0x90c   :  { %6414 = vmatmul.bf16.vlgmr.msra.gmra.mxu3 %v18108_v55  ;;  %v12647_v11 = vld [vmem:[#allocation5 + $0x5e0] sm:$0xf0] }
 0x90d   :  { %6458 = vmatpush.bf16.msrb.mxu3 %v13930_v26  ;;  %6433 = vmatpush.bf16.msrb.mxu1 %v12842_v36  ;;  %v16569_v22 = vld [vmem:[#allocation5 + $0x9a4] sm:$0xf]  ;;  %v6182_v26 = vadd.f32 %v6181_v21, %v6169_v19  ;;  %v12650_v29 = vor.u32 %v16441_v17, %v12647_v11  ;;  %v6194_v36 = vpop.f32.mrf.mxu2 }
 0x90e   :  { %v13159_v23 = vld [vmem:[#allocation5 + $0x9e0] sm:$0xf0] }
 0x90f   :  { %6446 = vmatpush.bf16.msrb.mxu2 %v13354_v37  ;;  %6421 = vmatpush.bf16.msrb.mxu0 %v12266_v48  ;;  %v16697_v24 = vld [vmem:[#allocation5 + $0xda4] sm:$0xf]  ;;  %v13162_v31 = vor.u32 %v16569_v22, %v13159_v23 }
 0x910   :  { %v13671_v25 = vld [vmem:[#allocation5 + $0xde0] sm:$0xf0] }
 0x911   :  { %6459 = vmatpush.bf16.msrb.mxu3 %v13866_v41  ;;  %6434 = vmatpush.bf16.msrb.mxu1 %v12778_v50  ;;  %v16297_v32 = vld [vmem:[#allocation5 + $0x124] sm:$0xf]  ;;  %v13674_v37 = vor.u32 %v16697_v24, %v13671_v25  ;;  %v6195_v41 = vadd.f32 %v6194_v36, %v6182_v26  ;;  %v6209_v25 = vpop.f32.mrf.mxu3  ;;  %v12397_v26 = vld [vmem:[#allocation5 + $0x3a8] sm:$0xf] }
 0x912   :  { %v12071_v33 = vld [vmem:[#allocation5 + $0x160] sm:$0xf0] }
 0x913   :  { %6447 = vmatpush.bf16.msrb.mxu2 %v13290_v52  ;;  %6422 = vmatpush.bf16.msrb.mxu0 %v12202_v8  ;;  %v16425_v35 = vld [vmem:[#allocation5 + $0x524] sm:$0xf]  ;;  %v12074_v46 = vor.u32 %v16297_v32, %v12071_v33  ;;  %v18175_v48 = vadd.f32 %v6207_v43, %v6195_v41  ;;  %v16514_v32 = vld [vmem:[#allocation5 + $0x7e4] sm:$0xf0] }
 0x914   :  { %v12583_v38 = vld [vmem:[#allocation5 + $0x560] sm:$0xf0]  ;;  %v13421_v33 = vld [vmem:[#allocation5 + $0xba8] sm:$0xf] }
 0x915   :  { %6460 = vmatpush.bf16.msrb.mxu3 %v13802_v12  ;;  %6435 = vmatpush.bf16.msrb.mxu1 %v12714_v10  ;;  %v16553_v39 = vld [vmem:[#allocation5 + $0x924] sm:$0xf]  ;;  %v12586_v50 = vor.u32 %v16425_v35, %v12583_v38  ;;  %v6183_v12 = vpop.f32.mrf.mxu1  ;;  %v6787_v5 = vmax.f32 %v18175_v48, 0.0  ;;  %v16642_v35 = vld [vmem:[#allocation5 + $0xbe4] sm:$0xf0] }
 0x916   :  { %v13095_v40 = vld [vmem:[#allocation5 + $0x960] sm:$0xf0]  ;;  %v13933_v38 = vld [vmem:[#allocation5 + $0xfa8] sm:$0xf] }
 0x917   :  { %6448 = vmatpush.bf16.msrb.mxu2 %v13226_v13  ;;  %v16681_v44 = vld [vmem:[#allocation5 + $0xd24] sm:$0xf]  ;;  %6423 = vmatpush.bf16.msrb.mxu0 %v12138_v27  ;;  %v13098_v52 = vor.u32 %v16553_v39, %v13095_v40  ;;  %v16386_v27 = vld [vmem:[#allocation5 + $0x3e4] sm:$0xf0] }
 0x918   :  { %v13607_v45 = vld [vmem:[#allocation5 + $0xd60] sm:$0xf0]  ;;  %v16770_v39 = vld [vmem:[#allocation5 + $0xfe4] sm:$0xf0]  ;;  %v12398_v41 = vor.u32 %v16386_v27, %v12397_v26 }
 0x919   :  { %6461 = vmatpush.bf16.msrb.mxu3 %v13738_v4  ;;  %v16281_v47 = vld [vmem:[#allocation5 + $0xa4] sm:$0xf]  ;;  %6436 = vmatpush.bf16.msrb.mxu1 %v12650_v29  ;;  %v13610_v1 = vor.u32 %v16681_v44, %v13607_v45  ;;  %v6196_v4 = vpop.f32.mrf.mxu2  ;;  %v12909_v29 = vld [vmem:[#allocation5 + $0x7a8] sm:$0xf]  ;;  %v13422_v44 = vor.u32 %v16642_v35, %v13421_v33  ;;  %v13934_v49 = vor.u32 %v16770_v39, %v13933_v38  ;;  %v6220_v35 = vpop.f32.mrf.mxu0 }
 0x91a   :  { %v12007_v53 = vld [vmem:[#allocation5 + $0xe0] sm:$0xf0]  ;;  %v12910_v43 = vor.u32 %v16514_v32, %v12909_v29  ;;  %v12333_v45 = vld [vmem:[#allocation5 + $0x328] sm:$0xf] }
 0x91b   :  { %6449 = vmatpush.bf16.msrb.mxu2 %v13162_v31  ;;  %v16409_v62 = vld [vmem:[#allocation5 + $0x4a4] sm:$0xf]  ;;  %6424 = vmatpush.bf16.msrb.mxu0 %v12074_v46  ;;  %v12010_v2 = vor.u32 %v16281_v47, %v12007_v53  ;;  %v16370_v46 = vld [vmem:[#allocation5 + $0x364] sm:$0xf0] }
 0x91c   :  { %v12519_v58 = vld [vmem:[#allocation5 + $0x4e0] sm:$0xf0]  ;;  %v12845_v47 = vld [vmem:[#allocation5 + $0x728] sm:$0xf]  ;;  %v12334_v12 = vor.u32 %v16370_v46, %v12333_v45 }
 0x91d   :  { %6462 = vmatpush.bf16.msrb.mxu3 %v13674_v37  ;;  %v16537_v3 = vld [vmem:[#allocation5 + $0x8a4] sm:$0xf]  ;;  %6437 = vmatpush.bf16.msrb.mxu1 %v12586_v50  ;;  %v12522_v15 = vor.u32 %v16409_v62, %v12519_v58  ;;  %v16498_v50 = vld [vmem:[#allocation5 + $0x764] sm:$0xf0] }
 0x91e   :  { %v13031_v63 = vld [vmem:[#allocation5 + $0x8e0] sm:$0xf0]  ;;  %v16626_v53 = vld [vmem:[#allocation5 + $0xb64] sm:$0xf0] }
 0x91f   :  { %v16665_v7 = vld [vmem:[#allocation5 + $0xca4] sm:$0xf]  ;;  %6450 = vmatpush.bf16.msrb.mxu2 %v13098_v52  ;;  %v13034_v16 = vor.u32 %v16537_v3, %v13031_v63  ;;  %6425 = vmatpush.bf16.msrb.mxu0 %v12010_v2  ;;  %v13357_v52 = vld [vmem:[#allocation5 + $0xb28] sm:$0xf] }
 0x920   :  { %v13543_v8 = vld [vmem:[#allocation5 + $0xce0] sm:$0xf0]  ;;  %v13869_v62 = vld [vmem:[#allocation5 + $0xf28] sm:$0xf]  ;;  %v13358_v3 = vor.u32 %v16626_v53, %v13357_v52 }
 0x921   :  { %v16265_v10 = vld [vmem:[#allocation5 + $0x24] sm:$0xf]  ;;  %6463 = vmatpush.bf16.msrb.mxu3 %v13610_v1  ;;  %v13546_v11 = vor.u32 %v16665_v7, %v13543_v8  ;;  %6438 = vmatpush.bf16.msrb.mxu1 %v12522_v15  ;;  %v16754_v58 = vld [vmem:[#allocation5 + $0xf64] sm:$0xf0]  ;;  %v12846_v1 = vor.u32 %v16498_v50, %v12845_v47 }
 0x922   :  { %v11943_v13 = vld [vmem:[#allocation5 + $0x60] sm:$0xf0]  ;;  %v12269_v63 = vld [vmem:[#allocation5 + $0x2a8] sm:$0xf]  ;;  %v13870_v2 = vor.u32 %v16754_v58, %v13869_v62 }
 0x923   :  { %v16393_v17 = vld [vmem:[#allocation5 + $0x424] sm:$0xf]  ;;  %v11946_v31 = vor.u32 %v16265_v10, %v11943_v13  ;;  %6451 = vmatpush.bf16.msrb.mxu2 %v13034_v16  ;;  %v16354_v7 = vld [vmem:[#allocation5 + $0x2e4] sm:$0xf0] }
 0x924   :  { %v12455_v19 = vld [vmem:[#allocation5 + $0x460] sm:$0xf0]  ;;  %v12781_v8 = vld [vmem:[#allocation5 + $0x6a8] sm:$0xf] }
 0x925   :  { %v16521_v21 = vld [vmem:[#allocation5 + $0x824] sm:$0xf]  ;;  %v12458_v36 = vor.u32 %v16393_v17, %v12455_v19  ;;  %6464 = vmatpush.bf16.msrb.mxu3 %v13546_v11  ;;  %6426 = vmatpush.bf16.msrb.mxu0 %v11946_v31  ;;  %v16482_v10 = vld [vmem:[#allocation5 + $0x6e4] sm:$0xf0]  ;;  %v12270_v19 = vor.u32 %v16354_v7, %v12269_v63  ;;  %v6246_v63 = vpop.f32.mrf.mxu2 }
 0x926   :  { %v12967_v22 = vld [vmem:[#allocation5 + $0x860] sm:$0xf0]  ;;  %v13293_v13 = vld [vmem:[#allocation5 + $0xaa8] sm:$0xf]  ;;  %v12782_v4 = vor.u32 %v16482_v10, %v12781_v8 }
 0x927   :  { %v16649_v23 = vld [vmem:[#allocation5 + $0xc24] sm:$0xf]  ;;  %v12970_v37 = vor.u32 %v16521_v21, %v12967_v22  ;;  %6439 = vmatpush.bf16.msrb.mxu1 %v12458_v36  ;;  %v16610_v15 = vld [vmem:[#allocation5 + $0xae4] sm:$0xf0] }
 0x928   :  { %v13479_v24 = vld [vmem:[#allocation5 + $0xc60] sm:$0xf0]  ;;  %v13805_v16 = vld [vmem:[#allocation5 + $0xea8] sm:$0xf]  ;;  %6427 = vmatmul.bf16.vlgmr.msrb.gmra.mxu0 %v18112_v60  ;;  %v13294_v11 = vor.u32 %v16610_v15, %v13293_v13  ;;  %v6259_v15 = vpop.f32.mrf.mxu3 }
 0x929   :  { %v13482_v40 = vor.u32 %v16649_v23, %v13479_v24  ;;  %6452 = vmatpush.bf16.msrb.mxu2 %v12970_v37  ;;  %6471 = vmatpush.bf16.msra.mxu0 %v12398_v41  ;;  %v16738_v17 = vld [vmem:[#allocation5 + $0xee4] sm:$0xf0]  ;;  %v3364_v24 = vperm.slane %v18172_v59, 5 }
 0x92a   :  { %v12205_v21 = vld [vmem:[#allocation5 + $0x228] sm:$0xf]  ;;  %6440 = vmatmul.bf16.vlgmr.msrb.gmra.mxu1 %v18116_v54  ;;  %v13806_v25 = vor.u32 %v16738_v17, %v13805_v16 }
 0x92b   :  { %6465 = vmatpush.bf16.msrb.mxu3 %v13482_v40  ;;  %6484 = vmatpush.bf16.msra.mxu1 %v12910_v43  ;;  %v16338_v22 = vld [vmem:[#allocation5 + $0x264] sm:$0xf0]  ;;  %v6221_v41 = vadd.f32 %v6220_v35, %v3364_v24  ;;  %v6233_v43 = vpop.f32.mrf.mxu1 }
 0x92c   :  { %6453 = vmatmul.bf16.vlgmr.msrb.gmra.mxu2 %v18104_v51  ;;  %v12717_v23 = vld [vmem:[#allocation5 + $0x628] sm:$0xf]  ;;  %v12206_v33 = vor.u32 %v16338_v22, %v12205_v21 }
 0x92d   :  { %6497 = vmatpush.bf16.msra.mxu2 %v13422_v44  ;;  %6472 = vmatpush.bf16.msra.mxu0 %v12334_v12  ;;  %v16466_v26 = vld [vmem:[#allocation5 + $0x664] sm:$0xf0]  ;;  %v6234_v52 = vadd.f32 %v6233_v43, %v6221_v41 }
 0x92e   :  { %6466 = vmatmul.bf16.vlgmr.msrb.gmra.mxu3 %v18108_v55  ;;  %v13229_v27 = vld [vmem:[#allocation5 + $0xa28] sm:$0xf]  ;;  %v12718_v36 = vor.u32 %v16466_v26, %v12717_v23 }
 0x92f   :  { %6510 = vmatpush.bf16.msra.mxu3 %v13934_v49  ;;  %6485 = vmatpush.bf16.msra.mxu1 %v12846_v1  ;;  %v16594_v29 = vld [vmem:[#allocation5 + $0xa64] sm:$0xf0]  ;;  %v6247_v13 = vadd.f32 %v6246_v63, %v6234_v52  ;;  %v16634_v63 = vld [vmem:[#allocation5 + $0xbac] sm:$0xf] }
 0x930   :  { %v13741_v31 = vld [vmem:[#allocation5 + $0xe28] sm:$0xf]  ;;  %v13230_v37 = vor.u32 %v16594_v29, %v13229_v27 }
 0x931   :  { %6498 = vmatpush.bf16.msra.mxu2 %v13358_v3  ;;  %v16722_v32 = vld [vmem:[#allocation5 + $0xe64] sm:$0xf0]  ;;  %6473 = vmatpush.bf16.msra.mxu0 %v12270_v19 }
 0x932   :  { %v12141_v38 = vld [vmem:[#allocation5 + $0x1a8] sm:$0xf]  ;;  %v13742_v44 = vor.u32 %v16722_v32, %v13741_v31 }
 0x933   :  { %6511 = vmatpush.bf16.msra.mxu3 %v13870_v2  ;;  %6486 = vmatpush.bf16.msra.mxu1 %v12782_v4  ;;  %v16322_v39 = vld [vmem:[#allocation5 + $0x1e4] sm:$0xf0]  ;;  %v18183_v4 = vadd.f32 %v6259_v15, %v6247_v13  ;;  %v6235_v27 = vpop.f32.mrf.mxu1  ;;  %v13935_v13 = vld [vmem:[#allocation5 + $0xfe8] sm:$0xf0] }
 0x934   :  { %v12653_v40 = vld [vmem:[#allocation5 + $0x5a8] sm:$0xf]  ;;  %v12142_v53 = vor.u32 %v16322_v39, %v12141_v38  ;;  %v16746_v27 = vld [vmem:[#allocation5 + $0xf2c] sm:$0xf] }
 0x935   :  { %6499 = vmatpush.bf16.msra.mxu2 %v13294_v11  ;;  %v16450_v45 = vld [vmem:[#allocation5 + $0x5e4] sm:$0xf0]  ;;  %6474 = vmatpush.bf16.msra.mxu0 %v12206_v33  ;;  %v6222_v11 = vpop.f32.mrf.mxu0  ;;  %v6788_v33 = vmax.f32 %v18183_v4, 0.0 }
 0x936   :  { %v13165_v46 = vld [vmem:[#allocation5 + $0x9a8] sm:$0xf]  ;;  %v12654_v62 = vor.u32 %v16450_v45, %v12653_v40  ;;  %v12335_v11 = vld [vmem:[#allocation5 + $0x368] sm:$0xf0] }
 0x937   :  { %6512 = vmatpush.bf16.msra.mxu3 %v13806_v25  ;;  %v16578_v47 = vld [vmem:[#allocation5 + $0x9e4] sm:$0xf0]  ;;  %6487 = vmatpush.bf16.msra.mxu1 %v12718_v36 }
 0x938   :  { %v13677_v49 = vld [vmem:[#allocation5 + $0xda8] sm:$0xf]  ;;  %v13166_v58 = vor.u32 %v16578_v47, %v13165_v46  ;;  %v6248_v46 = vpop.f32.mrf.mxu2 }
 0x939   :  { %v16706_v50 = vld [vmem:[#allocation5 + $0xde4] sm:$0xf0]  ;;  %6500 = vmatpush.bf16.msra.mxu2 %v13230_v37  ;;  %6475 = vmatpush.bf16.msra.mxu0 %v12142_v53  ;;  %v6261_v53 = vpop.f32.mrf.mxu3 }
 0x93a   :  { %v12077_v12 = vld [vmem:[#allocation5 + $0x128] sm:$0xf]  ;;  %v13678_v7 = vor.u32 %v16706_v50, %v13677_v49  ;;  %v16458_v53 = vld [vmem:[#allocation5 + $0x62c] sm:$0xf] }
 0x93b   :  { %v16306_v1 = vld [vmem:[#allocation5 + $0x164] sm:$0xf0]  ;;  %6513 = vmatpush.bf16.msra.mxu3 %v13742_v44  ;;  %6488 = vmatpush.bf16.msra.mxu1 %v12654_v62  ;;  %v16378_v62 = vld [vmem:[#allocation5 + $0x3ac] sm:$0xf] }
 0x93c   :  { %v12589_v3 = vld [vmem:[#allocation5 + $0x528] sm:$0xf]  ;;  %v12078_v19 = vor.u32 %v16306_v1, %v12077_v12  ;;  %v16506_v12 = vld [vmem:[#allocation5 + $0x7ac] sm:$0xf] }
 0x93d   :  { %v16434_v8 = vld [vmem:[#allocation5 + $0x564] sm:$0xf0]  ;;  %6501 = vmatpush.bf16.msra.mxu2 %v13166_v58  ;;  %v12399_v58 = vld [vmem:[#allocation5 + $0x3e8] sm:$0xf0] }
 0x93e   :  { %v13101_v2 = vld [vmem:[#allocation5 + $0x928] sm:$0xf]  ;;  %v12590_v22 = vor.u32 %v16434_v8, %v12589_v3  ;;  %6476 = vmatpush.bf16.msra.mxu0 %v12078_v19  ;;  %v12911_v3 = vld [vmem:[#allocation5 + $0x7e8] sm:$0xf0] }
 0x93f   :  { %v16562_v10 = vld [vmem:[#allocation5 + $0x964] sm:$0xf0]  ;;  %6514 = vmatpush.bf16.msra.mxu3 %v13678_v7  ;;  %v13423_v7 = vld [vmem:[#allocation5 + $0xbe8] sm:$0xf0] }
 0x940   :  { %v13613_v16 = vld [vmem:[#allocation5 + $0xd28] sm:$0xf]  ;;  %v13102_v23 = vor.u32 %v16562_v10, %v13101_v2  ;;  %6489 = vmatpush.bf16.msra.mxu1 %v12590_v22  ;;  %v16762_v10 = vld [vmem:[#allocation5 + $0xfac] sm:$0xf]  ;;  %v13426_v19 = vor.u32 %v16634_v63, %v13423_v7 }
 0x941   :  { %v16690_v17 = vld [vmem:[#allocation5 + $0xd64] sm:$0xf0]  ;;  %v16490_v22 = vld [vmem:[#allocation5 + $0x72c] sm:$0xf] }
 0x942   :  { %v12013_v21 = vld [vmem:[#allocation5 + $0xa8] sm:$0xf]  ;;  %v13614_v29 = vor.u32 %v16690_v17, %v13613_v16  ;;  %6502 = vmatpush.bf16.msra.mxu2 %v13102_v23  ;;  %v12402_v16 = vor.u32 %v16378_v62, %v12399_v58  ;;  %v12914_v17 = vor.u32 %v16506_v12, %v12911_v3  ;;  %v13938_v23 = vor.u32 %v16762_v10, %v13935_v13  ;;  %v12719_v12 = vld [vmem:[#allocation5 + $0x668] sm:$0xf0] }
 0x943   :  { %v16290_v24 = vld [vmem:[#allocation5 + $0xe4] sm:$0xf0]  ;;  %v3365_v62 = vperm.slane %v18172_v59, 6  ;;  %v13231_v3 = vld [vmem:[#allocation5 + $0xa68] sm:$0xf0]  ;;  %v12722_v10 = vor.u32 %v16458_v53, %v12719_v12 }
 0x944   :  { %v12525_v25 = vld [vmem:[#allocation5 + $0x4a8] sm:$0xf]  ;;  %v12014_v37 = vor.u32 %v16290_v24, %v12013_v21  ;;  %6515 = vmatpush.bf16.msra.mxu3 %v13614_v29  ;;  %v16362_v21 = vld [vmem:[#allocation5 + $0x32c] sm:$0xf] }
 0x945   :  { %v16418_v26 = vld [vmem:[#allocation5 + $0x4e4] sm:$0xf0]  ;;  %v12847_v24 = vld [vmem:[#allocation5 + $0x768] sm:$0xf0] }
 0x946   :  { %v13037_v31 = vld [vmem:[#allocation5 + $0x8a8] sm:$0xf]  ;;  %v12526_v40 = vor.u32 %v16418_v26, %v12525_v25  ;;  %6477 = vmatpush.bf16.msra.mxu0 %v12014_v37  ;;  %v16618_v25 = vld [vmem:[#allocation5 + $0xb2c] sm:$0xf] }
 0x947   :  { %v16546_v32 = vld [vmem:[#allocation5 + $0x8e4] sm:$0xf0]  ;;  %v13359_v26 = vld [vmem:[#allocation5 + $0xb68] sm:$0xf0] }
 0x948   :  { %v13549_v35 = vld [vmem:[#allocation5 + $0xca8] sm:$0xf]  ;;  %v13038_v41 = vor.u32 %v16546_v32, %v13037_v31  ;;  %6490 = vmatpush.bf16.msra.mxu1 %v12526_v40  ;;  %v13871_v29 = vld [vmem:[#allocation5 + $0xf68] sm:$0xf0]  ;;  %v12338_v31 = vor.u32 %v16362_v21, %v12335_v11  ;;  %v12850_v32 = vor.u32 %v16490_v22, %v12847_v24  ;;  %v6285_v21 = vpop.f32.mrf.mxu1 }
 0x949   :  { %v16674_v36 = vld [vmem:[#allocation5 + $0xce4] sm:$0xf0]  ;;  %v12271_v37 = vld [vmem:[#allocation5 + $0x2e8] sm:$0xf0] }
 0x94a   :  { %v11949_v38 = vld [vmem:[#allocation5 + $0x28] sm:$0xf]  ;;  %v13550_v47 = vor.u32 %v16674_v36, %v13549_v35  ;;  %6503 = vmatpush.bf16.msra.mxu2 %v13038_v41  ;;  %v13362_v35 = vor.u32 %v16618_v25, %v13359_v26  ;;  %v16346_v36 = vld [vmem:[#allocation5 + $0x2ac] sm:$0xf] }
 0x94b   :  { %v16274_v39 = vld [vmem:[#allocation5 + $0x64] sm:$0xf0]  ;;  %v12783_v40 = vld [vmem:[#allocation5 + $0x6e8] sm:$0xf0]  ;;  %v12274_v46 = vor.u32 %v16346_v36, %v12271_v37 }
 0x94c   :  { %v12461_v43 = vld [vmem:[#allocation5 + $0x428] sm:$0xf]  ;;  %v11950_v1 = vor.u32 %v16274_v39, %v11949_v38  ;;  %6516 = vmatpush.bf16.msra.mxu3 %v13550_v47  ;;  %v16474_v38 = vld [vmem:[#allocation5 + $0x6ac] sm:$0xf]  ;;  %v13874_v39 = vor.u32 %v16746_v27, %v13871_v29 }
 0x94d   :  { %v16402_v44 = vld [vmem:[#allocation5 + $0x464] sm:$0xf0]  ;;  %v16602_v41 = vld [vmem:[#allocation5 + $0xaac] sm:$0xf] }
 0x94e   :  { %v12973_v45 = vld [vmem:[#allocation5 + $0x828] sm:$0xf]  ;;  %v12462_v8 = vor.u32 %v16402_v44, %v12461_v43  ;;  %6478 = vmatpush.bf16.msra.mxu0 %v11950_v1  ;;  %v13295_v43 = vld [vmem:[#allocation5 + $0xae8] sm:$0xf0] }
 0x94f   :  { %v16530_v49 = vld [vmem:[#allocation5 + $0x864] sm:$0xf0]  ;;  %v16730_v44 = vld [vmem:[#allocation5 + $0xeac] sm:$0xf] }
 0x950   :  { %v13485_v50 = vld [vmem:[#allocation5 + $0xc28] sm:$0xf]  ;;  %v12974_v2 = vor.u32 %v16530_v49, %v12973_v45  ;;  %6491 = vmatpush.bf16.msra.mxu1 %v12462_v8  ;;  %v13807_v45 = vld [vmem:[#allocation5 + $0xee8] sm:$0xf0]  ;;  %v12786_v49 = vor.u32 %v16474_v38, %v12783_v40  ;;  %v6298_v38 = vpop.f32.mrf.mxu2 }
 0x951   :  { %v16658_v52 = vld [vmem:[#allocation5 + $0xc64] sm:$0xf0]  ;;  %6479 = vmatmul.bf16.vlgmr.msra.gmra.mxu0 %v18112_v60  ;;  %v16330_v47 = vld [vmem:[#allocation5 + $0x22c] sm:$0xf]  ;;  %v13810_v58 = vor.u32 %v16730_v44, %v13807_v45  ;;  %v6311_v45 = vpop.f32.mrf.mxu3 }
 0x952   :  { %v13486_v15 = vor.u32 %v16658_v52, %v13485_v50  ;;  %6504 = vmatpush.bf16.msra.mxu2 %v12974_v2  ;;  %6523 = vmatpush.bf16.msrb.mxu0 %v12402_v16  ;;  %v13298_v50 = vor.u32 %v16602_v41, %v13295_v43  ;;  %v12207_v52 = vld [vmem:[#allocation5 + $0x268] sm:$0xf0]  ;;  %v6272_v2 = vpop.f32.mrf.mxu0 }
 0x953   :  { %6492 = vmatmul.bf16.vlgmr.msra.gmra.mxu1 %v18116_v54  ;;  %v16586_v1 = vld [vmem:[#allocation5 + $0xa2c] sm:$0xf]  ;;  %v12210_v8 = vor.u32 %v16330_v47, %v12207_v52 }
 0x954   :  { %6517 = vmatpush.bf16.msra.mxu3 %v13486_v15  ;;  %6536 = vmatpush.bf16.msrb.mxu1 %v12914_v17  ;;  %v16714_v63 = vld [vmem:[#allocation5 + $0xe2c] sm:$0xf]  ;;  %v13234_v13 = vor.u32 %v16586_v1, %v13231_v3 }
 0x955   :  { %6505 = vmatmul.bf16.vlgmr.msra.gmra.mxu2 %v18104_v51  ;;  %v13743_v7 = vld [vmem:[#allocation5 + $0xe68] sm:$0xf0] }
 0x956   :  { %6549 = vmatpush.bf16.msrb.mxu2 %v13426_v19  ;;  %6524 = vmatpush.bf16.msrb.mxu0 %v12338_v31  ;;  %v16314_v15 = vld [vmem:[#allocation5 + $0x1ac] sm:$0xf]  ;;  %v6273_v19 = vadd.f32 %v6272_v2, %v3365_v62  ;;  %v13746_v11 = vor.u32 %v16714_v63, %v13743_v7  ;;  %v6287_v63 = vpop.f32.mrf.mxu1 }
 0x957   :  { %6518 = vmatmul.bf16.vlgmr.msra.gmra.mxu3 %v18108_v55  ;;  %v12143_v16 = vld [vmem:[#allocation5 + $0x1e8] sm:$0xf0]  ;;  %v13365_v63 = vld [vmem:[#allocation5 + $0xb30] sm:$0xf] }
 0x958   :  { %6562 = vmatpush.bf16.msrb.mxu3 %v13938_v23  ;;  %6537 = vmatpush.bf16.msrb.mxu1 %v12850_v32  ;;  %v16442_v17 = vld [vmem:[#allocation5 + $0x5ac] sm:$0xf]  ;;  %v6286_v27 = vadd.f32 %v6285_v21, %v6273_v19  ;;  %v12146_v29 = vor.u32 %v16314_v15, %v12143_v16 }
 0x959   :  { %v12655_v22 = vld [vmem:[#allocation5 + $0x5e8] sm:$0xf0] }
 0x95a   :  { %6550 = vmatpush.bf16.msrb.mxu2 %v13362_v35  ;;  %6525 = vmatpush.bf16.msrb.mxu0 %v12274_v46  ;;  %v16570_v23 = vld [vmem:[#allocation5 + $0x9ac] sm:$0xf]  ;;  %v12658_v31 = vor.u32 %v16442_v17, %v12655_v22  ;;  %v6299_v44 = vadd.f32 %v6298_v38, %v6286_v27  ;;  %v6274_v53 = vpop.f32.mrf.mxu0 }
 0x95b   :  { %v13167_v24 = vld [vmem:[#allocation5 + $0x9e8] sm:$0xf0] }
 0x95c   :  { %6563 = vmatpush.bf16.msrb.mxu3 %v13874_v39  ;;  %6538 = vmatpush.bf16.msrb.mxu1 %v12786_v49  ;;  %v16698_v25 = vld [vmem:[#allocation5 + $0xdac] sm:$0xf]  ;;  %v13170_v32 = vor.u32 %v16570_v23, %v13167_v24  ;;  %v18191_v52 = vadd.f32 %v6311_v45, %v6299_v44  ;;  %v13941_v45 = vld [vmem:[#allocation5 + $0xfb0] sm:$0xf] }
 0x95d   :  { %v13679_v26 = vld [vmem:[#allocation5 + $0xde8] sm:$0xf0] }
 0x95e   :  { %6551 = vmatpush.bf16.msrb.mxu2 %v13298_v50  ;;  %6526 = vmatpush.bf16.msrb.mxu0 %v12210_v8  ;;  %v16298_v35 = vld [vmem:[#allocation5 + $0x12c] sm:$0xf]  ;;  %v13682_v39 = vor.u32 %v16698_v25, %v13679_v26  ;;  %v6300_v25 = vpop.f32.mrf.mxu2 }
 0x95f   :  { %v12079_v36 = vld [vmem:[#allocation5 + $0x168] sm:$0xf0]  ;;  %v13813_v25 = vld [vmem:[#allocation5 + $0xeb0] sm:$0xf] }
 0x960   :  { %6564 = vmatpush.bf16.msrb.mxu3 %v13810_v58  ;;  %6539 = vmatpush.bf16.msrb.mxu1 %v12722_v10  ;;  %v16426_v37 = vld [vmem:[#allocation5 + $0x52c] sm:$0xf]  ;;  %v12082_v49 = vor.u32 %v16298_v35, %v12079_v36  ;;  %v6789_v10 = vmax.f32 %v18191_v52, 0.0  ;;  %v12405_v35 = vld [vmem:[#allocation5 + $0x3b0] sm:$0xf] }
 0x961   :  { %v12591_v40 = vld [vmem:[#allocation5 + $0x568] sm:$0xf0]  ;;  %v16387_v36 = vld [vmem:[#allocation5 + $0x3ec] sm:$0xf0] }
 0x962   :  { %6552 = vmatpush.bf16.msrb.mxu2 %v13234_v13  ;;  %v16554_v41 = vld [vmem:[#allocation5 + $0x92c] sm:$0xf]  ;;  %6527 = vmatpush.bf16.msrb.mxu0 %v12146_v29  ;;  %v12594_v62 = vor.u32 %v16426_v37, %v12591_v40  ;;  %v12917_v37 = vld [vmem:[#allocation5 + $0x7b0] sm:$0xf] }
 0x963   :  { %v13103_v43 = vld [vmem:[#allocation5 + $0x968] sm:$0xf0]  ;;  %v13429_v40 = vld [vmem:[#allocation5 + $0xbb0] sm:$0xf] }
 0x964   :  { %6565 = vmatpush.bf16.msrb.mxu3 %v13746_v11  ;;  %v16682_v46 = vld [vmem:[#allocation5 + $0xd2c] sm:$0xf]  ;;  %6540 = vmatpush.bf16.msrb.mxu1 %v12658_v31  ;;  %v13106_v58 = vor.u32 %v16554_v41, %v13103_v43  ;;  %v16643_v41 = vld [vmem:[#allocation5 + $0xbec] sm:$0xf0] }
 0x965   :  { %v13615_v47 = vld [vmem:[#allocation5 + $0xd68] sm:$0xf0]  ;;  %v13430_v53 = vor.u32 %v16643_v41, %v13429_v40  ;;  %v13237_v40 = vld [vmem:[#allocation5 + $0xa30] sm:$0xf] }
 0x966   :  { %v16282_v50 = vld [vmem:[#allocation5 + $0xac] sm:$0xf]  ;;  %6553 = vmatpush.bf16.msrb.mxu2 %v13170_v32  ;;  %v13618_v7 = vor.u32 %v16682_v46, %v13615_v47  ;;  %6528 = vmatpush.bf16.msrb.mxu0 %v12082_v49  ;;  %v6313_v32 = vpop.f32.mrf.mxu3  ;;  %v16771_v46 = vld [vmem:[#allocation5 + $0xfec] sm:$0xf0]  ;;  %v12406_v49 = vor.u32 %v16387_v36, %v12405_v35 }
 0x967   :  { %v12015_v12 = vld [vmem:[#allocation5 + $0xe8] sm:$0xf0]  ;;  %v16339_v35 = vld [vmem:[#allocation5 + $0x26c] sm:$0xf0] }
 0x968   :  { %v16410_v1 = vld [vmem:[#allocation5 + $0x4ac] sm:$0xf]  ;;  %6566 = vmatpush.bf16.msrb.mxu3 %v13682_v39  ;;  %v12018_v16 = vor.u32 %v16282_v50, %v12015_v12  ;;  %6541 = vmatpush.bf16.msrb.mxu1 %v12594_v62  ;;  %v16515_v39 = vld [vmem:[#allocation5 + $0x7ec] sm:$0xf0] }
 0x969   :  { %v12527_v3 = vld [vmem:[#allocation5 + $0x4e8] sm:$0xf0]  ;;  %v12918_v50 = vor.u32 %v16515_v39, %v12917_v37  ;;  %v12341_v62 = vld [vmem:[#allocation5 + $0x330] sm:$0xf]  ;;  %v3366_v37 = vperm.slane %v18172_v59, 7 }
 0x96a   :  { %v16538_v8 = vld [vmem:[#allocation5 + $0x8ac] sm:$0xf]  ;;  %6554 = vmatpush.bf16.msrb.mxu2 %v13106_v58  ;;  %v12530_v21 = vor.u32 %v16410_v1, %v12527_v3  ;;  %6529 = vmatpush.bf16.msrb.mxu0 %v12018_v16  ;;  %v16371_v58 = vld [vmem:[#allocation5 + $0x36c] sm:$0xf0]  ;;  %v13942_v1 = vor.u32 %v16771_v46, %v13941_v45  ;;  %v6324_v46 = vpop.f32.mrf.mxu0 }
 0x96b   :  { %v13039_v2 = vld [vmem:[#allocation5 + $0x8e8] sm:$0xf0]  ;;  %v12853_v12 = vld [vmem:[#allocation5 + $0x730] sm:$0xf] }
 0x96c   :  { %v16666_v13 = vld [vmem:[#allocation5 + $0xcac] sm:$0xf]  ;;  %v13042_v11 = vor.u32 %v16538_v8, %v13039_v2  ;;  %6567 = vmatpush.bf16.msrb.mxu3 %v13618_v7  ;;  %6542 = vmatpush.bf16.msrb.mxu1 %v12530_v21  ;;  %v16499_v3 = vld [vmem:[#allocation5 + $0x76c] sm:$0xf0] }
 0x96d   :  { %v13551_v15 = vld [vmem:[#allocation5 + $0xce8] sm:$0xf0]  ;;  %v16627_v7 = vld [vmem:[#allocation5 + $0xb6c] sm:$0xf0] }
 0x96e   :  { %v16266_v17 = vld [vmem:[#allocation5 + $0x2c] sm:$0xf]  ;;  %v13554_v26 = vor.u32 %v16666_v13, %v13551_v15  ;;  %6555 = vmatpush.bf16.msrb.mxu2 %v13042_v11  ;;  %v13877_v8 = vld [vmem:[#allocation5 + $0xf30] sm:$0xf]  ;;  %v12342_v13 = vor.u32 %v16371_v58, %v12341_v62  ;;  %v12854_v15 = vor.u32 %v16499_v3, %v12853_v12  ;;  %v13366_v16 = vor.u32 %v16627_v7, %v13365_v63  ;;  %v6337_v12 = vpop.f32.mrf.mxu1 }
 0x96f   :  { %v11951_v19 = vld [vmem:[#allocation5 + $0x68] sm:$0xf0]  ;;  %v16755_v2 = vld [vmem:[#allocation5 + $0xf6c] sm:$0xf0]  ;;  %v6325_v58 = vadd.f32 %v6324_v46, %v3366_v37 }
 0x970   :  { %v16394_v22 = vld [vmem:[#allocation5 + $0x42c] sm:$0xf]  ;;  %v11954_v38 = vor.u32 %v16266_v17, %v11951_v19  ;;  %6568 = vmatpush.bf16.msrb.mxu3 %v13554_v26  ;;  %v12277_v17 = vld [vmem:[#allocation5 + $0x2b0] sm:$0xf]  ;;  %v13878_v11 = vor.u32 %v16755_v2, %v13877_v8 }
 0x971   :  { %v12463_v23 = vld [vmem:[#allocation5 + $0x468] sm:$0xf0]  ;;  %v16355_v19 = vld [vmem:[#allocation5 + $0x2ec] sm:$0xf0]  ;;  %v6338_v2 = vadd.f32 %v6337_v12, %v6325_v58 }
 0x972   :  { %v16522_v24 = vld [vmem:[#allocation5 + $0x82c] sm:$0xf]  ;;  %v12466_v43 = vor.u32 %v16394_v22, %v12463_v23  ;;  %6530 = vmatpush.bf16.msrb.mxu0 %v11954_v38  ;;  %v12789_v21 = vld [vmem:[#allocation5 + $0x6b0] sm:$0xf]  ;;  %v6326_v37 = vpop.f32.mrf.mxu0 }
 0x973   :  { %v12975_v27 = vld [vmem:[#allocation5 + $0x868] sm:$0xf0]  ;;  %v16483_v22 = vld [vmem:[#allocation5 + $0x6ec] sm:$0xf0] }
 0x974   :  { %v16650_v29 = vld [vmem:[#allocation5 + $0xc2c] sm:$0xf]  ;;  %v12978_v44 = vor.u32 %v16522_v24, %v12975_v27  ;;  %6543 = vmatpush.bf16.msrb.mxu1 %v12466_v43  ;;  %v13301_v23 = vld [vmem:[#allocation5 + $0xab0] sm:$0xf]  ;;  %v12278_v27 = vor.u32 %v16355_v19, %v12277_v17 }
 0x975   :  { %v13487_v31 = vld [vmem:[#allocation5 + $0xc68] sm:$0xf0]  ;;  %v16611_v24 = vld [vmem:[#allocation5 + $0xaec] sm:$0xf0]  ;;  %6531 = vmatmul.bf16.vlgmr.msrb.gmra.mxu0 %v18112_v60 }
 0x976   :  { %v13490_v47 = vor.u32 %v16650_v29, %v13487_v31  ;;  %6556 = vmatpush.bf16.msrb.mxu2 %v12978_v44  ;;  %6575 = vmatpush.bf16.msra.mxu0 %v12406_v49  ;;  %v16739_v26 = vld [vmem:[#allocation5 + $0xeec] sm:$0xf0]  ;;  %v12790_v31 = vor.u32 %v16483_v22, %v12789_v21  ;;  %v13302_v32 = vor.u32 %v16611_v24, %v13301_v23 }
 0x977   :  { %v12213_v29 = vld [vmem:[#allocation5 + $0x230] sm:$0xf]  ;;  %6544 = vmatmul.bf16.vlgmr.msrb.gmra.mxu1 %v18116_v54  ;;  %v13814_v38 = vor.u32 %v16739_v26, %v13813_v25 }
 0x978   :  { %6569 = vmatpush.bf16.msrb.mxu3 %v13490_v47  ;;  %6588 = vmatpush.bf16.msra.mxu1 %v12918_v50  ;;  %v12725_v36 = vld [vmem:[#allocation5 + $0x630] sm:$0xf]  ;;  %v12214_v45 = vor.u32 %v16339_v35, %v12213_v29 }
 0x979   :  { %6557 = vmatmul.bf16.vlgmr.msrb.gmra.mxu2 %v18104_v51  ;;  %v16467_v39 = vld [vmem:[#allocation5 + $0x66c] sm:$0xf0] }
 0x97a   :  { %6601 = vmatpush.bf16.msra.mxu2 %v13430_v53  ;;  %6576 = vmatpush.bf16.msra.mxu0 %v12342_v13  ;;  %v16595_v41 = vld [vmem:[#allocation5 + $0xa6c] sm:$0xf0]  ;;  %v12726_v47 = vor.u32 %v16467_v39, %v12725_v36 }
 0x97b   :  { %6570 = vmatmul.bf16.vlgmr.msrb.gmra.mxu3 %v18108_v55  ;;  %v13749_v43 = vld [vmem:[#allocation5 + $0xe30] sm:$0xf]  ;;  %v13238_v49 = vor.u32 %v16595_v41, %v13237_v40 }
 0x97c   :  { %6614 = vmatpush.bf16.msra.mxu3 %v13942_v1  ;;  %6589 = vmatpush.bf16.msra.mxu1 %v12854_v15  ;;  %v16723_v44 = vld [vmem:[#allocation5 + $0xe6c] sm:$0xf0] }
 0x97d   :  { %v12149_v50 = vld [vmem:[#allocation5 + $0x1b0] sm:$0xf]  ;;  %v13750_v59 = vor.u32 %v16723_v44, %v13749_v43  ;;  %v6339_v44 = vpop.f32.mrf.mxu1 }
 0x97e   :  { %6602 = vmatpush.bf16.msra.mxu2 %v13366_v16  ;;  %6577 = vmatpush.bf16.msra.mxu0 %v12278_v27  ;;  %v16323_v53 = vld [vmem:[#allocation5 + $0x1ec] sm:$0xf0]  ;;  %v6363_v27 = vpop.f32.mrf.mxu3  ;;  %v12855_v44 = vld [vmem:[#allocation5 + $0x770] sm:$0xf0] }
 0x97f   :  { %v12661_v62 = vld [vmem:[#allocation5 + $0x5b0] sm:$0xf]  ;;  %v12150_v13 = vor.u32 %v16323_v53, %v12149_v50 }
 0x980   :  { %6615 = vmatpush.bf16.msra.mxu3 %v13878_v11  ;;  %6590 = vmatpush.bf16.msra.mxu1 %v12790_v31  ;;  %v16451_v1 = vld [vmem:[#allocation5 + $0x5ec] sm:$0xf0]  ;;  %v6350_v11 = vpop.f32.mrf.mxu2 }
 0x981   :  { %v13173_v3 = vld [vmem:[#allocation5 + $0x9b0] sm:$0xf]  ;;  %v12662_v15 = vor.u32 %v16451_v1, %v12661_v62  ;;  %v6351_v26 = vadd.f32 %v6350_v11, %v6338_v2  ;;  %v16507_v11 = vld [vmem:[#allocation5 + $0x7b4] sm:$0xf] }
 0x982   :  { %6603 = vmatpush.bf16.msra.mxu2 %v13302_v32  ;;  %v16579_v63 = vld [vmem:[#allocation5 + $0x9ec] sm:$0xf0]  ;;  %6578 = vmatpush.bf16.msra.mxu0 %v12214_v45 }
 0x983   :  { %v13685_v7 = vld [vmem:[#allocation5 + $0xdb0] sm:$0xf]  ;;  %v13174_v16 = vor.u32 %v16579_v63, %v13173_v3  ;;  %v18199_v36 = vadd.f32 %v6363_v27, %v6351_v26 }
 0x984   :  { %6616 = vmatpush.bf16.msra.mxu3 %v13814_v38  ;;  %v16707_v8 = vld [vmem:[#allocation5 + $0xdec] sm:$0xf0]  ;;  %6591 = vmatpush.bf16.msra.mxu1 %v12726_v47 }
 0x985   :  { %v12085_v17 = vld [vmem:[#allocation5 + $0x130] sm:$0xf]  ;;  %v13686_v22 = vor.u32 %v16707_v8, %v13685_v7 }
 0x986   :  { %6604 = vmatpush.bf16.msra.mxu2 %v13238_v49  ;;  %v16307_v19 = vld [vmem:[#allocation5 + $0x16c] sm:$0xf0]  ;;  %6579 = vmatpush.bf16.msra.mxu0 %v12150_v13  ;;  %v6790_v49 = vmax.f32 %v18199_v36, 0.0 }
 0x987   :  { %v12597_v21 = vld [vmem:[#allocation5 + $0x530] sm:$0xf]  ;;  %v12086_v32 = vor.u32 %v16307_v19, %v12085_v17  ;;  %v6365_v17 = vpop.f32.mrf.mxu3  ;;  %v16379_v19 = vld [vmem:[#allocation5 + $0x3b4] sm:$0xf] }
 0x988   :  { %6617 = vmatpush.bf16.msra.mxu3 %v13750_v59  ;;  %v16435_v23 = vld [vmem:[#allocation5 + $0x56c] sm:$0xf0]  ;;  %6592 = vmatpush.bf16.msra.mxu1 %v12662_v15  ;;  %v6352_v8 = vpop.f32.mrf.mxu2 }
 0x989   :  { %v13109_v24 = vld [vmem:[#allocation5 + $0x930] sm:$0xf]  ;;  %v12598_v38 = vor.u32 %v16435_v23, %v12597_v21  ;;  %v12407_v21 = vld [vmem:[#allocation5 + $0x3f0] sm:$0xf0] }
 0x98a   :  { %v16563_v25 = vld [vmem:[#allocation5 + $0x96c] sm:$0xf0]  ;;  %6605 = vmatpush.bf16.msra.mxu2 %v13174_v16  ;;  %6580 = vmatpush.bf16.msra.mxu0 %v12086_v32  ;;  %v12919_v23 = vld [vmem:[#allocation5 + $0x7f0] sm:$0xf0] }
 0x98b   :  { %v13621_v29 = vld [vmem:[#allocation5 + $0xd30] sm:$0xf]  ;;  %v13110_v39 = vor.u32 %v16563_v25, %v13109_v24  ;;  %v16635_v24 = vld [vmem:[#allocation5 + $0xbb4] sm:$0xf]  ;;  %v12922_v37 = vor.u32 %v16507_v11, %v12919_v23 }
 0x98c   :  { %v16691_v31 = vld [vmem:[#allocation5 + $0xd6c] sm:$0xf0]  ;;  %6618 = vmatpush.bf16.msra.mxu3 %v13686_v22  ;;  %6593 = vmatpush.bf16.msra.mxu1 %v12598_v38  ;;  %v13431_v25 = vld [vmem:[#allocation5 + $0xbf0] sm:$0xf0] }
 0x98d   :  { %v12021_v35 = vld [vmem:[#allocation5 + $0xb0] sm:$0xf]  ;;  %v13622_v45 = vor.u32 %v16691_v31, %v13621_v29  ;;  %v16763_v29 = vld [vmem:[#allocation5 + $0xfb4] sm:$0xf]  ;;  %v13434_v38 = vor.u32 %v16635_v24, %v13431_v25 }
 0x98e   :  { %v16291_v40 = vld [vmem:[#allocation5 + $0xec] sm:$0xf0]  ;;  %6606 = vmatpush.bf16.msra.mxu2 %v13110_v39  ;;  %v13943_v31 = vld [vmem:[#allocation5 + $0xff0] sm:$0xf0] }
 0x98f   :  { %v12533_v41 = vld [vmem:[#allocation5 + $0x4b0] sm:$0xf]  ;;  %v12022_v62 = vor.u32 %v16291_v40, %v12021_v35  ;;  %v12410_v35 = vor.u32 %v16379_v19, %v12407_v21  ;;  %v16363_v39 = vld [vmem:[#allocation5 + $0x334] sm:$0xf] }
 0x990   :  { %v16419_v43 = vld [vmem:[#allocation5 + $0x4ec] sm:$0xf0]  ;;  %6619 = vmatpush.bf16.msra.mxu3 %v13622_v45  ;;  %v12343_v40 = vld [vmem:[#allocation5 + $0x370] sm:$0xf0] }
 0x991   :  { %v13045_v46 = vld [vmem:[#allocation5 + $0x8b0] sm:$0xf]  ;;  %v12534_v59 = vor.u32 %v16419_v43, %v12533_v41  ;;  %6581 = vmatpush.bf16.msra.mxu0 %v12022_v62  ;;  %v16491_v41 = vld [vmem:[#allocation5 + $0x734] sm:$0xf]  ;;  %v13946_v43 = vor.u32 %v16763_v29, %v13943_v31 }
 0x992   :  { %v16547_v47 = vld [vmem:[#allocation5 + $0x8ec] sm:$0xf0]  ;;  %v16619_v45 = vld [vmem:[#allocation5 + $0xb34] sm:$0xf]  ;;  %v12858_v62 = vor.u32 %v16491_v41, %v12855_v44  ;;  %v6389_v44 = vpop.f32.mrf.mxu1 }
 0x993   :  { %v13557_v50 = vld [vmem:[#allocation5 + $0xcb0] sm:$0xf]  ;;  %v13046_v1 = vor.u32 %v16547_v47, %v13045_v46  ;;  %6594 = vmatpush.bf16.msra.mxu1 %v12534_v59  ;;  %v13367_v46 = vld [vmem:[#allocation5 + $0xb70] sm:$0xf0] }
 0x994   :  { %v16675_v53 = vld [vmem:[#allocation5 + $0xcec] sm:$0xf0]  ;;  %v16747_v47 = vld [vmem:[#allocation5 + $0xf34] sm:$0xf] }
 0x995   :  { %v11957_v58 = vld [vmem:[#allocation5 + $0x30] sm:$0xf]  ;;  %v13558_v2 = vor.u32 %v16675_v53, %v13557_v50  ;;  %6607 = vmatpush.bf16.msra.mxu2 %v13046_v1  ;;  %v13879_v50 = vld [vmem:[#allocation5 + $0xf70] sm:$0xf0]  ;;  %v12346_v53 = vor.u32 %v16363_v39, %v12343_v40 }
 0x996   :  { %v16275_v12 = vld [vmem:[#allocation5 + $0x6c] sm:$0xf0]  ;;  %v12279_v59 = vld [vmem:[#allocation5 + $0x2f0] sm:$0xf0] }
 0x997   :  { %v12469_v3 = vld [vmem:[#allocation5 + $0x430] sm:$0xf]  ;;  %v11958_v22 = vor.u32 %v16275_v12, %v11957_v58  ;;  %6620 = vmatpush.bf16.msra.mxu3 %v13558_v2  ;;  %v13370_v58 = vor.u32 %v16619_v45, %v13367_v46  ;;  %v16347_v12 = vld [vmem:[#allocation5 + $0x2b4] sm:$0xf] }
 0x998   :  { %v16403_v63 = vld [vmem:[#allocation5 + $0x46c] sm:$0xf0]  ;;  %v16475_v1 = vld [vmem:[#allocation5 + $0x6b4] sm:$0xf] }
 0x999   :  { %v12981_v7 = vld [vmem:[#allocation5 + $0x830] sm:$0xf]  ;;  %v12470_v26 = vor.u32 %v16403_v63, %v12469_v3  ;;  %6582 = vmatpush.bf16.msra.mxu0 %v11958_v22  ;;  %v13882_v3 = vor.u32 %v16747_v47, %v13879_v50  ;;  %v12791_v63 = vld [vmem:[#allocation5 + $0x6f0] sm:$0xf0] }
 0x99a   :  { %v16531_v13 = vld [vmem:[#allocation5 + $0x86c] sm:$0xf0]  ;;  %v13303_v8 = vld [vmem:[#allocation5 + $0xaf0] sm:$0xf0]  ;;  %v12794_v19 = vor.u32 %v16475_v1, %v12791_v63 }
 0x99b   :  { %v13493_v15 = vld [vmem:[#allocation5 + $0xc30] sm:$0xf]  ;;  %v12982_v27 = vor.u32 %v16531_v13, %v12981_v7  ;;  %6595 = vmatpush.bf16.msra.mxu1 %v12470_v26  ;;  %v16603_v7 = vld [vmem:[#allocation5 + $0xab4] sm:$0xf] }
 0x99c   :  { %v16659_v16 = vld [vmem:[#allocation5 + $0xc6c] sm:$0xf0]  ;;  %v16731_v2 = vld [vmem:[#allocation5 + $0xeb4] sm:$0xf]  ;;  %6583 = vmatmul.bf16.vlgmr.msra.gmra.mxu0 %v18112_v60  ;;  %v13306_v21 = vor.u32 %v16603_v7, %v13303_v8  ;;  %v6402_v8 = vpop.f32.mrf.mxu2 }
 0x99d   :  { %v13494_v32 = vor.u32 %v16659_v16, %v13493_v15  ;;  %6608 = vmatpush.bf16.msra.mxu2 %v12982_v27  ;;  %6627 = vmatpush.bf16.msrb.mxu0 %v12410_v35  ;;  %v13815_v13 = vld [vmem:[#allocation5 + $0xef0] sm:$0xf0]  ;;  %v12282_v15 = vor.u32 %v16347_v12, %v12279_v59  ;;  %v6376_v35 = vpop.f32.mrf.mxu0 }
 0x99e   :  { %v16331_v16 = vld [vmem:[#allocation5 + $0x234] sm:$0xf]  ;;  %6596 = vmatmul.bf16.vlgmr.msra.gmra.mxu1 %v18116_v54  ;;  %v13818_v24 = vor.u32 %v16731_v2, %v13815_v13 }
 0x99f   :  { %6621 = vmatpush.bf16.msra.mxu3 %v13494_v32  ;;  %6640 = vmatpush.bf16.msrb.mxu1 %v12922_v37  ;;  %v18206_v17 = vld [vmem:[#allocation22 + $0x8] sm:$0xff] }
 0x9a0   :  { %6609 = vmatmul.bf16.vlgmr.msra.gmra.mxu2 %v18104_v51  ;;  %v12215_v11 = vld [vmem:[#allocation5 + $0x270] sm:$0xf0]  ;;  %v3367_v23 = vperm.slane %v18206_v17, 0 }
 0x9a1   :  { %6653 = vmatpush.bf16.msrb.mxu2 %v13434_v38  ;;  %6628 = vmatpush.bf16.msrb.mxu0 %v12346_v53  ;;  %v16459_v22 = vld [vmem:[#allocation5 + $0x634] sm:$0xf]  ;;  %v12218_v32 = vor.u32 %v16331_v16, %v12215_v11 }
 0x9a2   :  { %6622 = vmatmul.bf16.vlgmr.msra.gmra.mxu3 %v18108_v55  ;;  %v12727_v25 = vld [vmem:[#allocation5 + $0x670] sm:$0xf0] }
 0x9a3   :  { %6666 = vmatpush.bf16.msrb.mxu3 %v13946_v43  ;;  %6641 = vmatpush.bf16.msrb.mxu1 %v12858_v62  ;;  %v16587_v26 = vld [vmem:[#allocation5 + $0xa34] sm:$0xf]  ;;  %v12730_v37 = vor.u32 %v16459_v22, %v12727_v25  ;;  %v6377_v43 = vadd.f32 %v6376_v35, %v3367_v23 }
 0x9a4   :  { %v13239_v27 = vld [vmem:[#allocation5 + $0xa70] sm:$0xf0] }
 0x9a5   :  { %6654 = vmatpush.bf16.msrb.mxu2 %v13370_v58  ;;  %v16715_v29 = vld [vmem:[#allocation5 + $0xe34] sm:$0xf]  ;;  %6629 = vmatpush.bf16.msrb.mxu0 %v12282_v15  ;;  %v13242_v38 = vor.u32 %v16587_v26, %v13239_v27  ;;  %v6390_v58 = vadd.f32 %v6389_v44, %v6377_v43  ;;  %v6378_v26 = vpop.f32.mrf.mxu0 }
 0x9a6   :  { %v13751_v31 = vld [vmem:[#allocation5 + $0xe70] sm:$0xf0]  ;;  %v16772_v26 = vld [vmem:[#allocation5 + $0xff4] sm:$0xf0] }
 0x9a7   :  { %6667 = vmatpush.bf16.msrb.mxu3 %v13882_v3  ;;  %6642 = vmatpush.bf16.msrb.mxu1 %v12794_v19  ;;  %v16315_v39 = vld [vmem:[#allocation5 + $0x1b4] sm:$0xf]  ;;  %v13754_v45 = vor.u32 %v16715_v29, %v13751_v31  ;;  %v6403_v19 = vadd.f32 %v6402_v8, %v6390_v58 }
 0x9a8   :  { %v12151_v40 = vld [vmem:[#allocation5 + $0x1f0] sm:$0xf0] }
 0x9a9   :  { %6655 = vmatpush.bf16.msrb.mxu2 %v13306_v21  ;;  %v16443_v41 = vld [vmem:[#allocation5 + $0x5b4] sm:$0xf]  ;;  %6630 = vmatpush.bf16.msrb.mxu0 %v12218_v32  ;;  %v12154_v12 = vor.u32 %v16315_v39, %v12151_v40  ;;  %v6415_v21 = vpop.f32.mrf.mxu3 }
 0x9aa   :  { %v12663_v46 = vld [vmem:[#allocation5 + $0x5f0] sm:$0xf0]  ;;  %v18209_v25 = vadd.f32 %v6415_v21, %v6403_v19  ;;  %v16516_v19 = vld [vmem:[#allocation5 + $0x7f4] sm:$0xf0] }
 0x9ab   :  { %6668 = vmatpush.bf16.msrb.mxu3 %v13818_v24  ;;  %v16571_v47 = vld [vmem:[#allocation5 + $0x9b4] sm:$0xf]  ;;  %6643 = vmatpush.bf16.msrb.mxu1 %v12730_v37  ;;  %v12666_v59 = vor.u32 %v16443_v41, %v12663_v46  ;;  %v6391_v37 = vpop.f32.mrf.mxu1  ;;  %v13437_v21 = vld [vmem:[#allocation5 + $0xbb8] sm:$0xf] }
 0x9ac   :  { %v13175_v50 = vld [vmem:[#allocation5 + $0x9f0] sm:$0xf0]  ;;  %v6791_v41 = vmax.f32 %v18209_v25, 0.0  ;;  %v16372_v37 = vld [vmem:[#allocation5 + $0x374] sm:$0xf0] }
 0x9ad   :  { %v16699_v53 = vld [vmem:[#allocation5 + $0xdb4] sm:$0xf]  ;;  %6656 = vmatpush.bf16.msrb.mxu2 %v13242_v38  ;;  %v13178_v1 = vor.u32 %v16571_v47, %v13175_v50  ;;  %6631 = vmatpush.bf16.msrb.mxu0 %v12154_v12 }
 0x9ae   :  { %v13687_v62 = vld [vmem:[#allocation5 + $0xdf0] sm:$0xf0] }
 0x9af   :  { %v16299_v3 = vld [vmem:[#allocation5 + $0x134] sm:$0xf]  ;;  %6669 = vmatpush.bf16.msrb.mxu3 %v13754_v45  ;;  %v13690_v2 = vor.u32 %v16699_v53, %v13687_v62  ;;  %6644 = vmatpush.bf16.msrb.mxu1 %v12666_v59  ;;  %v6404_v59 = vpop.f32.mrf.mxu2 }
 0x9b0   :  { %v12087_v63 = vld [vmem:[#allocation5 + $0x170] sm:$0xf0] }
 0x9b1   :  { %v16427_v7 = vld [vmem:[#allocation5 + $0x534] sm:$0xf]  ;;  %v12090_v23 = vor.u32 %v16299_v3, %v12087_v63  ;;  %6657 = vmatpush.bf16.msrb.mxu2 %v13178_v1  ;;  %v6417_v8 = vpop.f32.mrf.mxu3 }
 0x9b2   :  { %v12599_v13 = vld [vmem:[#allocation5 + $0x570] sm:$0xf0]  ;;  %v16740_v8 = vld [vmem:[#allocation5 + $0xef4] sm:$0xf0] }
 0x9b3   :  { %v16555_v15 = vld [vmem:[#allocation5 + $0x934] sm:$0xf]  ;;  %v12602_v27 = vor.u32 %v16427_v7, %v12599_v13  ;;  %6670 = vmatpush.bf16.msrb.mxu3 %v13690_v2  ;;  %6632 = vmatpush.bf16.msrb.mxu0 %v12090_v23  ;;  %v12413_v2 = vld [vmem:[#allocation5 + $0x3b8] sm:$0xf] }
 0x9b4   :  { %v13111_v16 = vld [vmem:[#allocation5 + $0x970] sm:$0xf0]  ;;  %v16388_v13 = vld [vmem:[#allocation5 + $0x3f4] sm:$0xf0] }
 0x9b5   :  { %v16683_v11 = vld [vmem:[#allocation5 + $0xd34] sm:$0xf]  ;;  %v13114_v29 = vor.u32 %v16555_v15, %v13111_v16  ;;  %6645 = vmatpush.bf16.msrb.mxu1 %v12602_v27  ;;  %v12925_v15 = vld [vmem:[#allocation5 + $0x7b8] sm:$0xf] }
 0x9b6   :  { %v13623_v22 = vld [vmem:[#allocation5 + $0xd70] sm:$0xf0] }
 0x9b7   :  { %v16283_v24 = vld [vmem:[#allocation5 + $0xb4] sm:$0xf]  ;;  %v13626_v38 = vor.u32 %v16683_v11, %v13623_v22  ;;  %6658 = vmatpush.bf16.msrb.mxu2 %v13114_v29  ;;  %v16644_v11 = vld [vmem:[#allocation5 + $0xbf4] sm:$0xf0]  ;;  %v12414_v29 = vor.u32 %v16388_v13, %v12413_v2 }
 0x9b8   :  { %v12023_v31 = vld [vmem:[#allocation5 + $0xf0] sm:$0xf0]  ;;  %v12221_v13 = vld [vmem:[#allocation5 + $0x238] sm:$0xf] }
 0x9b9   :  { %v16411_v32 = vld [vmem:[#allocation5 + $0x4b4] sm:$0xf]  ;;  %v12026_v45 = vor.u32 %v16283_v24, %v12023_v31  ;;  %6671 = vmatpush.bf16.msrb.mxu3 %v13626_v38  ;;  %v13949_v24 = vld [vmem:[#allocation5 + $0xfb8] sm:$0xf]  ;;  %v12926_v31 = vor.u32 %v16516_v19, %v12925_v15 }
 0x9ba   :  { %v12535_v35 = vld [vmem:[#allocation5 + $0x4f0] sm:$0xf0]  ;;  %v12861_v38 = vld [vmem:[#allocation5 + $0x738] sm:$0xf] }
 0x9bb   :  { %v16539_v39 = vld [vmem:[#allocation5 + $0x8b4] sm:$0xf]  ;;  %v12538_v50 = vor.u32 %v16411_v32, %v12535_v35  ;;  %6633 = vmatpush.bf16.msrb.mxu0 %v12026_v45  ;;  %v13438_v32 = vor.u32 %v16644_v11, %v13437_v21  ;;  %v12349_v35 = vld [vmem:[#allocation5 + $0x338] sm:$0xf]  ;;  %v3368_v11 = vperm.slane %v18206_v17, 1 }
 0x9bc   :  { %v13047_v40 = vld [vmem:[#allocation5 + $0x8f0] sm:$0xf0]  ;;  %v13885_v45 = vld [vmem:[#allocation5 + $0xf38] sm:$0xf] }
 0x9bd   :  { %v16667_v43 = vld [vmem:[#allocation5 + $0xcb4] sm:$0xf]  ;;  %v13050_v53 = vor.u32 %v16539_v39, %v13047_v40  ;;  %6646 = vmatpush.bf16.msrb.mxu1 %v12538_v50  ;;  %v13950_v39 = vor.u32 %v16772_v26, %v13949_v24  ;;  %v16500_v40 = vld [vmem:[#allocation5 + $0x774] sm:$0xf0] }
 0x9be   :  { %v13559_v44 = vld [vmem:[#allocation5 + $0xcf0] sm:$0xf0]  ;;  %v12862_v50 = vor.u32 %v16500_v40, %v12861_v38  ;;  %v16340_v19 = vld [vmem:[#allocation5 + $0x274] sm:$0xf0] }
 0x9bf   :  { %v16267_v46 = vld [vmem:[#allocation5 + $0x34] sm:$0xf]  ;;  %v13562_v1 = vor.u32 %v16667_v43, %v13559_v44  ;;  %6659 = vmatpush.bf16.msrb.mxu2 %v13050_v53  ;;  %v13373_v43 = vld [vmem:[#allocation5 + $0xb38] sm:$0xf] }
 0x9c0   :  { %v11959_v47 = vld [vmem:[#allocation5 + $0x70] sm:$0xf0]  ;;  %v16628_v44 = vld [vmem:[#allocation5 + $0xb74] sm:$0xf0] }
 0x9c1   :  { %v16395_v62 = vld [vmem:[#allocation5 + $0x434] sm:$0xf]  ;;  %v11962_v16 = vor.u32 %v16267_v46, %v11959_v47  ;;  %6672 = vmatpush.bf16.msrb.mxu3 %v13562_v1  ;;  %v16756_v46 = vld [vmem:[#allocation5 + $0xf74] sm:$0xf0]  ;;  %v12350_v47 = vor.u32 %v16372_v37, %v12349_v35  ;;  %v13374_v53 = vor.u32 %v16628_v44, %v13373_v43  ;;  %v6441_v44 = vpop.f32.mrf.mxu1 }
 0x9c2   :  { %v12471_v58 = vld [vmem:[#allocation5 + $0x470] sm:$0xf0]  ;;  %v13886_v59 = vor.u32 %v16756_v46, %v13885_v45  ;;  %v16484_v1 = vld [vmem:[#allocation5 + $0x6f4] sm:$0xf0] }
 0x9c3   :  { %v16523_v12 = vld [vmem:[#allocation5 + $0x834] sm:$0xf]  ;;  %v12474_v22 = vor.u32 %v16395_v62, %v12471_v58  ;;  %6634 = vmatpush.bf16.msrb.mxu0 %v11962_v16  ;;  %v12285_v62 = vld [vmem:[#allocation5 + $0x2b8] sm:$0xf] }
 0x9c4   :  { %v12983_v3 = vld [vmem:[#allocation5 + $0x870] sm:$0xf0]  ;;  %v16356_v58 = vld [vmem:[#allocation5 + $0x2f4] sm:$0xf0] }
 0x9c5   :  { %v16651_v63 = vld [vmem:[#allocation5 + $0xc34] sm:$0xf]  ;;  %v12986_v23 = vor.u32 %v16523_v12, %v12983_v3  ;;  %6647 = vmatpush.bf16.msrb.mxu1 %v12474_v22  ;;  %v12797_v12 = vld [vmem:[#allocation5 + $0x6b8] sm:$0xf]  ;;  %v12286_v2 = vor.u32 %v16356_v58, %v12285_v62 }
 0x9c6   :  { %v13495_v7 = vld [vmem:[#allocation5 + $0xc70] sm:$0xf0]  ;;  %v13309_v3 = vld [vmem:[#allocation5 + $0xab8] sm:$0xf]  ;;  %6635 = vmatmul.bf16.vlgmr.msrb.gmra.mxu0 %v18112_v60  ;;  %v12798_v15 = vor.u32 %v16484_v1, %v12797_v12 }
 0x9c7   :  { %v13498_v27 = vor.u32 %v16651_v63, %v13495_v7  ;;  %6660 = vmatpush.bf16.msrb.mxu2 %v12986_v23  ;;  %6679 = vmatpush.bf16.msra.mxu0 %v12414_v29  ;;  %v16612_v63 = vld [vmem:[#allocation5 + $0xaf4] sm:$0xf0] }
 0x9c8   :  { %v13821_v7 = vld [vmem:[#allocation5 + $0xeb8] sm:$0xf]  ;;  %6648 = vmatmul.bf16.vlgmr.msrb.gmra.mxu1 %v18116_v54  ;;  %v13310_v16 = vor.u32 %v16612_v63, %v13309_v3 }
 0x9c9   :  { %6673 = vmatpush.bf16.msrb.mxu3 %v13498_v27  ;;  %6692 = vmatpush.bf16.msra.mxu1 %v12926_v31  ;;  %v12733_v21 = vld [vmem:[#allocation5 + $0x638] sm:$0xf]  ;;  %v13822_v22 = vor.u32 %v16740_v8, %v13821_v7  ;;  %v12222_v31 = vor.u32 %v16340_v19, %v12221_v13  ;;  %v6454_v8 = vpop.f32.mrf.mxu2 }
 0x9ca   :  { %6661 = vmatmul.bf16.vlgmr.msrb.gmra.mxu2 %v18104_v51  ;;  %v16468_v23 = vld [vmem:[#allocation5 + $0x674] sm:$0xf0] }
 0x9cb   :  { %6705 = vmatpush.bf16.msra.mxu2 %v13438_v32  ;;  %6680 = vmatpush.bf16.msra.mxu0 %v12350_v47  ;;  %v13245_v24 = vld [vmem:[#allocation5 + $0xa38] sm:$0xf]  ;;  %v6428_v32 = vpop.f32.mrf.mxu0  ;;  %v12734_v35 = vor.u32 %v16468_v23, %v12733_v21  ;;  %v6467_v21 = vpop.f32.mrf.mxu3 }
 0x9cc   :  { %6674 = vmatmul.bf16.vlgmr.msrb.gmra.mxu3 %v18108_v55  ;;  %v16596_v26 = vld [vmem:[#allocation5 + $0xa74] sm:$0xf0]  ;;  %v6429_v43 = vadd.f32 %v6428_v32, %v3368_v11 }
 0x9cd   :  { %6718 = vmatpush.bf16.msra.mxu3 %v13950_v39  ;;  %6693 = vmatpush.bf16.msra.mxu1 %v12862_v50  ;;  %v13757_v27 = vld [vmem:[#allocation5 + $0xe38] sm:$0xf]  ;;  %v13246_v37 = vor.u32 %v16596_v26, %v13245_v24 }
 0x9ce   :  { %v16724_v29 = vld [vmem:[#allocation5 + $0xe74] sm:$0xf0]  ;;  %v6442_v58 = vadd.f32 %v6441_v44, %v6429_v43 }
 0x9cf   :  { %6706 = vmatpush.bf16.msra.mxu2 %v13374_v53  ;;  %6681 = vmatpush.bf16.msra.mxu0 %v12286_v2  ;;  %v12157_v38 = vld [vmem:[#allocation5 + $0x1b8] sm:$0xf]  ;;  %v13758_v45 = vor.u32 %v16724_v29, %v13757_v27 }
 0x9d0   :  { %v16324_v39 = vld [vmem:[#allocation5 + $0x1f4] sm:$0xf0]  ;;  %v6455_v19 = vadd.f32 %v6454_v8, %v6442_v58 }
 0x9d1   :  { %6719 = vmatpush.bf16.msra.mxu3 %v13886_v59  ;;  %6694 = vmatpush.bf16.msra.mxu1 %v12798_v15  ;;  %v12669_v40 = vld [vmem:[#allocation5 + $0x5b8] sm:$0xf]  ;;  %v12158_v12 = vor.u32 %v16324_v39, %v12157_v38  ;;  %v6443_v38 = vpop.f32.mrf.mxu1 }
 0x9d2   :  { %v16452_v46 = vld [vmem:[#allocation5 + $0x5f4] sm:$0xf0]  ;;  %v18217_v26 = vadd.f32 %v6467_v21, %v6455_v19  ;;  %v16508_v19 = vld [vmem:[#allocation5 + $0x7bc] sm:$0xf] }
 0x9d3   :  { %6707 = vmatpush.bf16.msra.mxu2 %v13310_v16  ;;  %v13181_v47 = vld [vmem:[#allocation5 + $0x9b8] sm:$0xf]  ;;  %6682 = vmatpush.bf16.msra.mxu0 %v12222_v31  ;;  %v12670_v59 = vor.u32 %v16452_v46, %v12669_v40  ;;  %v6430_v27 = vpop.f32.mrf.mxu0 }
 0x9d4   :  { %v16580_v50 = vld [vmem:[#allocation5 + $0x9f4] sm:$0xf0]  ;;  %v6792_v44 = vmax.f32 %v18217_v26, 0.0 }
 0x9d5   :  { %6720 = vmatpush.bf16.msra.mxu3 %v13822_v22  ;;  %v13693_v53 = vld [vmem:[#allocation5 + $0xdb8] sm:$0xf]  ;;  %6695 = vmatpush.bf16.msra.mxu1 %v12734_v35  ;;  %v13182_v1 = vor.u32 %v16580_v50, %v13181_v47 }
 0x9d6   :  { %v16708_v62 = vld [vmem:[#allocation5 + $0xdf4] sm:$0xf0] }
 0x9d7   :  { %6708 = vmatpush.bf16.msra.mxu2 %v13246_v37  ;;  %v12093_v3 = vld [vmem:[#allocation5 + $0x138] sm:$0xf]  ;;  %v13694_v2 = vor.u32 %v16708_v62, %v13693_v53  ;;  %6683 = vmatpush.bf16.msra.mxu0 %v12158_v12 }
 0x9d8   :  { %v16308_v63 = vld [vmem:[#allocation5 + $0x174] sm:$0xf0] }
 0x9d9   :  { %v12605_v7 = vld [vmem:[#allocation5 + $0x538] sm:$0xf]  ;;  %6721 = vmatpush.bf16.msra.mxu3 %v13758_v45  ;;  %v12094_v23 = vor.u32 %v16308_v63, %v12093_v3  ;;  %6696 = vmatpush.bf16.msra.mxu1 %v12670_v59  ;;  %v6456_v3 = vpop.f32.mrf.mxu2 }
 0x9da   :  { %v16436_v13 = vld [vmem:[#allocation5 + $0x574] sm:$0xf0]  ;;  %v12287_v3 = vld [vmem:[#allocation5 + $0x2f8] sm:$0xf0] }
 0x9db   :  { %v13117_v15 = vld [vmem:[#allocation5 + $0x938] sm:$0xf]  ;;  %6709 = vmatpush.bf16.msra.mxu2 %v13182_v1  ;;  %v12606_v29 = vor.u32 %v16436_v13, %v12605_v7  ;;  %6684 = vmatpush.bf16.msra.mxu0 %v12094_v23  ;;  %v6469_v13 = vpop.f32.mrf.mxu3  ;;  %v13439_v23 = vld [vmem:[#allocation5 + $0xbf8] sm:$0xf0] }
 0x9dc   :  { %v16564_v16 = vld [vmem:[#allocation5 + $0x974] sm:$0xf0]  ;;  %v13311_v13 = vld [vmem:[#allocation5 + $0xaf8] sm:$0xf0] }
 0x9dd   :  { %v13629_v11 = vld [vmem:[#allocation5 + $0xd38] sm:$0xf]  ;;  %v13118_v31 = vor.u32 %v16564_v16, %v13117_v15  ;;  %6722 = vmatpush.bf16.msra.mxu3 %v13694_v2  ;;  %6697 = vmatpush.bf16.msra.mxu1 %v12606_v29  ;;  %v16380_v15 = vld [vmem:[#allocation5 + $0x3bc] sm:$0xf] }
 0x9de   :  { %v16692_v22 = vld [vmem:[#allocation5 + $0xd74] sm:$0xf0]  ;;  %v12415_v16 = vld [vmem:[#allocation5 + $0x3f8] sm:$0xf0] }
 0x9df   :  { %v12029_v24 = vld [vmem:[#allocation5 + $0xb8] sm:$0xf]  ;;  %v13630_v39 = vor.u32 %v16692_v22, %v13629_v11  ;;  %6710 = vmatpush.bf16.msra.mxu2 %v13118_v31  ;;  %v12927_v11 = vld [vmem:[#allocation5 + $0x7f8] sm:$0xf0] }
 0x9e0   :  { %v16292_v32 = vld [vmem:[#allocation5 + $0xf4] sm:$0xf0]  ;;  %v16636_v22 = vld [vmem:[#allocation5 + $0xbbc] sm:$0xf] }
 0x9e1   :  { %v12541_v35 = vld [vmem:[#allocation5 + $0x4b8] sm:$0xf]  ;;  %v12030_v47 = vor.u32 %v16292_v32, %v12029_v24  ;;  %6723 = vmatpush.bf16.msra.mxu3 %v13630_v39  ;;  %v16764_v29 = vld [vmem:[#allocation5 + $0xfbc] sm:$0xf]  ;;  %v13442_v38 = vor.u32 %v16636_v22, %v13439_v23 }
 0x9e2   :  { %v16420_v37 = vld [vmem:[#allocation5 + $0x4f4] sm:$0xf0]  ;;  %v13951_v31 = vld [vmem:[#allocation5 + $0xff8] sm:$0xf0] }
 0x9e3   :  { %v13053_v40 = vld [vmem:[#allocation5 + $0x8b8] sm:$0xf]  ;;  %v12542_v62 = vor.u32 %v16420_v37, %v12541_v35  ;;  %6685 = vmatpush.bf16.msra.mxu0 %v12030_v47  ;;  %v12418_v35 = vor.u32 %v16380_v15, %v12415_v16  ;;  %v12930_v37 = vor.u32 %v16508_v19, %v12927_v11  ;;  %v16364_v39 = vld [vmem:[#allocation5 + $0x33c] sm:$0xf] }
 0x9e4   :  { %v16548_v43 = vld [vmem:[#allocation5 + $0x8f4] sm:$0xf0]  ;;  %v16620_v47 = vld [vmem:[#allocation5 + $0xb3c] sm:$0xf] }
 0x9e5   :  { %v13565_v45 = vld [vmem:[#allocation5 + $0xcb8] sm:$0xf]  ;;  %v13054_v58 = vor.u32 %v16548_v43, %v13053_v40  ;;  %6698 = vmatpush.bf16.msra.mxu1 %v12542_v62  ;;  %v12351_v40 = vld [vmem:[#allocation5 + $0x378] sm:$0xf0] }
 0x9e6   :  { %v16676_v46 = vld [vmem:[#allocation5 + $0xcf4] sm:$0xf0]  ;;  %v16492_v43 = vld [vmem:[#allocation5 + $0x73c] sm:$0xf] }
 0x9e7   :  { %v11965_v50 = vld [vmem:[#allocation5 + $0x38] sm:$0xf]  ;;  %v13566_v63 = vor.u32 %v16676_v46, %v13565_v45  ;;  %6711 = vmatpush.bf16.msra.mxu2 %v13054_v58  ;;  %v13954_v45 = vor.u32 %v16764_v29, %v13951_v31  ;;  %v12863_v46 = vld [vmem:[#allocation5 + $0x778] sm:$0xf0]  ;;  %v12354_v58 = vor.u32 %v16364_v39, %v12351_v40  ;;  %v6480_v40 = vpop.f32.mrf.mxu0 }
 0x9e8   :  { %v16276_v53 = vld [vmem:[#allocation5 + $0x74] sm:$0xf0]  ;;  %v13887_v62 = vld [vmem:[#allocation5 + $0xf78] sm:$0xf0] }
 0x9e9   :  { %v12477_v12 = vld [vmem:[#allocation5 + $0x438] sm:$0xf]  ;;  %v11966_v21 = vor.u32 %v16276_v53, %v11965_v50  ;;  %6724 = vmatpush.bf16.msra.mxu3 %v13566_v63  ;;  %v13375_v50 = vld [vmem:[#allocation5 + $0xb78] sm:$0xf0] }
 0x9ea   :  { %v16404_v59 = vld [vmem:[#allocation5 + $0x474] sm:$0xf0]  ;;  %v16748_v53 = vld [vmem:[#allocation5 + $0xf3c] sm:$0xf] }
 0x9eb   :  { %v12989_v1 = vld [vmem:[#allocation5 + $0x838] sm:$0xf]  ;;  %v12478_v24 = vor.u32 %v16404_v59, %v12477_v12  ;;  %6686 = vmatpush.bf16.msra.mxu0 %v11966_v21  ;;  %v12866_v12 = vor.u32 %v16492_v43, %v12863_v46  ;;  %v13378_v59 = vor.u32 %v16620_v47, %v13375_v50  ;;  %v16476_v63 = vld [vmem:[#allocation5 + $0x6bc] sm:$0xf] }
 0x9ec   :  { %v16532_v7 = vld [vmem:[#allocation5 + $0x874] sm:$0xf0]  ;;  %v16732_v15 = vld [vmem:[#allocation5 + $0xebc] sm:$0xf] }
 0x9ed   :  { %v13501_v8 = vld [vmem:[#allocation5 + $0xc38] sm:$0xf]  ;;  %v12990_v27 = vor.u32 %v16532_v7, %v12989_v1  ;;  %6699 = vmatpush.bf16.msra.mxu1 %v12478_v24  ;;  %v16348_v1 = vld [vmem:[#allocation5 + $0x2bc] sm:$0xf]  ;;  %v13890_v7 = vor.u32 %v16748_v53, %v13887_v62  ;;  %v6493_v62 = vpop.f32.mrf.mxu1 }
 0x9ee   :  { %v16660_v2 = vld [vmem:[#allocation5 + $0xc74] sm:$0xf0]  ;;  %v13823_v16 = vld [vmem:[#allocation5 + $0xef8] sm:$0xf0]  ;;  %6687 = vmatmul.bf16.vlgmr.msra.gmra.mxu0 %v18112_v60  ;;  %v12290_v19 = vor.u32 %v16348_v1, %v12287_v3 }
 0x9ef   :  { %v13502_v32 = vor.u32 %v16660_v2, %v13501_v8  ;;  %6712 = vmatpush.bf16.msra.mxu2 %v12990_v27  ;;  %6731 = vmatpush.bf16.msrb.mxu0 %v12418_v35  ;;  %v12799_v8 = vld [vmem:[#allocation5 + $0x6f8] sm:$0xf0]  ;;  %v3369_v27 = vperm.slane %v18206_v17, 2  ;;  %v13826_v29 = vor.u32 %v16732_v15, %v13823_v16 }
 0x9f0   :  { %v16604_v2 = vld [vmem:[#allocation5 + $0xabc] sm:$0xf]  ;;  %6700 = vmatmul.bf16.vlgmr.msra.gmra.mxu1 %v18116_v54  ;;  %v12802_v11 = vor.u32 %v16476_v63, %v12799_v8 }
 0x9f1   :  { %6725 = vmatpush.bf16.msra.mxu3 %v13502_v32  ;;  %6744 = vmatpush.bf16.msrb.mxu1 %v12930_v37  ;;  %v16332_v21 = vld [vmem:[#allocation5 + $0x23c] sm:$0xf]  ;;  %v13314_v22 = vor.u32 %v16604_v2, %v13311_v13  ;;  %v6481_v53 = vadd.f32 %v6480_v40, %v3369_v27 }
 0x9f2   :  { %6713 = vmatmul.bf16.vlgmr.msra.gmra.mxu2 %v18104_v51  ;;  %v12223_v23 = vld [vmem:[#allocation5 + $0x278] sm:$0xf0] }
 0x9f3   :  { %6757 = vmatpush.bf16.msrb.mxu2 %v13442_v38  ;;  %6732 = vmatpush.bf16.msrb.mxu0 %v12354_v58  ;;  %v16460_v24 = vld [vmem:[#allocation5 + $0x63c] sm:$0xf]  ;;  %v12226_v39 = vor.u32 %v16332_v21, %v12223_v23  ;;  %v6506_v21 = vpop.f32.mrf.mxu2 }
 0x9f4   :  { %6726 = vmatmul.bf16.vlgmr.msra.gmra.mxu3 %v18108_v55  ;;  %v12735_v31 = vld [vmem:[#allocation5 + $0x678] sm:$0xf0] }
 0x9f5   :  { %6770 = vmatpush.bf16.msrb.mxu3 %v13954_v45  ;;  %6745 = vmatpush.bf16.msrb.mxu1 %v12866_v12  ;;  %v16588_v32 = vld [vmem:[#allocation5 + $0xa3c] sm:$0xf]  ;;  %v12738_v43 = vor.u32 %v16460_v24, %v12735_v31 }
 0x9f6   :  { %v13247_v35 = vld [vmem:[#allocation5 + $0xa78] sm:$0xf0] }
 0x9f7   :  { %6758 = vmatpush.bf16.msrb.mxu2 %v13378_v59  ;;  %v16716_v37 = vld [vmem:[#allocation5 + $0xe3c] sm:$0xf]  ;;  %6733 = vmatpush.bf16.msrb.mxu0 %v12290_v19  ;;  %v13250_v45 = vor.u32 %v16588_v32, %v13247_v35 }
 0x9f8   :  { %v13759_v38 = vld [vmem:[#allocation5 + $0xe78] sm:$0xf0] }
 0x9f9   :  { %6771 = vmatpush.bf16.msrb.mxu3 %v13890_v7  ;;  %6746 = vmatpush.bf16.msrb.mxu1 %v12802_v11  ;;  %v16316_v46 = vld [vmem:[#allocation5 + $0x1bc] sm:$0xf]  ;;  %v13762_v58 = vor.u32 %v16716_v37, %v13759_v38  ;;  %v6494_v7 = vadd.f32 %v6493_v62, %v6481_v53 }
 0x9fa   :  { %v12159_v47 = vld [vmem:[#allocation5 + $0x1f8] sm:$0xf0] }
 0x9fb   :  { %6759 = vmatpush.bf16.msrb.mxu2 %v13314_v22  ;;  %v16444_v50 = vld [vmem:[#allocation5 + $0x5bc] sm:$0xf]  ;;  %6734 = vmatpush.bf16.msrb.mxu0 %v12226_v39  ;;  %v12162_v8 = vor.u32 %v16316_v46, %v12159_v47  ;;  %v6507_v27 = vadd.f32 %v6506_v21, %v6494_v7  ;;  %v6482_v39 = vpop.f32.mrf.mxu0 }
 0x9fc   :  { %v12671_v12 = vld [vmem:[#allocation5 + $0x5f8] sm:$0xf0] }
 0x9fd   :  { %6772 = vmatpush.bf16.msrb.mxu3 %v13826_v29  ;;  %v16572_v59 = vld [vmem:[#allocation5 + $0x9bc] sm:$0xf]  ;;  %6747 = vmatpush.bf16.msrb.mxu1 %v12738_v43  ;;  %v12674_v2 = vor.u32 %v16444_v50, %v12671_v12  ;;  %v6519_v29 = vpop.f32.mrf.mxu3  ;;  %v6495_v50 = vpop.f32.mrf.mxu1 }
 0x9fe   :  { %v13183_v1 = vld [vmem:[#allocation5 + $0x9f8] sm:$0xf0]  ;;  %v18225_v38 = vadd.f32 %v6519_v29, %v6507_v27 }
 0x9ff   :  { %v16700_v3 = vld [vmem:[#allocation5 + $0xdbc] sm:$0xf]  ;;  %6760 = vmatpush.bf16.msrb.mxu2 %v13250_v45  ;;  %v13186_v13 = vor.u32 %v16572_v59, %v13183_v1  ;;  %6735 = vmatpush.bf16.msrb.mxu0 %v12162_v8 }
 0xa00   :  { %v13695_v63 = vld [vmem:[#allocation5 + $0xdf8] sm:$0xf0]  ;;  %v6793_v12 = vmax.f32 %v18225_v38, 0.0 }
 0xa01   :  { %v16300_v15 = vld [vmem:[#allocation5 + $0x13c] sm:$0xf]  ;;  %6773 = vmatpush.bf16.msrb.mxu3 %v13762_v58  ;;  %v13698_v11 = vor.u32 %v16700_v3, %v13695_v63  ;;  %6748 = vmatpush.bf16.msrb.mxu1 %v12674_v2 }
 0xa02   :  { %v12095_v16 = vld [vmem:[#allocation5 + $0x178] sm:$0xf0] }
 0xa03   :  { %v16428_v19 = vld [vmem:[#allocation5 + $0x53c] sm:$0xf]  ;;  %v12098_v35 = vor.u32 %v16300_v15, %v12095_v16  ;;  %6761 = vmatpush.bf16.msrb.mxu2 %v13186_v13  ;;  %v6508_v15 = vpop.f32.mrf.mxu2 }
 0xa04   :  { %v12607_v22 = vld [vmem:[#allocation5 + $0x578] sm:$0xf0] }
 0xa05   :  { %v16556_v23 = vld [vmem:[#allocation5 + $0x93c] sm:$0xf]  ;;  %v12610_v40 = vor.u32 %v16428_v19, %v12607_v22  ;;  %6774 = vmatpush.bf16.msrb.mxu3 %v13698_v11  ;;  %6736 = vmatpush.bf16.msrb.mxu0 %v12098_v35  ;;  %v6521_v22 = vpop.f32.mrf.mxu3  ;;  %v3370_v35 = vperm.slane %v18206_v17, 3 }
 0xa06   :  { %v13119_v24 = vld [vmem:[#allocation5 + $0x978] sm:$0xf0] }
 0xa07   :  { %v16684_v31 = vld [vmem:[#allocation5 + $0xd3c] sm:$0xf]  ;;  %v13122_v43 = vor.u32 %v16556_v23, %v13119_v24  ;;  %6749 = vmatpush.bf16.msrb.mxu1 %v12610_v40  ;;  %v6545_v40 = vpop.f32.mrf.mxu1 }
 0xa08   :  { %v13631_v32 = vld [vmem:[#allocation5 + $0xd78] sm:$0xf0] }
 0xa09   :  { %v16284_v37 = vld [vmem:[#allocation5 + $0xbc] sm:$0xf]  ;;  %v13634_v53 = vor.u32 %v16684_v31, %v13631_v32  ;;  %6762 = vmatpush.bf16.msrb.mxu2 %v13122_v43 }
 0xa0a   :  { %v12031_v45 = vld [vmem:[#allocation5 + $0xf8] sm:$0xf0] }
 0xa0b   :  { %v16412_v46 = vld [vmem:[#allocation5 + $0x4bc] sm:$0xf]  ;;  %v12034_v3 = vor.u32 %v16284_v37, %v12031_v45  ;;  %6775 = vmatpush.bf16.msrb.mxu3 %v13634_v53  ;;  %v6532_v37 = vpop.f32.mrf.mxu0  ;;  %v6558_v45 = vpop.f32.mrf.mxu2 }
 0xa0c   :  { %v12543_v47 = vld [vmem:[#allocation5 + $0x4f8] sm:$0xf0]  ;;  %v6533_v39 = vadd.f32 %v6532_v37, %v3370_v35 }
 0xa0d   :  { %v16540_v62 = vld [vmem:[#allocation5 + $0x8bc] sm:$0xf]  ;;  %v12546_v63 = vor.u32 %v16412_v46, %v12543_v47  ;;  %6737 = vmatpush.bf16.msrb.mxu0 %v12034_v3  ;;  %v6571_v47 = vpop.f32.mrf.mxu3 }
 0xa0e   :  { %v13055_v58 = vld [vmem:[#allocation5 + $0x8f8] sm:$0xf0]  ;;  %v6546_v43 = vadd.f32 %v6545_v40, %v6533_v39 }
 0xa0f   :  { %v16668_v59 = vld [vmem:[#allocation5 + $0xcbc] sm:$0xf]  ;;  %v13058_v7 = vor.u32 %v16540_v62, %v13055_v58  ;;  %6750 = vmatpush.bf16.msrb.mxu1 %v12546_v63  ;;  %v6547_v62 = vpop.f32.mrf.mxu1 }
 0xa10   :  { %v13567_v1 = vld [vmem:[#allocation5 + $0xcf8] sm:$0xf0]  ;;  %v6559_v46 = vadd.f32 %v6558_v45, %v6546_v43 }
 0xa11   :  { %v16268_v8 = vld [vmem:[#allocation5 + $0x3c] sm:$0xf]  ;;  %v13570_v16 = vor.u32 %v16668_v59, %v13567_v1  ;;  %6763 = vmatpush.bf16.msrb.mxu2 %v13058_v7 }
 0xa12   :  { %v11967_v2 = vld [vmem:[#allocation5 + $0x78] sm:$0xf0]  ;;  %v18233_v50 = vadd.f32 %v6571_v47, %v6559_v46  ;;  %v3373_v46 = vperm.slane %v18206_v17, 6 }
 0xa13   :  { %v16396_v13 = vld [vmem:[#allocation5 + $0x43c] sm:$0xf]  ;;  %v11970_v27 = vor.u32 %v16268_v8, %v11967_v2  ;;  %6776 = vmatpush.bf16.msrb.mxu3 %v13570_v16  ;;  %v6534_v53 = vpop.f32.mrf.mxu0 }
 0xa14   :  { %v12479_v19 = vld [vmem:[#allocation5 + $0x478] sm:$0xf0] }
 0xa15   :  { %v16524_v21 = vld [vmem:[#allocation5 + $0x83c] sm:$0xf]  ;;  %v12482_v29 = vor.u32 %v16396_v13, %v12479_v19  ;;  %6738 = vmatpush.bf16.msrb.mxu0 %v11970_v27  ;;  %v6573_v58 = vpop.f32.mrf.mxu3 }
 0xa16   :  { %v12991_v11 = vld [vmem:[#allocation5 + $0x878] sm:$0xf0] }
 0xa17   :  { %v16652_v23 = vld [vmem:[#allocation5 + $0xc3c] sm:$0xf]  ;;  %v12994_v31 = vor.u32 %v16524_v21, %v12991_v11  ;;  %6751 = vmatpush.bf16.msrb.mxu1 %v12482_v29  ;;  %v3372_v11 = vperm.slane %v18206_v17, 5 }
 0xa18   :  { %v13503_v24 = vld [vmem:[#allocation5 + $0xc78] sm:$0xf0]  ;;  %6739 = vmatmul.bf16.vlgmr.msrb.gmra.mxu0 %v18112_v60  ;;  %v6794_v60 = vmax.f32 %v18233_v50, 0.0 }
 0xa19   :  { %v13506_v32 = vor.u32 %v16652_v23, %v13503_v24  ;;  %6764 = vmatpush.bf16.msrb.mxu2 %v12994_v31 }
 0xa1a   :  { %6752 = vmatmul.bf16.vlgmr.msrb.gmra.mxu1 %v18116_v54  ;;  %v6560_v54 = vpop.f32.mrf.mxu2 }
 0xa1b   :  { %6777 = vmatpush.bf16.msrb.mxu3 %v13506_v32  ;;  %v6597_v1 = vpop.f32.mrf.mxu1 }
 0xa1c   :  { %6765 = vmatmul.bf16.vlgmr.msrb.gmra.mxu2 %v18104_v51  ;;  %v3371_v51 = vperm.slane %v18206_v17, 4 }
 0xa1e   :  { %6778 = vmatmul.bf16.vlgmr.msrb.gmra.mxu3 %v18108_v55  ;;  %v6584_v55 = vpop.f32.mrf.mxu0 }
 0xa1f   :  { %v6585_v59 = vadd.f32 %v6584_v55, %v3371_v51 }
 0xa21   :  { %v6598_v3 = vadd.f32 %v6597_v1, %v6585_v59 }
 0xa23   :  { %v6610_v63 = vpop.f32.mrf.mxu2  ;;  %v6599_v15 = vpop.f32.mrf.mxu1 }
 0xa24   :  { %v6611_v7 = vadd.f32 %v6610_v63, %v6598_v3 }
 0xa25   :  { %v6623_v8 = vpop.f32.mrf.mxu3 }
 0xa26   :  { %v18237_v2 = vadd.f32 %v6623_v8, %v6611_v7  ;;  %v6586_v13 = vpop.f32.mrf.mxu0 }
 0xa27   :  { %v3374_v13 = vperm.slane %v18206_v17, 7 }
 0xa2b   :  { %v6612_v19 = vpop.f32.mrf.mxu2 }
 0xa2d   :  { %v6625_v21 = vpop.f32.mrf.mxu3 }
 0xa43   :  { %v6636_v22 = vpop.f32.mrf.mxu0 }
 0xa44   :  { %v6637_v23 = vadd.f32 %v6636_v22, %v3372_v11 }
 0xa45   :  { %v6649_v24 = vpop.f32.mrf.mxu1 }
 0xa46   :  { %v6650_v27 = vadd.f32 %v6649_v24, %v6637_v23 }
 0xa4b   :  { %v6638_v37 = vpop.f32.mrf.mxu0 }
 0xa4d   :  { %v6662_v29 = vpop.f32.mrf.mxu2  ;;  %v6651_v39 = vpop.f32.mrf.mxu1 }
 0xa4e   :  { %v6663_v31 = vadd.f32 %v6662_v29, %v6650_v27 }
 0xa4f   :  { %v6675_v32 = vpop.f32.mrf.mxu3 }
 0xa50   :  { %v18241_v35 = vadd.f32 %v6675_v32, %v6663_v31 }
 0xa55   :  { %v6664_v43 = vpop.f32.mrf.mxu2 }
 0xa57   :  { %v6677_v45 = vpop.f32.mrf.mxu3 }
 0xa6b   :  { %v6688_v47 = vpop.f32.mrf.mxu0 }
 0xa6c   :  { %v6689_v53 = vadd.f32 %v6688_v47, %v3373_v46 }
 0xa6d   :  { %v6701_v62 = vpop.f32.mrf.mxu1 }
 0xa6e   :  { %v6702_v54 = vadd.f32 %v6701_v62, %v6689_v53 }
 0xa73   :  { %v6690_v1 = vpop.f32.mrf.mxu0 }
 0xa75   :  { %v6714_v58 = vpop.f32.mrf.mxu2  ;;  %v6703_v3 = vpop.f32.mrf.mxu1 }
 0xa76   :  { %v6715_v51 = vadd.f32 %v6714_v58, %v6702_v54 }
 0xa77   :  { %v6727_v55 = vpop.f32.mrf.mxu3 }
 0xa78   :  { %v18245_v59 = vadd.f32 %v6727_v55, %v6715_v51 }
 0xa7d   :  { %v6716_v7 = vpop.f32.mrf.mxu2 }
 0xa7f   :  { %v6729_v8 = vpop.f32.mrf.mxu3 }
 0xa95   :  { %v6740_v15 = vpop.f32.mrf.mxu0 }
 0xa96   :  { %v6741_v19 = vadd.f32 %v6740_v15, %v3374_v13 }
 0xa97   :  { %v6753_v21 = vpop.f32.mrf.mxu1 }
 0xa98   :  { %v6754_v11 = vadd.f32 %v6753_v21, %v6741_v19 }
 0xa9d   :  { %v6742_v27 = vpop.f32.mrf.mxu0 }
 0xa9f   :  { %v6766_v22 = vpop.f32.mrf.mxu2  ;;  %v6755_v29 = vpop.f32.mrf.mxu1 }
 0xaa0   :  { %v6767_v23 = vadd.f32 %v6766_v22, %v6754_v11 }
 0xaa1   :  { %v6779_v24 = vpop.f32.mrf.mxu3 }
 0xaa2   :  { %v18249_v31 = vadd.f32 %v6779_v24, %v6767_v23 }
 0xaa7   :  { %v6768_v37 = vpop.f32.mrf.mxu2 }
 0xaa9   :  { %v6781_v39 = vpop.f32.mrf.mxu3 }
 0xaaa   :  { %17757 = dma.done.wait [#allocation7 + $0x1], 65536 }
 0xaab   :  { %17758 = vsyncadd [#allocation7 + $0x1], 4294901760  ;;  %v14069_v43 = vld [vmem:[#allocation6 + $0xe0] sm:$0xf]  ;;  %v16803_v45 = vld [vmem:[#allocation6 + $0xec] sm:$0xf0] }
 0xaac   :  { %v14197_v17 = vld [vmem:[#allocation6 + $0x1e0] sm:$0xf]  ;;  %v14070_v46 = vor.u32 %v16803_v45, %v14069_v43  ;;  %v16835_v47 = vld [vmem:[#allocation6 + $0x1ec] sm:$0xf0]  ;;  %s17786_s9 = smov [#allocation28]   ;;  %s10819_s27 = sshll.u32 %s18462_s15, 4  ;;  %s10820_s27 = int_to_ptr.hbm [resolvable:$true] %s10819_s27 }
 0xaad   :  { %v14325_v53 = vld [vmem:[#allocation6 + $0x2e0] sm:$0xf]  ;;  %v16867_v62 = vld [vmem:[#allocation6 + $0x2ec] sm:$0xf0]  ;;  %v14198_v54 = vor.u32 %v16835_v47, %v14197_v17  ;;  %s10817_s11 = sshll.u32 %s17786_s9, 4  ;;  %s10818_s11 = int_to_ptr.vmem [resolvable:$true] %s10817_s11 }
 0xaae   :  { %v14326_v58 = vor.u32 %v16867_v62, %v14325_v53  ;;  %v14453_v51 = vld [vmem:[#allocation6 + $0x3e0] sm:$0xf]  ;;  %v16899_v55 = vld [vmem:[#allocation6 + $0x3ec] sm:$0xf0]  ;;  %9901 = vmatpush.bf16.msra.mxu0 %v14070_v46 }
 0xaaf   :  { %v14053_v1 = vld [vmem:[#allocation6 + $0xc0] sm:$0xf]  ;;  %v14454_v3 = vor.u32 %v16899_v55, %v14453_v51  ;;  %v16799_v7 = vld [vmem:[#allocation6 + $0xcc] sm:$0xf0]  ;;  %9914 = vmatpush.bf16.msra.mxu1 %v14198_v54 }
 0xab0   :  { %v14181_v8 = vld [vmem:[#allocation6 + $0x1c0] sm:$0xf]  ;;  %v16831_v13 = vld [vmem:[#allocation6 + $0x1cc] sm:$0xf0]  ;;  %9927 = vmatpush.bf16.msra.mxu2 %v14326_v58  ;;  %v14054_v15 = vor.u32 %v16799_v7, %v14053_v1 }
 0xab1   :  { %v14182_v19 = vor.u32 %v16831_v13, %v14181_v8  ;;  %v14309_v21 = vld [vmem:[#allocation6 + $0x2c0] sm:$0xf]  ;;  %v16863_v11 = vld [vmem:[#allocation6 + $0x2cc] sm:$0xf0]  ;;  %9940 = vmatpush.bf16.msra.mxu3 %v14454_v3 }
 0xab2   :  { %v14437_v22 = vld [vmem:[#allocation6 + $0x3c0] sm:$0xf]  ;;  %v14310_v23 = vor.u32 %v16863_v11, %v14309_v21  ;;  %v16895_v24 = vld [vmem:[#allocation6 + $0x3cc] sm:$0xf0]  ;;  %9902 = vmatpush.bf16.msra.mxu0 %v14054_v15 }
 0xab3   :  { %v14037_v27 = vld [vmem:[#allocation6 + $0xa0] sm:$0xf]  ;;  %v16795_v29 = vld [vmem:[#allocation6 + $0xac] sm:$0xf0]  ;;  %v14438_v37 = vor.u32 %v16895_v24, %v14437_v22  ;;  %9915 = vmatpush.bf16.msra.mxu1 %v14182_v19 }
 0xab4   :  { %v14165_v39 = vld [vmem:[#allocation6 + $0x1a0] sm:$0xf]  ;;  %v16827_v43 = vld [vmem:[#allocation6 + $0x1ac] sm:$0xf0]  ;;  %v14038_v17 = vor.u32 %v16795_v29, %v14037_v27  ;;  %9928 = vmatpush.bf16.msra.mxu2 %v14310_v23 }
 0xab5   :  { %v14293_v45 = vld [vmem:[#allocation6 + $0x2a0] sm:$0xf]  ;;  %v16859_v46 = vld [vmem:[#allocation6 + $0x2ac] sm:$0xf0]  ;;  %v14166_v62 = vor.u32 %v16827_v43, %v14165_v39  ;;  %9941 = vmatpush.bf16.msra.mxu3 %v14438_v37 }
 0xab6   :  { %v14421_v47 = vld [vmem:[#allocation6 + $0x3a0] sm:$0xf]  ;;  %v16891_v53 = vld [vmem:[#allocation6 + $0x3ac] sm:$0xf0]  ;;  %v14294_v54 = vor.u32 %v16859_v46, %v14293_v45  ;;  %9903 = vmatpush.bf16.msra.mxu0 %v14038_v17 }
 0xab7   :  { %v14021_v58 = vld [vmem:[#allocation6 + $0x80] sm:$0xf]  ;;  %v16791_v51 = vld [vmem:[#allocation6 + $0x8c] sm:$0xf0]  ;;  %v14422_v1 = vor.u32 %v16891_v53, %v14421_v47  ;;  %9916 = vmatpush.bf16.msra.mxu1 %v14166_v62 }
 0xab8   :  { %v14149_v55 = vld [vmem:[#allocation6 + $0x180] sm:$0xf]  ;;  %v16823_v3 = vld [vmem:[#allocation6 + $0x18c] sm:$0xf0]  ;;  %v14022_v15 = vor.u32 %v16791_v51, %v14021_v58  ;;  %9929 = vmatpush.bf16.msra.mxu2 %v14294_v54 }
 0xab9   :  { %v14277_v7 = vld [vmem:[#allocation6 + $0x280] sm:$0xf]  ;;  %v16855_v8 = vld [vmem:[#allocation6 + $0x28c] sm:$0xf0]  ;;  %v14150_v11 = vor.u32 %v16823_v3, %v14149_v55  ;;  %9942 = vmatpush.bf16.msra.mxu3 %v14422_v1 }
 0xaba   :  { %v14405_v13 = vld [vmem:[#allocation6 + $0x380] sm:$0xf]  ;;  %v16887_v21 = vld [vmem:[#allocation6 + $0x38c] sm:$0xf0]  ;;  %v14278_v22 = vor.u32 %v16855_v8, %v14277_v7  ;;  %9904 = vmatpush.bf16.msra.mxu0 %v14022_v15 }
 0xabb   :  { %v14005_v19 = vld [vmem:[#allocation6 + $0x60] sm:$0xf]  ;;  %v16787_v23 = vld [vmem:[#allocation6 + $0x6c] sm:$0xf0]  ;;  %v14406_v27 = vor.u32 %v16887_v21, %v14405_v13  ;;  %9917 = vmatpush.bf16.msra.mxu1 %v14150_v11 }
 0xabc   :  { %v14133_v24 = vld [vmem:[#allocation6 + $0x160] sm:$0xf]  ;;  %v16819_v29 = vld [vmem:[#allocation6 + $0x16c] sm:$0xf0]  ;;  %v14006_v46 = vor.u32 %v16787_v23, %v14005_v19  ;;  %9930 = vmatpush.bf16.msra.mxu2 %v14278_v22 }
 0xabd   :  { %v14261_v39 = vld [vmem:[#allocation6 + $0x260] sm:$0xf]  ;;  %v16851_v37 = vld [vmem:[#allocation6 + $0x26c] sm:$0xf0]  ;;  %v14134_v17 = vor.u32 %v16819_v29, %v14133_v24  ;;  %9943 = vmatpush.bf16.msra.mxu3 %v14406_v27 }
 0xabe   :  { %v14389_v43 = vld [vmem:[#allocation6 + $0x360] sm:$0xf]  ;;  %v16883_v45 = vld [vmem:[#allocation6 + $0x36c] sm:$0xf0]  ;;  %v14262_v47 = vor.u32 %v16851_v37, %v14261_v39  ;;  %9905 = vmatpush.bf16.msra.mxu0 %v14006_v46 }
 0xabf   :  { %v13989_v53 = vld [vmem:[#allocation6 + $0x40] sm:$0xf]  ;;  %v16783_v62 = vld [vmem:[#allocation6 + $0x4c] sm:$0xf0]  ;;  %v14390_v58 = vor.u32 %v16883_v45, %v14389_v43  ;;  %9918 = vmatpush.bf16.msra.mxu1 %v14134_v17 }
 0xac0   :  { %v14117_v54 = vld [vmem:[#allocation6 + $0x140] sm:$0xf]  ;;  %v16815_v51 = vld [vmem:[#allocation6 + $0x14c] sm:$0xf0]  ;;  %v13990_v8 = vor.u32 %v16783_v62, %v13989_v53  ;;  %9931 = vmatpush.bf16.msra.mxu2 %v14262_v47 }
 0xac1   :  { %v14245_v55 = vld [vmem:[#allocation6 + $0x240] sm:$0xf]  ;;  %v16847_v1 = vld [vmem:[#allocation6 + $0x24c] sm:$0xf0]  ;;  %v14118_v13 = vor.u32 %v16815_v51, %v14117_v54  ;;  %9944 = vmatpush.bf16.msra.mxu3 %v14390_v58 }
 0xac2   :  { %v14373_v3 = vld [vmem:[#allocation6 + $0x340] sm:$0xf]  ;;  %v16879_v7 = vld [vmem:[#allocation6 + $0x34c] sm:$0xf0]  ;;  %v14246_v21 = vor.u32 %v16847_v1, %v14245_v55  ;;  %9906 = vmatpush.bf16.msra.mxu0 %v13990_v8 }
 0xac3   :  { %v13973_v15 = vld [vmem:[#allocation6 + $0x20] sm:$0xf]  ;;  %v16779_v11 = vld [vmem:[#allocation6 + $0x2c] sm:$0xf0]  ;;  %v14374_v19 = vor.u32 %v16879_v7, %v14373_v3  ;;  %9919 = vmatpush.bf16.msra.mxu1 %v14118_v13 }
 0xac4   :  { %v14101_v22 = vld [vmem:[#allocation6 + $0x120] sm:$0xf]  ;;  %v16811_v23 = vld [vmem:[#allocation6 + $0x12c] sm:$0xf0]  ;;  %v13974_v37 = vor.u32 %v16779_v11, %v13973_v15  ;;  %9932 = vmatpush.bf16.msra.mxu2 %v14246_v21 }
 0xac5   :  { %v14229_v24 = vld [vmem:[#allocation6 + $0x220] sm:$0xf]  ;;  %v16843_v27 = vld [vmem:[#allocation6 + $0x22c] sm:$0xf0]  ;;  %v14102_v46 = vor.u32 %v16811_v23, %v14101_v22  ;;  %9945 = vmatpush.bf16.msra.mxu3 %v14374_v19 }
 0xac6   :  { %v14357_v29 = vld [vmem:[#allocation6 + $0x320] sm:$0xf]  ;;  %v16875_v39 = vld [vmem:[#allocation6 + $0x32c] sm:$0xf0]  ;;  %v14230_v17 = vor.u32 %v16843_v27, %v14229_v24  ;;  %9907 = vmatpush.bf16.msra.mxu0 %v13974_v37 }
 0xac7   :  { %v13957_v43 = vld [vmem:[#allocation6] sm:$0xf]  ;;  %v16775_v45 = vld [vmem:[#allocation6 + $0xc] sm:$0xf0]  ;;  %v14358_v54 = vor.u32 %v16875_v39, %v14357_v29  ;;  %9920 = vmatpush.bf16.msra.mxu1 %v14102_v46  ;;  %v18255_v46 = vpack.c.bf16 %v6785_v28, %v6785_v28  ;;  %v18270_v28 = vpack.c.bf16 %v6784_v20, %v6784_v20 }
 0xac8   :  { %v14085_v47 = vld [vmem:[#allocation6 + $0x100] sm:$0xf]  ;;  %v16807_v53 = vld [vmem:[#allocation6 + $0x10c] sm:$0xf0]  ;;  %v13958_v8 = vor.u32 %v16775_v45, %v13957_v43  ;;  %9933 = vmatpush.bf16.msra.mxu2 %v14230_v17 }
 0xac9   :  { %v14213_v62 = vld [vmem:[#allocation6 + $0x200] sm:$0xf]  ;;  %v16839_v58 = vld [vmem:[#allocation6 + $0x20c] sm:$0xf0]  ;;  %v14086_v13 = vor.u32 %v16807_v53, %v14085_v47  ;;  %9946 = vmatpush.bf16.msra.mxu3 %v14358_v54  ;;  %v18265_v53 = vpack.c.bf16 %v6786_v42, %v6786_v42 }
 0xaca   :  { %v14341_v51 = vld [vmem:[#allocation6 + $0x300] sm:$0xf]  ;;  %v16871_v55 = vld [vmem:[#allocation6 + $0x30c] sm:$0xf0]  ;;  %v14214_v21 = vor.u32 %v16839_v58, %v14213_v62  ;;  %9908 = vmatpush.bf16.msra.mxu0 %v13958_v8 }
 0xacb   :  { %v14581_v1 = vld [vmem:[#allocation6 + $0x4e0] sm:$0xf]  ;;  %v16931_v3 = vld [vmem:[#allocation6 + $0x4ec] sm:$0xf0]  ;;  %v14342_v19 = vor.u32 %v16871_v55, %v14341_v51  ;;  %9921 = vmatpush.bf16.msra.mxu1 %v14086_v13 }
 0xacc   :  { %v14709_v7 = vld [vmem:[#allocation6 + $0x5e0] sm:$0xf]  ;;  %v16963_v15 = vld [vmem:[#allocation6 + $0x5ec] sm:$0xf0]  ;;  %v14582_v24 = vor.u32 %v16931_v3, %v14581_v1  ;;  %9934 = vmatpush.bf16.msra.mxu2 %v14214_v21 }
 0xacd   :  { %v14837_v11 = vld [vmem:[#allocation6 + $0x6e0] sm:$0xf]  ;;  %v16995_v32 = vld [vmem:[#allocation6 + $0x6ec] sm:$0xf0]  ;;  %v14710_v27 = vor.u32 %v16963_v15, %v14709_v7  ;;  %9947 = vmatpush.bf16.msra.mxu3 %v14342_v19 }
 0xace   :  { %v14965_v22 = vld [vmem:[#allocation6 + $0x7e0] sm:$0xf]  ;;  %v17027_v23 = vld [vmem:[#allocation6 + $0x7ec] sm:$0xf0]  ;;  %v14838_v29 = vor.u32 %v16995_v32, %v14837_v11  ;;  %v18260_v32 = vpack.c.bf16 %v6783_v14, %v6783_v14  ;;  %9953 = vmatpush.bf16.msrb.mxu0 %v14582_v24  ;;  %9922 = vmatmul.bf16.vlgmr.msra.gmra.mxu1 %v18270_v28 }
 0xacf   :  { %v14565_v39 = vld [vmem:[#allocation6 + $0x4c0] sm:$0xf]  ;;  %v16927_v40 = vld [vmem:[#allocation6 + $0x4cc] sm:$0xf0]  ;;  %v14966_v37 = vor.u32 %v17027_v23, %v14965_v22  ;;  %9966 = vmatpush.bf16.msrb.mxu1 %v14710_v27  ;;  %9935 = vmatmul.bf16.vlgmr.msra.gmra.mxu2 %v18255_v46 }
 0xad0   :  { %v14693_v63 = vld [vmem:[#allocation6 + $0x5c0] sm:$0xf]  ;;  %v16959_v43 = vld [vmem:[#allocation6 + $0x5cc] sm:$0xf0]  ;;  %v14566_v18 = vor.u32 %v16927_v40, %v14565_v39  ;;  %9979 = vmatpush.bf16.msrb.mxu2 %v14838_v29  ;;  %9909 = vmatmul.bf16.vlgmr.msra.gmra.mxu0 %v18260_v32 }
 0xad1   :  { %v14821_v45 = vld [vmem:[#allocation6 + $0x6c0] sm:$0xf]  ;;  %v16991_v16 = vld [vmem:[#allocation6 + $0x6cc] sm:$0xf0]  ;;  %v14694_v62 = vor.u32 %v16959_v43, %v14693_v63  ;;  %9992 = vmatpush.bf16.msrb.mxu3 %v14966_v37 }
 0xad2   :  { %v14949_v17 = vld [vmem:[#allocation6 + $0x7c0] sm:$0xf]  ;;  %v17023_v47 = vld [vmem:[#allocation6 + $0x7cc] sm:$0xf0]  ;;  %v14822_v0 = vor.u32 %v16991_v16, %v14821_v45  ;;  %9948 = vmatmul.bf16.vlgmr.msra.gmra.mxu3 %v18265_v53  ;;  %9954 = vmatpush.bf16.msrb.mxu0 %v14566_v18 }
 0xad3   :  { %v14549_v54 = vld [vmem:[#allocation6 + $0x4a0] sm:$0xf]  ;;  %v16923_v14 = vld [vmem:[#allocation6 + $0x4ac] sm:$0xf0]  ;;  %v14950_v30 = vor.u32 %v17023_v47, %v14949_v17  ;;  %9967 = vmatpush.bf16.msrb.mxu1 %v14694_v62 }
 0xad4   :  { %v14677_v58 = vld [vmem:[#allocation6 + $0x5a0] sm:$0xf]  ;;  %v16955_v51 = vld [vmem:[#allocation6 + $0x5ac] sm:$0xf0]  ;;  %v14550_v6 = vor.u32 %v16923_v14, %v14549_v54  ;;  %9980 = vmatpush.bf16.msrb.mxu2 %v14822_v0 }
 0xad5   :  { %v14805_v42 = vld [vmem:[#allocation6 + $0x6a0] sm:$0xf]  ;;  %v16987_v55 = vld [vmem:[#allocation6 + $0x6ac] sm:$0xf0]  ;;  %v14678_v20 = vor.u32 %v16955_v51, %v14677_v58  ;;  %9993 = vmatpush.bf16.msrb.mxu3 %v14950_v30 }
 0xad6   :  { %v14933_v40 = vld [vmem:[#allocation6 + $0x7a0] sm:$0xf]  ;;  %v17019_v1 = vld [vmem:[#allocation6 + $0x7ac] sm:$0xf0]  ;;  %v14806_v16 = vor.u32 %v16987_v55, %v14805_v42  ;;  %9955 = vmatpush.bf16.msrb.mxu0 %v14550_v6 }
 0xad7   :  { %v14533_v63 = vld [vmem:[#allocation6 + $0x480] sm:$0xf]  ;;  %v16919_v3 = vld [vmem:[#allocation6 + $0x48c] sm:$0xf0]  ;;  %v14934_v8 = vor.u32 %v17019_v1, %v14933_v40  ;;  %9968 = vmatpush.bf16.msrb.mxu1 %v14678_v20 }
 0xad8   :  { %v14661_v7 = vld [vmem:[#allocation6 + $0x580] sm:$0xf]  ;;  %v16951_v15 = vld [vmem:[#allocation6 + $0x58c] sm:$0xf0]  ;;  %v14534_v23 = vor.u32 %v16919_v3, %v14533_v63  ;;  %9981 = vmatpush.bf16.msrb.mxu2 %v14806_v16 }
 0xad9   :  { %v14789_v11 = vld [vmem:[#allocation6 + $0x680] sm:$0xf]  ;;  %v16983_v13 = vld [vmem:[#allocation6 + $0x68c] sm:$0xf0]  ;;  %v14662_v19 = vor.u32 %v16951_v15, %v14661_v7  ;;  %9994 = vmatpush.bf16.msrb.mxu3 %v14934_v8 }
 0xada   :  { %v14917_v21 = vld [vmem:[#allocation6 + $0x780] sm:$0xf]  ;;  %v17015_v22 = vld [vmem:[#allocation6 + $0x78c] sm:$0xf0]  ;;  %v14790_v24 = vor.u32 %v16983_v13, %v14789_v11  ;;  %9956 = vmatpush.bf16.msrb.mxu0 %v14534_v23 }
 0xadb   :  { %v14517_v27 = vld [vmem:[#allocation6 + $0x460] sm:$0xf]  ;;  %v16915_v29 = vld [vmem:[#allocation6 + $0x46c] sm:$0xf0]  ;;  %v14918_v37 = vor.u32 %v17015_v22, %v14917_v21  ;;  %9969 = vmatpush.bf16.msrb.mxu1 %v14662_v19 }
 0xadc   :  { %v14645_v39 = vld [vmem:[#allocation6 + $0x560] sm:$0xf]  ;;  %v16947_v43 = vld [vmem:[#allocation6 + $0x56c] sm:$0xf0]  ;;  %v14518_v62 = vor.u32 %v16915_v29, %v14517_v27  ;;  %9982 = vmatpush.bf16.msrb.mxu2 %v14790_v24 }
 0xadd   :  { %v14773_v45 = vld [vmem:[#allocation6 + $0x660] sm:$0xf]  ;;  %v16979_v17 = vld [vmem:[#allocation6 + $0x66c] sm:$0xf0]  ;;  %v14646_v0 = vor.u32 %v16947_v43, %v14645_v39  ;;  %9995 = vmatpush.bf16.msrb.mxu3 %v14918_v37 }
 0xade   :  { %v14901_v47 = vld [vmem:[#allocation6 + $0x760] sm:$0xf]  ;;  %v17011_v18 = vld [vmem:[#allocation6 + $0x76c] sm:$0xf0]  ;;  %v14774_v54 = vor.u32 %v16979_v17, %v14773_v45  ;;  %9957 = vmatpush.bf16.msrb.mxu0 %v14518_v62 }
 0xadf   :  { %v14501_v14 = vld [vmem:[#allocation6 + $0x440] sm:$0xf]  ;;  %v16911_v58 = vld [vmem:[#allocation6 + $0x44c] sm:$0xf0]  ;;  %v14902_v51 = vor.u32 %v17011_v18, %v14901_v47  ;;  %9970 = vmatpush.bf16.msrb.mxu1 %v14646_v0 }
 0xae0   :  { %v14629_v30 = vld [vmem:[#allocation6 + $0x540] sm:$0xf]  ;;  %v16943_v42 = vld [vmem:[#allocation6 + $0x54c] sm:$0xf0]  ;;  %v14502_v20 = vor.u32 %v16911_v58, %v14501_v14  ;;  %9983 = vmatpush.bf16.msrb.mxu2 %v14774_v54 }
 0xae1   :  { %v14757_v55 = vld [vmem:[#allocation6 + $0x640] sm:$0xf]  ;;  %v16975_v40 = vld [vmem:[#allocation6 + $0x64c] sm:$0xf0]  ;;  %v14630_v16 = vor.u32 %v16943_v42, %v14629_v30  ;;  %9996 = vmatpush.bf16.msrb.mxu3 %v14902_v51 }
 0xae2   :  { %v14885_v1 = vld [vmem:[#allocation6 + $0x740] sm:$0xf]  ;;  %v17007_v6 = vld [vmem:[#allocation6 + $0x74c] sm:$0xf0]  ;;  %v14758_v63 = vor.u32 %v16975_v40, %v14757_v55  ;;  %9958 = vmatpush.bf16.msrb.mxu0 %v14502_v20 }
 0xae3   :  { %v14485_v3 = vld [vmem:[#allocation6 + $0x420] sm:$0xf]  ;;  %v16907_v7 = vld [vmem:[#allocation6 + $0x42c] sm:$0xf0]  ;;  %v14886_v15 = vor.u32 %v17007_v6, %v14885_v1  ;;  %9971 = vmatpush.bf16.msrb.mxu1 %v14630_v16 }
 0xae4   :  { %v14613_v8 = vld [vmem:[#allocation6 + $0x520] sm:$0xf]  ;;  %v16939_v11 = vld [vmem:[#allocation6 + $0x52c] sm:$0xf0]  ;;  %v14486_v19 = vor.u32 %v16907_v7, %v14485_v3  ;;  %9984 = vmatpush.bf16.msrb.mxu2 %v14758_v63 }
 0xae5   :  { %v14741_v13 = vld [vmem:[#allocation6 + $0x620] sm:$0xf]  ;;  %v16971_v21 = vld [vmem:[#allocation6 + $0x62c] sm:$0xf0]  ;;  %v14614_v29 = vor.u32 %v16939_v11, %v14613_v8  ;;  %9997 = vmatpush.bf16.msrb.mxu3 %v14886_v15 }
 0xae6   :  { %v14869_v22 = vld [vmem:[#allocation6 + $0x720] sm:$0xf]  ;;  %v17003_v23 = vld [vmem:[#allocation6 + $0x72c] sm:$0xf0]  ;;  %v14742_v39 = vor.u32 %v16971_v21, %v14741_v13  ;;  %9959 = vmatpush.bf16.msrb.mxu0 %v14486_v19 }
 0xae7   :  { %v14469_v24 = vld [vmem:[#allocation6 + $0x400] sm:$0xf]  ;;  %v16903_v27 = vld [vmem:[#allocation6 + $0x40c] sm:$0xf0]  ;;  %v14870_v17 = vor.u32 %v17003_v23, %v14869_v22  ;;  %9972 = vmatpush.bf16.msrb.mxu1 %v14614_v29  ;;  %v18279_v23 = vpack.c.bf16 %v6789_v10, %v6789_v10  ;;  %v18289_v29 = vpack.c.bf16 %v6790_v49, %v6790_v49  ;;  %v18294_v10 = vpack.c.bf16 %v6788_v33, %v6788_v33 }
 0xae8   :  { %v14597_v37 = vld [vmem:[#allocation6 + $0x500] sm:$0xf]  ;;  %v16935_v43 = vld [vmem:[#allocation6 + $0x50c] sm:$0xf0]  ;;  %v14470_v58 = vor.u32 %v16903_v27, %v14469_v24  ;;  %9985 = vmatpush.bf16.msrb.mxu2 %v14742_v39  ;;  %v18284_v27 = vpack.c.bf16 %v6787_v5, %v6787_v5 }
 0xae9   :  { %v14725_v45 = vld [vmem:[#allocation6 + $0x600] sm:$0xf]  ;;  %v16967_v47 = vld [vmem:[#allocation6 + $0x60c] sm:$0xf0]  ;;  %v14598_v55 = vor.u32 %v16935_v43, %v14597_v37  ;;  %9998 = vmatpush.bf16.msrb.mxu3 %v14870_v17 }
 0xaea   :  { %v14853_v18 = vld [vmem:[#allocation6 + $0x700] sm:$0xf]  ;;  %v16999_v62 = vld [vmem:[#allocation6 + $0x70c] sm:$0xf0]  ;;  %v14726_v40 = vor.u32 %v16967_v47, %v14725_v45  ;;  %9960 = vmatpush.bf16.msrb.mxu0 %v14470_v58 }
 0xaeb   :  { %v15093_v0 = vld [vmem:[#allocation6 + $0x8e0] sm:$0xf]  ;;  %v17059_v54 = vld [vmem:[#allocation6 + $0x8ec] sm:$0xf0]  ;;  %v14854_v20 = vor.u32 %v16999_v62, %v14853_v18  ;;  %9973 = vmatpush.bf16.msrb.mxu1 %v14598_v55 }
 0xaec   :  { %v15221_v14 = vld [vmem:[#allocation6 + $0x9e0] sm:$0xf]  ;;  %v17091_v30 = vld [vmem:[#allocation6 + $0x9ec] sm:$0xf0]  ;;  %v15094_v16 = vor.u32 %v17059_v54, %v15093_v0  ;;  %9986 = vmatpush.bf16.msrb.mxu2 %v14726_v40 }
 0xaed   :  { %v15349_v51 = vld [vmem:[#allocation6 + $0xae0] sm:$0xf]  ;;  %v17123_v42 = vld [vmem:[#allocation6 + $0xaec] sm:$0xf0]  ;;  %v15222_v63 = vor.u32 %v17091_v30, %v15221_v14  ;;  %9999 = vmatpush.bf16.msrb.mxu3 %v14854_v20  ;;  %9961 = vmatmul.bf16.vlgmr.msrb.gmra.mxu0 %v18284_v27 }
 0xaee   :  { %v15477_v1 = vld [vmem:[#allocation6 + $0xbe0] sm:$0xf]  ;;  %v17155_v6 = vld [vmem:[#allocation6 + $0xbec] sm:$0xf0]  ;;  %v15350_v3 = vor.u32 %v17123_v42, %v15349_v51  ;;  %10005 = vmatpush.bf16.msra.mxu0 %v15094_v16  ;;  %9974 = vmatmul.bf16.vlgmr.msrb.gmra.mxu1 %v18294_v10 }
 0xaef   :  { %v15077_v7 = vld [vmem:[#allocation6 + $0x8c0] sm:$0xf]  ;;  %v17055_v8 = vld [vmem:[#allocation6 + $0x8cc] sm:$0xf0]  ;;  %v15478_v11 = vor.u32 %v17155_v6, %v15477_v1  ;;  %10018 = vmatpush.bf16.msra.mxu1 %v15222_v63  ;;  %9987 = vmatmul.bf16.vlgmr.msrb.gmra.mxu2 %v18279_v23 }
 0xaf0   :  { %v15205_v15 = vld [vmem:[#allocation6 + $0x9c0] sm:$0xf]  ;;  %v17087_v13 = vld [vmem:[#allocation6 + $0x9cc] sm:$0xf0]  ;;  %v15078_v52 = vor.u32 %v17055_v8, %v15077_v7  ;;  %10031 = vmatpush.bf16.msra.mxu2 %v15350_v3  ;;  %10000 = vmatmul.bf16.vlgmr.msrb.gmra.mxu3 %v18289_v29 }
 0xaf1   :  { %v15333_v21 = vld [vmem:[#allocation6 + $0xac0] sm:$0xf]  ;;  %v17119_v22 = vld [vmem:[#allocation6 + $0xacc] sm:$0xf0]  ;;  %v15206_v39 = vor.u32 %v17087_v13, %v15205_v15  ;;  %10044 = vmatpush.bf16.msra.mxu3 %v15478_v11 }
 0xaf2   :  { %v15461_v19 = vld [vmem:[#allocation6 + $0xbc0] sm:$0xf]  ;;  %v17151_v24 = vld [vmem:[#allocation6 + $0xbcc] sm:$0xf0]  ;;  %v15334_v48 = vor.u32 %v17119_v22, %v15333_v21  ;;  %10006 = vmatpush.bf16.msra.mxu0 %v15078_v52 }
 0xaf3   :  { %v15061_v37 = vld [vmem:[#allocation6 + $0x8a0] sm:$0xf]  ;;  %v17051_v5 = vld [vmem:[#allocation6 + $0x8ac] sm:$0xf0]  ;;  %v15462_v36 = vor.u32 %v17151_v24, %v15461_v19  ;;  %10019 = vmatpush.bf16.msra.mxu1 %v15206_v39 }
 0xaf4   :  { %v15189_v43 = vld [vmem:[#allocation6 + $0x9a0] sm:$0xf]  ;;  %v17083_v49 = vld [vmem:[#allocation6 + $0x9ac] sm:$0xf0]  ;;  %v15062_v4 = vor.u32 %v17051_v5, %v15061_v37  ;;  %10032 = vmatpush.bf16.msra.mxu2 %v15334_v48 }
 0xaf5   :  { %v15317_v45 = vld [vmem:[#allocation6 + $0xaa0] sm:$0xf]  ;;  %v17115_v17 = vld [vmem:[#allocation6 + $0xaac] sm:$0xf0]  ;;  %v15190_v33 = vor.u32 %v17083_v49, %v15189_v43  ;;  %10045 = vmatpush.bf16.msra.mxu3 %v15462_v36 }
 0xaf6   :  { %v15445_v47 = vld [vmem:[#allocation6 + $0xba0] sm:$0xf]  ;;  %v17147_v18 = vld [vmem:[#allocation6 + $0xbac] sm:$0xf0]  ;;  %v15318_v62 = vor.u32 %v17115_v17, %v15317_v45  ;;  %10007 = vmatpush.bf16.msra.mxu0 %v15062_v4 }
 0xaf7   :  { %v15045_v0 = vld [vmem:[#allocation6 + $0x880] sm:$0xf]  ;;  %v17047_v54 = vld [vmem:[#allocation6 + $0x88c] sm:$0xf0]  ;;  %v15446_v58 = vor.u32 %v17147_v18, %v15445_v47  ;;  %10020 = vmatpush.bf16.msra.mxu1 %v15190_v33 }
 0xaf8   :  { %v15173_v14 = vld [vmem:[#allocation6 + $0x980] sm:$0xf]  ;;  %v17079_v30 = vld [vmem:[#allocation6 + $0x98c] sm:$0xf0]  ;;  %v15046_v1 = vor.u32 %v17047_v54, %v15045_v0  ;;  %10033 = vmatpush.bf16.msra.mxu2 %v15318_v62 }
 0xaf9   :  { %v15301_v51 = vld [vmem:[#allocation6 + $0xa80] sm:$0xf]  ;;  %v17111_v42 = vld [vmem:[#allocation6 + $0xa8c] sm:$0xf0]  ;;  %v15174_v6 = vor.u32 %v17079_v30, %v15173_v14  ;;  %10046 = vmatpush.bf16.msra.mxu3 %v15446_v58 }
 0xafa   :  { %v15429_v55 = vld [vmem:[#allocation6 + $0xb80] sm:$0xf]  ;;  %v17143_v40 = vld [vmem:[#allocation6 + $0xb8c] sm:$0xf0]  ;;  %v15302_v20 = vor.u32 %v17111_v42, %v15301_v51  ;;  %10008 = vmatpush.bf16.msra.mxu0 %v15046_v1 }
 0xafb   :  { %v15029_v16 = vld [vmem:[#allocation6 + $0x860] sm:$0xf]  ;;  %v17043_v63 = vld [vmem:[#allocation6 + $0x86c] sm:$0xf0]  ;;  %v15430_v7 = vor.u32 %v17143_v40, %v15429_v55  ;;  %10021 = vmatpush.bf16.msra.mxu1 %v15174_v6 }
 0xafc   :  { %v15157_v3 = vld [vmem:[#allocation6 + $0x960] sm:$0xf]  ;;  %v17075_v8 = vld [vmem:[#allocation6 + $0x96c] sm:$0xf0]  ;;  %v15030_v22 = vor.u32 %v17043_v63, %v15029_v16  ;;  %10034 = vmatpush.bf16.msra.mxu2 %v15302_v20 }
 0xafd   :  { %v15285_v15 = vld [vmem:[#allocation6 + $0xa60] sm:$0xf]  ;;  %v17107_v11 = vld [vmem:[#allocation6 + $0xa6c] sm:$0xf0]  ;;  %v15158_v19 = vor.u32 %v17075_v8, %v15157_v3  ;;  %10047 = vmatpush.bf16.msra.mxu3 %v15430_v7 }
 0xafe   :  { %v15413_v13 = vld [vmem:[#allocation6 + $0xb60] sm:$0xf]  ;;  %v17139_v21 = vld [vmem:[#allocation6 + $0xb6c] sm:$0xf0]  ;;  %v15286_v24 = vor.u32 %v17107_v11, %v15285_v15  ;;  %10009 = vmatpush.bf16.msra.mxu0 %v15030_v22 }
 0xaff   :  { %v15013_v52 = vld [vmem:[#allocation6 + $0x840] sm:$0xf]  ;;  %v17039_v39 = vld [vmem:[#allocation6 + $0x84c] sm:$0xf0]  ;;  %v15414_v37 = vor.u32 %v17139_v21, %v15413_v13  ;;  %10022 = vmatpush.bf16.msra.mxu1 %v15158_v19 }
 0xb00   :  { %v15141_v48 = vld [vmem:[#allocation6 + $0x940] sm:$0xf]  ;;  %v17071_v5 = vld [vmem:[#allocation6 + $0x94c] sm:$0xf0]  ;;  %v15014_v17 = vor.u32 %v17039_v39, %v15013_v52  ;;  %10035 = vmatpush.bf16.msra.mxu2 %v15286_v24 }
 0xb01   :  { %v15269_v43 = vld [vmem:[#allocation6 + $0xa40] sm:$0xf]  ;;  %v17103_v36 = vld [vmem:[#allocation6 + $0xa4c] sm:$0xf0]  ;;  %v15142_v47 = vor.u32 %v17071_v5, %v15141_v48  ;;  %10048 = vmatpush.bf16.msra.mxu3 %v15414_v37 }
 0xb02   :  { %v15397_v49 = vld [vmem:[#allocation6 + $0xb40] sm:$0xf]  ;;  %v17135_v45 = vld [vmem:[#allocation6 + $0xb4c] sm:$0xf0]  ;;  %v15270_v18 = vor.u32 %v17103_v36, %v15269_v43  ;;  %10010 = vmatpush.bf16.msra.mxu0 %v15014_v17 }
 0xb03   :  { %v14997_v4 = vld [vmem:[#allocation6 + $0x820] sm:$0xf]  ;;  %v17035_v33 = vld [vmem:[#allocation6 + $0x82c] sm:$0xf0]  ;;  %v15398_v0 = vor.u32 %v17135_v45, %v15397_v49  ;;  %10023 = vmatpush.bf16.msra.mxu1 %v15142_v47 }
 0xb04   :  { %v15125_v62 = vld [vmem:[#allocation6 + $0x920] sm:$0xf]  ;;  %v17067_v54 = vld [vmem:[#allocation6 + $0x92c] sm:$0xf0]  ;;  %v14998_v42 = vor.u32 %v17035_v33, %v14997_v4  ;;  %10036 = vmatpush.bf16.msra.mxu2 %v15270_v18  ;;  %v18303_v33 = vpack.c.bf16 %v6791_v41, %v6791_v41  ;;  %v18318_v41 = vpack.c.bf16 %v6794_v60, %v6794_v60 }
 0xb05   :  { %v15253_v14 = vld [vmem:[#allocation6 + $0xa20] sm:$0xf]  ;;  %v17099_v58 = vld [vmem:[#allocation6 + $0xa2c] sm:$0xf0]  ;;  %v15126_v1 = vor.u32 %v17067_v54, %v15125_v62  ;;  %10049 = vmatpush.bf16.msra.mxu3 %v15398_v0 }
 0xb06   :  { %v15381_v30 = vld [vmem:[#allocation6 + $0xb20] sm:$0xf]  ;;  %v17131_v51 = vld [vmem:[#allocation6 + $0xb2c] sm:$0xf0]  ;;  %v15254_v6 = vor.u32 %v17099_v58, %v15253_v14  ;;  %10011 = vmatpush.bf16.msra.mxu0 %v14998_v42  ;;  %v18308_v14 = vpack.c.bf16 %v6793_v12, %v6793_v12  ;;  %v18313_v58 = vpack.c.bf16 %v6792_v44, %v6792_v44 }
 0xb07   :  { %v14981_v55 = vld [vmem:[#allocation6 + $0x800] sm:$0xf]  ;;  %v17031_v40 = vld [vmem:[#allocation6 + $0x80c] sm:$0xf0]  ;;  %v15382_v3 = vor.u32 %v17131_v51, %v15381_v30  ;;  %10024 = vmatpush.bf16.msra.mxu1 %v15126_v1 }
 0xb08   :  { %v15109_v20 = vld [vmem:[#allocation6 + $0x900] sm:$0xf]  ;;  %v17063_v16 = vld [vmem:[#allocation6 + $0x90c] sm:$0xf0]  ;;  %v14982_v22 = vor.u32 %v17031_v40, %v14981_v55  ;;  %10037 = vmatpush.bf16.msra.mxu2 %v15254_v6 }
 0xb09   :  { %v15237_v63 = vld [vmem:[#allocation6 + $0xa00] sm:$0xf]  ;;  %v17095_v7 = vld [vmem:[#allocation6 + $0xa0c] sm:$0xf0]  ;;  %v15110_v39 = vor.u32 %v17063_v16, %v15109_v20  ;;  %10050 = vmatpush.bf16.msra.mxu3 %v15382_v3 }
 0xb0a   :  { %v15365_v8 = vld [vmem:[#allocation6 + $0xb00] sm:$0xf]  ;;  %v17127_v15 = vld [vmem:[#allocation6 + $0xb0c] sm:$0xf0]  ;;  %v15238_v48 = vor.u32 %v17095_v7, %v15237_v63  ;;  %10012 = vmatpush.bf16.msra.mxu0 %v14982_v22 }
 0xb0b   :  { %v15605_v11 = vld [vmem:[#allocation6 + $0xce0] sm:$0xf]  ;;  %v17187_v13 = vld [vmem:[#allocation6 + $0xcec] sm:$0xf0]  ;;  %v15366_v43 = vor.u32 %v17127_v15, %v15365_v8  ;;  %10025 = vmatpush.bf16.msra.mxu1 %v15110_v39 }
 0xb0c   :  { %v15733_v21 = vld [vmem:[#allocation6 + $0xde0] sm:$0xf]  ;;  %v17219_v19 = vld [vmem:[#allocation6 + $0xdec] sm:$0xf0]  ;;  %v15606_v36 = vor.u32 %v17187_v13, %v15605_v11  ;;  %10038 = vmatpush.bf16.msra.mxu2 %v15238_v48 }
 0xb0d   :  { %v15861_v24 = vld [vmem:[#allocation6 + $0xee0] sm:$0xf]  ;;  %v17251_v52 = vld [vmem:[#allocation6 + $0xeec] sm:$0xf0]  ;;  %v15734_v49 = vor.u32 %v17219_v19, %v15733_v21  ;;  %10051 = vmatpush.bf16.msra.mxu3 %v15366_v43  ;;  %10013 = vmatmul.bf16.vlgmr.msra.gmra.mxu0 %v18303_v33 }
 0xb0e   :  { %v15989_v37 = vld [vmem:[#allocation6 + $0xfe0] sm:$0xf]  ;;  %v17283_v5 = vld [vmem:[#allocation6 + $0xfec] sm:$0xf0]  ;;  %v15862_v45 = vor.u32 %v17251_v52, %v15861_v24  ;;  %10057 = vmatpush.bf16.msrb.mxu0 %v15606_v36  ;;  %10026 = vmatmul.bf16.vlgmr.msra.gmra.mxu1 %v18313_v58 }
 0xb0f   :  { %v15589_v17 = vld [vmem:[#allocation6 + $0xcc0] sm:$0xf]  ;;  %v17183_v47 = vld [vmem:[#allocation6 + $0xccc] sm:$0xf0]  ;;  %v15990_v4 = vor.u32 %v17283_v5, %v15989_v37  ;;  %10070 = vmatpush.bf16.msrb.mxu1 %v15734_v49  ;;  %10039 = vmatmul.bf16.vlgmr.msra.gmra.mxu2 %v18308_v14 }
 0xb10   :  { %v15717_v18 = vld [vmem:[#allocation6 + $0xdc0] sm:$0xf]  ;;  %v17215_v62 = vld [vmem:[#allocation6 + $0xdcc] sm:$0xf0]  ;;  %v15590_v51 = vor.u32 %v17183_v47, %v15589_v17  ;;  %10083 = vmatpush.bf16.msrb.mxu2 %v15862_v45  ;;  %10052 = vmatmul.bf16.vlgmr.msra.gmra.mxu3 %v18318_v41 }
 0xb11   :  { %v15845_v0 = vld [vmem:[#allocation6 + $0xec0] sm:$0xf]  ;;  %v17247_v54 = vld [vmem:[#allocation6 + $0xecc] sm:$0xf0]  ;;  %v15718_v38 = vor.u32 %v17215_v62, %v15717_v18  ;;  %10096 = vmatpush.bf16.msrb.mxu3 %v15990_v4 }
 0xb12   :  { %v15973_v30 = vld [vmem:[#allocation6 + $0xfc0] sm:$0xf]  ;;  %v17279_v25 = vld [vmem:[#allocation6 + $0xfcc] sm:$0xf0]  ;;  %v15846_v12 = vor.u32 %v17247_v54, %v15845_v0  ;;  %10058 = vmatpush.bf16.msrb.mxu0 %v15590_v51 }
 0xb13   :  { %v15573_v42 = vld [vmem:[#allocation6 + $0xca0] sm:$0xf]  ;;  %v17179_v55 = vld [vmem:[#allocation6 + $0xcac] sm:$0xf0]  ;;  %v15974_v44 = vor.u32 %v17279_v25, %v15973_v30  ;;  %10071 = vmatpush.bf16.msrb.mxu1 %v15718_v38 }
 0xb14   :  { %v15701_v26 = vld [vmem:[#allocation6 + $0xda0] sm:$0xf]  ;;  %v17211_v40 = vld [vmem:[#allocation6 + $0xdac] sm:$0xf0]  ;;  %v15574_v20 = vor.u32 %v17179_v55, %v15573_v42  ;;  %10084 = vmatpush.bf16.msrb.mxu2 %v15846_v12 }
 0xb15   :  { %v15829_v1 = vld [vmem:[#allocation6 + $0xea0] sm:$0xf]  ;;  %v17243_v6 = vld [vmem:[#allocation6 + $0xeac] sm:$0xf0]  ;;  %v15702_v16 = vor.u32 %v17211_v40, %v15701_v26  ;;  %10097 = vmatpush.bf16.msrb.mxu3 %v15974_v44 }
 0xb16   :  { %v15957_v50 = vld [vmem:[#allocation6 + $0xfa0] sm:$0xf]  ;;  %v17275_v60 = vld [vmem:[#allocation6 + $0xfac] sm:$0xf0]  ;;  %v15830_v63 = vor.u32 %v17243_v6, %v15829_v1  ;;  %10059 = vmatpush.bf16.msrb.mxu0 %v15574_v20 }
 0xb17   :  { %v15557_v3 = vld [vmem:[#allocation6 + $0xc80] sm:$0xf]  ;;  %v17175_v7 = vld [vmem:[#allocation6 + $0xc8c] sm:$0xf0]  ;;  %v15958_v15 = vor.u32 %v17275_v60, %v15957_v50  ;;  %10072 = vmatpush.bf16.msrb.mxu1 %v15702_v16 }
 0xb18   :  { %v15685_v8 = vld [vmem:[#allocation6 + $0xd80] sm:$0xf]  ;;  %v17207_v11 = vld [vmem:[#allocation6 + $0xd8c] sm:$0xf0]  ;;  %v15558_v24 = vor.u32 %v17175_v7, %v15557_v3  ;;  %10085 = vmatpush.bf16.msrb.mxu2 %v15830_v63 }
 0xb19   :  { %v15813_v13 = vld [vmem:[#allocation6 + $0xe80] sm:$0xf]  ;;  %v17239_v21 = vld [vmem:[#allocation6 + $0xe8c] sm:$0xf0]  ;;  %v15686_v52 = vor.u32 %v17207_v11, %v15685_v8  ;;  %10098 = vmatpush.bf16.msrb.mxu3 %v15958_v15 }
 0xb1a   :  { %v15941_v22 = vld [vmem:[#allocation6 + $0xf80] sm:$0xf]  ;;  %v17271_v19 = vld [vmem:[#allocation6 + $0xf8c] sm:$0xf0]  ;;  %v15814_v39 = vor.u32 %v17239_v21, %v15813_v13  ;;  %10060 = vmatpush.bf16.msrb.mxu0 %v15558_v24 }
 0xb1b   :  { %v15541_v48 = vld [vmem:[#allocation6 + $0xc60] sm:$0xf]  ;;  %v17171_v37 = vld [vmem:[#allocation6 + $0xc6c] sm:$0xf0]  ;;  %v15942_v43 = vor.u32 %v17271_v19, %v15941_v22  ;;  %10073 = vmatpush.bf16.msrb.mxu1 %v15686_v52 }
 0xb1c   :  { %v15669_v5 = vld [vmem:[#allocation6 + $0xd60] sm:$0xf]  ;;  %v17203_v36 = vld [vmem:[#allocation6 + $0xd6c] sm:$0xf0]  ;;  %v15542_v18 = vor.u32 %v17171_v37, %v15541_v48  ;;  %10086 = vmatpush.bf16.msrb.mxu2 %v15814_v39 }
 0xb1d   :  { %v15797_v49 = vld [vmem:[#allocation6 + $0xe60] sm:$0xf]  ;;  %v17235_v45 = vld [vmem:[#allocation6 + $0xe6c] sm:$0xf0]  ;;  %v15670_v4 = vor.u32 %v17203_v36, %v15669_v5  ;;  %10099 = vmatpush.bf16.msrb.mxu3 %v15942_v43  ;;  %v16801_v5 = vld [vmem:[#allocation6 + $0xe4] sm:$0xf] }
 0xb1e   :  { %v15925_v17 = vld [vmem:[#allocation6 + $0xf60] sm:$0xf]  ;;  %v17267_v47 = vld [vmem:[#allocation6 + $0xf6c] sm:$0xf0]  ;;  %v15798_v62 = vor.u32 %v17235_v45, %v15797_v49  ;;  %10061 = vmatpush.bf16.msrb.mxu0 %v15542_v18  ;;  %v14071_v43 = vld [vmem:[#allocation6 + $0xf0] sm:$0xf0] }
 0xb1f   :  { %v15525_v0 = vld [vmem:[#allocation6 + $0xc40] sm:$0xf]  ;;  %v17167_v54 = vld [vmem:[#allocation6 + $0xc4c] sm:$0xf0]  ;;  %v15926_v25 = vor.u32 %v17267_v47, %v15925_v17  ;;  %10074 = vmatpush.bf16.msrb.mxu1 %v15670_v4  ;;  %v16833_v36 = vld [vmem:[#allocation6 + $0x1e4] sm:$0xf] }
 0xb20   :  { %v15653_v30 = vld [vmem:[#allocation6 + $0xd40] sm:$0xf]  ;;  %v17199_v51 = vld [vmem:[#allocation6 + $0xd4c] sm:$0xf0]  ;;  %v15526_v26 = vor.u32 %v17167_v54, %v15525_v0  ;;  %10087 = vmatpush.bf16.msrb.mxu2 %v15798_v62  ;;  %v14199_v45 = vld [vmem:[#allocation6 + $0x1f0] sm:$0xf0] }
 0xb21   :  { %v15781_v38 = vld [vmem:[#allocation6 + $0xe40] sm:$0xf]  ;;  %v17231_v12 = vld [vmem:[#allocation6 + $0xe4c] sm:$0xf0]  ;;  %v15654_v44 = vor.u32 %v17199_v51, %v15653_v30  ;;  %10100 = vmatpush.bf16.msrb.mxu3 %v15926_v25  ;;  %v16865_v17 = vld [vmem:[#allocation6 + $0x2e4] sm:$0xf]  ;;  %v14074_v30 = vor.u32 %v16801_v5, %v14071_v43  ;;  %v14202_v25 = vor.u32 %v16833_v36, %v14199_v45 }
 0xb22   :  { %v15909_v42 = vld [vmem:[#allocation6 + $0xf40] sm:$0xf]  ;;  %v17263_v55 = vld [vmem:[#allocation6 + $0xf4c] sm:$0xf0]  ;;  %v15782_v40 = vor.u32 %v17231_v12, %v15781_v38  ;;  %10062 = vmatpush.bf16.msrb.mxu0 %v15526_v26  ;;  %v14327_v47 = vld [vmem:[#allocation6 + $0x2f0] sm:$0xf0] }
 0xb23   :  { %v15509_v1 = vld [vmem:[#allocation6 + $0xc20] sm:$0xf]  ;;  %v17163_v6 = vld [vmem:[#allocation6 + $0xc2c] sm:$0xf0]  ;;  %v15910_v60 = vor.u32 %v17263_v55, %v15909_v42  ;;  %10075 = vmatpush.bf16.msrb.mxu1 %v15654_v44  ;;  %v16897_v62 = vld [vmem:[#allocation6 + $0x3e4] sm:$0xf]  ;;  %v14330_v51 = vor.u32 %v16865_v17, %v14327_v47 }
 0xb24   :  { %v15637_v50 = vld [vmem:[#allocation6 + $0xd20] sm:$0xf]  ;;  %v17195_v20 = vld [vmem:[#allocation6 + $0xd2c] sm:$0xf0]  ;;  %v15510_v8 = vor.u32 %v17163_v6, %v15509_v1  ;;  %10088 = vmatpush.bf16.msrb.mxu2 %v15782_v40  ;;  %v14455_v0 = vld [vmem:[#allocation6 + $0x3f0] sm:$0xf0] }
 0xb25   :  { %v15765_v16 = vld [vmem:[#allocation6 + $0xe20] sm:$0xf]  ;;  %v17227_v63 = vld [vmem:[#allocation6 + $0xe2c] sm:$0xf0]  ;;  %v15638_v13 = vor.u32 %v17195_v20, %v15637_v50  ;;  %10101 = vmatpush.bf16.msrb.mxu3 %v15910_v60  ;;  %v16797_v38 = vld [vmem:[#allocation6 + $0xc4] sm:$0xf]  ;;  %v14458_v55 = vor.u32 %v16897_v62, %v14455_v0 }
 0xb26   :  { %v15893_v3 = vld [vmem:[#allocation6 + $0xf20] sm:$0xf]  ;;  %v17259_v7 = vld [vmem:[#allocation6 + $0xf2c] sm:$0xf0]  ;;  %v15766_v21 = vor.u32 %v17227_v63, %v15765_v16  ;;  %10063 = vmatpush.bf16.msrb.mxu0 %v15510_v8  ;;  %v14055_v12 = vld [vmem:[#allocation6 + $0xd0] sm:$0xf0] }
 0xb27   :  { %v15493_v15 = vld [vmem:[#allocation6 + $0xc00] sm:$0xf]  ;;  %v17159_v11 = vld [vmem:[#allocation6 + $0xc0c] sm:$0xf0]  ;;  %v15894_v52 = vor.u32 %v17259_v7, %v15893_v3  ;;  %10076 = vmatpush.bf16.msrb.mxu1 %v15638_v13  ;;  %v16829_v42 = vld [vmem:[#allocation6 + $0x1c4] sm:$0xf]  ;;  %v14058_v8 = vor.u32 %v16797_v38, %v14055_v12 }
 0xb28   :  { %v15621_v22 = vld [vmem:[#allocation6 + $0xd00] sm:$0xf]  ;;  %v17191_v19 = vld [vmem:[#allocation6 + $0xd0c] sm:$0xf0]  ;;  %v15494_v49 = vor.u32 %v17159_v11, %v15493_v15  ;;  %10089 = vmatpush.bf16.msrb.mxu2 %v15766_v21  ;;  %v18466_v26 = vmax.f32 %v18237_v2, 0.0  ;;  %v18467_v50 = vmax.f32 %v18245_v59, 0.0 }
 0xb29   :  { %v15749_v24 = vld [vmem:[#allocation6 + $0xe00] sm:$0xf]  ;;  %v17223_v39 = vld [vmem:[#allocation6 + $0xe0c] sm:$0xf0]  ;;  %v15622_v18 = vor.u32 %v17191_v19, %v15621_v22  ;;  %10102 = vmatpush.bf16.msrb.mxu3 %v15894_v52  ;;  %v14183_v40 = vld [vmem:[#allocation6 + $0x1d0] sm:$0xf0] }
 0xb2a   :  { %v15877_v48 = vld [vmem:[#allocation6 + $0xf00] sm:$0xf]  ;;  %v17255_v37 = vld [vmem:[#allocation6 + $0xf0c] sm:$0xf0]  ;;  %v15750_v4 = vor.u32 %v17223_v39, %v15749_v24  ;;  %10064 = vmatpush.bf16.msrb.mxu0 %v15494_v49  ;;  %v18327_v44 = vpack.c.bf16 %v18466_v26, %v18466_v26  ;;  %v16861_v1 = vld [vmem:[#allocation6 + $0x2c4] sm:$0xf]  ;;  %v18332_v60 = vpack.c.bf16 %v18467_v50, %v18467_v50  ;;  %v14186_v59 = vor.u32 %v16829_v42, %v14183_v40 }
 0xb2b   :  { %v15878_v54 = vor.u32 %v17255_v37, %v15877_v48  ;;  %v14311_v6 = vld [vmem:[#allocation6 + $0x2d0] sm:$0xf0]  ;;  %10077 = vmatpush.bf16.msrb.mxu1 %v15622_v18  ;;  %v18468_v20 = vmax.f32 %v18241_v35, 0.0  ;;  %v16893_v63 = vld [vmem:[#allocation6 + $0x3c4] sm:$0xf]  ;;  %v18469_v3 = vmax.f32 %v18249_v31, 0.0 }
 0xb2c   :  { %10090 = vmatpush.bf16.msrb.mxu2 %v15750_v4  ;;  %v14439_v2 = vld [vmem:[#allocation6 + $0x3d0] sm:$0xf0]  ;;  %v14314_v15 = vor.u32 %v16861_v1, %v14311_v6  ;;  %v16793_v11 = vld [vmem:[#allocation6 + $0xa4] sm:$0xf] }
 0xb2d   :  { %v18337_v16 = vpack.c.bf16 %v18468_v20, %v18468_v20  ;;  %10103 = vmatpush.bf16.msrb.mxu3 %v15878_v54  ;;  %v18342_v7 = vpack.c.bf16 %v18469_v3, %v18469_v3  ;;  %v14039_v13 = vld [vmem:[#allocation6 + $0xb0] sm:$0xf0]  ;;  %v16825_v35 = vld [vmem:[#allocation6 + $0x1a4] sm:$0xf]  ;;  %10065 = vmatmul.bf16.vlgmr.msrb.gmra.mxu0 %v18327_v44  ;;  %v14442_v21 = vor.u32 %v16893_v63, %v14439_v2 }
 0xb2e   :  { %10109 = vmatpush.bf16.msra.mxu0 %v14074_v30  ;;  %v14167_v22 = vld [vmem:[#allocation6 + $0x1b0] sm:$0xf0]  ;;  %v16857_v19 = vld [vmem:[#allocation6 + $0x2a4] sm:$0xf]  ;;  %v14042_v39 = vor.u32 %v16793_v11, %v14039_v13 }
 0xb2f   :  { %10122 = vmatpush.bf16.msra.mxu1 %v14202_v25  ;;  %v14295_v24 = vld [vmem:[#allocation6 + $0x2b0] sm:$0xf0]  ;;  %10091 = vmatmul.bf16.vlgmr.msrb.gmra.mxu2 %v18332_v60  ;;  %v16889_v31 = vld [vmem:[#allocation6 + $0x3a4] sm:$0xf]  ;;  %v14170_v48 = vor.u32 %v16825_v35, %v14167_v22 }
 0xb30   :  { %10135 = vmatpush.bf16.msra.mxu2 %v14330_v51  ;;  %10078 = vmatmul.bf16.vlgmr.msrb.gmra.mxu1 %v18337_v16  ;;  %v14423_v52 = vld [vmem:[#allocation6 + $0x3b0] sm:$0xf0]  ;;  %v14298_v37 = vor.u32 %v16857_v19, %v14295_v24  ;;  %v16789_v5 = vld [vmem:[#allocation6 + $0x84] sm:$0xf] }
 0xb31   :  { %10148 = vmatpush.bf16.msra.mxu3 %v14458_v55  ;;  %v14023_v43 = vld [vmem:[#allocation6 + $0x90] sm:$0xf0]  ;;  %v16821_v36 = vld [vmem:[#allocation6 + $0x184] sm:$0xf]  ;;  %v14426_v49 = vor.u32 %v16889_v31, %v14423_v52 }
 0xb32   :  { %10104 = vmatmul.bf16.vlgmr.msrb.gmra.mxu3 %v18342_v7  ;;  %10110 = vmatpush.bf16.msra.mxu0 %v14058_v8  ;;  %v14151_v45 = vld [vmem:[#allocation6 + $0x190] sm:$0xf0]  ;;  %v16853_v17 = vld [vmem:[#allocation6 + $0x284] sm:$0xf]  ;;  %v14026_v62 = vor.u32 %v16789_v5, %v14023_v43 }
 0xb33   :  { %10123 = vmatpush.bf16.msra.mxu1 %v14186_v59  ;;  %v14279_v47 = vld [vmem:[#allocation6 + $0x290] sm:$0xf0]  ;;  %v16885_v18 = vld [vmem:[#allocation6 + $0x384] sm:$0xf]  ;;  %v14154_v0 = vor.u32 %v16821_v36, %v14151_v45 }
 0xb34   :  { %10136 = vmatpush.bf16.msra.mxu2 %v14314_v15  ;;  %v14407_v4 = vld [vmem:[#allocation6 + $0x390] sm:$0xf0]  ;;  %v14282_v54 = vor.u32 %v16853_v17, %v14279_v47  ;;  %v16785_v30 = vld [vmem:[#allocation6 + $0x64] sm:$0xf] }
 0xb35   :  { %10149 = vmatpush.bf16.msra.mxu3 %v14442_v21  ;;  %v14007_v25 = vld [vmem:[#allocation6 + $0x70] sm:$0xf0]  ;;  %v16817_v51 = vld [vmem:[#allocation6 + $0x164] sm:$0xf]  ;;  %v14410_v38 = vor.u32 %v16885_v18, %v14407_v4 }
 0xb36   :  { %10111 = vmatpush.bf16.msra.mxu0 %v14042_v39  ;;  %v14135_v12 = vld [vmem:[#allocation6 + $0x170] sm:$0xf0]  ;;  %v16849_v42 = vld [vmem:[#allocation6 + $0x264] sm:$0xf]  ;;  %v14010_v1 = vor.u32 %v16785_v30, %v14007_v25 }
 0xb37   :  { %10124 = vmatpush.bf16.msra.mxu1 %v14170_v48  ;;  %v14263_v55 = vld [vmem:[#allocation6 + $0x270] sm:$0xf0]  ;;  %v16881_v26 = vld [vmem:[#allocation6 + $0x364] sm:$0xf]  ;;  %v14138_v6 = vor.u32 %v16817_v51, %v14135_v12 }
 0xb38   :  { %10137 = vmatpush.bf16.msra.mxu2 %v14298_v37  ;;  %v14391_v40 = vld [vmem:[#allocation6 + $0x370] sm:$0xf0]  ;;  %v14266_v50 = vor.u32 %v16849_v42, %v14263_v55  ;;  %v16781_v20 = vld [vmem:[#allocation6 + $0x44] sm:$0xf] }
 0xb39   :  { %10150 = vmatpush.bf16.msra.mxu3 %v14426_v49  ;;  %v13991_v63 = vld [vmem:[#allocation6 + $0x50] sm:$0xf0]  ;;  %v16813_v2 = vld [vmem:[#allocation6 + $0x144] sm:$0xf]  ;;  %v14394_v3 = vor.u32 %v16881_v26, %v14391_v40 }
 0xb3a   :  { %10112 = vmatpush.bf16.msra.mxu0 %v14026_v62  ;;  %v14119_v8 = vld [vmem:[#allocation6 + $0x150] sm:$0xf0]  ;;  %v16845_v59 = vld [vmem:[#allocation6 + $0x244] sm:$0xf]  ;;  %v13994_v35 = vor.u32 %v16781_v20, %v13991_v63 }
 0xb3b   :  { %10125 = vmatpush.bf16.msra.mxu1 %v14154_v0  ;;  %v14247_v15 = vld [vmem:[#allocation6 + $0x250] sm:$0xf0]  ;;  %v16877_v11 = vld [vmem:[#allocation6 + $0x344] sm:$0xf]  ;;  %v14122_v21 = vor.u32 %v16813_v2, %v14119_v8 }
 0xb3c   :  { %10138 = vmatpush.bf16.msra.mxu2 %v14282_v54  ;;  %v14375_v13 = vld [vmem:[#allocation6 + $0x350] sm:$0xf0]  ;;  %v14250_v22 = vor.u32 %v16845_v59, %v14247_v15  ;;  %v16777_v19 = vld [vmem:[#allocation6 + $0x24] sm:$0xf] }
 0xb3d   :  { %10151 = vmatpush.bf16.msra.mxu3 %v14410_v38  ;;  %v13975_v24 = vld [vmem:[#allocation6 + $0x30] sm:$0xf0]  ;;  %v16809_v31 = vld [vmem:[#allocation6 + $0x124] sm:$0xf]  ;;  %v14378_v52 = vor.u32 %v16877_v11, %v14375_v13 }
 0xb3e   :  { %10113 = vmatpush.bf16.msra.mxu0 %v14010_v1  ;;  %v14103_v39 = vld [vmem:[#allocation6 + $0x130] sm:$0xf0]  ;;  %v16841_v48 = vld [vmem:[#allocation6 + $0x224] sm:$0xf]  ;;  %v13978_v36 = vor.u32 %v16777_v19, %v13975_v24 }
 0xb3f   :  { %10126 = vmatpush.bf16.msra.mxu1 %v14138_v6  ;;  %v14231_v37 = vld [vmem:[#allocation6 + $0x230] sm:$0xf0]  ;;  %v16873_v5 = vld [vmem:[#allocation6 + $0x324] sm:$0xf]  ;;  %v14106_v17 = vor.u32 %v16809_v31, %v14103_v39 }
 0xb40   :  { %10139 = vmatpush.bf16.msra.mxu2 %v14266_v50  ;;  %v14359_v43 = vld [vmem:[#allocation6 + $0x330] sm:$0xf0]  ;;  %v16773_v49 = vld [vmem:[#allocation6 + $0x4] sm:$0xf]  ;;  %v14234_v47 = vor.u32 %v16841_v48, %v14231_v37 }
 0xb41   :  { %10152 = vmatpush.bf16.msra.mxu3 %v14394_v3  ;;  %v13959_v45 = vld [vmem:[#allocation6 + $0x10] sm:$0xf0]  ;;  %v16805_v18 = vld [vmem:[#allocation6 + $0x104] sm:$0xf]  ;;  %v14362_v0 = vor.u32 %v16873_v5, %v14359_v43 }
 0xb42   :  { %10114 = vmatpush.bf16.msra.mxu0 %v13994_v35  ;;  %v14087_v4 = vld [vmem:[#allocation6 + $0x110] sm:$0xf0]  ;;  %v16837_v62 = vld [vmem:[#allocation6 + $0x204] sm:$0xf]  ;;  %v13962_v42 = vor.u32 %v16773_v49, %v13959_v45 }
 0xb43   :  { %10127 = vmatpush.bf16.msra.mxu1 %v14122_v21  ;;  %v14215_v54 = vld [vmem:[#allocation6 + $0x210] sm:$0xf0]  ;;  %v16869_v30 = vld [vmem:[#allocation6 + $0x304] sm:$0xf]  ;;  %v14090_v1 = vor.u32 %v16805_v18, %v14087_v4 }
 0xb44   :  { %10140 = vmatpush.bf16.msra.mxu2 %v14250_v22  ;;  %v14343_v25 = vld [vmem:[#allocation6 + $0x310] sm:$0xf0]  ;;  %v16929_v51 = vld [vmem:[#allocation6 + $0x4e4] sm:$0xf]  ;;  %v14218_v6 = vor.u32 %v16837_v62, %v14215_v54 }
 0xb45   :  { %10153 = vmatpush.bf16.msra.mxu3 %v14378_v52  ;;  %v14583_v38 = vld [vmem:[#allocation6 + $0x4f0] sm:$0xf0]  ;;  %v16961_v12 = vld [vmem:[#allocation6 + $0x5e4] sm:$0xf]  ;;  %v14346_v63 = vor.u32 %v16869_v30, %v14343_v25 }
 0xb46   :  { %10115 = vmatpush.bf16.msra.mxu0 %v13978_v36  ;;  %v14711_v55 = vld [vmem:[#allocation6 + $0x5f0] sm:$0xf0]  ;;  %v16993_v26 = vld [vmem:[#allocation6 + $0x6e4] sm:$0xf]  ;;  %v14586_v2 = vor.u32 %v16929_v51, %v14583_v38 }
 0xb47   :  { %v14839_v40 = vld [vmem:[#allocation6 + $0x6f0] sm:$0xf0]  ;;  %10128 = vmatpush.bf16.msra.mxu1 %v14106_v17  ;;  %v17025_v50 = vld [vmem:[#allocation6 + $0x7e4] sm:$0xf]  ;;  %v14714_v3 = vor.u32 %v16961_v12, %v14711_v55  ;;  %v7331_v17 = vld [vmem:[#allocation23] sm:$0xf] }
 0xb48   :  { %10141 = vmatpush.bf16.msra.mxu2 %v14234_v47  ;;  %v14967_v20 = vld [vmem:[#allocation6 + $0x7f0] sm:$0xf0]  ;;  %v14842_v8 = vor.u32 %v16993_v26, %v14839_v40  ;;  %v16925_v59 = vld [vmem:[#allocation6 + $0x4c4] sm:$0xf]  ;;  %v7333_v51 = vperm.slane %v7331_v17, 0 }
 0xb49   :  { %10154 = vmatpush.bf16.msra.mxu3 %v14362_v0  ;;  %v14567_v15 = vld [vmem:[#allocation6 + $0x4d0] sm:$0xf0]  ;;  %v16957_v11 = vld [vmem:[#allocation6 + $0x5c4] sm:$0xf]  ;;  %v14970_v13 = vor.u32 %v17025_v50, %v14967_v20 }
 0xb4a   :  { %10116 = vmatpush.bf16.msra.mxu0 %v13962_v42  ;;  %v14695_v35 = vld [vmem:[#allocation6 + $0x5d0] sm:$0xf0]  ;;  %v16989_v21 = vld [vmem:[#allocation6 + $0x6c4] sm:$0xf]  ;;  %v14570_v31 = vor.u32 %v16925_v59, %v14567_v15 }
 0xb4b   :  { %v14823_v22 = vld [vmem:[#allocation6 + $0x6d0] sm:$0xf0]  ;;  %10129 = vmatpush.bf16.msra.mxu1 %v14090_v1  ;;  %v17021_v19 = vld [vmem:[#allocation6 + $0x7c4] sm:$0xf]  ;;  %v14698_v39 = vor.u32 %v16957_v11, %v14695_v35  ;;  %v9923_v59 = vpop.f32.mrf.mxu1 }
 0xb4c   :  { %10142 = vmatpush.bf16.msra.mxu2 %v14218_v6  ;;  %v14951_v24 = vld [vmem:[#allocation6 + $0x7d0] sm:$0xf0]  ;;  %v16921_v52 = vld [vmem:[#allocation6 + $0x4a4] sm:$0xf]  ;;  %v14826_v48 = vor.u32 %v16989_v21, %v14823_v22 }
 0xb4d   :  { %10155 = vmatpush.bf16.msra.mxu3 %v14346_v63  ;;  %v14551_v37 = vld [vmem:[#allocation6 + $0x4b0] sm:$0xf0]  ;;  %v16953_v5 = vld [vmem:[#allocation6 + $0x5a4] sm:$0xf]  ;;  %v14954_v36 = vor.u32 %v17021_v19, %v14951_v24  ;;  %10117 = vmatmul.bf16.vlgmr.msra.gmra.mxu0 %v18260_v32  ;;  %v9910_v6 = vpop.f32.mrf.mxu0 }
 0xb4e   :  { %10161 = vmatpush.bf16.msrb.mxu0 %v14586_v2  ;;  %v14679_v43 = vld [vmem:[#allocation6 + $0x5b0] sm:$0xf0]  ;;  %v16985_v49 = vld [vmem:[#allocation6 + $0x6a4] sm:$0xf]  ;;  %v14554_v4 = vor.u32 %v16921_v52, %v14551_v37  ;;  %10130 = vmatmul.bf16.vlgmr.msra.gmra.mxu1 %v18270_v28 }
 0xb4f   :  { %10174 = vmatpush.bf16.msrb.mxu1 %v14714_v3  ;;  %v14807_v45 = vld [vmem:[#allocation6 + $0x6b0] sm:$0xf0]  ;;  %10143 = vmatmul.bf16.vlgmr.msra.gmra.mxu2 %v18255_v46  ;;  %v17017_v47 = vld [vmem:[#allocation6 + $0x7a4] sm:$0xf]  ;;  %v14682_v0 = vor.u32 %v16953_v5, %v14679_v43 }
 0xb50   :  { %10187 = vmatpush.bf16.msrb.mxu2 %v14842_v8  ;;  %v14935_v18 = vld [vmem:[#allocation6 + $0x7b0] sm:$0xf0]  ;;  %10156 = vmatmul.bf16.vlgmr.msra.gmra.mxu3 %v18265_v53  ;;  %v16917_v62 = vld [vmem:[#allocation6 + $0x484] sm:$0xf]  ;;  %v14810_v54 = vor.u32 %v16985_v49, %v14807_v45  ;;  %v9911_v8 = vadd.f32 %v9910_v6, %v7333_v51 }
 0xb51   :  { %10200 = vmatpush.bf16.msrb.mxu3 %v14970_v13  ;;  %v14535_v30 = vld [vmem:[#allocation6 + $0x490] sm:$0xf0]  ;;  %v16949_v25 = vld [vmem:[#allocation6 + $0x584] sm:$0xf]  ;;  %v14938_v38 = vor.u32 %v17017_v47, %v14935_v18 }
 0xb52   :  { %10162 = vmatpush.bf16.msrb.mxu0 %v14570_v31  ;;  %v14663_v12 = vld [vmem:[#allocation6 + $0x590] sm:$0xf0]  ;;  %v16981_v42 = vld [vmem:[#allocation6 + $0x684] sm:$0xf]  ;;  %v14538_v1 = vor.u32 %v16917_v62, %v14535_v30  ;;  %v9924_v19 = vadd.f32 %v9923_v59, %v9911_v8  ;;  %v9936_v5 = vpop.f32.mrf.mxu2 }
 0xb53   :  { %10175 = vmatpush.bf16.msrb.mxu1 %v14698_v39  ;;  %v14791_v55 = vld [vmem:[#allocation6 + $0x690] sm:$0xf0]  ;;  %v17013_v26 = vld [vmem:[#allocation6 + $0x784] sm:$0xf]  ;;  %v14666_v50 = vor.u32 %v16949_v25, %v14663_v12 }
 0xb54   :  { %10188 = vmatpush.bf16.msrb.mxu2 %v14826_v48  ;;  %v14919_v40 = vld [vmem:[#allocation6 + $0x790] sm:$0xf0]  ;;  %v14794_v20 = vor.u32 %v16981_v42, %v14791_v55  ;;  %v16913_v63 = vld [vmem:[#allocation6 + $0x464] sm:$0xf]  ;;  %v9937_v17 = vadd.f32 %v9936_v5, %v9924_v19  ;;  %v9925_v42 = vpop.f32.mrf.mxu1 }
 0xb55   :  { %10201 = vmatpush.bf16.msrb.mxu3 %v14954_v36  ;;  %v14519_v2 = vld [vmem:[#allocation6 + $0x470] sm:$0xf0]  ;;  %v16945_v3 = vld [vmem:[#allocation6 + $0x564] sm:$0xf]  ;;  %v14922_v15 = vor.u32 %v17013_v26, %v14919_v40  ;;  %v9949_v47 = vpop.f32.mrf.mxu3 }
 0xb56   :  { %10163 = vmatpush.bf16.msrb.mxu0 %v14554_v4  ;;  %v14647_v11 = vld [vmem:[#allocation6 + $0x570] sm:$0xf0]  ;;  %v16977_v13 = vld [vmem:[#allocation6 + $0x664] sm:$0xf]  ;;  %v14522_v24 = vor.u32 %v16913_v63, %v14519_v2 }
 0xb57   :  { %10176 = vmatpush.bf16.msrb.mxu1 %v14682_v0  ;;  %v14775_v35 = vld [vmem:[#allocation6 + $0x670] sm:$0xf0]  ;;  %v17009_v21 = vld [vmem:[#allocation6 + $0x764] sm:$0xf]  ;;  %v14650_v31 = vor.u32 %v16945_v3, %v14647_v11  ;;  %v18352_v0 = vadd.f32 %v9949_v47, %v9937_v17 }
 0xb58   :  { %10189 = vmatpush.bf16.msrb.mxu2 %v14810_v54  ;;  %v14903_v22 = vld [vmem:[#allocation6 + $0x770] sm:$0xf0]  ;;  %v14778_v52 = vor.u32 %v16977_v13, %v14775_v35  ;;  %v16909_v39 = vld [vmem:[#allocation6 + $0x444] sm:$0xf]  ;;  %v9912_v54 = vpop.f32.mrf.mxu0 }
 0xb59   :  { %10202 = vmatpush.bf16.msrb.mxu3 %v14938_v38  ;;  %v14503_v48 = vld [vmem:[#allocation6 + $0x450] sm:$0xf0]  ;;  %v16941_v37 = vld [vmem:[#allocation6 + $0x544] sm:$0xf]  ;;  %v14906_v43 = vor.u32 %v17009_v21, %v14903_v22 }
 0xb5a   :  { %10164 = vmatpush.bf16.msrb.mxu0 %v14538_v1  ;;  %v14631_v36 = vld [vmem:[#allocation6 + $0x550] sm:$0xf0]  ;;  %v16973_v49 = vld [vmem:[#allocation6 + $0x644] sm:$0xf]  ;;  %v14506_v62 = vor.u32 %v16909_v39, %v14503_v48  ;;  %v9938_v13 = vpop.f32.mrf.mxu2 }
 0xb5b   :  { %10177 = vmatpush.bf16.msrb.mxu1 %v14666_v50  ;;  %v14759_v45 = vld [vmem:[#allocation6 + $0x650] sm:$0xf0]  ;;  %v17005_v18 = vld [vmem:[#allocation6 + $0x744] sm:$0xf]  ;;  %v14634_v30 = vor.u32 %v16941_v37, %v14631_v36 }
 0xb5c   :  { %10190 = vmatpush.bf16.msrb.mxu2 %v14794_v20  ;;  %v14887_v4 = vld [vmem:[#allocation6 + $0x750] sm:$0xf0]  ;;  %v14762_v25 = vor.u32 %v16973_v49, %v14759_v45  ;;  %v16905_v51 = vld [vmem:[#allocation6 + $0x424] sm:$0xf] }
 0xb5d   :  { %10203 = vmatpush.bf16.msrb.mxu3 %v14922_v15  ;;  %v14487_v38 = vld [vmem:[#allocation6 + $0x430] sm:$0xf0]  ;;  %v16937_v12 = vld [vmem:[#allocation6 + $0x524] sm:$0xf]  ;;  %v14890_v55 = vor.u32 %v17005_v18, %v14887_v4 }
 0xb5e   :  { %10165 = vmatpush.bf16.msrb.mxu0 %v14522_v24  ;;  %v14615_v26 = vld [vmem:[#allocation6 + $0x530] sm:$0xf0]  ;;  %v16969_v40 = vld [vmem:[#allocation6 + $0x624] sm:$0xf]  ;;  %v14490_v20 = vor.u32 %v16905_v51, %v14487_v38  ;;  %v9951_v24 = vpop.f32.mrf.mxu3 }
 0xb5f   :  { %10178 = vmatpush.bf16.msrb.mxu1 %v14650_v31  ;;  %v14743_v1 = vld [vmem:[#allocation6 + $0x630] sm:$0xf0]  ;;  %v17001_v6 = vld [vmem:[#allocation6 + $0x724] sm:$0xf]  ;;  %v14618_v3 = vor.u32 %v16937_v12, %v14615_v26 }
 0xb60   :  { %10191 = vmatpush.bf16.msrb.mxu2 %v14778_v52  ;;  %v14871_v50 = vld [vmem:[#allocation6 + $0x730] sm:$0xf0]  ;;  %v16901_v63 = vld [vmem:[#allocation6 + $0x404] sm:$0xf]  ;;  %v14746_v8 = vor.u32 %v16969_v40, %v14743_v1 }
 0xb61   :  { %10204 = vmatpush.bf16.msrb.mxu3 %v14906_v43  ;;  %v14471_v2 = vld [vmem:[#allocation6 + $0x410] sm:$0xf0]  ;;  %v16933_v59 = vld [vmem:[#allocation6 + $0x504] sm:$0xf]  ;;  %v14874_v35 = vor.u32 %v17001_v6, %v14871_v50 }
 0xb62   :  { %10166 = vmatpush.bf16.msrb.mxu0 %v14506_v62  ;;  %v14599_v15 = vld [vmem:[#allocation6 + $0x510] sm:$0xf0]  ;;  %v16965_v11 = vld [vmem:[#allocation6 + $0x604] sm:$0xf]  ;;  %v14474_v48 = vor.u32 %v16901_v63, %v14471_v2 }
 0xb63   :  { %10179 = vmatpush.bf16.msrb.mxu1 %v14634_v30  ;;  %v14727_v21 = vld [vmem:[#allocation6 + $0x610] sm:$0xf0]  ;;  %v16997_v22 = vld [vmem:[#allocation6 + $0x704] sm:$0xf]  ;;  %v14602_v36 = vor.u32 %v16933_v59, %v14599_v15 }
 0xb64   :  { %10192 = vmatpush.bf16.msrb.mxu2 %v14762_v25  ;;  %v14855_v19 = vld [vmem:[#allocation6 + $0x710] sm:$0xf0]  ;;  %v17057_v31 = vld [vmem:[#allocation6 + $0x8e4] sm:$0xf]  ;;  %v14730_v49 = vor.u32 %v16965_v11, %v14727_v21 }
 0xb65   :  { %10205 = vmatpush.bf16.msrb.mxu3 %v14890_v55  ;;  %v15095_v52 = vld [vmem:[#allocation6 + $0x8f0] sm:$0xf0]  ;;  %v17089_v39 = vld [vmem:[#allocation6 + $0x9e4] sm:$0xf]  ;;  %v14858_v47 = vor.u32 %v16997_v22, %v14855_v19 }
 0xb66   :  { %10167 = vmatpush.bf16.msrb.mxu0 %v14490_v20  ;;  %v15223_v37 = vld [vmem:[#allocation6 + $0x9f0] sm:$0xf0]  ;;  %v17121_v5 = vld [vmem:[#allocation6 + $0xae4] sm:$0xf]  ;;  %v15098_v18 = vor.u32 %v17057_v31, %v15095_v52 }
 0xb67   :  { %v15351_v43 = vld [vmem:[#allocation6 + $0xaf0] sm:$0xf0]  ;;  %10180 = vmatpush.bf16.msrb.mxu1 %v14618_v3  ;;  %v17153_v45 = vld [vmem:[#allocation6 + $0xbe4] sm:$0xf]  ;;  %v15226_v4 = vor.u32 %v17089_v39, %v15223_v37 }
 0xb68   :  { %10193 = vmatpush.bf16.msrb.mxu2 %v14746_v8  ;;  %v15479_v17 = vld [vmem:[#allocation6 + $0xbf0] sm:$0xf0]  ;;  %v15354_v62 = vor.u32 %v17121_v5, %v15351_v43  ;;  %v17053_v54 = vld [vmem:[#allocation6 + $0x8c4] sm:$0xf] }
 0xb69   :  { %10206 = vmatpush.bf16.msrb.mxu3 %v14874_v35  ;;  %v15079_v30 = vld [vmem:[#allocation6 + $0x8d0] sm:$0xf0]  ;;  %v17085_v25 = vld [vmem:[#allocation6 + $0x9c4] sm:$0xf]  ;;  %v15482_v51 = vor.u32 %v17153_v45, %v15479_v17 }
 0xb6a   :  { %10168 = vmatpush.bf16.msrb.mxu0 %v14474_v48  ;;  %v15207_v38 = vld [vmem:[#allocation6 + $0x9d0] sm:$0xf0]  ;;  %v17117_v12 = vld [vmem:[#allocation6 + $0xac4] sm:$0xf]  ;;  %v15082_v40 = vor.u32 %v17053_v54, %v15079_v30 }
 0xb6b   :  { %v15335_v42 = vld [vmem:[#allocation6 + $0xad0] sm:$0xf0]  ;;  %10181 = vmatpush.bf16.msrb.mxu1 %v14602_v36  ;;  %v17149_v55 = vld [vmem:[#allocation6 + $0xbc4] sm:$0xf]  ;;  %v15210_v1 = vor.u32 %v17085_v25, %v15207_v38  ;;  %v9962_v36 = vpop.f32.mrf.mxu0 }
 0xb6c   :  { %10194 = vmatpush.bf16.msrb.mxu2 %v14730_v49  ;;  %v15463_v26 = vld [vmem:[#allocation6 + $0xbd0] sm:$0xf0]  ;;  %v15338_v6 = vor.u32 %v17117_v12, %v15335_v42  ;;  %v17049_v50 = vld [vmem:[#allocation6 + $0x8a4] sm:$0xf] }
 0xb6d   :  { %10207 = vmatpush.bf16.msrb.mxu3 %v14858_v47  ;;  %v15063_v20 = vld [vmem:[#allocation6 + $0x8b0] sm:$0xf0]  ;;  %v17081_v63 = vld [vmem:[#allocation6 + $0x9a4] sm:$0xf]  ;;  %v15466_v2 = vor.u32 %v17149_v55, %v15463_v26  ;;  %10169 = vmatmul.bf16.vlgmr.msrb.gmra.mxu0 %v18284_v27 }
 0xb6e   :  { %10213 = vmatpush.bf16.msra.mxu0 %v15098_v18  ;;  %v15191_v3 = vld [vmem:[#allocation6 + $0x9b0] sm:$0xf0]  ;;  %v17113_v8 = vld [vmem:[#allocation6 + $0xaa4] sm:$0xf]  ;;  %v15066_v13 = vor.u32 %v17049_v50, %v15063_v20  ;;  %10182 = vmatmul.bf16.vlgmr.msrb.gmra.mxu1 %v18294_v10 }
 0xb6f   :  { %10226 = vmatpush.bf16.msra.mxu1 %v15226_v4  ;;  %10195 = vmatmul.bf16.vlgmr.msrb.gmra.mxu2 %v18279_v23  ;;  %v15319_v59 = vld [vmem:[#allocation6 + $0xab0] sm:$0xf0]  ;;  %v17145_v15 = vld [vmem:[#allocation6 + $0xba4] sm:$0xf]  ;;  %v15194_v35 = vor.u32 %v17081_v63, %v15191_v3  ;;  %v9963_v4 = vadd.f32 %v9962_v36, %v18352_v0 }
 0xb70   :  { %10239 = vmatpush.bf16.msra.mxu2 %v15354_v62  ;;  %v15447_v11 = vld [vmem:[#allocation6 + $0xbb0] sm:$0xf0]  ;;  %10208 = vmatmul.bf16.vlgmr.msrb.gmra.mxu3 %v18289_v29  ;;  %v15322_v21 = vor.u32 %v17113_v8, %v15319_v59  ;;  %v17045_v22 = vld [vmem:[#allocation6 + $0x884] sm:$0xf]  ;;  %v9975_v62 = vpop.f32.mrf.mxu1 }
 0xb71   :  { %10252 = vmatpush.bf16.msra.mxu3 %v15482_v51  ;;  %v15047_v19 = vld [vmem:[#allocation6 + $0x890] sm:$0xf0]  ;;  %v17077_v24 = vld [vmem:[#allocation6 + $0x984] sm:$0xf]  ;;  %v15450_v31 = vor.u32 %v17145_v15, %v15447_v11  ;;  %v9976_v42 = vadd.f32 %v9975_v62, %v9963_v4 }
 0xb72   :  { %10214 = vmatpush.bf16.msra.mxu0 %v15082_v40  ;;  %v15175_v52 = vld [vmem:[#allocation6 + $0x990] sm:$0xf0]  ;;  %v17109_v39 = vld [vmem:[#allocation6 + $0xa84] sm:$0xf]  ;;  %v15050_v43 = vor.u32 %v17045_v22, %v15047_v19  ;;  %v9988_v20 = vpop.f32.mrf.mxu2 }
 0xb73   :  { %10227 = vmatpush.bf16.msra.mxu1 %v15210_v1  ;;  %v15303_v48 = vld [vmem:[#allocation6 + $0xa90] sm:$0xf0]  ;;  %v17141_v37 = vld [vmem:[#allocation6 + $0xb84] sm:$0xf]  ;;  %v15178_v49 = vor.u32 %v17077_v24, %v15175_v52  ;;  %v9989_v8 = vadd.f32 %v9988_v20, %v9976_v42  ;;  %v10001_v59 = vpop.f32.mrf.mxu3 }
 0xb74   :  { %10240 = vmatpush.bf16.msra.mxu2 %v15338_v6  ;;  %v15431_v5 = vld [vmem:[#allocation6 + $0xb90] sm:$0xf0]  ;;  %v15306_v45 = vor.u32 %v17109_v39, %v15303_v48  ;;  %v17041_v17 = vld [vmem:[#allocation6 + $0x864] sm:$0xf] }
 0xb75   :  { %10253 = vmatpush.bf16.msra.mxu3 %v15466_v2  ;;  %v15031_v47 = vld [vmem:[#allocation6 + $0x870] sm:$0xf0]  ;;  %v17073_v18 = vld [vmem:[#allocation6 + $0x964] sm:$0xf]  ;;  %v15434_v54 = vor.u32 %v17141_v37, %v15431_v5 }
 0xb76   :  { %10215 = vmatpush.bf16.msra.mxu0 %v15066_v13  ;;  %v15159_v30 = vld [vmem:[#allocation6 + $0x970] sm:$0xf0]  ;;  %v17105_v25 = vld [vmem:[#allocation6 + $0xa64] sm:$0xf]  ;;  %v15034_v55 = vor.u32 %v17041_v17, %v15031_v47 }
 0xb77   :  { %10228 = vmatpush.bf16.msra.mxu1 %v15194_v35  ;;  %v15287_v51 = vld [vmem:[#allocation6 + $0xa70] sm:$0xf0]  ;;  %v17137_v38 = vld [vmem:[#allocation6 + $0xb64] sm:$0xf]  ;;  %v15162_v26 = vor.u32 %v17073_v18, %v15159_v30  ;;  %v18359_v35 = vadd.f32 %v10001_v59, %v9989_v8 }
 0xb78   :  { %10241 = vmatpush.bf16.msra.mxu2 %v15322_v21  ;;  %v15415_v12 = vld [vmem:[#allocation6 + $0xb70] sm:$0xf0]  ;;  %v15290_v40 = vor.u32 %v17105_v25, %v15287_v51  ;;  %v17037_v1 = vld [vmem:[#allocation6 + $0x844] sm:$0xf]  ;;  %v9964_v21 = vpop.f32.mrf.mxu0  ;;  %v9977_v39 = vpop.f32.mrf.mxu1 }
 0xb79   :  { %10254 = vmatpush.bf16.msra.mxu3 %v15450_v31  ;;  %v15015_v6 = vld [vmem:[#allocation6 + $0x850] sm:$0xf0]  ;;  %v17069_v50 = vld [vmem:[#allocation6 + $0x944] sm:$0xf]  ;;  %v15418_v0 = vor.u32 %v17137_v38, %v15415_v12 }
 0xb7a   :  { %10216 = vmatpush.bf16.msra.mxu0 %v15050_v43  ;;  %v15143_v63 = vld [vmem:[#allocation6 + $0x950] sm:$0xf0]  ;;  %v17101_v2 = vld [vmem:[#allocation6 + $0xa44] sm:$0xf]  ;;  %v15018_v13 = vor.u32 %v17037_v1, %v15015_v6  ;;  %v9990_v25 = vpop.f32.mrf.mxu2 }
 0xb7b   :  { %10229 = vmatpush.bf16.msra.mxu1 %v15178_v49  ;;  %v15271_v3 = vld [vmem:[#allocation6 + $0xa50] sm:$0xf0]  ;;  %v17133_v15 = vld [vmem:[#allocation6 + $0xb44] sm:$0xf]  ;;  %v15146_v22 = vor.u32 %v17069_v50, %v15143_v63 }
 0xb7c   :  { %10242 = vmatpush.bf16.msra.mxu2 %v15306_v45  ;;  %v15399_v11 = vld [vmem:[#allocation6 + $0xb50] sm:$0xf0]  ;;  %v15274_v19 = vor.u32 %v17101_v2, %v15271_v3  ;;  %v17033_v24 = vld [vmem:[#allocation6 + $0x824] sm:$0xf] }
 0xb7d   :  { %10255 = vmatpush.bf16.msra.mxu3 %v15434_v54  ;;  %v14999_v31 = vld [vmem:[#allocation6 + $0x830] sm:$0xf0]  ;;  %v17065_v52 = vld [vmem:[#allocation6 + $0x924] sm:$0xf]  ;;  %v15402_v48 = vor.u32 %v17133_v15, %v15399_v11 }
 0xb7e   :  { %10217 = vmatpush.bf16.msra.mxu0 %v15034_v55  ;;  %v15127_v37 = vld [vmem:[#allocation6 + $0x930] sm:$0xf0]  ;;  %v17097_v5 = vld [vmem:[#allocation6 + $0xa24] sm:$0xf]  ;;  %v15002_v45 = vor.u32 %v17033_v24, %v14999_v31  ;;  %v10003_v55 = vpop.f32.mrf.mxu3 }
 0xb7f   :  { %10230 = vmatpush.bf16.msra.mxu1 %v15162_v26  ;;  %v15255_v43 = vld [vmem:[#allocation6 + $0xa30] sm:$0xf0]  ;;  %v17129_v36 = vld [vmem:[#allocation6 + $0xb24] sm:$0xf]  ;;  %v15130_v18 = vor.u32 %v17065_v52, %v15127_v37 }
 0xb80   :  { %10243 = vmatpush.bf16.msra.mxu2 %v15290_v40  ;;  %v15383_v49 = vld [vmem:[#allocation6 + $0xb30] sm:$0xf0]  ;;  %v17029_v17 = vld [vmem:[#allocation6 + $0x804] sm:$0xf]  ;;  %v15258_v4 = vor.u32 %v17097_v5, %v15255_v43 }
 0xb81   :  { %10256 = vmatpush.bf16.msra.mxu3 %v15418_v0  ;;  %v14983_v47 = vld [vmem:[#allocation6 + $0x810] sm:$0xf0]  ;;  %v17061_v62 = vld [vmem:[#allocation6 + $0x904] sm:$0xf]  ;;  %v15386_v51 = vor.u32 %v17129_v36, %v15383_v49 }
 0xb82   :  { %10218 = vmatpush.bf16.msra.mxu0 %v15018_v13  ;;  %v15111_v54 = vld [vmem:[#allocation6 + $0x910] sm:$0xf0]  ;;  %v17093_v30 = vld [vmem:[#allocation6 + $0xa04] sm:$0xf]  ;;  %v14986_v6 = vor.u32 %v17029_v17, %v14983_v47 }
 0xb83   :  { %10231 = vmatpush.bf16.msra.mxu1 %v15146_v22  ;;  %v15239_v38 = vld [vmem:[#allocation6 + $0xa10] sm:$0xf0]  ;;  %v17125_v12 = vld [vmem:[#allocation6 + $0xb04] sm:$0xf]  ;;  %v15114_v63 = vor.u32 %v17061_v62, %v15111_v54 }
 0xb84   :  { %10244 = vmatpush.bf16.msra.mxu2 %v15274_v19  ;;  %v15367_v42 = vld [vmem:[#allocation6 + $0xb10] sm:$0xf0]  ;;  %v17185_v26 = vld [vmem:[#allocation6 + $0xce4] sm:$0xf]  ;;  %v15242_v2 = vor.u32 %v17093_v30, %v15239_v38 }
 0xb85   :  { %10257 = vmatpush.bf16.msra.mxu3 %v15402_v48  ;;  %v15607_v40 = vld [vmem:[#allocation6 + $0xcf0] sm:$0xf0]  ;;  %v17217_v1 = vld [vmem:[#allocation6 + $0xde4] sm:$0xf]  ;;  %v15370_v59 = vor.u32 %v17125_v12, %v15367_v42 }
 0xb86   :  { %10219 = vmatpush.bf16.msra.mxu0 %v15002_v45  ;;  %v15735_v50 = vld [vmem:[#allocation6 + $0xdf0] sm:$0xf0]  ;;  %v17249_v20 = vld [vmem:[#allocation6 + $0xee4] sm:$0xf]  ;;  %v15610_v15 = vor.u32 %v17185_v26, %v15607_v40 }
 0xb87   :  { %v15863_v0 = vld [vmem:[#allocation6 + $0xef0] sm:$0xf0]  ;;  %10232 = vmatpush.bf16.msra.mxu1 %v15130_v18  ;;  %v17281_v3 = vld [vmem:[#allocation6 + $0xfe4] sm:$0xf]  ;;  %v15738_v11 = vor.u32 %v17217_v1, %v15735_v50 }
 0xb88   :  { %10245 = vmatpush.bf16.msra.mxu2 %v15258_v4  ;;  %v15991_v8 = vld [vmem:[#allocation6 + $0xff0] sm:$0xf0]  ;;  %v15866_v13 = vor.u32 %v17249_v20, %v15863_v0  ;;  %v17181_v21 = vld [vmem:[#allocation6 + $0xcc4] sm:$0xf] }
 0xb89   :  { %10258 = vmatpush.bf16.msra.mxu3 %v15386_v51  ;;  %v15591_v22 = vld [vmem:[#allocation6 + $0xcd0] sm:$0xf0]  ;;  %v17213_v19 = vld [vmem:[#allocation6 + $0xdc4] sm:$0xf]  ;;  %v15994_v24 = vor.u32 %v17281_v3, %v15991_v8 }
 0xb8a   :  { %10220 = vmatpush.bf16.msra.mxu0 %v14986_v6  ;;  %v15719_v31 = vld [vmem:[#allocation6 + $0xdd0] sm:$0xf0]  ;;  %v17245_v52 = vld [vmem:[#allocation6 + $0xec4] sm:$0xf]  ;;  %v15594_v5 = vor.u32 %v17181_v21, %v15591_v22  ;;  %v10014_v50 = vpop.f32.mrf.mxu0 }
 0xb8b   :  { %v15847_v39 = vld [vmem:[#allocation6 + $0xed0] sm:$0xf0]  ;;  %10233 = vmatpush.bf16.msra.mxu1 %v15114_v63  ;;  %v17277_v48 = vld [vmem:[#allocation6 + $0xfc4] sm:$0xf]  ;;  %v15722_v43 = vor.u32 %v17213_v19, %v15719_v31  ;;  %v10015_v63 = vadd.f32 %v10014_v50, %v18359_v35  ;;  %v10027_v3 = vpop.f32.mrf.mxu1 }
 0xb8c   :  { %10246 = vmatpush.bf16.msra.mxu2 %v15242_v2  ;;  %v15975_v37 = vld [vmem:[#allocation6 + $0xfd0] sm:$0xf0]  ;;  %v15850_v36 = vor.u32 %v17245_v52, %v15847_v39  ;;  %v17177_v49 = vld [vmem:[#allocation6 + $0xca4] sm:$0xf] }
 0xb8d   :  { %10259 = vmatpush.bf16.msra.mxu3 %v15370_v59  ;;  %v15575_v45 = vld [vmem:[#allocation6 + $0xcb0] sm:$0xf0]  ;;  %v17209_v17 = vld [vmem:[#allocation6 + $0xda4] sm:$0xf]  ;;  %10221 = vmatmul.bf16.vlgmr.msra.gmra.mxu0 %v18303_v33  ;;  %v15978_v47 = vor.u32 %v17277_v48, %v15975_v37  ;;  %v10028_v22 = vadd.f32 %v10027_v3, %v10015_v63 }
 0xb8e   :  { %10265 = vmatpush.bf16.msrb.mxu0 %v15610_v15  ;;  %v15703_v18 = vld [vmem:[#allocation6 + $0xdb0] sm:$0xf0]  ;;  %v17241_v4 = vld [vmem:[#allocation6 + $0xea4] sm:$0xf]  ;;  %10234 = vmatmul.bf16.vlgmr.msra.gmra.mxu1 %v18313_v58  ;;  %v15578_v25 = vor.u32 %v17177_v49, %v15575_v45 }
 0xb8f   :  { %10278 = vmatpush.bf16.msrb.mxu1 %v15738_v11  ;;  %v15831_v62 = vld [vmem:[#allocation6 + $0xeb0] sm:$0xf0]  ;;  %10247 = vmatmul.bf16.vlgmr.msra.gmra.mxu2 %v18308_v14  ;;  %v17273_v54 = vld [vmem:[#allocation6 + $0xfa4] sm:$0xf]  ;;  %v15706_v51 = vor.u32 %v17209_v17, %v15703_v18 }
 0xb90   :  { %10291 = vmatpush.bf16.msrb.mxu2 %v15866_v13  ;;  %v15959_v30 = vld [vmem:[#allocation6 + $0xfb0] sm:$0xf0]  ;;  %10260 = vmatmul.bf16.vlgmr.msra.gmra.mxu3 %v18318_v41  ;;  %v15834_v38 = vor.u32 %v17241_v4, %v15831_v62  ;;  %v17173_v12 = vld [vmem:[#allocation6 + $0xc84] sm:$0xf] }
 0xb91   :  { %10304 = vmatpush.bf16.msrb.mxu3 %v15994_v24  ;;  %v15559_v42 = vld [vmem:[#allocation6 + $0xc90] sm:$0xf0]  ;;  %v17205_v55 = vld [vmem:[#allocation6 + $0xd84] sm:$0xf]  ;;  %v15962_v26 = vor.u32 %v17273_v54, %v15959_v30 }
 0xb92   :  { %10266 = vmatpush.bf16.msrb.mxu0 %v15594_v5  ;;  %v15687_v40 = vld [vmem:[#allocation6 + $0xd90] sm:$0xf0]  ;;  %v17237_v1 = vld [vmem:[#allocation6 + $0xe84] sm:$0xf]  ;;  %v15562_v2 = vor.u32 %v17173_v12, %v15559_v42  ;;  %v10040_v45 = vpop.f32.mrf.mxu2 }
 0xb93   :  { %10279 = vmatpush.bf16.msrb.mxu1 %v15722_v43  ;;  %v15815_v6 = vld [vmem:[#allocation6 + $0xe90] sm:$0xf0]  ;;  %v17269_v20 = vld [vmem:[#allocation6 + $0xf84] sm:$0xf]  ;;  %v15690_v8 = vor.u32 %v17205_v55, %v15687_v40  ;;  %v10041_v4 = vadd.f32 %v10040_v45, %v10028_v22  ;;  %v10053_v62 = vpop.f32.mrf.mxu3  ;;  %v16868_v45 = vld [vmem:[#allocation6 + $0x2f4] sm:$0xf0] }
 0xb94   :  { %10292 = vmatpush.bf16.msrb.mxu2 %v15850_v36  ;;  %v15943_v0 = vld [vmem:[#allocation6 + $0xf90] sm:$0xf0]  ;;  %v15818_v59 = vor.u32 %v17237_v1, %v15815_v6  ;;  %v17169_v15 = vld [vmem:[#allocation6 + $0xc64] sm:$0xf] }
 0xb95   :  { %10305 = vmatpush.bf16.msrb.mxu3 %v15978_v47  ;;  %v15543_v11 = vld [vmem:[#allocation6 + $0xc70] sm:$0xf0]  ;;  %v17201_v13 = vld [vmem:[#allocation6 + $0xd64] sm:$0xf]  ;;  %v15946_v21 = vor.u32 %v17269_v20, %v15943_v0  ;;  %v18366_v12 = vadd.f32 %v10053_v62, %v10041_v4  ;;  %v16900_v4 = vld [vmem:[#allocation6 + $0x3f4] sm:$0xf0] }
 0xb96   :  { %10267 = vmatpush.bf16.msrb.mxu0 %v15578_v25  ;;  %v15671_v19 = vld [vmem:[#allocation6 + $0xd70] sm:$0xf0]  ;;  %v17233_v24 = vld [vmem:[#allocation6 + $0xe64] sm:$0xf]  ;;  %v15546_v48 = vor.u32 %v17169_v15, %v15543_v11  ;;  %v10016_v25 = vpop.f32.mrf.mxu0 }
 0xb97   :  { %10280 = vmatpush.bf16.msrb.mxu1 %v15706_v51  ;;  %v15799_v31 = vld [vmem:[#allocation6 + $0xe70] sm:$0xf0]  ;;  %v17265_v52 = vld [vmem:[#allocation6 + $0xf64] sm:$0xf]  ;;  %v15674_v35 = vor.u32 %v17201_v13, %v15671_v19 }
 0xb98   :  { %10293 = vmatpush.bf16.msrb.mxu2 %v15834_v38  ;;  %v15927_v39 = vld [vmem:[#allocation6 + $0xf70] sm:$0xf0]  ;;  %v15802_v37 = vor.u32 %v17233_v24, %v15799_v31  ;;  %v17165_v5 = vld [vmem:[#allocation6 + $0xc44] sm:$0xf]  ;;  %v10029_v38 = vpop.f32.mrf.mxu1 }
 0xb99   :  { %10306 = vmatpush.bf16.msrb.mxu3 %v15962_v26  ;;  %v15527_v43 = vld [vmem:[#allocation6 + $0xc50] sm:$0xf0]  ;;  %v17197_v36 = vld [vmem:[#allocation6 + $0xd44] sm:$0xf]  ;;  %v15930_v49 = vor.u32 %v17265_v52, %v15927_v39  ;;  %v16800_v38 = vld [vmem:[#allocation6 + $0xd4] sm:$0xf0] }
 0xb9a   :  { %10268 = vmatpush.bf16.msrb.mxu0 %v15562_v2  ;;  %v15655_v17 = vld [vmem:[#allocation6 + $0xd50] sm:$0xf0]  ;;  %v17229_v47 = vld [vmem:[#allocation6 + $0xe44] sm:$0xf]  ;;  %v15530_v51 = vor.u32 %v17165_v5, %v15527_v43  ;;  %v10042_v39 = vpop.f32.mrf.mxu2 }
 0xb9b   :  { %10281 = vmatpush.bf16.msrb.mxu1 %v15690_v8  ;;  %v15783_v18 = vld [vmem:[#allocation6 + $0xe50] sm:$0xf0]  ;;  %v17261_v54 = vld [vmem:[#allocation6 + $0xf44] sm:$0xf]  ;;  %v15658_v42 = vor.u32 %v17197_v36, %v15655_v17  ;;  %v10055_v5 = vpop.f32.mrf.mxu3  ;;  %v16836_v36 = vld [vmem:[#allocation6 + $0x1f4] sm:$0xf0] }
 0xb9c   :  { %10294 = vmatpush.bf16.msrb.mxu2 %v15818_v59  ;;  %v15911_v30 = vld [vmem:[#allocation6 + $0xf50] sm:$0xf0]  ;;  %v15786_v55 = vor.u32 %v17229_v47, %v15783_v18  ;;  %v17161_v26 = vld [vmem:[#allocation6 + $0xc24] sm:$0xf]  ;;  %v14461_v18 = vld [vmem:[#allocation6 + $0x3e8] sm:$0xf] }
 0xb9d   :  { %10307 = vmatpush.bf16.msrb.mxu3 %v15946_v21  ;;  %v15511_v40 = vld [vmem:[#allocation6 + $0xc30] sm:$0xf0]  ;;  %v17193_v1 = vld [vmem:[#allocation6 + $0xd24] sm:$0xf]  ;;  %v15914_v6 = vor.u32 %v17261_v54, %v15911_v30  ;;  %v16792_v39 = vld [vmem:[#allocation6 + $0x94] sm:$0xf0] }
 0xb9e   :  { %10269 = vmatpush.bf16.msrb.mxu0 %v15546_v48  ;;  %v15639_v50 = vld [vmem:[#allocation6 + $0xd30] sm:$0xf0]  ;;  %v17225_v20 = vld [vmem:[#allocation6 + $0xe24] sm:$0xf]  ;;  %v15514_v3 = vor.u32 %v17161_v26, %v15511_v40  ;;  %v14077_v48 = vld [vmem:[#allocation6 + $0xe8] sm:$0xf] }
 0xb9f   :  { %10282 = vmatpush.bf16.msrb.mxu1 %v15674_v35  ;;  %v15767_v0 = vld [vmem:[#allocation6 + $0xe30] sm:$0xf0]  ;;  %v17257_v63 = vld [vmem:[#allocation6 + $0xf24] sm:$0xf]  ;;  %v15642_v15 = vor.u32 %v17193_v1, %v15639_v50  ;;  %v16804_v35 = vld [vmem:[#allocation6 + $0xf4] sm:$0xf0] }
 0xba0   :  { %10295 = vmatpush.bf16.msrb.mxu2 %v15802_v37  ;;  %v15895_v2 = vld [vmem:[#allocation6 + $0xf30] sm:$0xf0]  ;;  %v17157_v8 = vld [vmem:[#allocation6 + $0xc04] sm:$0xf]  ;;  %v15770_v11 = vor.u32 %v17225_v20, %v15767_v0  ;;  %v14205_v37 = vld [vmem:[#allocation6 + $0x1e8] sm:$0xf]  ;;  %v14078_v54 = vor.u32 %v16804_v35, %v14077_v48 }
 0xba1   :  { %10308 = vmatpush.bf16.msrb.mxu3 %v15930_v49  ;;  %v15495_v59 = vld [vmem:[#allocation6 + $0xc10] sm:$0xf0]  ;;  %v17189_v13 = vld [vmem:[#allocation6 + $0xd04] sm:$0xf]  ;;  %v15898_v19 = vor.u32 %v17257_v63, %v15895_v2  ;;  %v14333_v49 = vld [vmem:[#allocation6 + $0x2e8] sm:$0xf]  ;;  %v14206_v30 = vor.u32 %v16836_v36, %v14205_v37 }
 0xba2   :  { %10270 = vmatpush.bf16.msrb.mxu0 %v15530_v51  ;;  %v15623_v21 = vld [vmem:[#allocation6 + $0xd10] sm:$0xf0]  ;;  %v17221_v22 = vld [vmem:[#allocation6 + $0xe04] sm:$0xf]  ;;  %v15498_v43 = vor.u32 %v17157_v8, %v15495_v59  ;;  %v14334_v25 = vor.u32 %v16868_v45, %v14333_v49  ;;  %v14061_v51 = vld [vmem:[#allocation6 + $0xc8] sm:$0xf] }
 0xba3   :  { %10283 = vmatpush.bf16.msrb.mxu1 %v15658_v42  ;;  %v15751_v24 = vld [vmem:[#allocation6 + $0xe10] sm:$0xf0]  ;;  %v17253_v31 = vld [vmem:[#allocation6 + $0xf04] sm:$0xf]  ;;  %v15626_v17 = vor.u32 %v17189_v13, %v15623_v21  ;;  %v14189_v42 = vld [vmem:[#allocation6 + $0x1c8] sm:$0xf]  ;;  %v14062_v20 = vor.u32 %v16800_v38, %v14061_v51 }
 0xba4   :  { %10296 = vmatpush.bf16.msrb.mxu2 %v15786_v55  ;;  %v15879_v52 = vld [vmem:[#allocation6 + $0xf10] sm:$0xf0]  ;;  %v15754_v47 = vor.u32 %v17221_v22, %v15751_v24  ;;  %v14462_v55 = vor.u32 %v16900_v4, %v14461_v18  ;;  %v16832_v26 = vld [vmem:[#allocation6 + $0x1d4] sm:$0xf0]  ;;  %v14317_v40 = vld [vmem:[#allocation6 + $0x2c8] sm:$0xf] }
 0xba5   :  { %10309 = vmatpush.bf16.msrb.mxu3 %v15914_v6  ;;  %v15882_v62 = vor.u32 %v17253_v31, %v15879_v52  ;;  %v16864_v1 = vld [vmem:[#allocation6 + $0x2d4] sm:$0xf0]  ;;  %v14445_v6 = vld [vmem:[#allocation6 + $0x3c8] sm:$0xf]  ;;  %v14190_v0 = vor.u32 %v16832_v26, %v14189_v42 }
 0xba6   :  { %10271 = vmatpush.bf16.msrb.mxu0 %v15514_v3  ;;  %v16896_v50 = vld [vmem:[#allocation6 + $0x3d4] sm:$0xf0]  ;;  %v14318_v63 = vor.u32 %v16864_v1, %v14317_v40  ;;  %v14045_v2 = vld [vmem:[#allocation6 + $0xa8] sm:$0xf] }
 0xba7   :  { %10284 = vmatpush.bf16.msrb.mxu1 %v15642_v15  ;;  %v16796_v3 = vld [vmem:[#allocation6 + $0xb4] sm:$0xf0]  ;;  %v14173_v8 = vld [vmem:[#allocation6 + $0x1a8] sm:$0xf]  ;;  %v14446_v59 = vor.u32 %v16896_v50, %v14445_v6 }
 0xba8   :  { %10297 = vmatpush.bf16.msrb.mxu2 %v15770_v11  ;;  %v16828_v15 = vld [vmem:[#allocation6 + $0x1b4] sm:$0xf0]  ;;  %v14301_v11 = vld [vmem:[#allocation6 + $0x2a8] sm:$0xf] }
 0xba9   :  { %10310 = vmatpush.bf16.msrb.mxu3 %v15898_v19  ;;  %v16860_v13 = vld [vmem:[#allocation6 + $0x2b4] sm:$0xf0]  ;;  %v14429_v21 = vld [vmem:[#allocation6 + $0x3a8] sm:$0xf]  ;;  %v14046_v19 = vor.u32 %v16796_v3, %v14045_v2  ;;  %v14174_v24 = vor.u32 %v16828_v15, %v14173_v8 }
 0xbaa   :  { %10272 = vmatpush.bf16.msrb.mxu0 %v15498_v43  ;;  %v16892_v22 = vld [vmem:[#allocation6 + $0x3b4] sm:$0xf0]  ;;  %v14302_v31 = vor.u32 %v16860_v13, %v14301_v11  ;;  %v14029_v52 = vld [vmem:[#allocation6 + $0x88] sm:$0xf]  ;;  %v10066_v36 = vpop.f32.mrf.mxu0 }
 0xbab   :  { %10285 = vmatpush.bf16.msrb.mxu1 %v15626_v17  ;;  %v14157_v48 = vld [vmem:[#allocation6 + $0x188] sm:$0xf]  ;;  %v14430_v35 = vor.u32 %v16892_v22, %v14429_v21  ;;  %v16824_v37 = vld [vmem:[#allocation6 + $0x194] sm:$0xf0]  ;;  %v10067_v17 = vadd.f32 %v10066_v36, %v18366_v12 }
 0xbac   :  { %10298 = vmatpush.bf16.msrb.mxu2 %v15754_v47  ;;  %v14285_v5 = vld [vmem:[#allocation6 + $0x288] sm:$0xf]  ;;  %v16856_v43 = vld [vmem:[#allocation6 + $0x294] sm:$0xf0]  ;;  %v14030_v47 = vor.u32 %v16792_v39, %v14029_v52  ;;  %v14158_v4 = vor.u32 %v16824_v37, %v14157_v48 }
 0xbad   :  { %10311 = vmatpush.bf16.msrb.mxu3 %v15882_v62  ;;  %10273 = vmatmul.bf16.vlgmr.msrb.gmra.mxu0 %v18327_v44  ;;  %v14413_v49 = vld [vmem:[#allocation6 + $0x388] sm:$0xf]  ;;  %v16888_v45 = vld [vmem:[#allocation6 + $0x394] sm:$0xf0]  ;;  %v10079_v18 = vpop.f32.mrf.mxu1  ;;  %v14286_v62 = vor.u32 %v16856_v43, %v14285_v5 }
 0xbae   :  { %10317 = vmatpush.bf16.msra.mxu0 %v14078_v54  ;;  %10286 = vmatmul.bf16.vlgmr.msrb.gmra.mxu1 %v18337_v16  ;;  %v14013_v54 = vld [vmem:[#allocation6 + $0x68] sm:$0xf]  ;;  %v14414_v51 = vor.u32 %v16888_v45, %v14413_v49  ;;  %v10080_v38 = vadd.f32 %v10079_v18, %v10067_v17  ;;  %v16820_v42 = vld [vmem:[#allocation6 + $0x174] sm:$0xf0] }
 0xbaf   :  { %10330 = vmatpush.bf16.msra.mxu1 %v14206_v30  ;;  %10299 = vmatmul.bf16.vlgmr.msrb.gmra.mxu2 %v18332_v60  ;;  %v16788_v30 = vld [vmem:[#allocation6 + $0x74] sm:$0xf0]  ;;  %v14397_v40 = vld [vmem:[#allocation6 + $0x368] sm:$0xf] }
 0xbb0   :  { %10343 = vmatpush.bf16.msra.mxu2 %v14334_v25  ;;  %10312 = vmatmul.bf16.vlgmr.msrb.gmra.mxu3 %v18342_v7  ;;  %v14141_v25 = vld [vmem:[#allocation6 + $0x168] sm:$0xf]  ;;  %v16852_v26 = vld [vmem:[#allocation6 + $0x274] sm:$0xf0]  ;;  %v14014_v6 = vor.u32 %v16788_v30, %v14013_v54 }
 0xbb1   :  { %10356 = vmatpush.bf16.msra.mxu3 %v14462_v55  ;;  %v14269_v55 = vld [vmem:[#allocation6 + $0x268] sm:$0xf]  ;;  %v16884_v1 = vld [vmem:[#allocation6 + $0x374] sm:$0xf0]  ;;  %v14142_v12 = vor.u32 %v16820_v42, %v14141_v25 }
 0xbb2   :  { %10318 = vmatpush.bf16.msra.mxu0 %v14062_v20  ;;  %v14270_v50 = vor.u32 %v16852_v26, %v14269_v55  ;;  %v13997_v20 = vld [vmem:[#allocation6 + $0x48] sm:$0xf]  ;;  %v14398_v2 = vor.u32 %v16884_v1, %v14397_v40  ;;  %v10092_v3 = vpop.f32.mrf.mxu2  ;;  %v16816_v8 = vld [vmem:[#allocation6 + $0x154] sm:$0xf0] }
 0xbb3   :  { %10331 = vmatpush.bf16.msra.mxu1 %v14190_v0  ;;  %v16784_v0 = vld [vmem:[#allocation6 + $0x54] sm:$0xf0]  ;;  %v10093_v11 = vadd.f32 %v10092_v3, %v10080_v38  ;;  %v14381_v21 = vld [vmem:[#allocation6 + $0x348] sm:$0xf] }
 0xbb4   :  { %10344 = vmatpush.bf16.msra.mxu2 %v14318_v63  ;;  %v14125_v63 = vld [vmem:[#allocation6 + $0x148] sm:$0xf]  ;;  %v16848_v15 = vld [vmem:[#allocation6 + $0x254] sm:$0xf0] }
 0xbb5   :  { %10357 = vmatpush.bf16.msra.mxu3 %v14446_v59  ;;  %v14253_v59 = vld [vmem:[#allocation6 + $0x248] sm:$0xf]  ;;  %v10105_v13 = vpop.f32.mrf.mxu3  ;;  %v16880_v22 = vld [vmem:[#allocation6 + $0x354] sm:$0xf0]  ;;  %v14126_v39 = vor.u32 %v16816_v8, %v14125_v63 }
 0xbb6   :  { %10319 = vmatpush.bf16.msra.mxu0 %v14046_v19  ;;  %v10068_v19 = vpop.f32.mrf.mxu0  ;;  %v18373_v52 = vadd.f32 %v10105_v13, %v10093_v11  ;;  %v14254_v48 = vor.u32 %v16848_v15, %v14253_v59  ;;  %v16780_v37 = vld [vmem:[#allocation6 + $0x34] sm:$0xf0]  ;;  %v14109_v5 = vld [vmem:[#allocation6 + $0x128] sm:$0xf]  ;;  %v14382_v43 = vor.u32 %v16880_v22, %v14381_v21 }
 0xbb7   :  { %10332 = vmatpush.bf16.msra.mxu1 %v14174_v24  ;;  %v13998_v24 = vor.u32 %v16784_v0, %v13997_v20  ;;  %v16812_v36 = vld [vmem:[#allocation6 + $0x134] sm:$0xf0]  ;;  %v14237_v49 = vld [vmem:[#allocation6 + $0x228] sm:$0xf] }
 0xbb8   :  { %10345 = vmatpush.bf16.msra.mxu2 %v14302_v31  ;;  %v10081_v31 = vpop.f32.mrf.mxu1  ;;  %v16844_v45 = vld [vmem:[#allocation6 + $0x234] sm:$0xf0]  ;;  %v14365_v17 = vld [vmem:[#allocation6 + $0x328] sm:$0xf]  ;;  %v14110_v54 = vor.u32 %v16812_v36, %v14109_v5 }
 0xbb9   :  { %10358 = vmatpush.bf16.msra.mxu3 %v14430_v35  ;;  %v13981_v35 = vld [vmem:[#allocation6 + $0x28] sm:$0xf]  ;;  %v14238_v30 = vor.u32 %v16844_v45, %v14237_v49  ;;  %v16840_v55 = vld [vmem:[#allocation6 + $0x214] sm:$0xf0] }
 0xbba   :  { %10320 = vmatpush.bf16.msra.mxu0 %v14030_v47  ;;  %v16876_v47 = vld [vmem:[#allocation6 + $0x334] sm:$0xf0]  ;;  %v13982_v18 = vor.u32 %v16780_v37, %v13981_v35  ;;  %v14093_v25 = vld [vmem:[#allocation6 + $0x108] sm:$0xf]  ;;  %v10094_v1 = vpop.f32.mrf.mxu2 }
 0xbbb   :  { %10333 = vmatpush.bf16.msra.mxu1 %v14158_v4  ;;  %v13965_v4 = vld [vmem:[#allocation6 + $0x8] sm:$0xf]  ;;  %v14366_v42 = vor.u32 %v16876_v47, %v14365_v17  ;;  %v16872_v40 = vld [vmem:[#allocation6 + $0x314] sm:$0xf0] }
 0xbbc   :  { %10346 = vmatpush.bf16.msra.mxu2 %v14286_v62  ;;  %v16776_v62 = vld [vmem:[#allocation6 + $0x14] sm:$0xf0]  ;;  %v14221_v38 = vld [vmem:[#allocation6 + $0x208] sm:$0xf] }
 0xbbd   :  { %10359 = vmatpush.bf16.msra.mxu3 %v14414_v51  ;;  %v16808_v51 = vld [vmem:[#allocation6 + $0x114] sm:$0xf0]  ;;  %v14349_v26 = vld [vmem:[#allocation6 + $0x308] sm:$0xf]  ;;  %v10107_v20 = vpop.f32.mrf.mxu3  ;;  %v13966_v0 = vor.u32 %v16776_v62, %v13965_v4  ;;  %v14222_v59 = vor.u32 %v16840_v55, %v14221_v38 }
 0xbbe   :  { %10321 = vmatpush.bf16.msra.mxu0 %v14014_v6  ;;  %v14589_v6 = vld [vmem:[#allocation6 + $0x4e8] sm:$0xf]  ;;  %v16964_v63 = vld [vmem:[#allocation6 + $0x5f4] sm:$0xf0]  ;;  %v14094_v8 = vor.u32 %v16808_v51, %v14093_v25  ;;  %v14350_v13 = vor.u32 %v16872_v40, %v14349_v26 }
 0xbbf   :  { %10334 = vmatpush.bf16.msra.mxu1 %v14142_v12  ;;  %v16932_v12 = vld [vmem:[#allocation6 + $0x4f4] sm:$0xf0]  ;;  %v14973_v15 = vld [vmem:[#allocation6 + $0x7e8] sm:$0xf] }
 0xbc0   :  { %10347 = vmatpush.bf16.msra.mxu2 %v14270_v50  ;;  %v14717_v50 = vld [vmem:[#allocation6 + $0x5e8] sm:$0xf]  ;;  %v16996_v3 = vld [vmem:[#allocation6 + $0x6f4] sm:$0xf0]  ;;  %v14590_v21 = vor.u32 %v16932_v12, %v14589_v6 }
 0xbc1   :  { %10360 = vmatpush.bf16.msra.mxu3 %v14398_v2  ;;  %v14845_v2 = vld [vmem:[#allocation6 + $0x6e8] sm:$0xf]  ;;  %v17028_v11 = vld [vmem:[#allocation6 + $0x7f4] sm:$0xf0]  ;;  %v14718_v22 = vor.u32 %v16964_v63, %v14717_v50 }
 0xbc2   :  { %10322 = vmatpush.bf16.msra.mxu0 %v13998_v24  ;;  %v14846_v19 = vor.u32 %v16996_v3, %v14845_v2  ;;  %v14573_v24 = vld [vmem:[#allocation6 + $0x4c8] sm:$0xf]  ;;  %v16928_v31 = vld [vmem:[#allocation6 + $0x4d4] sm:$0xf0] }
 0xbc3   :  { %10335 = vmatpush.bf16.msra.mxu1 %v14126_v39  ;;  %v14701_v39 = vld [vmem:[#allocation6 + $0x5c8] sm:$0xf]  ;;  %v16960_v35 = vld [vmem:[#allocation6 + $0x5d4] sm:$0xf0]  ;;  %v14574_v49 = vor.u32 %v16928_v31, %v14573_v24 }
 0xbc4   :  { %10348 = vmatpush.bf16.msra.mxu2 %v14254_v48  ;;  %v14974_v48 = vor.u32 %v17028_v11, %v14973_v15  ;;  %v14829_v37 = vld [vmem:[#allocation6 + $0x6c8] sm:$0xf]  ;;  %v16992_v5 = vld [vmem:[#allocation6 + $0x6d4] sm:$0xf0]  ;;  %v14702_v45 = vor.u32 %v16960_v35, %v14701_v39 }
 0xbc5   :  { %10361 = vmatpush.bf16.msra.mxu3 %v14382_v43  ;;  %v14957_v43 = vld [vmem:[#allocation6 + $0x7c8] sm:$0xf]  ;;  %v17024_v36 = vld [vmem:[#allocation6 + $0x7d4] sm:$0xf0]  ;;  %v14830_v17 = vor.u32 %v16992_v5, %v14829_v37 }
 0xbc6   :  { %10323 = vmatpush.bf16.msra.mxu0 %v13982_v18  ;;  %v14557_v47 = vld [vmem:[#allocation6 + $0x4a8] sm:$0xf]  ;;  %v16924_v18 = vld [vmem:[#allocation6 + $0x4b4] sm:$0xf0]  ;;  %v14958_v62 = vor.u32 %v17024_v36, %v14957_v43 }
 0xbc7   :  { %10336 = vmatpush.bf16.msra.mxu1 %v14110_v54  ;;  %v14685_v4 = vld [vmem:[#allocation6 + $0x5a8] sm:$0xf]  ;;  %v16956_v54 = vld [vmem:[#allocation6 + $0x5b4] sm:$0xf0] }
 0xbc8   :  { %10349 = vmatpush.bf16.msra.mxu2 %v14238_v30  ;;  %v14813_v30 = vld [vmem:[#allocation6 + $0x6a8] sm:$0xf]  ;;  %v16988_v25 = vld [vmem:[#allocation6 + $0x6b4] sm:$0xf0]  ;;  %v14686_v26 = vor.u32 %v16956_v54, %v14685_v4 }
 0xbc9   :  { %10362 = vmatpush.bf16.msra.mxu3 %v14366_v42  ;;  %v14941_v51 = vld [vmem:[#allocation6 + $0x7a8] sm:$0xf]  ;;  %v17020_v38 = vld [vmem:[#allocation6 + $0x7b4] sm:$0xf0]  ;;  %v14558_v42 = vor.u32 %v16924_v18, %v14557_v47  ;;  %v14814_v40 = vor.u32 %v16988_v25, %v14813_v30 }
 0xbca   :  { %10324 = vmatpush.bf16.msra.mxu0 %v13966_v0  ;;  %v14541_v55 = vld [vmem:[#allocation6 + $0x488] sm:$0xf]  ;;  %v16920_v1 = vld [vmem:[#allocation6 + $0x494] sm:$0xf0]  ;;  %v14942_v20 = vor.u32 %v17020_v38, %v14941_v51  ;;  %v10118_v15 = vpop.f32.mrf.mxu0 }
 0xbcb   :  { %10337 = vmatpush.bf16.msra.mxu1 %v14094_v8  ;;  %v14669_v6 = vld [vmem:[#allocation6 + $0x588] sm:$0xf]  ;;  %v17379_v12 = vld [vmem:[#allocation23] sm:$0xf]  ;;  %v10131_v31 = vpop.f32.mrf.mxu1 }
 0xbcc   :  { %10350 = vmatpush.bf16.msra.mxu2 %v14222_v59  ;;  %v7334_v50 = vperm.slane %v17379_v12, 1  ;;  %v16952_v0 = vld [vmem:[#allocation6 + $0x594] sm:$0xf0]  ;;  %v14797_v63 = vld [vmem:[#allocation6 + $0x688] sm:$0xf]  ;;  %v14542_v59 = vor.u32 %v16920_v1, %v14541_v55 }
 0xbcd   :  { %10363 = vmatpush.bf16.msra.mxu3 %v14350_v13  ;;  %10325 = vmatmul.bf16.vlgmr.msra.gmra.mxu0 %v18260_v32  ;;  %v16984_v2 = vld [vmem:[#allocation6 + $0x694] sm:$0xf0]  ;;  %v14925_v3 = vld [vmem:[#allocation6 + $0x788] sm:$0xf]  ;;  %v14670_v11 = vor.u32 %v16952_v0, %v14669_v6 }
 0xbce   :  { %10369 = vmatpush.bf16.msrb.mxu0 %v14590_v21  ;;  %10338 = vmatmul.bf16.vlgmr.msra.gmra.mxu1 %v18270_v28  ;;  %v17016_v8 = vld [vmem:[#allocation6 + $0x794] sm:$0xf0]  ;;  %v14798_v13 = vor.u32 %v16984_v2, %v14797_v63  ;;  %v14525_v21 = vld [vmem:[#allocation6 + $0x468] sm:$0xf]  ;;  %v10119_v24 = vadd.f32 %v10118_v15, %v7334_v50 }
 0xbcf   :  { %10382 = vmatpush.bf16.msrb.mxu1 %v14718_v22  ;;  %10351 = vmatmul.bf16.vlgmr.msra.gmra.mxu2 %v18255_v46  ;;  %v16916_v22 = vld [vmem:[#allocation6 + $0x474] sm:$0xf0]  ;;  %v14926_v39 = vor.u32 %v17016_v8, %v14925_v3  ;;  %v14781_v35 = vld [vmem:[#allocation6 + $0x668] sm:$0xf] }
 0xbd0   :  { %10395 = vmatpush.bf16.msrb.mxu2 %v14846_v19  ;;  %10364 = vmatmul.bf16.vlgmr.msra.gmra.mxu3 %v18265_v53  ;;  %v14653_v19 = vld [vmem:[#allocation6 + $0x568] sm:$0xf]  ;;  %v16980_v37 = vld [vmem:[#allocation6 + $0x674] sm:$0xf0]  ;;  %v10132_v36 = vadd.f32 %v10131_v31, %v10119_v24 }
 0xbd1   :  { %10408 = vmatpush.bf16.msrb.mxu3 %v14974_v48  ;;  %v16948_v48 = vld [vmem:[#allocation6 + $0x574] sm:$0xf0]  ;;  %v14909_v5 = vld [vmem:[#allocation6 + $0x768] sm:$0xf] }
 0xbd2   :  { %10370 = vmatpush.bf16.msrb.mxu0 %v14574_v49  ;;  %v17012_v43 = vld [vmem:[#allocation6 + $0x774] sm:$0xf0]  ;;  %v14526_v49 = vor.u32 %v16916_v22, %v14525_v21  ;;  %v14509_v47 = vld [vmem:[#allocation6 + $0x448] sm:$0xf]  ;;  %v10120_v6 = vpop.f32.mrf.mxu0 }
 0xbd3   :  { %10383 = vmatpush.bf16.msrb.mxu1 %v14702_v45  ;;  %v14654_v45 = vor.u32 %v16948_v48, %v14653_v19  ;;  %v16912_v18 = vld [vmem:[#allocation6 + $0x454] sm:$0xf0]  ;;  %v14637_v4 = vld [vmem:[#allocation6 + $0x548] sm:$0xf]  ;;  %v14910_v54 = vor.u32 %v17012_v43, %v14909_v5  ;;  %v10133_v2 = vpop.f32.mrf.mxu1 }
 0xbd4   :  { %10396 = vmatpush.bf16.msrb.mxu2 %v14830_v17  ;;  %v14782_v17 = vor.u32 %v16980_v37, %v14781_v35  ;;  %v16944_v30 = vld [vmem:[#allocation6 + $0x554] sm:$0xf0]  ;;  %v14765_v25 = vld [vmem:[#allocation6 + $0x648] sm:$0xf] }
 0xbd5   :  { %10409 = vmatpush.bf16.msrb.mxu3 %v14958_v62  ;;  %v10144_v62 = vpop.f32.mrf.mxu2  ;;  %v16976_v51 = vld [vmem:[#allocation6 + $0x654] sm:$0xf0]  ;;  %v14893_v55 = vld [vmem:[#allocation6 + $0x748] sm:$0xf]  ;;  %v14638_v12 = vor.u32 %v16944_v30, %v14637_v4 }
 0xbd6   :  { %10371 = vmatpush.bf16.msrb.mxu0 %v14558_v42  ;;  %v10145_v38 = vadd.f32 %v10144_v62, %v10132_v36  ;;  %v10157_v42 = vpop.f32.mrf.mxu3  ;;  %v14766_v50 = vor.u32 %v16976_v51, %v14765_v25  ;;  %v16908_v0 = vld [vmem:[#allocation6 + $0x434] sm:$0xf0]  ;;  %v14621_v63 = vld [vmem:[#allocation6 + $0x528] sm:$0xf] }
 0xbd7   :  { %10384 = vmatpush.bf16.msrb.mxu1 %v14686_v26  ;;  %v17008_v26 = vld [vmem:[#allocation6 + $0x754] sm:$0xf0]  ;;  %v14477_v22 = vld [vmem:[#allocation6 + $0x408] sm:$0xf] }
 0xbd8   :  { %10397 = vmatpush.bf16.msrb.mxu2 %v14814_v40  ;;  %v14510_v40 = vor.u32 %v16912_v18, %v14509_v47  ;;  %v18379_v1 = vadd.f32 %v10157_v42, %v10145_v38  ;;  %v14894_v3 = vor.u32 %v17008_v26, %v14893_v55  ;;  %v16940_v8 = vld [vmem:[#allocation6 + $0x534] sm:$0xf0]  ;;  %v14733_v35 = vld [vmem:[#allocation6 + $0x608] sm:$0xf] }
 0xbd9   :  { %10410 = vmatpush.bf16.msrb.mxu3 %v14942_v20  ;;  %v14493_v20 = vld [vmem:[#allocation6 + $0x428] sm:$0xf]  ;;  %v16972_v15 = vld [vmem:[#allocation6 + $0x634] sm:$0xf0]  ;;  %v14622_v24 = vor.u32 %v16940_v8, %v14621_v63 }
 0xbda   :  { %10372 = vmatpush.bf16.msrb.mxu0 %v14542_v59  ;;  %v14749_v59 = vld [vmem:[#allocation6 + $0x628] sm:$0xf]  ;;  %v14494_v21 = vor.u32 %v16908_v0, %v14493_v20  ;;  %v16904_v19 = vld [vmem:[#allocation6 + $0x414] sm:$0xf0] }
 0xbdb   :  { %10385 = vmatpush.bf16.msrb.mxu1 %v14670_v11  ;;  %v14877_v11 = vld [vmem:[#allocation6 + $0x728] sm:$0xf]  ;;  %v14750_v31 = vor.u32 %v16972_v15, %v14749_v59  ;;  %v16936_v48 = vld [vmem:[#allocation6 + $0x514] sm:$0xf0]  ;;  %v14478_v4 = vor.u32 %v16904_v19, %v14477_v22 }
 0xbdc   :  { %10398 = vmatpush.bf16.msrb.mxu2 %v14798_v13  ;;  %v17004_v13 = vld [vmem:[#allocation6 + $0x734] sm:$0xf0]  ;;  %v14861_v36 = vld [vmem:[#allocation6 + $0x708] sm:$0xf] }
 0xbdd   :  { %10411 = vmatpush.bf16.msrb.mxu3 %v14926_v39  ;;  %v14605_v39 = vld [vmem:[#allocation6 + $0x508] sm:$0xf]  ;;  %v10146_v37 = vpop.f32.mrf.mxu2  ;;  %v14878_v5 = vor.u32 %v17004_v13, %v14877_v11  ;;  %v16968_v43 = vld [vmem:[#allocation6 + $0x614] sm:$0xf0] }
 0xbde   :  { %10373 = vmatpush.bf16.msrb.mxu0 %v14526_v49  ;;  %v17000_v49 = vld [vmem:[#allocation6 + $0x714] sm:$0xf0]  ;;  %v15229_v18 = vld [vmem:[#allocation6 + $0x9e8] sm:$0xf]  ;;  %v14606_v25 = vor.u32 %v16936_v48, %v14605_v39  ;;  %v14734_v51 = vor.u32 %v16968_v43, %v14733_v35 }
 0xbdf   :  { %10386 = vmatpush.bf16.msrb.mxu1 %v14654_v45  ;;  %v10159_v45 = vpop.f32.mrf.mxu3  ;;  %v17060_v47 = vld [vmem:[#allocation6 + $0x8f4] sm:$0xf0]  ;;  %v15485_v38 = vld [vmem:[#allocation6 + $0xbe8] sm:$0xf]  ;;  %v14862_v55 = vor.u32 %v17000_v49, %v14861_v36 }
 0xbe0   :  { %10399 = vmatpush.bf16.msrb.mxu2 %v14782_v17  ;;  %v15101_v17 = vld [vmem:[#allocation6 + $0x8e8] sm:$0xf]  ;;  %v17092_v62 = vld [vmem:[#allocation6 + $0x9f4] sm:$0xf0] }
 0xbe1   :  { %10412 = vmatpush.bf16.msrb.mxu3 %v14910_v54  ;;  %v15357_v54 = vld [vmem:[#allocation6 + $0xae8] sm:$0xf]  ;;  %v17124_v30 = vld [vmem:[#allocation6 + $0xaf4] sm:$0xf0]  ;;  %v15102_v26 = vor.u32 %v17060_v47, %v15101_v17 }
 0xbe2   :  { %10374 = vmatpush.bf16.msrb.mxu0 %v14510_v40  ;;  %v17156_v42 = vld [vmem:[#allocation6 + $0xbf4] sm:$0xf0]  ;;  %v15230_v40 = vor.u32 %v17092_v62, %v15229_v18  ;;  %v15358_v6 = vor.u32 %v17124_v30, %v15357_v54  ;;  %v15213_v20 = vld [vmem:[#allocation6 + $0x9c8] sm:$0xf] }
 0xbe3   :  { %10387 = vmatpush.bf16.msrb.mxu1 %v14638_v12  ;;  %v15085_v12 = vld [vmem:[#allocation6 + $0x8c8] sm:$0xf]  ;;  %v15486_v0 = vor.u32 %v17156_v42, %v15485_v38  ;;  %v17088_v63 = vld [vmem:[#allocation6 + $0x9d4] sm:$0xf0] }
 0xbe4   :  { %10400 = vmatpush.bf16.msrb.mxu2 %v14766_v50  ;;  %v17056_v50 = vld [vmem:[#allocation6 + $0x8d4] sm:$0xf0]  ;;  %v15341_v2 = vld [vmem:[#allocation6 + $0xac8] sm:$0xf]  ;;  %v15214_v11 = vor.u32 %v17088_v63, %v15213_v20 }
 0xbe5   :  { %10413 = vmatpush.bf16.msrb.mxu3 %v14894_v3  ;;  %v17120_v3 = vld [vmem:[#allocation6 + $0xad4] sm:$0xf0]  ;;  %v15469_v8 = vld [vmem:[#allocation6 + $0xbc8] sm:$0xf]  ;;  %v15086_v15 = vor.u32 %v17056_v50, %v15085_v12 }
 0xbe6   :  { %10375 = vmatpush.bf16.msrb.mxu0 %v14494_v21  ;;  %v17152_v59 = vld [vmem:[#allocation6 + $0xbd4] sm:$0xf0]  ;;  %v15342_v13 = vor.u32 %v17120_v3, %v15341_v2  ;;  %v15069_v21 = vld [vmem:[#allocation6 + $0x8a8] sm:$0xf] }
 0xbe7   :  { %10388 = vmatpush.bf16.msrb.mxu1 %v14622_v24  ;;  %v17052_v22 = vld [vmem:[#allocation6 + $0x8b4] sm:$0xf0]  ;;  %v15197_v19 = vld [vmem:[#allocation6 + $0x9a8] sm:$0xf]  ;;  %v15470_v24 = vor.u32 %v17152_v59, %v15469_v8 }
 0xbe8   :  { %10401 = vmatpush.bf16.msrb.mxu2 %v14750_v31  ;;  %v17084_v31 = vld [vmem:[#allocation6 + $0x9b4] sm:$0xf0]  ;;  %v15325_v39 = vld [vmem:[#allocation6 + $0xaa8] sm:$0xf] }
 0xbe9   :  { %10414 = vmatpush.bf16.msrb.mxu3 %v14878_v5  ;;  %v17116_v48 = vld [vmem:[#allocation6 + $0xab4] sm:$0xf0]  ;;  %v15453_v35 = vld [vmem:[#allocation6 + $0xba8] sm:$0xf]  ;;  %v15070_v5 = vor.u32 %v17052_v22, %v15069_v21  ;;  %v15198_v43 = vor.u32 %v17084_v31, %v15197_v19 }
 0xbea   :  { %10376 = vmatpush.bf16.msrb.mxu0 %v14478_v4  ;;  %v17148_v37 = vld [vmem:[#allocation6 + $0xbb4] sm:$0xf0]  ;;  %v15326_v36 = vor.u32 %v17116_v48, %v15325_v39  ;;  %v15053_v49 = vld [vmem:[#allocation6 + $0x888] sm:$0xf] }
 0xbeb   :  { %10389 = vmatpush.bf16.msrb.mxu1 %v14606_v25  ;;  %v17048_v45 = vld [vmem:[#allocation6 + $0x894] sm:$0xf0]  ;;  %v15181_v17 = vld [vmem:[#allocation6 + $0x988] sm:$0xf]  ;;  %v15454_v47 = vor.u32 %v17148_v37, %v15453_v35  ;;  %v10183_v12 = vpop.f32.mrf.mxu1 }
 0xbec   :  { %10402 = vmatpush.bf16.msrb.mxu2 %v14734_v51  ;;  %v17080_v18 = vld [vmem:[#allocation6 + $0x994] sm:$0xf0]  ;;  %v15309_v4 = vld [vmem:[#allocation6 + $0xa88] sm:$0xf]  ;;  %v15054_v25 = vor.u32 %v17048_v45, %v15053_v49  ;;  %v10170_v51 = vpop.f32.mrf.mxu0 }
 0xbed   :  { %10415 = vmatpush.bf16.msrb.mxu3 %v14862_v55  ;;  %10377 = vmatmul.bf16.vlgmr.msrb.gmra.mxu0 %v18284_v27  ;;  %v17112_v62 = vld [vmem:[#allocation6 + $0xa94] sm:$0xf0]  ;;  %v15437_v54 = vld [vmem:[#allocation6 + $0xb88] sm:$0xf]  ;;  %v15182_v38 = vor.u32 %v17080_v18, %v15181_v17 }
 0xbee   :  { %10421 = vmatpush.bf16.msra.mxu0 %v15102_v26  ;;  %10390 = vmatmul.bf16.vlgmr.msrb.gmra.mxu1 %v18294_v10  ;;  %v17144_v30 = vld [vmem:[#allocation6 + $0xb94] sm:$0xf0]  ;;  %v15310_v42 = vor.u32 %v17112_v62, %v15309_v4  ;;  %v15037_v55 = vld [vmem:[#allocation6 + $0x868] sm:$0xf] }
 0xbef   :  { %10434 = vmatpush.bf16.msra.mxu1 %v15230_v40  ;;  %10403 = vmatmul.bf16.vlgmr.msrb.gmra.mxu2 %v18279_v23  ;;  %v17044_v26 = vld [vmem:[#allocation6 + $0x874] sm:$0xf0]  ;;  %v15165_v40 = vld [vmem:[#allocation6 + $0x968] sm:$0xf]  ;;  %v15438_v50 = vor.u32 %v17144_v30, %v15437_v54 }
 0xbf0   :  { %10447 = vmatpush.bf16.msra.mxu2 %v15358_v6  ;;  %10416 = vmatmul.bf16.vlgmr.msrb.gmra.mxu3 %v18289_v29  ;;  %v10171_v6 = vadd.f32 %v10170_v51, %v18379_v1  ;;  %v17076_v20 = vld [vmem:[#allocation6 + $0x974] sm:$0xf0]  ;;  %v15421_v2 = vld [vmem:[#allocation6 + $0xb68] sm:$0xf]  ;;  %v15038_v59 = vor.u32 %v17044_v26, %v15037_v55 }
 0xbf1   :  { %10460 = vmatpush.bf16.msra.mxu3 %v15486_v0  ;;  %v15293_v0 = vld [vmem:[#allocation6 + $0xa68] sm:$0xf]  ;;  %v17108_v63 = vld [vmem:[#allocation6 + $0xa74] sm:$0xf0] }
 0xbf2   :  { %10422 = vmatpush.bf16.msra.mxu0 %v15086_v15  ;;  %v17140_v3 = vld [vmem:[#allocation6 + $0xb74] sm:$0xf0]  ;;  %v10184_v8 = vadd.f32 %v10183_v12, %v10171_v6  ;;  %v15166_v15 = vor.u32 %v17076_v20, %v15165_v40  ;;  %v15149_v22 = vld [vmem:[#allocation6 + $0x948] sm:$0xf]  ;;  %v10196_v19 = vpop.f32.mrf.mxu2 }
 0xbf3   :  { %10435 = vmatpush.bf16.msra.mxu1 %v15214_v11  ;;  %v15294_v11 = vor.u32 %v17108_v63, %v15293_v0  ;;  %v17040_v21 = vld [vmem:[#allocation6 + $0x854] sm:$0xf0]  ;;  %v15422_v1 = vor.u32 %v17140_v3, %v15421_v2  ;;  %v15277_v31 = vld [vmem:[#allocation6 + $0xa48] sm:$0xf]  ;;  %v10209_v35 = vpop.f32.mrf.mxu3  ;;  %v10185_v62 = vpop.f32.mrf.mxu1 }
 0xbf4   :  { %10448 = vmatpush.bf16.msra.mxu2 %v15342_v13  ;;  %v15021_v13 = vld [vmem:[#allocation6 + $0x848] sm:$0xf]  ;;  %v17104_v39 = vld [vmem:[#allocation6 + $0xa54] sm:$0xf0]  ;;  %v10197_v48 = vadd.f32 %v10196_v19, %v10184_v8  ;;  %v10172_v49 = vpop.f32.mrf.mxu0 }
 0xbf5   :  { %10461 = vmatpush.bf16.msra.mxu3 %v15470_v24  ;;  %v17072_v24 = vld [vmem:[#allocation6 + $0x954] sm:$0xf0]  ;;  %v15405_v37 = vld [vmem:[#allocation6 + $0xb48] sm:$0xf]  ;;  %v15278_v17 = vor.u32 %v17104_v39, %v15277_v31 }
 0xbf6   :  { %10423 = vmatpush.bf16.msra.mxu0 %v15070_v5  ;;  %v17136_v5 = vld [vmem:[#allocation6 + $0xb54] sm:$0xf0]  ;;  %v15150_v45 = vor.u32 %v17072_v24, %v15149_v22  ;;  %v15133_v4 = vld [vmem:[#allocation6 + $0x928] sm:$0xf] }
 0xbf7   :  { %10436 = vmatpush.bf16.msra.mxu1 %v15198_v43  ;;  %v15022_v43 = vor.u32 %v17040_v21, %v15021_v13  ;;  %v17036_v18 = vld [vmem:[#allocation6 + $0x834] sm:$0xf0]  ;;  %v15406_v54 = vor.u32 %v17136_v5, %v15405_v37  ;;  %v14989_v26 = vld [vmem:[#allocation6 + $0x808] sm:$0xf] }
 0xbf8   :  { %10449 = vmatpush.bf16.msra.mxu2 %v15326_v36  ;;  %v18386_v36 = vadd.f32 %v10209_v35, %v10197_v48  ;;  %v17068_v30 = vld [vmem:[#allocation6 + $0x934] sm:$0xf0]  ;;  %v15245_v0 = vld [vmem:[#allocation6 + $0xa08] sm:$0xf] }
 0xbf9   :  { %10462 = vmatpush.bf16.msra.mxu3 %v15454_v47  ;;  %v15005_v47 = vld [vmem:[#allocation6 + $0x828] sm:$0xf]  ;;  %v17100_v51 = vld [vmem:[#allocation6 + $0xa34] sm:$0xf0]  ;;  %v15134_v6 = vor.u32 %v17068_v30, %v15133_v4 }
 0xbfa   :  { %10424 = vmatpush.bf16.msra.mxu0 %v15054_v25  ;;  %v15261_v25 = vld [vmem:[#allocation6 + $0xa28] sm:$0xf]  ;;  %v15006_v55 = vor.u32 %v17036_v18, %v15005_v47  ;;  %v17032_v40 = vld [vmem:[#allocation6 + $0x814] sm:$0xf0]  ;;  %v10198_v63 = vpop.f32.mrf.mxu2 }
 0xbfb   :  { %10437 = vmatpush.bf16.msra.mxu1 %v15182_v38  ;;  %v15389_v38 = vld [vmem:[#allocation6 + $0xb28] sm:$0xf]  ;;  %v15262_v12 = vor.u32 %v17100_v51, %v15261_v25  ;;  %v17064_v20 = vld [vmem:[#allocation6 + $0x914] sm:$0xf0]  ;;  %v14990_v22 = vor.u32 %v17032_v40, %v14989_v26 }
 0xbfc   :  { %10450 = vmatpush.bf16.msra.mxu2 %v15310_v42  ;;  %v17132_v42 = vld [vmem:[#allocation6 + $0xb34] sm:$0xf0]  ;;  %v15373_v8 = vld [vmem:[#allocation6 + $0xb08] sm:$0xf] }
 0xbfd   :  { %10463 = vmatpush.bf16.msra.mxu3 %v15438_v50  ;;  %v15117_v50 = vld [vmem:[#allocation6 + $0x908] sm:$0xf]  ;;  %v15390_v2 = vor.u32 %v17132_v42, %v15389_v38  ;;  %v17096_v3 = vld [vmem:[#allocation6 + $0xa14] sm:$0xf0] }
 0xbfe   :  { %10425 = vmatpush.bf16.msra.mxu0 %v15038_v59  ;;  %v17128_v59 = vld [vmem:[#allocation6 + $0xb14] sm:$0xf0]  ;;  %v15741_v21 = vld [vmem:[#allocation6 + $0xde8] sm:$0xf]  ;;  %v15118_v31 = vor.u32 %v17064_v20, %v15117_v50  ;;  %v15246_v39 = vor.u32 %v17096_v3, %v15245_v0 }
 0xbff   :  { %10438 = vmatpush.bf16.msra.mxu1 %v15166_v15  ;;  %v10211_v15 = vpop.f32.mrf.mxu3  ;;  %v17188_v13 = vld [vmem:[#allocation6 + $0xcf4] sm:$0xf0]  ;;  %v15997_v48 = vld [vmem:[#allocation6 + $0xfe8] sm:$0xf]  ;;  %v15374_v37 = vor.u32 %v17128_v59, %v15373_v8 }
 0xc00   :  { %10451 = vmatpush.bf16.msra.mxu2 %v15294_v11  ;;  %v15613_v11 = vld [vmem:[#allocation6 + $0xce8] sm:$0xf]  ;;  %v17220_v19 = vld [vmem:[#allocation6 + $0xdf4] sm:$0xf0] }
 0xc01   :  { %10464 = vmatpush.bf16.msra.mxu3 %v15422_v1  ;;  %v15869_v1 = vld [vmem:[#allocation6 + $0xee8] sm:$0xf]  ;;  %v17252_v24 = vld [vmem:[#allocation6 + $0xef4] sm:$0xf0]  ;;  %v15614_v5 = vor.u32 %v17188_v13, %v15613_v11 }
 0xc02   :  { %10426 = vmatpush.bf16.msra.mxu0 %v15022_v43  ;;  %v17284_v35 = vld [vmem:[#allocation6 + $0xff4] sm:$0xf0]  ;;  %v15742_v43 = vor.u32 %v17220_v19, %v15741_v21  ;;  %v15870_v49 = vor.u32 %v17252_v24, %v15869_v1  ;;  %v15725_v47 = vld [vmem:[#allocation6 + $0xdc8] sm:$0xf] }
 0xc03   :  { %10439 = vmatpush.bf16.msra.mxu1 %v15150_v45  ;;  %v15597_v45 = vld [vmem:[#allocation6 + $0xcc8] sm:$0xf]  ;;  %v15998_v18 = vor.u32 %v17284_v35, %v15997_v48  ;;  %v17216_v4 = vld [vmem:[#allocation6 + $0xdd4] sm:$0xf0] }
 0xc04   :  { %10452 = vmatpush.bf16.msra.mxu2 %v15278_v17  ;;  %v17184_v17 = vld [vmem:[#allocation6 + $0xcd4] sm:$0xf0]  ;;  %v15853_v62 = vld [vmem:[#allocation6 + $0xec8] sm:$0xf]  ;;  %v15726_v38 = vor.u32 %v17216_v4, %v15725_v47 }
 0xc05   :  { %10465 = vmatpush.bf16.msra.mxu3 %v15406_v54  ;;  %v17248_v54 = vld [vmem:[#allocation6 + $0xed4] sm:$0xf0]  ;;  %v15981_v30 = vld [vmem:[#allocation6 + $0xfc8] sm:$0xf]  ;;  %v15598_v51 = vor.u32 %v17184_v17, %v15597_v45 }
 0xc06   :  { %10427 = vmatpush.bf16.msra.mxu0 %v15006_v55  ;;  %v17280_v25 = vld [vmem:[#allocation6 + $0xfd4] sm:$0xf0]  ;;  %v15854_v42 = vor.u32 %v17248_v54, %v15853_v62  ;;  %v15581_v55 = vld [vmem:[#allocation6 + $0xca8] sm:$0xf] }
 0xc07   :  { %10440 = vmatpush.bf16.msra.mxu1 %v15134_v6  ;;  %v17180_v26 = vld [vmem:[#allocation6 + $0xcb4] sm:$0xf0]  ;;  %v15709_v40 = vld [vmem:[#allocation6 + $0xda8] sm:$0xf]  ;;  %v15982_v6 = vor.u32 %v17280_v25, %v15981_v30 }
 0xc08   :  { %10453 = vmatpush.bf16.msra.mxu2 %v15262_v12  ;;  %v17212_v12 = vld [vmem:[#allocation6 + $0xdb4] sm:$0xf0]  ;;  %v15837_v50 = vld [vmem:[#allocation6 + $0xea8] sm:$0xf] }
 0xc09   :  { %10466 = vmatpush.bf16.msra.mxu3 %v15390_v2  ;;  %v17244_v20 = vld [vmem:[#allocation6 + $0xeb4] sm:$0xf0]  ;;  %v15965_v0 = vld [vmem:[#allocation6 + $0xfa8] sm:$0xf]  ;;  %v15582_v2 = vor.u32 %v17180_v26, %v15581_v55  ;;  %v15710_v3 = vor.u32 %v17212_v12, %v15709_v40 }
 0xc0a   :  { %10428 = vmatpush.bf16.msra.mxu0 %v14990_v22  ;;  %v17276_v63 = vld [vmem:[#allocation6 + $0xfb4] sm:$0xf0]  ;;  %v15838_v8 = vor.u32 %v17244_v20, %v15837_v50  ;;  %v15565_v59 = vld [vmem:[#allocation6 + $0xc88] sm:$0xf]  ;;  %v10222_v1 = vpop.f32.mrf.mxu0 }
 0xc0b   :  { %10441 = vmatpush.bf16.msra.mxu1 %v15118_v31  ;;  %v17176_v15 = vld [vmem:[#allocation6 + $0xc94] sm:$0xf0]  ;;  %v15693_v11 = vld [vmem:[#allocation6 + $0xd88] sm:$0xf]  ;;  %v15966_v13 = vor.u32 %v17276_v63, %v15965_v0  ;;  %v10235_v35 = vpop.f32.mrf.mxu1 }
 0xc0c   :  { %10454 = vmatpush.bf16.msra.mxu2 %v15246_v39  ;;  %v17208_v21 = vld [vmem:[#allocation6 + $0xd94] sm:$0xf0]  ;;  %v15821_v22 = vld [vmem:[#allocation6 + $0xe88] sm:$0xf]  ;;  %v10223_v39 = vadd.f32 %v10222_v1, %v18386_v36  ;;  %v15566_v48 = vor.u32 %v17176_v15, %v15565_v59 }
 0xc0d   :  { %10467 = vmatpush.bf16.msra.mxu3 %v15374_v37  ;;  %10429 = vmatmul.bf16.vlgmr.msra.gmra.mxu0 %v18303_v33  ;;  %v17240_v19 = vld [vmem:[#allocation6 + $0xe94] sm:$0xf0]  ;;  %v15949_v24 = vld [vmem:[#allocation6 + $0xf88] sm:$0xf]  ;;  %v15694_v37 = vor.u32 %v17208_v21, %v15693_v11 }
 0xc0e   :  { %10473 = vmatpush.bf16.msrb.mxu0 %v15614_v5  ;;  %10442 = vmatmul.bf16.vlgmr.msra.gmra.mxu1 %v18313_v58  ;;  %v17272_v31 = vld [vmem:[#allocation6 + $0xf94] sm:$0xf0]  ;;  %v15822_v5 = vor.u32 %v17240_v19, %v15821_v22  ;;  %v15677_v45 = vld [vmem:[#allocation6 + $0xd68] sm:$0xf]  ;;  %v10236_v47 = vadd.f32 %v10235_v35, %v10223_v39 }
 0xc0f   :  { %10486 = vmatpush.bf16.msrb.mxu1 %v15742_v43  ;;  %10455 = vmatmul.bf16.vlgmr.msra.gmra.mxu2 %v18308_v14  ;;  %v15549_v43 = vld [vmem:[#allocation6 + $0xc68] sm:$0xf]  ;;  %v15950_v17 = vor.u32 %v17272_v31, %v15949_v24  ;;  %v17236_v62 = vld [vmem:[#allocation6 + $0xe74] sm:$0xf0] }
 0xc10   :  { %10499 = vmatpush.bf16.msrb.mxu2 %v15870_v49  ;;  %10468 = vmatmul.bf16.vlgmr.msra.gmra.mxu3 %v18318_v41  ;;  %v17172_v49 = vld [vmem:[#allocation6 + $0xc74] sm:$0xf0]  ;;  %v15805_v4 = vld [vmem:[#allocation6 + $0xe68] sm:$0xf] }
 0xc11   :  { %10512 = vmatpush.bf16.msrb.mxu3 %v15998_v18  ;;  %v17204_v18 = vld [vmem:[#allocation6 + $0xd74] sm:$0xf0]  ;;  %v15933_v54 = vld [vmem:[#allocation6 + $0xf68] sm:$0xf]  ;;  %v15550_v25 = vor.u32 %v17172_v49, %v15549_v43 }
 0xc12   :  { %10474 = vmatpush.bf16.msrb.mxu0 %v15598_v51  ;;  %v17268_v30 = vld [vmem:[#allocation6 + $0xf74] sm:$0xf0]  ;;  %v15678_v36 = vor.u32 %v17204_v18, %v15677_v45  ;;  %v15806_v51 = vor.u32 %v17236_v62, %v15805_v4  ;;  %v15661_v55 = vld [vmem:[#allocation6 + $0xd48] sm:$0xf]  ;;  %v10248_v40 = vpop.f32.mrf.mxu2 }
 0xc13   :  { %10487 = vmatpush.bf16.msrb.mxu1 %v15726_v38  ;;  %v15533_v38 = vld [vmem:[#allocation6 + $0xc48] sm:$0xf]  ;;  %v15934_v26 = vor.u32 %v17268_v30, %v15933_v54  ;;  %v17232_v50 = vld [vmem:[#allocation6 + $0xe54] sm:$0xf0]  ;;  %v10249_v20 = vadd.f32 %v10248_v40, %v10236_v47  ;;  %v10261_v0 = vpop.f32.mrf.mxu3  ;;  %v10237_v59 = vpop.f32.mrf.mxu1  ;;  %v16866_v40 = vld [vmem:[#allocation6 + $0x2ec] sm:$0xf] }
 0xc14   :  { %10500 = vmatpush.bf16.msrb.mxu2 %v15854_v42  ;;  %v17168_v42 = vld [vmem:[#allocation6 + $0xc54] sm:$0xf0]  ;;  %v15789_v12 = vld [vmem:[#allocation6 + $0xe48] sm:$0xf]  ;;  %v16798_v59 = vld [vmem:[#allocation6 + $0xcc] sm:$0xf] }
 0xc15   :  { %10513 = vmatpush.bf16.msrb.mxu3 %v15982_v6  ;;  %v17200_v6 = vld [vmem:[#allocation6 + $0xd54] sm:$0xf0]  ;;  %v15917_v63 = vld [vmem:[#allocation6 + $0xf48] sm:$0xf]  ;;  %v18393_v15 = vadd.f32 %v10261_v0, %v10249_v20  ;;  %v16898_v20 = vld [vmem:[#allocation6 + $0x3ec] sm:$0xf] }
 0xc16   :  { %10475 = vmatpush.bf16.msrb.mxu0 %v15582_v2  ;;  %v17264_v2 = vld [vmem:[#allocation6 + $0xf54] sm:$0xf0]  ;;  %v15662_v11 = vor.u32 %v17200_v6, %v15661_v55  ;;  %v15517_v21 = vld [vmem:[#allocation6 + $0xc28] sm:$0xf]  ;;  %v14335_v6 = vld [vmem:[#allocation6 + $0x2f8] sm:$0xf0] }
 0xc17   :  { %10488 = vmatpush.bf16.msrb.mxu1 %v15710_v3  ;;  %v10224_v3 = vpop.f32.mrf.mxu0  ;;  %v17164_v22 = vld [vmem:[#allocation6 + $0xc34] sm:$0xf0]  ;;  %v15645_v19 = vld [vmem:[#allocation6 + $0xd28] sm:$0xf]  ;;  %v15918_v1 = vor.u32 %v17264_v2, %v15917_v63  ;;  %v14463_v0 = vld [vmem:[#allocation6 + $0x3f8] sm:$0xf0] }
 0xc18   :  { %10501 = vmatpush.bf16.msrb.mxu2 %v15838_v8  ;;  %v15534_v8 = vor.u32 %v17168_v42, %v15533_v38  ;;  %v17196_v24 = vld [vmem:[#allocation6 + $0xd34] sm:$0xf0]  ;;  %v15773_v31 = vld [vmem:[#allocation6 + $0xe28] sm:$0xf]  ;;  %v16834_v38 = vld [vmem:[#allocation6 + $0x1ec] sm:$0xf] }
 0xc19   :  { %10514 = vmatpush.bf16.msrb.mxu3 %v15966_v13  ;;  %v15790_v13 = vor.u32 %v17232_v50, %v15789_v12  ;;  %v17228_v39 = vld [vmem:[#allocation6 + $0xe34] sm:$0xf0]  ;;  %v15646_v49 = vor.u32 %v17196_v24, %v15645_v19  ;;  %v15757_v18 = vld [vmem:[#allocation6 + $0xe08] sm:$0xf]  ;;  %v16862_v19 = vld [vmem:[#allocation6 + $0x2cc] sm:$0xf] }
 0xc1a   :  { %10476 = vmatpush.bf16.msrb.mxu0 %v15566_v48  ;;  %v15901_v48 = vld [vmem:[#allocation6 + $0xf28] sm:$0xf]  ;;  %v17260_v35 = vld [vmem:[#allocation6 + $0xf34] sm:$0xf0]  ;;  %v15774_v45 = vor.u32 %v17228_v39, %v15773_v31  ;;  %v16894_v24 = vld [vmem:[#allocation6 + $0x3cc] sm:$0xf] }
 0xc1b   :  { %10489 = vmatpush.bf16.msrb.mxu1 %v15694_v37  ;;  %v15518_v37 = vor.u32 %v17164_v22, %v15517_v21  ;;  %v17160_v43 = vld [vmem:[#allocation6 + $0xc14] sm:$0xf0]  ;;  %v15902_v4 = vor.u32 %v17260_v35, %v15901_v48  ;;  %v15885_v54 = vld [vmem:[#allocation6 + $0xf08] sm:$0xf]  ;;  %v10263_v42 = vpop.f32.mrf.mxu3  ;;  %v14466_v21 = vor.u32 %v16898_v20, %v14463_v0  ;;  %v14191_v22 = vld [vmem:[#allocation6 + $0x1d8] sm:$0xf0] }
 0xc1c   :  { %10502 = vmatpush.bf16.msrb.mxu2 %v15822_v5  ;;  %v15501_v5 = vld [vmem:[#allocation6 + $0xc08] sm:$0xf]  ;;  %v17192_v47 = vld [vmem:[#allocation6 + $0xd14] sm:$0xf0]  ;;  %v14447_v31 = vld [vmem:[#allocation6 + $0x3d8] sm:$0xf0] }
 0xc1d   :  { %10515 = vmatpush.bf16.msrb.mxu3 %v15950_v17  ;;  %v15629_v17 = vld [vmem:[#allocation6 + $0xd08] sm:$0xf]  ;;  %v17224_v62 = vld [vmem:[#allocation6 + $0xe14] sm:$0xf0]  ;;  %v15502_v55 = vor.u32 %v17160_v43, %v15501_v5  ;;  %v14047_v5 = vld [vmem:[#allocation6 + $0xb8] sm:$0xf0] }
 0xc1e   :  { %10477 = vmatpush.bf16.msrb.mxu0 %v15550_v25  ;;  %v17256_v30 = vld [vmem:[#allocation6 + $0xf14] sm:$0xf0]  ;;  %v10250_v25 = vpop.f32.mrf.mxu2  ;;  %v15630_v12 = vor.u32 %v17192_v47, %v15629_v17  ;;  %v15758_v50 = vor.u32 %v17224_v62, %v15757_v18  ;;  %v16826_v43 = vld [vmem:[#allocation6 + $0x1ac] sm:$0xf]  ;;  %v14303_v47 = vld [vmem:[#allocation6 + $0x2b8] sm:$0xf0] }
 0xc1f   :  { %10490 = vmatpush.bf16.msrb.mxu1 %v15678_v36  ;;  %v16802_v36 = vld [vmem:[#allocation6 + $0xec] sm:$0xf]  ;;  %v15886_v63 = vor.u32 %v17256_v30, %v15885_v54  ;;  %v14159_v42 = vld [vmem:[#allocation6 + $0x198] sm:$0xf0] }
 0xc20   :  { %10503 = vmatpush.bf16.msrb.mxu2 %v15806_v51  ;;  %v14079_v51 = vld [vmem:[#allocation6 + $0xf8] sm:$0xf0]  ;;  %v16858_v17 = vld [vmem:[#allocation6 + $0x2ac] sm:$0xf] }
 0xc21   :  { %10516 = vmatpush.bf16.msrb.mxu3 %v15934_v26  ;;  %v14207_v26 = vld [vmem:[#allocation6 + $0x1f8] sm:$0xf0]  ;;  %v14082_v2 = vor.u32 %v16802_v36, %v14079_v51  ;;  %v16890_v18 = vld [vmem:[#allocation6 + $0x3ac] sm:$0xf]  ;;  %v14306_v30 = vor.u32 %v16858_v17, %v14303_v47 }
 0xc22   :  { %10478 = vmatpush.bf16.msrb.mxu0 %v15534_v8  ;;  %v14210_v3 = vor.u32 %v16834_v38, %v14207_v26  ;;  %v14338_v8 = vor.u32 %v16866_v40, %v14335_v6  ;;  %v16790_v25 = vld [vmem:[#allocation6 + $0x8c] sm:$0xf]  ;;  %v14031_v36 = vld [vmem:[#allocation6 + $0x98] sm:$0xf0] }
 0xc23   :  { %10491 = vmatpush.bf16.msrb.mxu1 %v15662_v11  ;;  %v14063_v11 = vld [vmem:[#allocation6 + $0xd8] sm:$0xf0]  ;;  %v16822_v51 = vld [vmem:[#allocation6 + $0x18c] sm:$0xf]  ;;  %v14034_v20 = vor.u32 %v16790_v25, %v14031_v36 }
 0xc24   :  { %10504 = vmatpush.bf16.msrb.mxu2 %v15790_v13  ;;  %v16830_v13 = vld [vmem:[#allocation6 + $0x1cc] sm:$0xf]  ;;  %v14066_v39 = vor.u32 %v16798_v59, %v14063_v11  ;;  %v14287_v26 = vld [vmem:[#allocation6 + $0x298] sm:$0xf0] }
 0xc25   :  { %10517 = vmatpush.bf16.msrb.mxu3 %v15918_v1  ;;  %v14319_v1 = vld [vmem:[#allocation6 + $0x2d8] sm:$0xf0]  ;;  %v14194_v48 = vor.u32 %v16830_v13, %v14191_v22  ;;  %v16886_v6 = vld [vmem:[#allocation6 + $0x38c] sm:$0xf] }
 0xc26   :  { %10479 = vmatpush.bf16.msrb.mxu0 %v15518_v37  ;;  %v14322_v35 = vor.u32 %v16862_v19, %v14319_v1  ;;  %v16794_v37 = vld [vmem:[#allocation6 + $0xac] sm:$0xf]  ;;  %v14271_v19 = vld [vmem:[#allocation6 + $0x278] sm:$0xf0] }
 0xc27   :  { %10492 = vmatpush.bf16.msrb.mxu1 %v15646_v49  ;;  %v14450_v49 = vor.u32 %v16894_v24, %v14447_v31  ;;  %v14050_v62 = vor.u32 %v16794_v37, %v14047_v5  ;;  %v16818_v59 = vld [vmem:[#allocation6 + $0x16c] sm:$0xf]  ;;  %v14399_v24 = vld [vmem:[#allocation6 + $0x378] sm:$0xf0] }
 0xc28   :  { %10505 = vmatpush.bf16.msrb.mxu2 %v15774_v45  ;;  %v14175_v45 = vld [vmem:[#allocation6 + $0x1b8] sm:$0xf0]  ;;  %v16850_v22 = vld [vmem:[#allocation6 + $0x26c] sm:$0xf] }
 0xc29   :  { %10518 = vmatpush.bf16.msrb.mxu3 %v15902_v4  ;;  %v14431_v4 = vld [vmem:[#allocation6 + $0x3b8] sm:$0xf0]  ;;  %v14178_v54 = vor.u32 %v16826_v43, %v14175_v45  ;;  %v16882_v1 = vld [vmem:[#allocation6 + $0x36c] sm:$0xf] }
 0xc2a   :  { %10480 = vmatpush.bf16.msrb.mxu0 %v15502_v55  ;;  %v14434_v38 = vor.u32 %v16890_v18, %v14431_v4  ;;  %v16854_v55 = vld [vmem:[#allocation6 + $0x28c] sm:$0xf]  ;;  %v10274_v40 = vpop.f32.mrf.mxu0  ;;  %v14402_v5 = vor.u32 %v16882_v1, %v14399_v24  ;;  %v14255_v17 = vld [vmem:[#allocation6 + $0x258] sm:$0xf0] }
 0xc2b   :  { %10493 = vmatpush.bf16.msrb.mxu1 %v15630_v12  ;;  %v14415_v12 = vld [vmem:[#allocation6 + $0x398] sm:$0xf0]  ;;  %v10287_v0 = vpop.f32.mrf.mxu1  ;;  %v16814_v37 = vld [vmem:[#allocation6 + $0x14c] sm:$0xf] }
 0xc2c   :  { %10506 = vmatpush.bf16.msrb.mxu2 %v15758_v50  ;;  %v10275_v50 = vadd.f32 %v10274_v40, %v18393_v15  ;;  %v14418_v11 = vor.u32 %v16886_v6, %v14415_v12  ;;  %v16846_v45 = vld [vmem:[#allocation6 + $0x24c] sm:$0xf]  ;;  %v14111_v6 = vld [vmem:[#allocation6 + $0x138] sm:$0xf0] }
 0xc2d   :  { %10519 = vmatpush.bf16.msrb.mxu3 %v15886_v63  ;;  %10481 = vmatmul.bf16.vlgmr.msrb.gmra.mxu0 %v18327_v44  ;;  %v14162_v63 = vor.u32 %v16822_v51, %v14159_v42  ;;  %v16878_v4 = vld [vmem:[#allocation6 + $0x34c] sm:$0xf]  ;;  %v14351_v24 = vld [vmem:[#allocation6 + $0x318] sm:$0xf0] }
 0xc2e   :  { %10525 = vmatpush.bf16.msra.mxu0 %v14082_v2  ;;  %10494 = vmatmul.bf16.vlgmr.msrb.gmra.mxu1 %v18337_v16  ;;  %v14290_v2 = vor.u32 %v16854_v55, %v14287_v26  ;;  %v10288_v13 = vadd.f32 %v10287_v0, %v10275_v50  ;;  %v16778_v42 = vld [vmem:[#allocation6 + $0x2c] sm:$0xf]  ;;  %v13983_v55 = vld [vmem:[#allocation6 + $0x38] sm:$0xf0] }
 0xc2f   :  { %10538 = vmatpush.bf16.msra.mxu1 %v14210_v3  ;;  %10507 = vmatmul.bf16.vlgmr.msrb.gmra.mxu2 %v18332_v60  ;;  %v16786_v3 = vld [vmem:[#allocation6 + $0x6c] sm:$0xf]  ;;  %v14239_v50 = vld [vmem:[#allocation6 + $0x238] sm:$0xf0] }
 0xc30   :  { %10551 = vmatpush.bf16.msra.mxu2 %v14338_v8  ;;  %10520 = vmatmul.bf16.vlgmr.msrb.gmra.mxu3 %v18342_v7  ;;  %v14015_v8 = vld [vmem:[#allocation6 + $0x78] sm:$0xf0]  ;;  %v16810_v26 = vld [vmem:[#allocation6 + $0x12c] sm:$0xf] }
 0xc31   :  { %10564 = vmatpush.bf16.msra.mxu3 %v14466_v21  ;;  %v14143_v21 = vld [vmem:[#allocation6 + $0x178] sm:$0xf0]  ;;  %v14018_v31 = vor.u32 %v16786_v3, %v14015_v8  ;;  %v16842_v12 = vld [vmem:[#allocation6 + $0x22c] sm:$0xf]  ;;  %v14114_v8 = vor.u32 %v16810_v26, %v14111_v6 }
 0xc32   :  { %10526 = vmatpush.bf16.msra.mxu0 %v14066_v39  ;;  %v14146_v15 = vor.u32 %v16818_v59, %v14143_v21  ;;  %v14274_v39 = vor.u32 %v16850_v22, %v14271_v19  ;;  %v10300_v43 = vpop.f32.mrf.mxu2  ;;  %v14367_v0 = vld [vmem:[#allocation6 + $0x338] sm:$0xf0]  ;;  %v14242_v59 = vor.u32 %v16842_v12, %v14239_v50  ;;  %v16838_v21 = vld [vmem:[#allocation6 + $0x20c] sm:$0xf] }
 0xc33   :  { %10539 = vmatpush.bf16.msra.mxu1 %v14194_v48  ;;  %v16782_v48 = vld [vmem:[#allocation6 + $0x4c] sm:$0xf]  ;;  %v10301_v47 = vadd.f32 %v10300_v43, %v10288_v13  ;;  %v10313_v18 = vpop.f32.mrf.mxu3  ;;  %v10289_v25 = vpop.f32.mrf.mxu1  ;;  %v13967_v3 = vld [vmem:[#allocation6 + $0x18] sm:$0xf0] }
 0xc34   :  { %10552 = vmatpush.bf16.msra.mxu2 %v14322_v35  ;;  %v13999_v35 = vld [vmem:[#allocation6 + $0x58] sm:$0xf0]  ;;  %v16870_v1 = vld [vmem:[#allocation6 + $0x30c] sm:$0xf] }
 0xc35   :  { %10565 = vmatpush.bf16.msra.mxu3 %v14450_v49  ;;  %v14127_v49 = vld [vmem:[#allocation6 + $0x158] sm:$0xf0]  ;;  %v18400_v36 = vadd.f32 %v10313_v18, %v10301_v47  ;;  %v16994_v43 = vld [vmem:[#allocation6 + $0x6ec] sm:$0xf] }
 0xc36   :  { %10527 = vmatpush.bf16.msra.mxu0 %v14050_v62  ;;  %v14383_v62 = vld [vmem:[#allocation6 + $0x358] sm:$0xf0]  ;;  %v14130_v51 = vor.u32 %v16814_v37, %v14127_v49  ;;  %v17026_v47 = vld [vmem:[#allocation6 + $0x7ec] sm:$0xf] }
 0xc37   :  { %10540 = vmatpush.bf16.msra.mxu1 %v14178_v54  ;;  %v10276_v54 = vpop.f32.mrf.mxu0  ;;  %v14386_v40 = vor.u32 %v16878_v4, %v14383_v62  ;;  %v14095_v13 = vld [vmem:[#allocation6 + $0x118] sm:$0xf0]  ;;  %v14354_v4 = vor.u32 %v16870_v1, %v14351_v24  ;;  %v16926_v25 = vld [vmem:[#allocation6 + $0x4cc] sm:$0xf] }
 0xc38   :  { %10553 = vmatpush.bf16.msra.mxu2 %v14306_v30  ;;  %v14002_v30 = vor.u32 %v16782_v48, %v13999_v35  ;;  %v14223_v19 = vld [vmem:[#allocation6 + $0x218] sm:$0xf0]  ;;  %v16962_v48 = vld [vmem:[#allocation6 + $0x5ec] sm:$0xf] }
 0xc39   :  { %10566 = vmatpush.bf16.msra.mxu3 %v14434_v38  ;;  %v14258_v38 = vor.u32 %v16846_v45, %v14255_v17  ;;  %v14847_v49 = vld [vmem:[#allocation6 + $0x6f8] sm:$0xf0]  ;;  %v14226_v17 = vor.u32 %v16838_v21, %v14223_v19  ;;  %v16990_v26 = vld [vmem:[#allocation6 + $0x6cc] sm:$0xf] }
 0xc3a   :  { %10528 = vmatpush.bf16.msra.mxu0 %v14034_v20  ;;  %v16874_v20 = vld [vmem:[#allocation6 + $0x32c] sm:$0xf]  ;;  %v14975_v18 = vld [vmem:[#allocation6 + $0x7f8] sm:$0xf0] }
 0xc3b   :  { %10541 = vmatpush.bf16.msra.mxu1 %v14162_v63  ;;  %v13986_v63 = vor.u32 %v16778_v42, %v13983_v55  ;;  %v14370_v22 = vor.u32 %v16874_v20, %v14367_v0  ;;  %v10315_v35 = vpop.f32.mrf.mxu3  ;;  %v14978_v42 = vor.u32 %v17026_v47, %v14975_v18  ;;  %v14703_v55 = vld [vmem:[#allocation6 + $0x5d8] sm:$0xf0]  ;;  %v17022_v6 = vld [vmem:[#allocation6 + $0x7cc] sm:$0xf] }
 0xc3c   :  { %10554 = vmatpush.bf16.msra.mxu2 %v14290_v2  ;;  %v16774_v2 = vld [vmem:[#allocation6 + $0xc] sm:$0xf]  ;;  %v14959_v12 = vld [vmem:[#allocation6 + $0x7d8] sm:$0xf0] }
 0xc3d   :  { %10567 = vmatpush.bf16.msra.mxu3 %v14418_v11  ;;  %v16806_v11 = vld [vmem:[#allocation6 + $0x10c] sm:$0xf]  ;;  %v13970_v37 = vor.u32 %v16774_v2, %v13967_v3  ;;  %v14559_v2 = vld [vmem:[#allocation6 + $0x4b8] sm:$0xf0] }
 0xc3e   :  { %10529 = vmatpush.bf16.msra.mxu0 %v14018_v31  ;;  %v10302_v31 = vpop.f32.mrf.mxu2  ;;  %v14098_v45 = vor.u32 %v16806_v11, %v14095_v13  ;;  %v16954_v3 = vld [vmem:[#allocation6 + $0x5ac] sm:$0xf]  ;;  %v14815_v13 = vld [vmem:[#allocation6 + $0x6b8] sm:$0xf0] }
 0xc3f   :  { %10542 = vmatpush.bf16.msra.mxu1 %v14146_v15  ;;  %v16930_v15 = vld [vmem:[#allocation6 + $0x4ec] sm:$0xf]  ;;  %v14527_v18 = vld [vmem:[#allocation6 + $0x478] sm:$0xf0] }
 0xc40   :  { %10555 = vmatpush.bf16.msra.mxu2 %v14274_v39  ;;  %v14591_v39 = vld [vmem:[#allocation6 + $0x4f8] sm:$0xf0]  ;;  %v16986_v11 = vld [vmem:[#allocation6 + $0x6ac] sm:$0xf] }
 0xc41   :  { %10568 = vmatpush.bf16.msra.mxu3 %v14402_v5  ;;  %v14719_v5 = vld [vmem:[#allocation6 + $0x5f8] sm:$0xf0]  ;;  %v14594_v62 = vor.u32 %v16930_v15, %v14591_v39  ;;  %v17018_v21 = vld [vmem:[#allocation6 + $0x7ac] sm:$0xf]  ;;  %v14818_v31 = vor.u32 %v16986_v11, %v14815_v13 }
 0xc42   :  { %10530 = vmatpush.bf16.msra.mxu0 %v14002_v30  ;;  %v14722_v54 = vor.u32 %v16962_v48, %v14719_v5  ;;  %v14850_v30 = vor.u32 %v16994_v43, %v14847_v49  ;;  %v16918_v1 = vld [vmem:[#allocation6 + $0x48c] sm:$0xf]  ;;  %v14543_v15 = vld [vmem:[#allocation6 + $0x498] sm:$0xf0] }
 0xc43   :  { %10543 = vmatpush.bf16.msra.mxu1 %v14130_v51  ;;  %v14575_v51 = vld [vmem:[#allocation6 + $0x4d8] sm:$0xf0]  ;;  %v16950_v39 = vld [vmem:[#allocation6 + $0x58c] sm:$0xf]  ;;  %v14546_v49 = vor.u32 %v16918_v1, %v14543_v15 }
 0xc44   :  { %10556 = vmatpush.bf16.msra.mxu2 %v14258_v38  ;;  %v16958_v38 = vld [vmem:[#allocation6 + $0x5cc] sm:$0xf]  ;;  %v14578_v50 = vor.u32 %v16926_v25, %v14575_v51  ;;  %v18406_v48 = vld [vmem:[#allocation23] sm:$0xf] }
 0xc45   :  { %10569 = vmatpush.bf16.msra.mxu3 %v14386_v40  ;;  %v14831_v40 = vld [vmem:[#allocation6 + $0x6d8] sm:$0xf0]  ;;  %v14706_v20 = vor.u32 %v16958_v38, %v14703_v55  ;;  %v17014_v5 = vld [vmem:[#allocation6 + $0x78c] sm:$0xf] }
 0xc46   :  { %10531 = vmatpush.bf16.msra.mxu0 %v13986_v63  ;;  %v14834_v0 = vor.u32 %v16990_v26, %v14831_v40  ;;  %v16922_v63 = vld [vmem:[#allocation6 + $0x4ac] sm:$0xf]  ;;  %v14927_v43 = vld [vmem:[#allocation6 + $0x798] sm:$0xf0] }
 0xc47   :  { %10544 = vmatpush.bf16.msra.mxu1 %v14114_v8  ;;  %v14962_v8 = vor.u32 %v17022_v6, %v14959_v12  ;;  %v14562_v19 = vor.u32 %v16922_v63, %v14559_v2  ;;  %v16914_v47 = vld [vmem:[#allocation6 + $0x46c] sm:$0xf]  ;;  %v14655_v25 = vld [vmem:[#allocation6 + $0x578] sm:$0xf0] }
 0xc48   :  { %10557 = vmatpush.bf16.msra.mxu2 %v14242_v59  ;;  %v14687_v59 = vld [vmem:[#allocation6 + $0x5b8] sm:$0xf0]  ;;  %v16978_v51 = vld [vmem:[#allocation6 + $0x66c] sm:$0xf]  ;;  %v14530_v40 = vor.u32 %v16914_v47, %v14527_v18 }
 0xc49   :  { %10570 = vmatpush.bf16.msra.mxu3 %v14370_v22  ;;  %v14943_v22 = vld [vmem:[#allocation6 + $0x7b8] sm:$0xf0]  ;;  %v14690_v24 = vor.u32 %v16954_v3, %v14687_v59 }
 0xc4a   :  { %10532 = vmatpush.bf16.msra.mxu0 %v13970_v37  ;;  %v14946_v35 = vor.u32 %v17018_v21, %v14943_v22  ;;  %v16982_v37 = vld [vmem:[#allocation6 + $0x68c] sm:$0xf]  ;;  %v14783_v38 = vld [vmem:[#allocation6 + $0x678] sm:$0xf0] }
 0xc4b   :  { %10545 = vmatpush.bf16.msra.mxu1 %v14098_v45  ;;  %v14911_v55 = vld [vmem:[#allocation6 + $0x778] sm:$0xf0]  ;;  %v14786_v12 = vor.u32 %v16978_v51, %v14783_v38  ;;  %v17006_v21 = vld [vmem:[#allocation6 + $0x74c] sm:$0xf] }
 0xc4c   :  { %10558 = vmatpush.bf16.msra.mxu2 %v14226_v17  ;;  %v14639_v3 = vld [vmem:[#allocation6 + $0x558] sm:$0xf0] }
 0xc4d   :  { %10571 = vmatpush.bf16.msra.mxu3 %v14354_v4  ;;  %10533 = vmatmul.bf16.vlgmr.msra.gmra.mxu0 %v18260_v32  ;;  %v14671_v32 = vld [vmem:[#allocation6 + $0x598] sm:$0xf0]  ;;  %v16946_v4 = vld [vmem:[#allocation6 + $0x56c] sm:$0xf] }
 0xc4e   :  { %10577 = vmatpush.bf16.msrb.mxu0 %v14594_v62  ;;  %10546 = vmatmul.bf16.vlgmr.msra.gmra.mxu1 %v18270_v28  ;;  %v10326_v28 = vpop.f32.mrf.mxu0  ;;  %v14674_v45 = vor.u32 %v16950_v39, %v14671_v32  ;;  %v14658_v6 = vor.u32 %v16946_v4, %v14655_v25  ;;  %v14767_v59 = vld [vmem:[#allocation6 + $0x658] sm:$0xf0]  ;;  %v16906_v39 = vld [vmem:[#allocation6 + $0x42c] sm:$0xf] }
 0xc4f   :  { %10590 = vmatpush.bf16.msrb.mxu1 %v14722_v54  ;;  %10559 = vmatmul.bf16.vlgmr.msra.gmra.mxu2 %v18255_v46  ;;  %v7335_v46 = vperm.slane %v18406_v48, 2  ;;  %v10339_v54 = vpop.f32.mrf.mxu1  ;;  %v14895_v22 = vld [vmem:[#allocation6 + $0x758] sm:$0xf0] }
 0xc50   :  { %10603 = vmatpush.bf16.msrb.mxu2 %v14850_v30  ;;  %10572 = vmatmul.bf16.vlgmr.msra.gmra.mxu3 %v18265_v53  ;;  %v14799_v53 = vld [vmem:[#allocation6 + $0x698] sm:$0xf0]  ;;  %v14930_v30 = vor.u32 %v17014_v5, %v14927_v43  ;;  %v16970_v5 = vld [vmem:[#allocation6 + $0x62c] sm:$0xf] }
 0xc51   :  { %10616 = vmatpush.bf16.msrb.mxu3 %v14978_v42  ;;  %v14802_v17 = vor.u32 %v16982_v37, %v14799_v53  ;;  %v10327_v62 = vadd.f32 %v10326_v28, %v7335_v46  ;;  %v17010_v42 = vld [vmem:[#allocation6 + $0x76c] sm:$0xf]  ;;  %v14495_v46 = vld [vmem:[#allocation6 + $0x438] sm:$0xf0]  ;;  %v14898_v37 = vor.u32 %v17006_v21, %v14895_v22 }
 0xc52   :  { %10578 = vmatpush.bf16.msrb.mxu0 %v14578_v50  ;;  %v16910_v50 = vld [vmem:[#allocation6 + $0x44c] sm:$0xf]  ;;  %v10352_v63 = vpop.f32.mrf.mxu2  ;;  %v14914_v2 = vor.u32 %v17010_v42, %v14911_v55  ;;  %v14623_v53 = vld [vmem:[#allocation6 + $0x538] sm:$0xf0] }
 0xc53   :  { %10591 = vmatpush.bf16.msrb.mxu1 %v14706_v20  ;;  %v10340_v26 = vadd.f32 %v10339_v54, %v10327_v62  ;;  %v14511_v20 = vld [vmem:[#allocation6 + $0x458] sm:$0xf0]  ;;  %v10365_v13 = vpop.f32.mrf.mxu3  ;;  %v16934_v62 = vld [vmem:[#allocation6 + $0x50c] sm:$0xf] }
 0xc54   :  { %10604 = vmatpush.bf16.msrb.mxu2 %v14834_v0  ;;  %v16942_v0 = vld [vmem:[#allocation6 + $0x54c] sm:$0xf]  ;;  %v14751_v43 = vld [vmem:[#allocation6 + $0x638] sm:$0xf0] }
 0xc55   :  { %10617 = vmatpush.bf16.msrb.mxu3 %v14962_v8  ;;  %v16974_v8 = vld [vmem:[#allocation6 + $0x64c] sm:$0xf]  ;;  %v10353_v11 = vadd.f32 %v10352_v63, %v10340_v26  ;;  %v14879_v28 = vld [vmem:[#allocation6 + $0x738] sm:$0xf0]  ;;  %v14754_v4 = vor.u32 %v16970_v5, %v14751_v43 }
 0xc56   :  { %10579 = vmatpush.bf16.msrb.mxu0 %v14562_v19  ;;  %v14514_v19 = vor.u32 %v16910_v50, %v14511_v20  ;;  %v14770_v15 = vor.u32 %v16974_v8, %v14767_v59  ;;  %v14479_v47 = vld [vmem:[#allocation6 + $0x418] sm:$0xf0]  ;;  %v16998_v42 = vld [vmem:[#allocation6 + $0x70c] sm:$0xf] }
 0xc57   :  { %10592 = vmatpush.bf16.msrb.mxu1 %v14690_v24  ;;  %v18409_v1 = vadd.f32 %v10365_v13, %v10353_v11  ;;  %v10328_v24 = vpop.f32.mrf.mxu0  ;;  %v10341_v32 = vpop.f32.mrf.mxu1  ;;  %v14607_v54 = vld [vmem:[#allocation6 + $0x518] sm:$0xf0]  ;;  %v17154_v8 = vld [vmem:[#allocation6 + $0xbec] sm:$0xf] }
 0xc58   :  { %10605 = vmatpush.bf16.msrb.mxu2 %v14818_v31  ;;  %v14642_v31 = vor.u32 %v16942_v0, %v14639_v3  ;;  %v14735_v38 = vld [vmem:[#allocation6 + $0x618] sm:$0xf0]  ;;  %v17122_v0 = vld [vmem:[#allocation6 + $0xaec] sm:$0xf] }
 0xc59   :  { %10618 = vmatpush.bf16.msrb.mxu3 %v14946_v35  ;;  %v16938_v35 = vld [vmem:[#allocation6 + $0x52c] sm:$0xf]  ;;  %v14863_v55 = vld [vmem:[#allocation6 + $0x718] sm:$0xf0] }
 0xc5a   :  { %10580 = vmatpush.bf16.msrb.mxu0 %v14546_v49  ;;  %v17002_v49 = vld [vmem:[#allocation6 + $0x72c] sm:$0xf]  ;;  %v14626_v18 = vor.u32 %v16938_v35, %v14623_v53  ;;  %v10354_v25 = vpop.f32.mrf.mxu2  ;;  %v15231_v20 = vld [vmem:[#allocation6 + $0x9f8] sm:$0xf0]  ;;  %v14866_v11 = vor.u32 %v16998_v42, %v14863_v55 }
 0xc5b   :  { %10593 = vmatpush.bf16.msrb.mxu1 %v14674_v45  ;;  %v14498_v45 = vor.u32 %v16906_v39, %v14495_v46  ;;  %v14882_v51 = vor.u32 %v17002_v49, %v14879_v28  ;;  %v10367_v26 = vpop.f32.mrf.mxu3  ;;  %v15359_v63 = vld [vmem:[#allocation6 + $0xaf8] sm:$0xf0]  ;;  %v17118_v46 = vld [vmem:[#allocation6 + $0xacc] sm:$0xf] }
 0xc5c   :  { %10606 = vmatpush.bf16.msrb.mxu2 %v14802_v17  ;;  %v16902_v17 = vld [vmem:[#allocation6 + $0x40c] sm:$0xf]  ;;  %v15487_v59 = vld [vmem:[#allocation6 + $0xbf8] sm:$0xf0]  ;;  %v15362_v22 = vor.u32 %v17122_v0, %v15359_v63 }
 0xc5d   :  { %10619 = vmatpush.bf16.msrb.mxu3 %v14930_v30  ;;  %v16966_v30 = vld [vmem:[#allocation6 + $0x60c] sm:$0xf]  ;;  %v14482_v50 = vor.u32 %v16902_v17, %v14479_v47  ;;  %v15087_v24 = vld [vmem:[#allocation6 + $0x8d8] sm:$0xf0] }
 0xc5e   :  { %10581 = vmatpush.bf16.msrb.mxu0 %v14530_v40  ;;  %v17058_v40 = vld [vmem:[#allocation6 + $0x8ec] sm:$0xf]  ;;  %v14738_v3 = vor.u32 %v16966_v30, %v14735_v38  ;;  %v15215_v39 = vld [vmem:[#allocation6 + $0x9d8] sm:$0xf0] }
 0xc5f   :  { %10594 = vmatpush.bf16.msrb.mxu1 %v14658_v6  ;;  %v15103_v6 = vld [vmem:[#allocation6 + $0x8f8] sm:$0xf0]  ;;  %v17150_v32 = vld [vmem:[#allocation6 + $0xbcc] sm:$0xf] }
 0xc60   :  { %10607 = vmatpush.bf16.msrb.mxu2 %v14786_v12  ;;  %v17090_v12 = vld [vmem:[#allocation6 + $0x9ec] sm:$0xf]  ;;  %v15106_v13 = vor.u32 %v17058_v40, %v15103_v6  ;;  %v15343_v35 = vld [vmem:[#allocation6 + $0xad8] sm:$0xf0] }
 0xc61   :  { %10620 = vmatpush.bf16.msrb.mxu3 %v14914_v2  ;;  %v14610_v2 = vor.u32 %v16934_v62, %v14607_v54  ;;  %v15234_v21 = vor.u32 %v17090_v12, %v15231_v20  ;;  %v15346_v43 = vor.u32 %v17118_v46, %v15343_v35  ;;  %v17050_v49 = vld [vmem:[#allocation6 + $0x8ac] sm:$0xf]  ;;  %v15071_v28 = vld [vmem:[#allocation6 + $0x8b8] sm:$0xf0] }
 0xc62   :  { %10582 = vmatpush.bf16.msrb.mxu0 %v14514_v19  ;;  %v17054_v19 = vld [vmem:[#allocation6 + $0x8cc] sm:$0xf]  ;;  %v15199_v47 = vld [vmem:[#allocation6 + $0x9b8] sm:$0xf0]  ;;  %v15074_v30 = vor.u32 %v17050_v49, %v15071_v28 }
 0xc63   :  { %10595 = vmatpush.bf16.msrb.mxu1 %v14642_v31  ;;  %v17086_v31 = vld [vmem:[#allocation6 + $0x9cc] sm:$0xf]  ;;  %v15090_v53 = vor.u32 %v17054_v19, %v15087_v24  ;;  %v15455_v54 = vld [vmem:[#allocation6 + $0xbb8] sm:$0xf0] }
 0xc64   :  { %10608 = vmatpush.bf16.msrb.mxu2 %v14770_v15  ;;  %v15490_v15 = vor.u32 %v17154_v8, %v15487_v59  ;;  %v15218_v5 = vor.u32 %v17086_v31, %v15215_v39  ;;  %v17146_v62 = vld [vmem:[#allocation6 + $0xbac] sm:$0xf]  ;;  %v15055_v42 = vld [vmem:[#allocation6 + $0x898] sm:$0xf0] }
 0xc65   :  { %10621 = vmatpush.bf16.msrb.mxu3 %v14898_v37  ;;  %v15471_v37 = vld [vmem:[#allocation6 + $0xbd8] sm:$0xf0]  ;;  %v17046_v38 = vld [vmem:[#allocation6 + $0x88c] sm:$0xf]  ;;  %v15458_v55 = vor.u32 %v17146_v62, %v15455_v54 }
 0xc66   :  { %10583 = vmatpush.bf16.msrb.mxu0 %v14498_v45  ;;  %v17082_v45 = vld [vmem:[#allocation6 + $0x9ac] sm:$0xf]  ;;  %v15474_v17 = vor.u32 %v17150_v32, %v15471_v37  ;;  %v15183_v26 = vld [vmem:[#allocation6 + $0x998] sm:$0xf0] }
 0xc67   :  { %10596 = vmatpush.bf16.msrb.mxu1 %v14626_v18  ;;  %v17114_v18 = vld [vmem:[#allocation6 + $0xaac] sm:$0xf]  ;;  %v15202_v25 = vor.u32 %v17082_v45, %v15199_v47  ;;  %v15311_v6 = vld [vmem:[#allocation6 + $0xa98] sm:$0xf0] }
 0xc68   :  { %10609 = vmatpush.bf16.msrb.mxu2 %v14754_v4  ;;  %v15327_v4 = vld [vmem:[#allocation6 + $0xab8] sm:$0xf0]  ;;  %v17110_v40 = vld [vmem:[#allocation6 + $0xa8c] sm:$0xf] }
 0xc69   :  { %10622 = vmatpush.bf16.msrb.mxu3 %v14882_v51  ;;  %v15330_v51 = vor.u32 %v17114_v18, %v15327_v4  ;;  %v17142_v12 = vld [vmem:[#allocation6 + $0xb8c] sm:$0xf]  ;;  %v15314_v20 = vor.u32 %v17110_v40, %v15311_v6  ;;  %v15039_v63 = vld [vmem:[#allocation6 + $0x878] sm:$0xf0] }
 0xc6a   :  { %10584 = vmatpush.bf16.msrb.mxu0 %v14482_v50  ;;  %v10378_v50 = vpop.f32.mrf.mxu0  ;;  %v17042_v0 = vld [vmem:[#allocation6 + $0x86c] sm:$0xf]  ;;  %v15423_v19 = vld [vmem:[#allocation6 + $0xb78] sm:$0xf0] }
 0xc6b   :  { %10597 = vmatpush.bf16.msrb.mxu1 %v14610_v2  ;;  %v17074_v2 = vld [vmem:[#allocation6 + $0x96c] sm:$0xf]  ;;  %v10391_v8 = vpop.f32.mrf.mxu1  ;;  %v15042_v31 = vor.u32 %v17042_v0, %v15039_v63  ;;  %v15023_v35 = vld [vmem:[#allocation6 + $0x858] sm:$0xf0] }
 0xc6c   :  { %10610 = vmatpush.bf16.msrb.mxu2 %v14738_v3  ;;  %v10379_v3 = vadd.f32 %v10378_v50, %v18409_v1  ;;  %v17038_v46 = vld [vmem:[#allocation6 + $0x84c] sm:$0xf]  ;;  %v15391_v6 = vld [vmem:[#allocation6 + $0xb38] sm:$0xf0] }
 0xc6d   :  { %10623 = vmatpush.bf16.msrb.mxu3 %v14866_v11  ;;  %10585 = vmatmul.bf16.vlgmr.msrb.gmra.mxu0 %v18284_v27  ;;  %v15439_v27 = vld [vmem:[#allocation6 + $0xb98] sm:$0xf0]  ;;  %v17070_v32 = vld [vmem:[#allocation6 + $0x94c] sm:$0xf]  ;;  %v15026_v47 = vor.u32 %v17038_v46, %v15023_v35 }
 0xc6e   :  { %10629 = vmatpush.bf16.msra.mxu0 %v15106_v13  ;;  %10598 = vmatmul.bf16.vlgmr.msrb.gmra.mxu1 %v18294_v10  ;;  %v15442_v59 = vor.u32 %v17142_v12, %v15439_v27  ;;  %v15167_v11 = vld [vmem:[#allocation6 + $0x978] sm:$0xf0]  ;;  %v17106_v13 = vld [vmem:[#allocation6 + $0xa6c] sm:$0xf]  ;;  %v10392_v24 = vadd.f32 %v10391_v8, %v10379_v3 }
 0xc6f   :  { %10642 = vmatpush.bf16.msra.mxu1 %v15234_v21  ;;  %10611 = vmatmul.bf16.vlgmr.msrb.gmra.mxu2 %v18279_v23  ;;  %v17078_v23 = vld [vmem:[#allocation6 + $0x98c] sm:$0xf]  ;;  %v15295_v21 = vld [vmem:[#allocation6 + $0xa78] sm:$0xf0] }
 0xc70   :  { %10655 = vmatpush.bf16.msra.mxu2 %v15362_v22  ;;  %10624 = vmatmul.bf16.vlgmr.msrb.gmra.mxu3 %v18289_v29  ;;  %v15058_v29 = vor.u32 %v17046_v38, %v15055_v42  ;;  %v15186_v10 = vor.u32 %v17078_v23, %v15183_v26  ;;  %v17138_v22 = vld [vmem:[#allocation6 + $0xb6c] sm:$0xf]  ;;  %v15298_v39 = vor.u32 %v17106_v13, %v15295_v21  ;;  %v15135_v23 = vld [vmem:[#allocation6 + $0x938] sm:$0xf0] }
 0xc71   :  { %10668 = vmatpush.bf16.msra.mxu3 %v15490_v15  ;;  %v15170_v15 = vor.u32 %v17074_v2, %v15167_v11  ;;  %v15426_v1 = vor.u32 %v17138_v22, %v15423_v19  ;;  %v17134_v45 = vld [vmem:[#allocation6 + $0xb4c] sm:$0xf]  ;;  %v15263_v26 = vld [vmem:[#allocation6 + $0xa38] sm:$0xf0] }
 0xc72   :  { %10630 = vmatpush.bf16.msra.mxu0 %v15090_v53  ;;  %v10404_v37 = vpop.f32.mrf.mxu2  ;;  %v15151_v53 = vld [vmem:[#allocation6 + $0x958] sm:$0xf0]  ;;  %v10380_v4 = vpop.f32.mrf.mxu0  ;;  %v17130_v40 = vld [vmem:[#allocation6 + $0xb2c] sm:$0xf] }
 0xc73   :  { %10643 = vmatpush.bf16.msra.mxu1 %v15218_v5  ;;  %v17102_v5 = vld [vmem:[#allocation6 + $0xa4c] sm:$0xf]  ;;  %v10405_v49 = vadd.f32 %v10404_v37, %v10392_v24  ;;  %v10417_v28 = vpop.f32.mrf.mxu3  ;;  %v15154_v62 = vor.u32 %v17070_v32, %v15151_v53  ;;  %v10393_v38 = vpop.f32.mrf.mxu1  ;;  %v15119_v0 = vld [vmem:[#allocation6 + $0x918] sm:$0xf0]  ;;  %v15394_v3 = vor.u32 %v17130_v40, %v15391_v6 }
 0xc74   :  { %10656 = vmatpush.bf16.msra.mxu2 %v15346_v43  ;;  %v15279_v43 = vld [vmem:[#allocation6 + $0xa58] sm:$0xf0]  ;;  %v17030_v27 = vld [vmem:[#allocation6 + $0x80c] sm:$0xf] }
 0xc75   :  { %10669 = vmatpush.bf16.msra.mxu3 %v15474_v17  ;;  %v15407_v17 = vld [vmem:[#allocation6 + $0xb58] sm:$0xf0]  ;;  %v18416_v18 = vadd.f32 %v10417_v28, %v10405_v49  ;;  %v15282_v54 = vor.u32 %v17102_v5, %v15279_v43  ;;  %v17094_v63 = vld [vmem:[#allocation6 + $0xa0c] sm:$0xf] }
 0xc76   :  { %10631 = vmatpush.bf16.msra.mxu0 %v15074_v30  ;;  %v17034_v30 = vld [vmem:[#allocation6 + $0x82c] sm:$0xf]  ;;  %v15410_v42 = vor.u32 %v17134_v45, %v15407_v17  ;;  %v15247_v8 = vld [vmem:[#allocation6 + $0xa18] sm:$0xf0] }
 0xc77   :  { %10644 = vmatpush.bf16.msra.mxu1 %v15202_v25  ;;  %v15007_v25 = vld [vmem:[#allocation6 + $0x838] sm:$0xf0]  ;;  %v17186_v21 = vld [vmem:[#allocation6 + $0xcec] sm:$0xf]  ;;  %v15250_v35 = vor.u32 %v17094_v63, %v15247_v8 }
 0xc78   :  { %10657 = vmatpush.bf16.msra.mxu2 %v15330_v51  ;;  %v17066_v51 = vld [vmem:[#allocation6 + $0x92c] sm:$0xf]  ;;  %v15010_v12 = vor.u32 %v17034_v30, %v15007_v25  ;;  %v15375_v11 = vld [vmem:[#allocation6 + $0xb18] sm:$0xf0] }
 0xc79   :  { %10670 = vmatpush.bf16.msra.mxu3 %v15458_v55  ;;  %v17098_v55 = vld [vmem:[#allocation6 + $0xa2c] sm:$0xf]  ;;  %v15138_v50 = vor.u32 %v17066_v51, %v15135_v23  ;;  %v15615_v22 = vld [vmem:[#allocation6 + $0xcf8] sm:$0xf0] }
 0xc7a   :  { %10632 = vmatpush.bf16.msra.mxu0 %v15058_v29  ;;  %v14991_v29 = vld [vmem:[#allocation6 + $0x818] sm:$0xf0]  ;;  %v10406_v2 = vpop.f32.mrf.mxu2  ;;  %v17218_v19 = vld [vmem:[#allocation6 + $0xdec] sm:$0xf]  ;;  %v15618_v53 = vor.u32 %v17186_v21, %v15615_v22 }
 0xc7b   :  { %10645 = vmatpush.bf16.msra.mxu1 %v15186_v10  ;;  %v15266_v10 = vor.u32 %v17098_v55, %v15263_v26  ;;  %v10419_v13 = vpop.f32.mrf.mxu3  ;;  %v14994_v24 = vor.u32 %v17030_v27, %v14991_v29  ;;  %v17282_v32 = vld [vmem:[#allocation6 + $0xfec] sm:$0xf]  ;;  %v15999_v37 = vld [vmem:[#allocation6 + $0xff8] sm:$0xf0] }
 0xc7c   :  { %10658 = vmatpush.bf16.msra.mxu2 %v15314_v20  ;;  %v17062_v20 = vld [vmem:[#allocation6 + $0x90c] sm:$0xf]  ;;  %v15599_v28 = vld [vmem:[#allocation6 + $0xcd8] sm:$0xf0]  ;;  %v16002_v17 = vor.u32 %v17282_v32, %v15999_v37 }
 0xc7d   :  { %10671 = vmatpush.bf16.msra.mxu3 %v15442_v59  ;;  %v17126_v59 = vld [vmem:[#allocation6 + $0xb0c] sm:$0xf]  ;;  %v15122_v46 = vor.u32 %v17062_v20, %v15119_v0  ;;  %v15983_v30 = vld [vmem:[#allocation6 + $0xfd8] sm:$0xf0] }
 0xc7e   :  { %10633 = vmatpush.bf16.msra.mxu0 %v15042_v31  ;;  %v15743_v31 = vld [vmem:[#allocation6 + $0xdf8] sm:$0xf0]  ;;  %v17182_v49 = vld [vmem:[#allocation6 + $0xccc] sm:$0xf] }
 0xc7f   :  { %10646 = vmatpush.bf16.msra.mxu1 %v15170_v15  ;;  %v17250_v15 = vld [vmem:[#allocation6 + $0xeec] sm:$0xf]  ;;  %v15746_v5 = vor.u32 %v17218_v19, %v15743_v31  ;;  %v15602_v25 = vor.u32 %v17182_v49, %v15599_v28  ;;  %v15583_v23 = vld [vmem:[#allocation6 + $0xcb8] sm:$0xf0] }
 0xc80   :  { %10659 = vmatpush.bf16.msra.mxu2 %v15298_v39  ;;  %v15871_v39 = vld [vmem:[#allocation6 + $0xef8] sm:$0xf0]  ;;  %v17214_v45 = vld [vmem:[#allocation6 + $0xdcc] sm:$0xf] }
 0xc81   :  { %10672 = vmatpush.bf16.msra.mxu3 %v15426_v1  ;;  %v15378_v1 = vor.u32 %v17126_v59, %v15375_v11  ;;  %v15874_v43 = vor.u32 %v17250_v15, %v15871_v39  ;;  %v17246_v4 = vld [vmem:[#allocation6 + $0xecc] sm:$0xf]  ;;  %v15711_v40 = vld [vmem:[#allocation6 + $0xdb8] sm:$0xf0] }
 0xc82   :  { %10634 = vmatpush.bf16.msra.mxu0 %v15026_v47  ;;  %v15727_v47 = vld [vmem:[#allocation6 + $0xdd8] sm:$0xf0]  ;;  %v17210_v55 = vld [vmem:[#allocation6 + $0xdac] sm:$0xf] }
 0xc83   :  { %10647 = vmatpush.bf16.msra.mxu1 %v15154_v62  ;;  %v15855_v62 = vld [vmem:[#allocation6 + $0xed8] sm:$0xf0]  ;;  %v15730_v51 = vor.u32 %v17214_v45, %v15727_v47  ;;  %v17242_v6 = vld [vmem:[#allocation6 + $0xeac] sm:$0xf] }
 0xc84   :  { %10660 = vmatpush.bf16.msra.mxu2 %v15282_v54  ;;  %v17278_v54 = vld [vmem:[#allocation6 + $0xfcc] sm:$0xf]  ;;  %v15858_v38 = vor.u32 %v17246_v4, %v15855_v62  ;;  %v15967_v29 = vld [vmem:[#allocation6 + $0xfb8] sm:$0xf0] }
 0xc85   :  { %10673 = vmatpush.bf16.msra.mxu3 %v15410_v42  ;;  %v17178_v42 = vld [vmem:[#allocation6 + $0xcac] sm:$0xf]  ;;  %v15986_v26 = vor.u32 %v17278_v54, %v15983_v30  ;;  %v15951_v11 = vld [vmem:[#allocation6 + $0xf98] sm:$0xf0] }
 0xc86   :  { %10635 = vmatpush.bf16.msra.mxu0 %v15010_v12  ;;  %v15839_v12 = vld [vmem:[#allocation6 + $0xeb8] sm:$0xf0]  ;;  %v17274_v27 = vld [vmem:[#allocation6 + $0xfac] sm:$0xf] }
 0xc87   :  { %10648 = vmatpush.bf16.msra.mxu1 %v15138_v50  ;;  %v15586_v50 = vor.u32 %v17178_v42, %v15583_v23  ;;  %v15842_v20 = vor.u32 %v17242_v6, %v15839_v12  ;;  %v17174_v0 = vld [vmem:[#allocation6 + $0xc8c] sm:$0xf]  ;;  %v15970_v2 = vor.u32 %v17274_v27, %v15967_v29  ;;  %v15551_v31 = vld [vmem:[#allocation6 + $0xc78] sm:$0xf0] }
 0xc88   :  { %10661 = vmatpush.bf16.msra.mxu2 %v15266_v10  ;;  %v15714_v10 = vor.u32 %v17210_v55, %v15711_v40  ;;  %v17206_v63 = vld [vmem:[#allocation6 + $0xd8c] sm:$0xf]  ;;  %v15807_v37 = vld [vmem:[#allocation6 + $0xe78] sm:$0xf0] }
 0xc89   :  { %10674 = vmatpush.bf16.msra.mxu3 %v15394_v3  ;;  %v15695_v3 = vld [vmem:[#allocation6 + $0xd98] sm:$0xf0]  ;;  %v17238_v8 = vld [vmem:[#allocation6 + $0xe8c] sm:$0xf] }
 0xc8a   :  { %10636 = vmatpush.bf16.msra.mxu0 %v14994_v24  ;;  %v10430_v59 = vpop.f32.mrf.mxu0  ;;  %v15698_v22 = vor.u32 %v17206_v63, %v15695_v3  ;;  %v17170_v24 = vld [vmem:[#allocation6 + $0xc6c] sm:$0xf]  ;;  %v15535_v28 = vld [vmem:[#allocation6 + $0xc58] sm:$0xf0] }
 0xc8b   :  { %10649 = vmatpush.bf16.msra.mxu1 %v15122_v46  ;;  %v10443_v21 = vpop.f32.mrf.mxu1  ;;  %v17202_v15 = vld [vmem:[#allocation6 + $0xd6c] sm:$0xf]  ;;  %v15663_v4 = vld [vmem:[#allocation6 + $0xd58] sm:$0xf0] }
 0xc8c   :  { %10662 = vmatpush.bf16.msra.mxu2 %v15250_v35  ;;  %v15679_v35 = vld [vmem:[#allocation6 + $0xd78] sm:$0xf0]  ;;  %v17234_v32 = vld [vmem:[#allocation6 + $0xe6c] sm:$0xf] }
 0xc8d   :  { %10675 = vmatpush.bf16.msra.mxu3 %v15378_v1  ;;  %10637 = vmatmul.bf16.vlgmr.msra.gmra.mxu0 %v18303_v33  ;;  %v15567_v33 = vld [vmem:[#allocation6 + $0xc98] sm:$0xf0]  ;;  %v17266_v1 = vld [vmem:[#allocation6 + $0xf6c] sm:$0xf] }
 0xc8e   :  { %10681 = vmatpush.bf16.msrb.mxu0 %v15618_v53  ;;  %10650 = vmatmul.bf16.vlgmr.msra.gmra.mxu1 %v18313_v58  ;;  %v17270_v58 = vld [vmem:[#allocation6 + $0xf8c] sm:$0xf]  ;;  %v15570_v13 = vor.u32 %v17174_v0, %v15567_v33  ;;  %v15935_v53 = vld [vmem:[#allocation6 + $0xf78] sm:$0xf0] }
 0xc8f   :  { %10694 = vmatpush.bf16.msrb.mxu1 %v15746_v5  ;;  %10663 = vmatmul.bf16.vlgmr.msra.gmra.mxu2 %v18308_v14  ;;  %v15823_v14 = vld [vmem:[#allocation6 + $0xe98] sm:$0xf0]  ;;  %v15954_v39 = vor.u32 %v17270_v58, %v15951_v11  ;;  %v15554_v5 = vor.u32 %v17170_v24, %v15551_v31  ;;  %v17166_v49 = vld [vmem:[#allocation6 + $0xc4c] sm:$0xf] }
 0xc90   :  { %10707 = vmatpush.bf16.msrb.mxu2 %v15874_v43  ;;  %10676 = vmatmul.bf16.vlgmr.msra.gmra.mxu3 %v18318_v41  ;;  %v10431_v41 = vadd.f32 %v10430_v59, %v18416_v18  ;;  %v15826_v19 = vor.u32 %v17238_v8, %v15823_v14  ;;  %v15682_v18 = vor.u32 %v17202_v15, %v15679_v35  ;;  %v17198_v45 = vld [vmem:[#allocation6 + $0xd4c] sm:$0xf]  ;;  %v15791_v54 = vld [vmem:[#allocation6 + $0xe58] sm:$0xf0] }
 0xc91   :  { %10720 = vmatpush.bf16.msrb.mxu3 %v16002_v17  ;;  %v15810_v43 = vor.u32 %v17234_v32, %v15807_v37  ;;  %v15938_v17 = vor.u32 %v17266_v1, %v15935_v53  ;;  %v17230_v62 = vld [vmem:[#allocation6 + $0xe4c] sm:$0xf]  ;;  %v15538_v23 = vor.u32 %v17166_v49, %v15535_v28  ;;  %v15666_v40 = vor.u32 %v17198_v45, %v15663_v4  ;;  %v15519_v27 = vld [vmem:[#allocation6 + $0xc38] sm:$0xf0] }
 0xc92   :  { %10682 = vmatpush.bf16.msrb.mxu0 %v15602_v25  ;;  %v10444_v46 = vadd.f32 %v10443_v21, %v10431_v41  ;;  %v10456_v47 = vpop.f32.mrf.mxu2  ;;  %v10432_v42 = vpop.f32.mrf.mxu0  ;;  %v15794_v6 = vor.u32 %v17230_v62, %v15791_v54  ;;  %v17162_v12 = vld [vmem:[#allocation6 + $0xc2c] sm:$0xf]  ;;  %v15775_v0 = vld [vmem:[#allocation6 + $0xe38] sm:$0xf0] }
 0xc93   :  { %10695 = vmatpush.bf16.msrb.mxu1 %v15730_v51  ;;  %v10469_v25 = vpop.f32.mrf.mxu3  ;;  %v17262_v51 = vld [vmem:[#allocation6 + $0xf4c] sm:$0xf]  ;;  %v10445_v55 = vpop.f32.mrf.mxu1  ;;  %v15903_v63 = vld [vmem:[#allocation6 + $0xf38] sm:$0xf0] }
 0xc94   :  { %10708 = vmatpush.bf16.msrb.mxu2 %v15858_v38  ;;  %v10457_v30 = vadd.f32 %v10456_v47, %v10444_v46  ;;  %v15919_v38 = vld [vmem:[#allocation6 + $0xf58] sm:$0xf0]  ;;  %v17194_v29 = vld [vmem:[#allocation6 + $0xd2c] sm:$0xf] }
 0xc95   :  { %10721 = vmatpush.bf16.msrb.mxu3 %v15986_v26  ;;  %v17258_v33 = vld [vmem:[#allocation6 + $0xf2c] sm:$0xf]  ;;  %v15503_v59 = vld [vmem:[#allocation6 + $0xc18] sm:$0xf0] }
 0xc96   :  { %10683 = vmatpush.bf16.msrb.mxu0 %v15586_v50  ;;  %v10470_v26 = vadd.f32 %v10469_v25, %v10457_v30  ;;  %v15922_v50 = vor.u32 %v17262_v51, %v15919_v38  ;;  %v17158_v14 = vld [vmem:[#allocation6 + $0xc0c] sm:$0xf]  ;;  %v15906_v11 = vor.u32 %v17258_v33, %v15903_v63  ;;  %v15631_v41 = vld [vmem:[#allocation6 + $0xd18] sm:$0xf0] }
 0xc97   :  { %10696 = vmatpush.bf16.msrb.mxu1 %v15714_v10  ;;  %v15647_v10 = vld [vmem:[#allocation6 + $0xd38] sm:$0xf0]  ;;  %v17190_v58 = vld [vmem:[#allocation6 + $0xd0c] sm:$0xf]  ;;  %v15506_v15 = vor.u32 %v17158_v14, %v15503_v59 }
 0xc98   :  { %10709 = vmatpush.bf16.msrb.mxu2 %v15842_v20  ;;  %v17226_v20 = vld [vmem:[#allocation6 + $0xe2c] sm:$0xf]  ;;  %v15650_v3 = vor.u32 %v17194_v29, %v15647_v10  ;;  %v15759_v21 = vld [vmem:[#allocation6 + $0xe18] sm:$0xf0] }
 0xc99   :  { %10722 = vmatpush.bf16.msrb.mxu3 %v15970_v2  ;;  %v15522_v2 = vor.u32 %v17162_v12, %v15519_v27  ;;  %v15778_v8 = vor.u32 %v17226_v20, %v15775_v0  ;;  %v15887_v24 = vld [vmem:[#allocation6 + $0xf18] sm:$0xf0] }
 0xc9a   :  { %10684 = vmatpush.bf16.msrb.mxu0 %v15570_v13  ;;  %v17222_v13 = vld [vmem:[#allocation6 + $0xe0c] sm:$0xf] }
 0xc9b   :  { %10697 = vmatpush.bf16.msrb.mxu1 %v15698_v22  ;;  %v10458_v22 = vpop.f32.mrf.mxu2  ;;  %v10471_v31 = vpop.f32.mrf.mxu3  ;;  %v15762_v46 = vor.u32 %v17222_v13, %v15759_v21 }
 0xc9c   :  { %10710 = vmatpush.bf16.msrb.mxu2 %v15826_v19  ;;  %v17254_v19 = vld [vmem:[#allocation6 + $0xf0c] sm:$0xf]  ;;  %v10734_v31 = vadd.f32 %v18400_v36, %v18096_v56 }
 0xc9d   :  { %10723 = vmatpush.bf16.msrb.mxu3 %v15954_v39  ;;  %v15634_v39 = vor.u32 %v17190_v58, %v15631_v41  ;;  %v15890_v35 = vor.u32 %v17254_v19, %v15887_v24 }
 0xc9e   :  { %10685 = vmatpush.bf16.msrb.mxu0 %v15554_v5 }
 0xc9f   :  { %10698 = vmatpush.bf16.msrb.mxu1 %v15682_v18 }
 0xca0   :  { %10711 = vmatpush.bf16.msrb.mxu2 %v15810_v43 }
 0xca1   :  { %10724 = vmatpush.bf16.msrb.mxu3 %v15938_v17 }
 0xca2   :  { %10686 = vmatpush.bf16.msrb.mxu0 %v15538_v23 }
 0xca3   :  { %10699 = vmatpush.bf16.msrb.mxu1 %v15666_v40 }
 0xca4   :  { %10712 = vmatpush.bf16.msrb.mxu2 %v15794_v6 }
 0xca5   :  { %10725 = vmatpush.bf16.msrb.mxu3 %v15922_v50 }
 0xca6   :  { %10687 = vmatpush.bf16.msrb.mxu0 %v15522_v2 }
 0xca7   :  { %10700 = vmatpush.bf16.msrb.mxu1 %v15650_v3 }
 0xca8   :  { %10713 = vmatpush.bf16.msrb.mxu2 %v15778_v8 }
 0xca9   :  { %10726 = vmatpush.bf16.msrb.mxu3 %v15906_v11 }
 0xcaa   :  { %10688 = vmatpush.bf16.msrb.mxu0 %v15506_v15  ;;  %v10482_v32 = vpop.f32.mrf.mxu0  ;;  %v10733_v15 = vadd.f32 %v18373_v52, %v18094_v34 }
 0xcab   :  { %10701 = vmatpush.bf16.msrb.mxu1 %v15634_v39  ;;  %v10483_v37 = vadd.f32 %v10482_v32, %v10470_v26  ;;  %v10495_v1 = vpop.f32.mrf.mxu1  ;;  %v10738_v32 = vsel %vm1745_vm0, %v10734_v31, 0.0 }
 0xcac   :  { %10714 = vmatpush.bf16.msrb.mxu2 %v15762_v46 }
 0xcad   :  { %10727 = vmatpush.bf16.msrb.mxu3 %v15890_v35  ;;  %10689 = vmatmul.bf16.vlgmr.msrb.gmra.mxu0 %v18327_v44  ;;  %v10496_v53 = vadd.f32 %v10495_v1, %v10483_v37  ;;  %v7336_v44 = vperm.slane %v18406_v48, 3 }
 0xcae   :  { %10702 = vmatmul.bf16.vlgmr.msrb.gmra.mxu1 %v18337_v16 }
 0xcaf   :  { %10715 = vmatmul.bf16.vlgmr.msrb.gmra.mxu2 %v18332_v60 }
 0xcb0   :  { %10728 = vmatmul.bf16.vlgmr.msrb.gmra.mxu3 %v18342_v7 }
 0xcb2   :  { %v10508_v5 = vpop.f32.mrf.mxu2  ;;  %v10484_v49 = vpop.f32.mrf.mxu0 }
 0xcb3   :  { %v10509_v18 = vadd.f32 %v10508_v5, %v10496_v53  ;;  %v10521_v43 = vpop.f32.mrf.mxu3  ;;  %v10497_v28 = vpop.f32.mrf.mxu1 }
 0xcb5   :  { %v10522_v45 = vadd.f32 %v10521_v43, %v10509_v18  ;;  %v10737_v18 = vsel %vm1745_vm0, %v10733_v15, 0.0 }
 0xcb6   :  { %v10739_v28 = vadd.f32 %v10738_v32, %v10737_v18 }
 0xcb7   :  { %v10735_v39 = vadd.f32 %v10522_v45, %v18098_v57 }
 0xcb9   :  { %v10740_v49 = vsel %vm1745_vm0, %v10735_v39, 0.0 }
 0xcba   :  { %v10510_v17 = vpop.f32.mrf.mxu2  ;;  %v10741_v36 = vadd.f32 %v10740_v49, %v10739_v28 }
 0xcbb   :  { %v10523_v47 = vpop.f32.mrf.mxu3 }
 0xcca   :  { %v10534_v4 = vpop.f32.mrf.mxu0 }
 0xccb   :  { %v10535_v16 = vadd.f32 %v10534_v4, %v7336_v44  ;;  %v10547_v62 = vpop.f32.mrf.mxu1 }
 0xccd   :  { %v10548_v60 = vadd.f32 %v10547_v62, %v10535_v16 }
 0xcd2   :  { %v10560_v54 = vpop.f32.mrf.mxu2  ;;  %v10536_v51 = vpop.f32.mrf.mxu0 }
 0xcd3   :  { %v10561_v7 = vadd.f32 %v10560_v54, %v10548_v60  ;;  %v10573_v30 = vpop.f32.mrf.mxu3  ;;  %v10549_v38 = vpop.f32.mrf.mxu1 }
 0xcd5   :  { %v10574_v25 = vadd.f32 %v10573_v30, %v10561_v7 }
 0xcda   :  { %v10562_v42 = vpop.f32.mrf.mxu2 }
 0xcdb   :  { %v10575_v23 = vpop.f32.mrf.mxu3 }
 0xcea   :  { %v10586_v55 = vpop.f32.mrf.mxu0 }
 0xceb   :  { %v10599_v26 = vpop.f32.mrf.mxu1  ;;  %v10587_v20 = vadd.f32 %v10586_v55, %v10574_v25 }
 0xced   :  { %v10600_v2 = vadd.f32 %v10599_v26, %v10587_v20  ;;  %v10794_v20 = vld [vmem:[#allocation26] sm:$0xf] }
 0xcf2   :  { %v10612_v40 = vpop.f32.mrf.mxu2  ;;  %v10588_v12 = vpop.f32.mrf.mxu0 }
 0xcf3   :  { %v10625_v6 = vpop.f32.mrf.mxu3  ;;  %v10601_v27 = vpop.f32.mrf.mxu1  ;;  %v10613_v8 = vadd.f32 %v10612_v40, %v10600_v2 }
 0xcf5   :  { %v10626_v58 = vadd.f32 %v10625_v6, %v10613_v8 }
 0xcfa   :  { %v10614_v29 = vpop.f32.mrf.mxu2 }
 0xcfb   :  { %v10627_v48 = vpop.f32.mrf.mxu3 }
 0xd0a   :  { %v10638_v50 = vpop.f32.mrf.mxu0 }
 0xd0b   :  { %v10651_v10 = vpop.f32.mrf.mxu1  ;;  %v10639_v11 = vadd.f32 %v10638_v50, %v10626_v58  ;;  %v10780_v50 = vld [vmem:[#allocation25] sm:$0xf] }
 0xd0c   :  { %v10784_v2 = vperm.slane %v10780_v50, 2 }
 0xd0d   :  { %v10652_v41 = vadd.f32 %v10651_v10, %v10639_v11 }
 0xd12   :  { %v10664_v0 = vpop.f32.mrf.mxu2  ;;  %v10640_v63 = vpop.f32.mrf.mxu0 }
 0xd13   :  { %v10677_v33 = vpop.f32.mrf.mxu3  ;;  %v10653_v3 = vpop.f32.mrf.mxu1  ;;  %v10665_v13 = vadd.f32 %v10664_v0, %v10652_v41  ;;  %v10783_v63 = vperm.slane %v10780_v50, 1 }
 0xd14   :  { %v10785_v3 = vperm.slane %v10780_v50, 3 }
 0xd15   :  { %v10678_v21 = vadd.f32 %v10677_v33, %v10665_v13  ;;  %v10782_v33 = vperm.slane %v10780_v50, 0 }
 0xd1a   :  { %v10666_v14 = vpop.f32.mrf.mxu2 }
 0xd1b   :  { %v10679_v59 = vpop.f32.mrf.mxu3  ;;  %v10796_v14 = vperm.slane %v10794_v20, 0 }
 0xd1c   :  { %v10798_v59 = vperm.slane %v10794_v20, 2 }
 0xd2a   :  { %v10690_v22 = vpop.f32.mrf.mxu0 }
 0xd2b   :  { %v10703_v19 = vpop.f32.mrf.mxu1  ;;  %v10691_v24 = vadd.f32 %v10690_v22, %v10678_v21  ;;  %v10799_v21 = vperm.slane %v10794_v20, 3 }
 0xd2d   :  { %v10704_v46 = vadd.f32 %v10703_v19, %v10691_v24 }
 0xd32   :  { %v10716_v35 = vpop.f32.mrf.mxu2  ;;  %v10692_v53 = vpop.f32.mrf.mxu0 }
 0xd33   :  { %v10717_v37 = vadd.f32 %v10716_v35, %v10704_v46  ;;  %v10729_v1 = vpop.f32.mrf.mxu3  ;;  %v10705_v5 = vpop.f32.mrf.mxu1 }
 0xd35   :  { %v10730_v43 = vadd.f32 %v10729_v1, %v10717_v37 }
 0xd37   :  { %v10736_v56 = vadd.f32 %v10730_v43, %v18100_v61 }
 0xd39   :  { %v10742_v34 = vsel %vm1745_vm0, %v10736_v56, 0.0 }
 0xd3a   :  { %v10718_v57 = vpop.f32.mrf.mxu2  ;;  %v10743_v52 = vadd.f32 %v10742_v34, %v10741_v36 }
 0xd3b   :  { %v10731_v45 = vpop.f32.mrf.mxu3 }
 0xd3c   :  { %10744 = vadd.xlane.f32.xlu0 %v10743_v52 }
 0xdaf   :  { %v10745_v17 = vpop.xlane.xlu0 %10744 }
 0xdb0   :  { %v10746_v47 = vmul.f32 %v10745_v17, %v18080_v9 }
 0xdb2   :  { %v10747_v44 = vsub.f32 %v10733_v15, %v10746_v47  ;;  %v10748_v4 = vsub.f32 %v10734_v31, %v10746_v47  ;;  %v10749_v16 = vsub.f32 %v10735_v39, %v10746_v47  ;;  %v10750_v62 = vsub.f32 %v10736_v56, %v10746_v47 }
 0xdb4   :  { %v10751_v60 = vmul.f32 %v10747_v44, %v10747_v44  ;;  %v10752_v54 = vmul.f32 %v10748_v4, %v10748_v4  ;;  %v10753_v7 = vmul.f32 %v10749_v16, %v10749_v16  ;;  %v10754_v30 = vmul.f32 %v10750_v62, %v10750_v62 }
 0xdb6   :  { %v10755_v61 = vsel %vm1745_vm0, %v10751_v60, 0.0  ;;  %v10756_v25 = vsel %vm1745_vm0, %v10752_v54, 0.0  ;;  %v10758_v38 = vsel %vm1745_vm0, %v10753_v7, 0.0  ;;  %v10760_v23 = vsel %vm1745_vm0, %v10754_v30, 0.0 }
 0xdb7   :  { %v10757_v51 = vadd.f32 %v10756_v25, %v10755_v61 }
 0xdb9   :  { %v10759_v42 = vadd.f32 %v10758_v38, %v10757_v51 }
 0xdbb   :  { %v10761_v55 = vadd.f32 %v10760_v23, %v10759_v42 }
 0xdbd   :  { %10762 = vadd.xlane.f32.xlu0 %v10761_v55 }
 0xe30   :  { %v10763_v26 = vpop.xlane.xlu0 %10762 }
 0xe31   :  { %v10764_v40 = vmul.f32 %v10763_v26, %v18080_v9  ;;  %v10797_v9 = vperm.slane %v10794_v20, 1 }
 0xe33   :  { %v10765_v6 = vadd.f32 1e-05, %v10764_v40 }
 0xe35   :  { %17377 = vrsqrt.f32 %v10765_v6  ;;  %vm10772_vm9 = vweird.f32 %v10765_v6 }
 0xe3b   :  { %v17378_v12 = vpop.eup %17377 }
 0xe3c   :  { %v10767_v27 = vmul.f32 %v17378_v12, %v10765_v6  ;;  %vm10773_vm8 = vweird.f32 %v17378_v12 }
 0xe3d   :  { %vm10774_vm0 = vmor %vm10772_vm9, %vm10773_vm8 }
 0xe3e   :  { %v10768_v29 = vmul.f32 %v17378_v12, %v10767_v27 }
 0xe40   :  { %v10769_v48 = vmul.f32 0.5, %v10768_v29 }
 0xe42   :  { %v10770_v10 = vsub.f32 1.5, %v10769_v48 }
 0xe44   :  { %v10771_v0 = vmul.f32 %v17378_v12, %v10770_v10 }
 0xe46   :  { %v10775_v8 = vsel %vm10774_vm0, %v17378_v12, %v10771_v0 }
 0xe47   :  { %v10776_v58 = vmul.f32 %v10775_v8, %v10747_v44  ;;  %v10777_v11 = vmul.f32 %v10775_v8, %v10748_v4  ;;  %v10778_v41 = vmul.f32 %v10775_v8, %v10749_v16  ;;  %v10779_v13 = vmul.f32 %v10775_v8, %v10750_v62 }
 0xe49   :  { %v10790_v22 = vmul.f32 %v10782_v33, %v10776_v58  ;;  %v10791_v19 = vmul.f32 %v10783_v63, %v10777_v11  ;;  %v10792_v24 = vmul.f32 %v10784_v2, %v10778_v41  ;;  %v10793_v31 = vmul.f32 %v10785_v3, %v10779_v13 }
 0xe4b   :  { %v10804_v15 = vadd.f32 %v10796_v14, %v10790_v22  ;;  %v10805_v39 = vadd.f32 %v10797_v9, %v10791_v19  ;;  %v10806_v46 = vadd.f32 %v10798_v59, %v10792_v24  ;;  %v10807_v35 = vadd.f32 %v10799_v21, %v10793_v31 }
 0xe4d   :  { %10808 = vst [vmem:[#allocation28] sm:$0x1f] %v10804_v15 }
 0xe4e   :  { %10809 = vst [vmem:[#allocation28 + $0x8] sm:$0x1f] %v10805_v39 }
 0xe4f   :  { %10810 = vst [vmem:[#allocation28 + $0x10] sm:$0x1f] %v10806_v46 }
 0xe50   :  { %10811 = vst [vmem:[#allocation28 + $0x18] sm:$0x1f] %v10807_v35 }
 0xe51   :  { %10822 = dma.vmem_to_hbm [thread:$0]  %s10818_s11, 512, %s10820_s27, [#allocation10]  }
 0xe52   :  { %17759 = dma.done.wait [#allocation10], 512  }
 0xe53   :  { %17760 = vsyncadd [#allocation10], 4294966784 }
 0xe54   :  { %10831 = vsyncpa [#allocation9], 1 }
 0xe55   :  { %10832 = vsyncpa [#allocation12], 1 }
 0xe56   :  { %10833 = vsyncpa [#allocation15], 1 }
 0xe57   :  { %10834 = vsyncpa [#allocation18], 1 }
 0xe58   :  { %10835 = vsyncpa [#allocation21], 1 }
 0xe59   :  { %10836 = vsyncpa [#allocation24], 1 }
 0xe5a   :  { %10837 = vsyncpa [#allocation27], 1 }
 0xe5b   :  { %10838 = vsyncpa [#allocation10], 1 }
 0xe5c   :  { %10839 = vsyncmov [#allocation7] }
 0xe5f   :  { %s10840_s15 = vpop.sfrf %10839 }
 0xe60   :  { %p16003_p0 = scmp.ne.s32.totalorder %s10840_s15, 0 }
 0xe62   :  { %10844 = shalt.err (%p16003_p0)  }
 0xe63   :  { %10846 = vsyncmov [#allocation7 + $0x1] }
 0xe66   :  { %s10847_s29 = vpop.sfrf %10846 }
 0xe67   :  { %p16004_p1 = scmp.ne.s32.totalorder %s10847_s29, 0 }
 0xe69   :  { %10851 = shalt.err (%p16004_p1)  }

</bundles_post_ra>
